<compile_context>
chip_gen: v6e
topology: v6e:2x2x1
jax: 0.10.0
libtpu: 0.0.40
codegen_flags: <defaults>
</compile_context>

<pallas_src>
import functools

import jax
import jax.numpy as jnp
import numpy as np
from jax.experimental import pallas as pl
from jax.experimental.pallas import tpu as pltpu


def _layernorm(x, g, b, eps):
    mu = jnp.mean(x, axis=-1, keepdims=True)
    var = jnp.mean(jnp.square(x - mu), axis=-1, keepdims=True)
    return (x - mu) * jax.lax.rsqrt(var + eps) * g + b


def _rel_encoder_layer_kernel(x_ref, *refs, n_head, eps, cdt, rel_shift):
    (ln1_g_ref, ln1_b_ref,
     wq_ref, bqu_ref, bqv_ref,
     wk_ref, bk_ref, wv_ref, bv_ref,
     p_ref,
     wo_ref, bo_ref,
     ln2_g_ref, ln2_b_ref,
     w1_ref, b1_ref, w2_ref, b2_ref,
     o_ref) = refs

    T, D = x_ref.shape[1], x_ref.shape[2]
    H = n_head
    P = p_ref.shape[1]                      # 2*T (padded to an even length)
    f32 = jnp.float32

    x = x_ref[0].astype(f32)                # (T, D)

    # ---------------- self-attention sublayer (pre-norm) ----------------
    xn = _layernorm(x, ln1_g_ref[...], ln1_b_ref[...], eps)           # f32
    xnh = jnp.broadcast_to(xn.astype(cdt)[None], (H, T, D))           # (H,T,D) bf16

    # Per-head projections, batched over H (bf16 MXU inputs, f32 accumulation).
    # 1/sqrt(d_k) is already folded into wq / bqu / bqv (see wrapper).
    q = jnp.einsum("htd,hdk->htk", xnh, wq_ref[...],
                   preferred_element_type=f32)                        # (H,T,dk)
    k = jnp.einsum("htd,hdk->htk", xnh, wk_ref[...],
                   preferred_element_type=f32) + bk_ref[...]
    v = jnp.einsum("htd,hdk->htk", xnh, wv_ref[...],
                   preferred_element_type=f32) + bv_ref[...]

    qu = (q + bqu_ref[...]).astype(cdt)     # scale*(q + bq + pos_bias_u)
    qv = (q + bqv_ref[...]).astype(cdt)     # scale*(q + bq + pos_bias_v)
    kc = k.astype(cdt)
    vc = v.astype(cdt)

    # Content term and (un-shifted) position term, batched over heads.
    ac = jnp.einsum("htd,hsd->hts", qu, kc, preferred_element_type=f32)      # (H,T,T)
    bd_raw = jnp.einsum("htd,hpd->htp", qv, p_ref[...],
                        preferred_element_type=f32)                          # (H,T,P)

    # rel-shift: bd[h, i, j] = bd_raw[h, i, j + T - 1 - i]
    if rel_shift == "reshape":
        # Single vectorized "skew": flatten, drop T-1 leading elements, re-split.
        flat = bd_raw.reshape(H, T * P)
        flat = flat[:, T - 1: T - 1 + T * (P - 1)]
        bd = flat.reshape(H, T, P - 1)[:, :, :T]
    else:
        # Fallback (T static slices, batched over heads) if the general reshape
        # is not supported by the Mosaic lowering in use.
        bd = jnp.concatenate(
            [bd_raw[:, i:i + 1, T - 1 - i: 2 * T - 1 - i] for i in range(T)],
            axis=1)

    s = ac + bd                                  # already scaled via the weights
    s = s - jnp.max(s, axis=-1, keepdims=True)
    e = jnp.exp(s)
    attn = e * pl.reciprocal(jnp.sum(e, axis=-1, keepdims=True), approx=True)

    ctx = jnp.einsum("hts,hsd->htd", attn.astype(cdt), vc,
                     preferred_element_type=f32)                             # (H,T,dk)
    out_h = jnp.einsum("htd,hde->hte", ctx.astype(cdt), wo_ref[...],
                       preferred_element_type=f32)                           # (H,T,D)
    x1 = x + jnp.sum(out_h, axis=0) + bo_ref[...]                            # residual

    # ---------------- feed-forward sublayer (pre-norm) ----------------
    x1n = _layernorm(x1, ln2_g_ref[...], ln2_b_ref[...], eps)
    h1 = jnp.dot(x1n.astype(cdt), w1_ref[...],
                 preferred_element_type=f32) + b1_ref[...]
    h1 = jnp.maximum(h1, 0.0)                                                # ReLU
    ff = jnp.dot(h1.astype(cdt), w2_ref[...],
                 preferred_element_type=f32) + b2_ref[...]

    o_ref[0] = (x1 + ff).astype(o_ref.dtype)


def relative_encoder_layer(x, pos_emb, params, *, n_head, eps=1e-12,
                           compute_dtype=jnp.bfloat16):
    """Forward of RelativeEncoderLayer (mask=None, cache=None). Returns (y, pos_emb)."""
    B, T, D = x.shape
    assert pos_emb.shape[1] == 2 * T - 1, "pos_emb must have length 2*T-1"
    H = n_head
    d_k = D // H
    P = 2 * T                              # pad rel positions to an even count
    F = params["w1"].shape[1]
    cdt = compute_dtype
    f32 = jnp.float32
    scale = 1.0 / float(d_k) ** 0.5

    # ---- batch-invariant preprocessing (hoisted out of the kernel) ----
    # Position projection (linear_pos, no bias): computed once, not per batch.
    p_proj = jnp.dot(pos_emb[0].astype(f32), params["wpos"].astype(f32),
                     preferred_element_type=f32)                      # (2T-1, D)
    p_proj = jnp.pad(p_proj, ((0, 1), (0, 0)))                        # (2T, D), zero row
    p_heads = jnp.transpose(p_proj.reshape(P, H, d_k), (1, 0, 2)).astype(cdt)

    def head_w(w, s=1.0):   # (D, H*d_k) -> (H, D, d_k), optionally pre-scaled
        return (jnp.transpose(w.reshape(D, H, d_k), (1, 0, 2)) * s).astype(cdt)

    def head_b(b):          # (1, H*d_k) -> (H, 1, d_k)
        return b.reshape(H, d_k)[:, None, :].astype(f32)

    # Fold the attention scale into wq and pre-sum the q bias with pos_bias_u/v.
    bqu = ((params["bq"].reshape(H, d_k) + params["pbu"]) * scale
           )[:, None, :].astype(f32)
    bqv = ((params["bq"].reshape(H, d_k) + params["pbv"]) * scale
           )[:, None, :].astype(f32)

    weights = [
        params["ln1_g"].astype(f32), params["ln1_b"].astype(f32),
        head_w(params["wq"], scale), bqu, bqv,
        head_w(params["wk"]), head_b(params["bk"]),
        head_w(params["wv"]), head_b(params["bv"]),
        p_heads,
        params["wo"].reshape(H, d_k, D).astype(cdt), params["bo"].astype(f32),
        params["ln2_g"].astype(f32), params["ln2_b"].astype(f32),
        params["w1"].astype(cdt), params["b1"].astype(f32),
        params["w2"].astype(cdt), params["b2"].astype(f32),
    ]

    # Size the scoped VMEM limit to the real buffer budget (with headroom),
    # capped below v7x's 64 MiB physical VMEM.
    w_bytes = sum(int(np.prod(w.shape)) * w.dtype.itemsize for w in weights)
    act_bytes = 4 * (8 * T * D + H * T * (3 * d_k + 2 * T + P + D) + 2 * T * F)
    est = 4 * T * D * 4 + 2 * w_bytes + 2 * act_bytes
    vmem_limit = int(min(max(est, 32 * 1024 * 1024), 56 * 1024 * 1024))

    out_shape = jax.ShapeDtypeStruct((B, T, D), x.dtype)

    def make_call(rel_shift, single_buffer_weights):
        kernel = functools.partial(
            _rel_encoder_layer_kernel,
            n_head=H, eps=eps, cdt=cdt, rel_shift=rel_shift)

        def rep_spec(w):
            n = w.ndim
            idx = lambda b, _n=n: (0,) * _n
            if single_buffer_weights:
                # Grid-invariant weights: no need for double buffering.
                return pl.BlockSpec(w.shape, idx, pipeline_mode=pl.Buffered(1))
            return pl.BlockSpec(w.shape, idx)

        in_specs = [pl.BlockSpec((1, T, D), lambda b: (b, 0, 0))]
        in_specs += [rep_spec(w) for w in weights]

        return pl.pallas_call(
            kernel,
            out_shape=out_shape,
            grid_spec=pltpu.PrefetchScalarGridSpec(
                num_scalar_prefetch=0,
                grid=(B,),
                in_specs=in_specs,
                out_specs=pl.BlockSpec((1, T, D), lambda b: (b, 0, 0)),
            ),
            compiler_params=pltpu.CompilerParams(
                dimension_semantics=("parallel",),
                vmem_limit_bytes=vmem_limit,
            ),
        )

    # Preferred configuration first; fall back if a Mosaic lowering feature
    # (general reshape skew / single-buffered BlockSpec) is unavailable.
    configs = (("reshape", True), ("reshape", False),
               ("slice", True), ("slice", False))
    err = None
    for rel_shift, single_buf in configs:
        try:
            out = make_call(rel_shift, single_buf)(x, *weights)
            return out, pos_emb
        except Exception as e:  # lowering not supported -> try the next path
            err = e
    raise err


def init_params(key, size, n_head, ff_dim):
    d_k = size // n_head
    keys = jax.random.split(key, 15)

    def w(k, shape, fan_in):
        return (jax.random.normal(k, shape, jnp.float32) / np.sqrt(fan_in)).astype(
            jnp.float32
        )

    return {
        "ln1_g": jnp.ones((1, size), jnp.float32),
        "ln1_b": jnp.zeros((1, size), jnp.float32),
        "wq": w(keys[0], (size, size), size),
        "bq": w(keys[1], (1, size), size),
        "wk": w(keys[2], (size, size), size),
        "bk": w(keys[3], (1, size), size),
        "wv": w(keys[4], (size, size), size),
        "bv": w(keys[5], (1, size), size),
        "wpos": w(keys[6], (size, size), size),
        "pbu": w(keys[7], (n_head, d_k), d_k),
        "pbv": w(keys[8], (n_head, d_k), d_k),
        "wo": w(keys[9], (size, size), size),
        "bo": w(keys[10], (1, size), size),
        "ln2_g": jnp.ones((1, size), jnp.float32),
        "ln2_b": jnp.zeros((1, size), jnp.float32),
        "w1": w(keys[11], (size, ff_dim), size),
        "b1": w(keys[12], (1, ff_dim), size),
        "w2": w(keys[13], (ff_dim, size), ff_dim),
        "b2": w(keys[14], (1, size), ff_dim),
    }


def reference(x, pos_emb, p, n_head, eps=1e-12):
    """Pure-JAX reference of the same forward pass (for validation)."""
    B, T, D = x.shape
    d_k = D // n_head

    def ln(z, g, b):
        m = z.mean(-1, keepdims=True)
        v = ((z - m) ** 2).mean(-1, keepdims=True)
        return (z - m) / jnp.sqrt(v + eps) * g[0] + b[0]

    with jax.default_matmul_precision("highest"):
        xn = ln(x, p["ln1_g"], p["ln1_b"])
        q = xn @ p["wq"] + p["bq"][0]
        k = xn @ p["wk"] + p["bk"][0]
        v = xn @ p["wv"] + p["bv"][0]
        pe = pos_emb[0] @ p["wpos"]                       # (2T-1, D)

        qh = q.reshape(B, T, n_head, d_k)
        kh = k.reshape(B, T, n_head, d_k)
        vh = v.reshape(B, T, n_head, d_k)
        ph = pe.reshape(-1, n_head, d_k)                  # (2T-1, H, d_k)

        ac = jnp.einsum("bthd,bshd->bhts", qh + p["pbu"][None, None], kh)
        bd_raw = jnp.einsum("bthd,phd->bhtp", qh + p["pbv"][None, None], ph)
        gidx = jnp.arange(T)[None, :] + (T - 1) - jnp.arange(T)[:, None]  # (T, T)
        gidx = jnp.broadcast_to(gidx[None, None], (B, n_head, T, T))
        bd = jnp.take_along_axis(bd_raw, gidx, axis=-1)

        scores = (ac + bd) / np.sqrt(d_k)
        attn = jax.nn.softmax(scores, axis=-1)
        ctx = jnp.einsum("bhts,bshd->bthd", attn, vh).reshape(B, T, D)
        x1 = x + ctx @ p["wo"] + p["bo"][0]

        x1n = ln(x1, p["ln2_g"], p["ln2_b"])
        y = x1 + jnp.maximum(x1n @ p["w1"] + p["b1"][0], 0.0) @ p["w2"] + p["b2"][0]
    return y


if __name__ == "__main__":
    B, T, D, H, F = 2, 8, 32, 4, 64
    key = jax.random.PRNGKey(0)
    kx, kp, kw = jax.random.split(key, 3)

    x = jax.random.normal(kx, (B, T, D), jnp.float32)
    pos_emb = jax.random.normal(kp, (1, 2 * T - 1, D), jnp.float32)
    params = init_params(kw, D, H, F)

    y, pos_out = relative_encoder_layer(x, pos_emb, params, n_head=H)
    y = jax.block_until_ready(y)

    y_ref = reference(x, pos_emb, params, H)
    # bf16 MXU inputs (f32 accumulation) vs. an f32 "highest"-precision reference.
    np.testing.assert_allclose(np.asarray(y), np.asarray(y_ref), rtol=2e-2, atol=2e-2)

    print("KERNEL_OK")
</pallas_src>

<mosaic_0001>
module attributes {stable_mosaic.version = 11 : i64} {
  func.func @_rel_encoder_layer_kernel(%arg0: i32, %arg1: memref<1x8x32xf32, #tpu.memory_space<vmem>>, %arg2: memref<1x32xf32, #tpu.memory_space<vmem>>, %arg3: memref<1x32xf32, #tpu.memory_space<vmem>>, %arg4: memref<4x32x8xbf16, #tpu.memory_space<vmem>>, %arg5: memref<4x1x8xf32, #tpu.memory_space<vmem>>, %arg6: memref<4x1x8xf32, #tpu.memory_space<vmem>>, %arg7: memref<4x32x8xbf16, #tpu.memory_space<vmem>>, %arg8: memref<4x1x8xf32, #tpu.memory_space<vmem>>, %arg9: memref<4x32x8xbf16, #tpu.memory_space<vmem>>, %arg10: memref<4x1x8xf32, #tpu.memory_space<vmem>>, %arg11: memref<4x16x8xbf16, #tpu.memory_space<vmem>>, %arg12: memref<4x8x32xbf16, #tpu.memory_space<vmem>>, %arg13: memref<1x32xf32, #tpu.memory_space<vmem>>, %arg14: memref<1x32xf32, #tpu.memory_space<vmem>>, %arg15: memref<1x32xf32, #tpu.memory_space<vmem>>, %arg16: memref<32x64xbf16, #tpu.memory_space<vmem>>, %arg17: memref<1x64xf32, #tpu.memory_space<vmem>>, %arg18: memref<64x32xbf16, #tpu.memory_space<vmem>>, %arg19: memref<1x32xf32, #tpu.memory_space<vmem>>, %arg20: memref<1x8x32xf32, #tpu.memory_space<vmem>>) attributes {dimension_semantics = [#tpu.dimension_semantics<parallel>], iteration_bounds = array<i64: 2>, scalar_prefetch = 0 : i64, scratch_operands = 0 : i64, tpu.core_type = #tpu.core_type<tc>, window_params = [{transform_indices = @transform_0, window_bounds = array<i64: 1, 8, 32>}, {pipeline_mode = #tpu.pipeline_mode<synchronous>, transform_indices = @transform_1, window_bounds = array<i64: 1, 32>}, {pipeline_mode = #tpu.pipeline_mode<synchronous>, transform_indices = @transform_2, window_bounds = array<i64: 1, 32>}, {pipeline_mode = #tpu.pipeline_mode<synchronous>, transform_indices = @transform_3, window_bounds = array<i64: 4, 32, 8>}, {pipeline_mode = #tpu.pipeline_mode<synchronous>, transform_indices = @transform_4, window_bounds = array<i64: 4, 1, 8>}, {pipeline_mode = #tpu.pipeline_mode<synchronous>, transform_indices = @transform_5, window_bounds = array<i64: 4, 1, 8>}, {pipeline_mode = #tpu.pipeline_mode<synchronous>, transform_indices = @transform_6, window_bounds = array<i64: 4, 32, 8>}, {pipeline_mode = #tpu.pipeline_mode<synchronous>, transform_indices = @transform_7, window_bounds = array<i64: 4, 1, 8>}, {pipeline_mode = #tpu.pipeline_mode<synchronous>, transform_indices = @transform_8, window_bounds = array<i64: 4, 32, 8>}, {pipeline_mode = #tpu.pipeline_mode<synchronous>, transform_indices = @transform_9, window_bounds = array<i64: 4, 1, 8>}, {pipeline_mode = #tpu.pipeline_mode<synchronous>, transform_indices = @transform_10, window_bounds = array<i64: 4, 16, 8>}, {pipeline_mode = #tpu.pipeline_mode<synchronous>, transform_indices = @transform_11, window_bounds = array<i64: 4, 8, 32>}, {pipeline_mode = #tpu.pipeline_mode<synchronous>, transform_indices = @transform_12, window_bounds = array<i64: 1, 32>}, {pipeline_mode = #tpu.pipeline_mode<synchronous>, transform_indices = @transform_13, window_bounds = array<i64: 1, 32>}, {pipeline_mode = #tpu.pipeline_mode<synchronous>, transform_indices = @transform_14, window_bounds = array<i64: 1, 32>}, {pipeline_mode = #tpu.pipeline_mode<synchronous>, transform_indices = @transform_15, window_bounds = array<i64: 32, 64>}, {pipeline_mode = #tpu.pipeline_mode<synchronous>, transform_indices = @transform_16, window_bounds = array<i64: 1, 64>}, {pipeline_mode = #tpu.pipeline_mode<synchronous>, transform_indices = @transform_17, window_bounds = array<i64: 64, 32>}, {pipeline_mode = #tpu.pipeline_mode<synchronous>, transform_indices = @transform_18, window_bounds = array<i64: 1, 32>}, {transform_indices = @transform_19, window_bounds = array<i64: 1, 8, 32>}]} {
    %c0 = arith.constant 0 : index
    %c0_0 = arith.constant 0 : index
    %c0_1 = arith.constant 0 : index
    %0 = vector.load %arg1[%c0, %c0_0, %c0_1] : memref<1x8x32xf32, #tpu.memory_space<vmem>>, vector<1x8x32xf32>
    %1 = vector.shape_cast %0 : vector<1x8x32xf32> to vector<8x32xf32>
    %c0_2 = arith.constant 0 : index
    %c0_3 = arith.constant 0 : index
    %2 = vector.load %arg2[%c0_2, %c0_3] : memref<1x32xf32, #tpu.memory_space<vmem>>, vector<1x32xf32>
    %c0_4 = arith.constant 0 : index
    %c0_5 = arith.constant 0 : index
    %3 = vector.load %arg3[%c0_4, %c0_5] : memref<1x32xf32, #tpu.memory_space<vmem>>, vector<1x32xf32>
    %cst = arith.constant dense<0.000000e+00> : vector<8xf32>
    %4 = vector.multi_reduction <add>, %1, %cst [1] : vector<8x32xf32> to vector<8xf32>
    %5 = vector.shape_cast %4 : vector<8xf32> to vector<8x1xf32>
    %cst_6 = arith.constant 3.200000e+01 : f32
    %6 = vector.broadcast %cst_6 : f32 to vector<8x1xf32>
    %7 = arith.divf %5, %6 : vector<8x1xf32>
    %8 = vector.broadcast %7 : vector<8x1xf32> to vector<8x32xf32>
    %9 = arith.subf %1, %8 : vector<8x32xf32>
    %10 = arith.mulf %9, %9 : vector<8x32xf32>
    %cst_7 = arith.constant dense<0.000000e+00> : vector<8xf32>
    %11 = vector.multi_reduction <add>, %10, %cst_7 [1] : vector<8x32xf32> to vector<8xf32>
    %12 = vector.shape_cast %11 : vector<8xf32> to vector<8x1xf32>
    %cst_8 = arith.constant 3.200000e+01 : f32
    %13 = vector.broadcast %cst_8 : f32 to vector<8x1xf32>
    %14 = arith.divf %12, %13 : vector<8x1xf32>
    %15 = vector.broadcast %7 : vector<8x1xf32> to vector<8x32xf32>
    %16 = arith.subf %1, %15 : vector<8x32xf32>
    %cst_9 = arith.constant 9.99999996E-13 : f32
    %17 = vector.broadcast %cst_9 : f32 to vector<8x1xf32>
    %18 = arith.addf %14, %17 : vector<8x1xf32>
    %19 = math.rsqrt %18 : vector<8x1xf32>
    %20 = vector.broadcast %19 : vector<8x1xf32> to vector<8x32xf32>
    %21 = arith.mulf %16, %20 : vector<8x32xf32>
    %22 = vector.broadcast %2 : vector<1x32xf32> to vector<8x32xf32>
    %23 = arith.mulf %21, %22 : vector<8x32xf32>
    %24 = vector.broadcast %3 : vector<1x32xf32> to vector<8x32xf32>
    %25 = arith.addf %23, %24 : vector<8x32xf32>
    %26 = arith.truncf %25 : vector<8x32xf32> to vector<8x32xbf16>
    %27 = vector.shape_cast %26 : vector<8x32xbf16> to vector<1x8x32xbf16>
    %28 = vector.shape_cast %27 : vector<1x8x32xbf16> to vector<1x8x32xbf16>
    %29 = vector.broadcast %28 : vector<1x8x32xbf16> to vector<4x8x32xbf16>
    %c0_10 = arith.constant 0 : index
    %c0_11 = arith.constant 0 : index
    %c0_12 = arith.constant 0 : index
    %30 = vector.load %arg4[%c0_10, %c0_11, %c0_12] : memref<4x32x8xbf16, #tpu.memory_space<vmem>>, vector<4x32x8xbf16>
    "tpu.trace_start"() <{level = 10 : i32, message = "htd,hdk->htk"}> : () -> ()
    %cst_13 = arith.constant dense<0.000000e+00> : vector<4x8x8xf32>
    %31 = tpu.matmul %29, %30, %cst_13 {dimension_numbers = #tpu.dot_dimension_numbers<[2], [1], [1], [2], [0, 0, 0, 1, 1, 2], [0], [0]>} : vector<4x8x32xbf16>, vector<4x32x8xbf16>, vector<4x8x8xf32> -> vector<4x8x8xf32>
    "tpu.trace_stop"() : () -> ()
    %c0_14 = arith.constant 0 : index
    %c0_15 = arith.constant 0 : index
    %c0_16 = arith.constant 0 : index
    %32 = vector.load %arg7[%c0_14, %c0_15, %c0_16] : memref<4x32x8xbf16, #tpu.memory_space<vmem>>, vector<4x32x8xbf16>
    "tpu.trace_start"() <{level = 10 : i32, message = "htd,hdk->htk"}> : () -> ()
    %cst_17 = arith.constant dense<0.000000e+00> : vector<4x8x8xf32>
    %33 = tpu.matmul %29, %32, %cst_17 {dimension_numbers = #tpu.dot_dimension_numbers<[2], [1], [1], [2], [0, 0, 0, 1, 1, 2], [0], [0]>} : vector<4x8x32xbf16>, vector<4x32x8xbf16>, vector<4x8x8xf32> -> vector<4x8x8xf32>
    "tpu.trace_stop"() : () -> ()
    %c0_18 = arith.constant 0 : index
    %c0_19 = arith.constant 0 : index
    %c0_20 = arith.constant 0 : index
    %34 = vector.load %arg8[%c0_18, %c0_19, %c0_20] : memref<4x1x8xf32, #tpu.memory_space<vmem>>, vector<4x1x8xf32>
    %35 = vector.broadcast %34 : vector<4x1x8xf32> to vector<4x8x8xf32>
    %36 = arith.addf %33, %35 : vector<4x8x8xf32>
    %c0_21 = arith.constant 0 : index
    %c0_22 = arith.constant 0 : index
    %c0_23 = arith.constant 0 : index
    %37 = vector.load %arg9[%c0_21, %c0_22, %c0_23] : memref<4x32x8xbf16, #tpu.memory_space<vmem>>, vector<4x32x8xbf16>
    "tpu.trace_start"() <{level = 10 : i32, message = "htd,hdk->htk"}> : () -> ()
    %cst_24 = arith.constant dense<0.000000e+00> : vector<4x8x8xf32>
    %38 = tpu.matmul %29, %37, %cst_24 {dimension_numbers = #tpu.dot_dimension_numbers<[2], [1], [1], [2], [0, 0, 0, 1, 1, 2], [0], [0]>} : vector<4x8x32xbf16>, vector<4x32x8xbf16>, vector<4x8x8xf32> -> vector<4x8x8xf32>
    "tpu.trace_stop"() : () -> ()
    %c0_25 = arith.constant 0 : index
    %c0_26 = arith.constant 0 : index
    %c0_27 = arith.constant 0 : index
    %39 = vector.load %arg10[%c0_25, %c0_26, %c0_27] : memref<4x1x8xf32, #tpu.memory_space<vmem>>, vector<4x1x8xf32>
    %40 = vector.broadcast %39 : vector<4x1x8xf32> to vector<4x8x8xf32>
    %41 = arith.addf %38, %40 : vector<4x8x8xf32>
    %c0_28 = arith.constant 0 : index
    %c0_29 = arith.constant 0 : index
    %c0_30 = arith.constant 0 : index
    %42 = vector.load %arg5[%c0_28, %c0_29, %c0_30] : memref<4x1x8xf32, #tpu.memory_space<vmem>>, vector<4x1x8xf32>
    %43 = vector.broadcast %42 : vector<4x1x8xf32> to vector<4x8x8xf32>
    %44 = arith.addf %31, %43 : vector<4x8x8xf32>
    %45 = arith.truncf %44 : vector<4x8x8xf32> to vector<4x8x8xbf16>
    %c0_31 = arith.constant 0 : index
    %c0_32 = arith.constant 0 : index
    %c0_33 = arith.constant 0 : index
    %46 = vector.load %arg6[%c0_31, %c0_32, %c0_33] : memref<4x1x8xf32, #tpu.memory_space<vmem>>, vector<4x1x8xf32>
    %47 = vector.broadcast %46 : vector<4x1x8xf32> to vector<4x8x8xf32>
    %48 = arith.addf %31, %47 : vector<4x8x8xf32>
    %49 = arith.truncf %48 : vector<4x8x8xf32> to vector<4x8x8xbf16>
    %50 = arith.truncf %36 : vector<4x8x8xf32> to vector<4x8x8xbf16>
    %51 = arith.truncf %41 : vector<4x8x8xf32> to vector<4x8x8xbf16>
    "tpu.trace_start"() <{level = 10 : i32, message = "htd,hsd->hts"}> : () -> ()
    %cst_34 = arith.constant dense<0.000000e+00> : vector<4x8x8xf32>
    %52 = tpu.matmul %45, %50, %cst_34 {dimension_numbers = #tpu.dot_dimension_numbers<[2], [2], [1], [1], [0, 0, 0, 1, 1, 1], [0], [0]>} : vector<4x8x8xbf16>, vector<4x8x8xbf16>, vector<4x8x8xf32> -> vector<4x8x8xf32>
    "tpu.trace_stop"() : () -> ()
    %c0_35 = arith.constant 0 : index
    %c0_36 = arith.constant 0 : index
    %c0_37 = arith.constant 0 : index
    %53 = vector.load %arg11[%c0_35, %c0_36, %c0_37] : memref<4x16x8xbf16, #tpu.memory_space<vmem>>, vector<4x16x8xbf16>
    "tpu.trace_start"() <{level = 10 : i32, message = "htd,hpd->htp"}> : () -> ()
    %cst_38 = arith.constant dense<0.000000e+00> : vector<4x8x16xf32>
    %54 = tpu.matmul %49, %53, %cst_38 {dimension_numbers = #tpu.dot_dimension_numbers<[2], [2], [1], [1], [0, 0, 0, 1, 1, 1], [0], [0]>} : vector<4x8x8xbf16>, vector<4x16x8xbf16>, vector<4x8x16xf32> -> vector<4x8x16xf32>
    "tpu.trace_stop"() : () -> ()
    %55 = vector.shape_cast %54 : vector<4x8x16xf32> to vector<4x128xf32>
    %56 = vector.extract_strided_slice %55 {offsets = [0, 7], sizes = [4, 120], strides = [1, 1]} : vector<4x128xf32> to vector<4x120xf32>
    %57 = vector.shape_cast %56 : vector<4x120xf32> to vector<4x8x15xf32>
    %58 = vector.extract_strided_slice %57 {offsets = [0, 0, 0], sizes = [4, 8, 8], strides = [1, 1, 1]} : vector<4x8x15xf32> to vector<4x8x8xf32>
    %59 = arith.addf %52, %58 : vector<4x8x8xf32>
    %cst_39 = arith.constant dense<0xFF800000> : vector<4x8xf32>
    %60 = vector.multi_reduction <maximumf>, %59, %cst_39 [2] : vector<4x8x8xf32> to vector<4x8xf32>
    %61 = vector.shape_cast %60 : vector<4x8xf32> to vector<4x8x1xf32>
    %62 = vector.broadcast %61 : vector<4x8x1xf32> to vector<4x8x8xf32>
    %63 = arith.subf %59, %62 : vector<4x8x8xf32>
    %64 = math.exp %63 : vector<4x8x8xf32>
    %cst_40 = arith.constant dense<0.000000e+00> : vector<4x8xf32>
    %65 = vector.multi_reduction <add>, %64, %cst_40 [2] : vector<4x8x8xf32> to vector<4x8xf32>
    %66 = vector.shape_cast %65 : vector<4x8xf32> to vector<4x8x1xf32>
    %67 = tpu.reciprocal %66 {approx = true} : vector<4x8x1xf32> -> vector<4x8x1xf32>
    %68 = vector.broadcast %67 : vector<4x8x1xf32> to vector<4x8x8xf32>
    %69 = arith.mulf %64, %68 : vector<4x8x8xf32>
    %70 = arith.truncf %69 : vector<4x8x8xf32> to vector<4x8x8xbf16>
    "tpu.trace_start"() <{level = 10 : i32, message = "hts,hsd->htd"}> : () -> ()
    %cst_41 = arith.constant dense<0.000000e+00> : vector<4x8x8xf32>
    %71 = tpu.matmul %70, %51, %cst_41 {dimension_numbers = #tpu.dot_dimension_numbers<[2], [1], [1], [2], [0, 0, 0, 1, 1, 2], [0], [0]>} : vector<4x8x8xbf16>, vector<4x8x8xbf16>, vector<4x8x8xf32> -> vector<4x8x8xf32>
    "tpu.trace_stop"() : () -> ()
    %72 = arith.truncf %71 : vector<4x8x8xf32> to vector<4x8x8xbf16>
    %c0_42 = arith.constant 0 : index
    %c0_43 = arith.constant 0 : index
    %c0_44 = arith.constant 0 : index
    %73 = vector.load %arg12[%c0_42, %c0_43, %c0_44] : memref<4x8x32xbf16, #tpu.memory_space<vmem>>, vector<4x8x32xbf16>
    "tpu.trace_start"() <{level = 10 : i32, message = "htd,hde->hte"}> : () -> ()
    %cst_45 = arith.constant dense<0.000000e+00> : vector<4x8x32xf32>
    %74 = tpu.matmul %72, %73, %cst_45 {dimension_numbers = #tpu.dot_dimension_numbers<[2], [1], [1], [2], [0, 0, 0, 1, 1, 2], [0], [0]>} : vector<4x8x8xbf16>, vector<4x8x32xbf16>, vector<4x8x32xf32> -> vector<4x8x32xf32>
    "tpu.trace_stop"() : () -> ()
    %cst_46 = arith.constant dense<0.000000e+00> : vector<8x32xf32>
    %75 = vector.multi_reduction <add>, %74, %cst_46 [0] : vector<4x8x32xf32> to vector<8x32xf32>
    %76 = arith.addf %1, %75 : vector<8x32xf32>
    %c0_47 = arith.constant 0 : index
    %c0_48 = arith.constant 0 : index
    %77 = vector.load %arg13[%c0_47, %c0_48] : memref<1x32xf32, #tpu.memory_space<vmem>>, vector<1x32xf32>
    %78 = vector.broadcast %77 : vector<1x32xf32> to vector<8x32xf32>
    %79 = arith.addf %76, %78 : vector<8x32xf32>
    %c0_49 = arith.constant 0 : index
    %c0_50 = arith.constant 0 : index
    %80 = vector.load %arg14[%c0_49, %c0_50] : memref<1x32xf32, #tpu.memory_space<vmem>>, vector<1x32xf32>
    %c0_51 = arith.constant 0 : index
    %c0_52 = arith.constant 0 : index
    %81 = vector.load %arg15[%c0_51, %c0_52] : memref<1x32xf32, #tpu.memory_space<vmem>>, vector<1x32xf32>
    %cst_53 = arith.constant dense<0.000000e+00> : vector<8xf32>
    %82 = vector.multi_reduction <add>, %79, %cst_53 [1] : vector<8x32xf32> to vector<8xf32>
    %83 = vector.shape_cast %82 : vector<8xf32> to vector<8x1xf32>
    %cst_54 = arith.constant 3.200000e+01 : f32
    %84 = vector.broadcast %cst_54 : f32 to vector<8x1xf32>
    %85 = arith.divf %83, %84 : vector<8x1xf32>
    %86 = vector.broadcast %85 : vector<8x1xf32> to vector<8x32xf32>
    %87 = arith.subf %79, %86 : vector<8x32xf32>
    %88 = arith.mulf %87, %87 : vector<8x32xf32>
    %cst_55 = arith.constant dense<0.000000e+00> : vector<8xf32>
    %89 = vector.multi_reduction <add>, %88, %cst_55 [1] : vector<8x32xf32> to vector<8xf32>
    %90 = vector.shape_cast %89 : vector<8xf32> to vector<8x1xf32>
    %cst_56 = arith.constant 3.200000e+01 : f32
    %91 = vector.broadcast %cst_56 : f32 to vector<8x1xf32>
    %92 = arith.divf %90, %91 : vector<8x1xf32>
    %93 = vector.broadcast %85 : vector<8x1xf32> to vector<8x32xf32>
    %94 = arith.subf %79, %93 : vector<8x32xf32>
    %cst_57 = arith.constant 9.99999996E-13 : f32
    %95 = vector.broadcast %cst_57 : f32 to vector<8x1xf32>
    %96 = arith.addf %92, %95 : vector<8x1xf32>
    %97 = math.rsqrt %96 : vector<8x1xf32>
    %98 = vector.broadcast %97 : vector<8x1xf32> to vector<8x32xf32>
    %99 = arith.mulf %94, %98 : vector<8x32xf32>
    %100 = vector.broadcast %80 : vector<1x32xf32> to vector<8x32xf32>
    %101 = arith.mulf %99, %100 : vector<8x32xf32>
    %102 = vector.broadcast %81 : vector<1x32xf32> to vector<8x32xf32>
    %103 = arith.addf %101, %102 : vector<8x32xf32>
    %104 = arith.truncf %103 : vector<8x32xf32> to vector<8x32xbf16>
    %c0_58 = arith.constant 0 : index
    %c0_59 = arith.constant 0 : index
    %105 = vector.load %arg16[%c0_58, %c0_59] : memref<32x64xbf16, #tpu.memory_space<vmem>>, vector<32x64xbf16>
    %cst_60 = arith.constant dense<0.000000e+00> : vector<8x64xf32>
    %106 = tpu.matmul %104, %105, %cst_60 {dimension_numbers = #tpu.dot_dimension_numbers<[1], [0], [0], [1], [0, 0, 1, 1], [], []>} : vector<8x32xbf16>, vector<32x64xbf16>, vector<8x64xf32> -> vector<8x64xf32>
    %c0_61 = arith.constant 0 : index
    %c0_62 = arith.constant 0 : index
    %107 = vector.load %arg17[%c0_61, %c0_62] : memref<1x64xf32, #tpu.memory_space<vmem>>, vector<1x64xf32>
    %108 = vector.broadcast %107 : vector<1x64xf32> to vector<8x64xf32>
    %109 = arith.addf %106, %108 : vector<8x64xf32>
    %cst_63 = arith.constant 0.000000e+00 : f32
    %110 = vector.broadcast %cst_63 : f32 to vector<8x64xf32>
    %111 = arith.maximumf %109, %110 : vector<8x64xf32>
    %112 = arith.truncf %111 : vector<8x64xf32> to vector<8x64xbf16>
    %c0_64 = arith.constant 0 : index
    %c0_65 = arith.constant 0 : index
    %113 = vector.load %arg18[%c0_64, %c0_65] : memref<64x32xbf16, #tpu.memory_space<vmem>>, vector<64x32xbf16>
    %cst_66 = arith.constant dense<0.000000e+00> : vector<8x32xf32>
    %114 = tpu.matmul %112, %113, %cst_66 {dimension_numbers = #tpu.dot_dimension_numbers<[1], [0], [0], [1], [0, 0, 1, 1], [], []>} : vector<8x64xbf16>, vector<64x32xbf16>, vector<8x32xf32> -> vector<8x32xf32>
    %c0_67 = arith.constant 0 : index
    %c0_68 = arith.constant 0 : index
    %115 = vector.load %arg19[%c0_67, %c0_68] : memref<1x32xf32, #tpu.memory_space<vmem>>, vector<1x32xf32>
    %116 = vector.broadcast %115 : vector<1x32xf32> to vector<8x32xf32>
    %117 = arith.addf %114, %116 : vector<8x32xf32>
    %118 = arith.addf %79, %117 : vector<8x32xf32>
    %c0_69 = arith.constant 0 : index
    %c0_70 = arith.constant 0 : index
    %c0_71 = arith.constant 0 : index
    %119 = vector.load %arg20[%c0_69, %c0_70, %c0_71] : memref<1x8x32xf32, #tpu.memory_space<vmem>>, vector<1x8x32xf32>
    %120 = vector.shape_cast %119 : vector<1x8x32xf32> to vector<8x32xf32>
    %121 = vector.shape_cast %118 : vector<8x32xf32> to vector<1x8x32xf32>
    tpu.vector_store %arg20[%c0_69, %c0_70, %c0_71], %121 {strides = array<i32>} : memref<1x8x32xf32, #tpu.memory_space<vmem>>, vector<1x8x32xf32>,
    return
  }
  func.func @transform_0(%arg0: i32) -> (i32, i32, i32) {
    %c0_i32 = arith.constant 0 : i32
    %c0_i32_0 = arith.constant 0 : i32
    %c0_i32_1 = arith.constant 0 : i32
    return %arg0, %c0_i32, %c0_i32_0 : i32, i32, i32
  }
  func.func @transform_1(%arg0: i32) -> (i32, i32) {
    %c0_i32 = arith.constant 0 : i32
    %c0_i32_0 = arith.constant 0 : i32
    %c0_i32_1 = arith.constant 0 : i32
    return %c0_i32, %c0_i32_0 : i32, i32
  }
  func.func @transform_2(%arg0: i32) -> (i32, i32) {
    %c0_i32 = arith.constant 0 : i32
    %c0_i32_0 = arith.constant 0 : i32
    %c0_i32_1 = arith.constant 0 : i32
    return %c0_i32, %c0_i32_0 : i32, i32
  }
  func.func @transform_3(%arg0: i32) -> (i32, i32, i32) {
    %c0_i32 = arith.constant 0 : i32
    %c0_i32_0 = arith.constant 0 : i32
    %c0_i32_1 = arith.constant 0 : i32
    %c0_i32_2 = arith.constant 0 : i32
    return %c0_i32, %c0_i32_0, %c0_i32_1 : i32, i32, i32
  }
  func.func @transform_4(%arg0: i32) -> (i32, i32, i32) {
    %c0_i32 = arith.constant 0 : i32
    %c0_i32_0 = arith.constant 0 : i32
    %c0_i32_1 = arith.constant 0 : i32
    %c0_i32_2 = arith.constant 0 : i32
    return %c0_i32, %c0_i32_0, %c0_i32_1 : i32, i32, i32
  }
  func.func @transform_5(%arg0: i32) -> (i32, i32, i32) {
    %c0_i32 = arith.constant 0 : i32
    %c0_i32_0 = arith.constant 0 : i32
    %c0_i32_1 = arith.constant 0 : i32
    %c0_i32_2 = arith.constant 0 : i32
    return %c0_i32, %c0_i32_0, %c0_i32_1 : i32, i32, i32
  }
  func.func @transform_6(%arg0: i32) -> (i32, i32, i32) {
    %c0_i32 = arith.constant 0 : i32
    %c0_i32_0 = arith.constant 0 : i32
    %c0_i32_1 = arith.constant 0 : i32
    %c0_i32_2 = arith.constant 0 : i32
    return %c0_i32, %c0_i32_0, %c0_i32_1 : i32, i32, i32
  }
  func.func @transform_7(%arg0: i32) -> (i32, i32, i32) {
    %c0_i32 = arith.constant 0 : i32
    %c0_i32_0 = arith.constant 0 : i32
    %c0_i32_1 = arith.constant 0 : i32
    %c0_i32_2 = arith.constant 0 : i32
    return %c0_i32, %c0_i32_0, %c0_i32_1 : i32, i32, i32
  }
  func.func @transform_8(%arg0: i32) -> (i32, i32, i32) {
    %c0_i32 = arith.constant 0 : i32
    %c0_i32_0 = arith.constant 0 : i32
    %c0_i32_1 = arith.constant 0 : i32
    %c0_i32_2 = arith.constant 0 : i32
    return %c0_i32, %c0_i32_0, %c0_i32_1 : i32, i32, i32
  }
  func.func @transform_9(%arg0: i32) -> (i32, i32, i32) {
    %c0_i32 = arith.constant 0 : i32
    %c0_i32_0 = arith.constant 0 : i32
    %c0_i32_1 = arith.constant 0 : i32
    %c0_i32_2 = arith.constant 0 : i32
    return %c0_i32, %c0_i32_0, %c0_i32_1 : i32, i32, i32
  }
  func.func @transform_10(%arg0: i32) -> (i32, i32, i32) {
    %c0_i32 = arith.constant 0 : i32
    %c0_i32_0 = arith.constant 0 : i32
    %c0_i32_1 = arith.constant 0 : i32
    %c0_i32_2 = arith.constant 0 : i32
    return %c0_i32, %c0_i32_0, %c0_i32_1 : i32, i32, i32
  }
  func.func @transform_11(%arg0: i32) -> (i32, i32, i32) {
    %c0_i32 = arith.constant 0 : i32
    %c0_i32_0 = arith.constant 0 : i32
    %c0_i32_1 = arith.constant 0 : i32
    %c0_i32_2 = arith.constant 0 : i32
    return %c0_i32, %c0_i32_0, %c0_i32_1 : i32, i32, i32
  }
  func.func @transform_12(%arg0: i32) -> (i32, i32) {
    %c0_i32 = arith.constant 0 : i32
    %c0_i32_0 = arith.constant 0 : i32
    %c0_i32_1 = arith.constant 0 : i32
    return %c0_i32, %c0_i32_0 : i32, i32
  }
  func.func @transform_13(%arg0: i32) -> (i32, i32) {
    %c0_i32 = arith.constant 0 : i32
    %c0_i32_0 = arith.constant 0 : i32
    %c0_i32_1 = arith.constant 0 : i32
    return %c0_i32, %c0_i32_0 : i32, i32
  }
  func.func @transform_14(%arg0: i32) -> (i32, i32) {
    %c0_i32 = arith.constant 0 : i32
    %c0_i32_0 = arith.constant 0 : i32
    %c0_i32_1 = arith.constant 0 : i32
    return %c0_i32, %c0_i32_0 : i32, i32
  }
  func.func @transform_15(%arg0: i32) -> (i32, i32) {
    %c0_i32 = arith.constant 0 : i32
    %c0_i32_0 = arith.constant 0 : i32
    %c0_i32_1 = arith.constant 0 : i32
    return %c0_i32, %c0_i32_0 : i32, i32
  }
  func.func @transform_16(%arg0: i32) -> (i32, i32) {
    %c0_i32 = arith.constant 0 : i32
    %c0_i32_0 = arith.constant 0 : i32
    %c0_i32_1 = arith.constant 0 : i32
    return %c0_i32, %c0_i32_0 : i32, i32
  }
  func.func @transform_17(%arg0: i32) -> (i32, i32) {
    %c0_i32 = arith.constant 0 : i32
    %c0_i32_0 = arith.constant 0 : i32
    %c0_i32_1 = arith.constant 0 : i32
    return %c0_i32, %c0_i32_0 : i32, i32
  }
  func.func @transform_18(%arg0: i32) -> (i32, i32) {
    %c0_i32 = arith.constant 0 : i32
    %c0_i32_0 = arith.constant 0 : i32
    %c0_i32_1 = arith.constant 0 : i32
    return %c0_i32, %c0_i32_0 : i32, i32
  }
  func.func @transform_19(%arg0: i32) -> (i32, i32, i32) {
    %c0_i32 = arith.constant 0 : i32
    %c0_i32_0 = arith.constant 0 : i32
    %c0_i32_1 = arith.constant 0 : i32
    return %arg0, %c0_i32, %c0_i32_0 : i32, i32, i32
  }
}

module attributes {stable_mosaic.version = 11 : i64} {
  func.func @_rel_encoder_layer_kernel(%arg0: i32, %arg1: memref<1x8x32xf32, #tpu.memory_space<vmem>>, %arg2: memref<1x32xf32, #tpu.memory_space<vmem>>, %arg3: memref<1x32xf32, #tpu.memory_space<vmem>>, %arg4: memref<4x32x8xbf16, #tpu.memory_space<vmem>>, %arg5: memref<4x1x8xf32, #tpu.memory_space<vmem>>, %arg6: memref<4x1x8xf32, #tpu.memory_space<vmem>>, %arg7: memref<4x32x8xbf16, #tpu.memory_space<vmem>>, %arg8: memref<4x1x8xf32, #tpu.memory_space<vmem>>, %arg9: memref<4x32x8xbf16, #tpu.memory_space<vmem>>, %arg10: memref<4x1x8xf32, #tpu.memory_space<vmem>>, %arg11: memref<4x16x8xbf16, #tpu.memory_space<vmem>>, %arg12: memref<4x8x32xbf16, #tpu.memory_space<vmem>>, %arg13: memref<1x32xf32, #tpu.memory_space<vmem>>, %arg14: memref<1x32xf32, #tpu.memory_space<vmem>>, %arg15: memref<1x32xf32, #tpu.memory_space<vmem>>, %arg16: memref<32x64xbf16, #tpu.memory_space<vmem>>, %arg17: memref<1x64xf32, #tpu.memory_space<vmem>>, %arg18: memref<64x32xbf16, #tpu.memory_space<vmem>>, %arg19: memref<1x32xf32, #tpu.memory_space<vmem>>, %arg20: memref<1x8x32xf32, #tpu.memory_space<vmem>>) attributes {dimension_semantics = [#tpu.dimension_semantics<parallel>], iteration_bounds = array<i64: 2>, scalar_prefetch = 0 : i64, scratch_operands = 0 : i64, tpu.core_type = #tpu.core_type<tc>, window_params = [{transform_indices = @transform_0, window_bounds = array<i64: 1, 8, 32>}, {pipeline_mode = #tpu.pipeline_mode<synchronous>, transform_indices = @transform_1, window_bounds = array<i64: 1, 32>}, {pipeline_mode = #tpu.pipeline_mode<synchronous>, transform_indices = @transform_2, window_bounds = array<i64: 1, 32>}, {pipeline_mode = #tpu.pipeline_mode<synchronous>, transform_indices = @transform_3, window_bounds = array<i64: 4, 32, 8>}, {pipeline_mode = #tpu.pipeline_mode<synchronous>, transform_indices = @transform_4, window_bounds = array<i64: 4, 1, 8>}, {pipeline_mode = #tpu.pipeline_mode<synchronous>, transform_indices = @transform_5, window_bounds = array<i64: 4, 1, 8>}, {pipeline_mode = #tpu.pipeline_mode<synchronous>, transform_indices = @transform_6, window_bounds = array<i64: 4, 32, 8>}, {pipeline_mode = #tpu.pipeline_mode<synchronous>, transform_indices = @transform_7, window_bounds = array<i64: 4, 1, 8>}, {pipeline_mode = #tpu.pipeline_mode<synchronous>, transform_indices = @transform_8, window_bounds = array<i64: 4, 32, 8>}, {pipeline_mode = #tpu.pipeline_mode<synchronous>, transform_indices = @transform_9, window_bounds = array<i64: 4, 1, 8>}, {pipeline_mode = #tpu.pipeline_mode<synchronous>, transform_indices = @transform_10, window_bounds = array<i64: 4, 16, 8>}, {pipeline_mode = #tpu.pipeline_mode<synchronous>, transform_indices = @transform_11, window_bounds = array<i64: 4, 8, 32>}, {pipeline_mode = #tpu.pipeline_mode<synchronous>, transform_indices = @transform_12, window_bounds = array<i64: 1, 32>}, {pipeline_mode = #tpu.pipeline_mode<synchronous>, transform_indices = @transform_13, window_bounds = array<i64: 1, 32>}, {pipeline_mode = #tpu.pipeline_mode<synchronous>, transform_indices = @transform_14, window_bounds = array<i64: 1, 32>}, {pipeline_mode = #tpu.pipeline_mode<synchronous>, transform_indices = @transform_15, window_bounds = array<i64: 32, 64>}, {pipeline_mode = #tpu.pipeline_mode<synchronous>, transform_indices = @transform_16, window_bounds = array<i64: 1, 64>}, {pipeline_mode = #tpu.pipeline_mode<synchronous>, transform_indices = @transform_17, window_bounds = array<i64: 64, 32>}, {pipeline_mode = #tpu.pipeline_mode<synchronous>, transform_indices = @transform_18, window_bounds = array<i64: 1, 32>}, {transform_indices = @transform_19, window_bounds = array<i64: 1, 8, 32>}]} {
    %c0 = arith.constant 0 : index
    %c0_0 = arith.constant 0 : index
    %c0_1 = arith.constant 0 : index
    %0 = vector.load %arg1[%c0, %c0_0, %c0_1] : memref<1x8x32xf32, #tpu.memory_space<vmem>>, vector<1x8x32xf32>
    %1 = vector.shape_cast %0 : vector<1x8x32xf32> to vector<8x32xf32>
    %c0_2 = arith.constant 0 : index
    %c0_3 = arith.constant 0 : index
    %2 = vector.load %arg2[%c0_2, %c0_3] : memref<1x32xf32, #tpu.memory_space<vmem>>, vector<1x32xf32>
    %c0_4 = arith.constant 0 : index
    %c0_5 = arith.constant 0 : index
    %3 = vector.load %arg3[%c0_4, %c0_5] : memref<1x32xf32, #tpu.memory_space<vmem>>, vector<1x32xf32>
    %cst = arith.constant dense<0.000000e+00> : vector<8xf32>
    %4 = vector.multi_reduction <add>, %1, %cst [1] : vector<8x32xf32> to vector<8xf32>
    %5 = vector.shape_cast %4 : vector<8xf32> to vector<8x1xf32>
    %cst_6 = arith.constant 3.200000e+01 : f32
    %6 = vector.broadcast %cst_6 : f32 to vector<8x1xf32>
    %7 = arith.divf %5, %6 : vector<8x1xf32>
    %8 = vector.broadcast %7 : vector<8x1xf32> to vector<8x32xf32>
    %9 = arith.subf %1, %8 : vector<8x32xf32>
    %10 = arith.mulf %9, %9 : vector<8x32xf32>
    %cst_7 = arith.constant dense<0.000000e+00> : vector<8xf32>
    %11 = vector.multi_reduction <add>, %10, %cst_7 [1] : vector<8x32xf32> to vector<8xf32>
    %12 = vector.shape_cast %11 : vector<8xf32> to vector<8x1xf32>
    %cst_8 = arith.constant 3.200000e+01 : f32
    %13 = vector.broadcast %cst_8 : f32 to vector<8x1xf32>
    %14 = arith.divf %12, %13 : vector<8x1xf32>
    %15 = vector.broadcast %7 : vector<8x1xf32> to vector<8x32xf32>
    %16 = arith.subf %1, %15 : vector<8x32xf32>
    %cst_9 = arith.constant 9.99999996E-13 : f32
    %17 = vector.broadcast %cst_9 : f32 to vector<8x1xf32>
    %18 = arith.addf %14, %17 : vector<8x1xf32>
    %19 = math.rsqrt %18 : vector<8x1xf32>
    %20 = vector.broadcast %19 : vector<8x1xf32> to vector<8x32xf32>
    %21 = arith.mulf %16, %20 : vector<8x32xf32>
    %22 = vector.broadcast %2 : vector<1x32xf32> to vector<8x32xf32>
    %23 = arith.mulf %21, %22 : vector<8x32xf32>
    %24 = vector.broadcast %3 : vector<1x32xf32> to vector<8x32xf32>
    %25 = arith.addf %23, %24 : vector<8x32xf32>
    %26 = arith.truncf %25 : vector<8x32xf32> to vector<8x32xbf16>
    %27 = vector.shape_cast %26 : vector<8x32xbf16> to vector<1x8x32xbf16>
    %28 = vector.shape_cast %27 : vector<1x8x32xbf16> to vector<1x8x32xbf16>
    %29 = vector.broadcast %28 : vector<1x8x32xbf16> to vector<4x8x32xbf16>
    %c0_10 = arith.constant 0 : index
    %c0_11 = arith.constant 0 : index
    %c0_12 = arith.constant 0 : index
    %30 = vector.load %arg4[%c0_10, %c0_11, %c0_12] : memref<4x32x8xbf16, #tpu.memory_space<vmem>>, vector<4x32x8xbf16>
    "tpu.trace_start"() <{level = 10 : i32, message = "htd,hdk->htk"}> : () -> ()
    %cst_13 = arith.constant dense<0.000000e+00> : vector<4x8x8xf32>
    %31 = tpu.matmul %29, %30, %cst_13 {dimension_numbers = #tpu.dot_dimension_numbers<[2], [1], [1], [2], [0, 0, 0, 1, 1, 2], [0], [0]>} : vector<4x8x32xbf16>, vector<4x32x8xbf16>, vector<4x8x8xf32> -> vector<4x8x8xf32>
    "tpu.trace_stop"() : () -> ()
    %c0_14 = arith.constant 0 : index
    %c0_15 = arith.constant 0 : index
    %c0_16 = arith.constant 0 : index
    %32 = vector.load %arg7[%c0_14, %c0_15, %c0_16] : memref<4x32x8xbf16, #tpu.memory_space<vmem>>, vector<4x32x8xbf16>
    "tpu.trace_start"() <{level = 10 : i32, message = "htd,hdk->htk"}> : () -> ()
    %cst_17 = arith.constant dense<0.000000e+00> : vector<4x8x8xf32>
    %33 = tpu.matmul %29, %32, %cst_17 {dimension_numbers = #tpu.dot_dimension_numbers<[2], [1], [1], [2], [0, 0, 0, 1, 1, 2], [0], [0]>} : vector<4x8x32xbf16>, vector<4x32x8xbf16>, vector<4x8x8xf32> -> vector<4x8x8xf32>
    "tpu.trace_stop"() : () -> ()
    %c0_18 = arith.constant 0 : index
    %c0_19 = arith.constant 0 : index
    %c0_20 = arith.constant 0 : index
    %34 = vector.load %arg8[%c0_18, %c0_19, %c0_20] : memref<4x1x8xf32, #tpu.memory_space<vmem>>, vector<4x1x8xf32>
    %35 = vector.broadcast %34 : vector<4x1x8xf32> to vector<4x8x8xf32>
    %36 = arith.addf %33, %35 : vector<4x8x8xf32>
    %c0_21 = arith.constant 0 : index
    %c0_22 = arith.constant 0 : index
    %c0_23 = arith.constant 0 : index
    %37 = vector.load %arg9[%c0_21, %c0_22, %c0_23] : memref<4x32x8xbf16, #tpu.memory_space<vmem>>, vector<4x32x8xbf16>
    "tpu.trace_start"() <{level = 10 : i32, message = "htd,hdk->htk"}> : () -> ()
    %cst_24 = arith.constant dense<0.000000e+00> : vector<4x8x8xf32>
    %38 = tpu.matmul %29, %37, %cst_24 {dimension_numbers = #tpu.dot_dimension_numbers<[2], [1], [1], [2], [0, 0, 0, 1, 1, 2], [0], [0]>} : vector<4x8x32xbf16>, vector<4x32x8xbf16>, vector<4x8x8xf32> -> vector<4x8x8xf32>
    "tpu.trace_stop"() : () -> ()
    %c0_25 = arith.constant 0 : index
    %c0_26 = arith.constant 0 : index
    %c0_27 = arith.constant 0 : index
    %39 = vector.load %arg10[%c0_25, %c0_26, %c0_27] : memref<4x1x8xf32, #tpu.memory_space<vmem>>, vector<4x1x8xf32>
    %40 = vector.broadcast %39 : vector<4x1x8xf32> to vector<4x8x8xf32>
    %41 = arith.addf %38, %40 : vector<4x8x8xf32>
    %c0_28 = arith.constant 0 : index
    %c0_29 = arith.constant 0 : index
    %c0_30 = arith.constant 0 : index
    %42 = vector.load %arg5[%c0_28, %c0_29, %c0_30] : memref<4x1x8xf32, #tpu.memory_space<vmem>>, vector<4x1x8xf32>
    %43 = vector.broadcast %42 : vector<4x1x8xf32> to vector<4x8x8xf32>
    %44 = arith.addf %31, %43 : vector<4x8x8xf32>
    %45 = arith.truncf %44 : vector<4x8x8xf32> to vector<4x8x8xbf16>
    %c0_31 = arith.constant 0 : index
    %c0_32 = arith.constant 0 : index
    %c0_33 = arith.constant 0 : index
    %46 = vector.load %arg6[%c0_31, %c0_32, %c0_33] : memref<4x1x8xf32, #tpu.memory_space<vmem>>, vector<4x1x8xf32>
    %47 = vector.broadcast %46 : vector<4x1x8xf32> to vector<4x8x8xf32>
    %48 = arith.addf %31, %47 : vector<4x8x8xf32>
    %49 = arith.truncf %48 : vector<4x8x8xf32> to vector<4x8x8xbf16>
    %50 = arith.truncf %36 : vector<4x8x8xf32> to vector<4x8x8xbf16>
    %51 = arith.truncf %41 : vector<4x8x8xf32> to vector<4x8x8xbf16>
    "tpu.trace_start"() <{level = 10 : i32, message = "htd,hsd->hts"}> : () -> ()
    %cst_34 = arith.constant dense<0.000000e+00> : vector<4x8x8xf32>
    %52 = tpu.matmul %45, %50, %cst_34 {dimension_numbers = #tpu.dot_dimension_numbers<[2], [2], [1], [1], [0, 0, 0, 1, 1, 1], [0], [0]>} : vector<4x8x8xbf16>, vector<4x8x8xbf16>, vector<4x8x8xf32> -> vector<4x8x8xf32>
    "tpu.trace_stop"() : () -> ()
    %c0_35 = arith.constant 0 : index
    %c0_36 = arith.constant 0 : index
    %c0_37 = arith.constant 0 : index
    %53 = vector.load %arg11[%c0_35, %c0_36, %c0_37] : memref<4x16x8xbf16, #tpu.memory_space<vmem>>, vector<4x16x8xbf16>
    "tpu.trace_start"() <{level = 10 : i32, message = "htd,hpd->htp"}> : () -> ()
    %cst_38 = arith.constant dense<0.000000e+00> : vector<4x8x16xf32>
    %54 = tpu.matmul %49, %53, %cst_38 {dimension_numbers = #tpu.dot_dimension_numbers<[2], [2], [1], [1], [0, 0, 0, 1, 1, 1], [0], [0]>} : vector<4x8x8xbf16>, vector<4x16x8xbf16>, vector<4x8x16xf32> -> vector<4x8x16xf32>
    "tpu.trace_stop"() : () -> ()
    %55 = vector.shape_cast %54 : vector<4x8x16xf32> to vector<4x128xf32>
    %56 = vector.extract_strided_slice %55 {offsets = [0, 7], sizes = [4, 120], strides = [1, 1]} : vector<4x128xf32> to vector<4x120xf32>
    %57 = vector.shape_cast %56 : vector<4x120xf32> to vector<4x8x15xf32>
    %58 = vector.extract_strided_slice %57 {offsets = [0, 0, 0], sizes = [4, 8, 8], strides = [1, 1, 1]} : vector<4x8x15xf32> to vector<4x8x8xf32>
    %59 = arith.addf %52, %58 : vector<4x8x8xf32>
    %cst_39 = arith.constant dense<0xFF800000> : vector<4x8xf32>
    %60 = vector.multi_reduction <maximumf>, %59, %cst_39 [2] : vector<4x8x8xf32> to vector<4x8xf32>
    %61 = vector.shape_cast %60 : vector<4x8xf32> to vector<4x8x1xf32>
    %62 = vector.broadcast %61 : vector<4x8x1xf32> to vector<4x8x8xf32>
    %63 = arith.subf %59, %62 : vector<4x8x8xf32>
    %64 = math.exp %63 : vector<4x8x8xf32>
    %cst_40 = arith.constant dense<0.000000e+00> : vector<4x8xf32>
    %65 = vector.multi_reduction <add>, %64, %cst_40 [2] : vector<4x8x8xf32> to vector<4x8xf32>
    %66 = vector.shape_cast %65 : vector<4x8xf32> to vector<4x8x1xf32>
    %67 = tpu.reciprocal %66 {approx = true} : vector<4x8x1xf32> -> vector<4x8x1xf32>
    %68 = vector.broadcast %67 : vector<4x8x1xf32> to vector<4x8x8xf32>
    %69 = arith.mulf %64, %68 : vector<4x8x8xf32>
    %70 = arith.truncf %69 : vector<4x8x8xf32> to vector<4x8x8xbf16>
    "tpu.trace_start"() <{level = 10 : i32, message = "hts,hsd->htd"}> : () -> ()
    %cst_41 = arith.constant dense<0.000000e+00> : vector<4x8x8xf32>
    %71 = tpu.matmul %70, %51, %cst_41 {dimension_numbers = #tpu.dot_dimension_numbers<[2], [1], [1], [2], [0, 0, 0, 1, 1, 2], [0], [0]>} : vector<4x8x8xbf16>, vector<4x8x8xbf16>, vector<4x8x8xf32> -> vector<4x8x8xf32>
    "tpu.trace_stop"() : () -> ()
    %72 = arith.truncf %71 : vector<4x8x8xf32> to vector<4x8x8xbf16>
    %c0_42 = arith.constant 0 : index
    %c0_43 = arith.constant 0 : index
    %c0_44 = arith.constant 0 : index
    %73 = vector.load %arg12[%c0_42, %c0_43, %c0_44] : memref<4x8x32xbf16, #tpu.memory_space<vmem>>, vector<4x8x32xbf16>
    "tpu.trace_start"() <{level = 10 : i32, message = "htd,hde->hte"}> : () -> ()
    %cst_45 = arith.constant dense<0.000000e+00> : vector<4x8x32xf32>
    %74 = tpu.matmul %72, %73, %cst_45 {dimension_numbers = #tpu.dot_dimension_numbers<[2], [1], [1], [2], [0, 0, 0, 1, 1, 2], [0], [0]>} : vector<4x8x8xbf16>, vector<4x8x32xbf16>, vector<4x8x32xf32> -> vector<4x8x32xf32>
    "tpu.trace_stop"() : () -> ()
    %cst_46 = arith.constant dense<0.000000e+00> : vector<8x32xf32>
    %75 = vector.multi_reduction <add>, %74, %cst_46 [0] : vector<4x8x32xf32> to vector<8x32xf32>
    %76 = arith.addf %1, %75 : vector<8x32xf32>
    %c0_47 = arith.constant 0 : index
    %c0_48 = arith.constant 0 : index
    %77 = vector.load %arg13[%c0_47, %c0_48] : memref<1x32xf32, #tpu.memory_space<vmem>>, vector<1x32xf32>
    %78 = vector.broadcast %77 : vector<1x32xf32> to vector<8x32xf32>
    %79 = arith.addf %76, %78 : vector<8x32xf32>
    %c0_49 = arith.constant 0 : index
    %c0_50 = arith.constant 0 : index
    %80 = vector.load %arg14[%c0_49, %c0_50] : memref<1x32xf32, #tpu.memory_space<vmem>>, vector<1x32xf32>
    %c0_51 = arith.constant 0 : index
    %c0_52 = arith.constant 0 : index
    %81 = vector.load %arg15[%c0_51, %c0_52] : memref<1x32xf32, #tpu.memory_space<vmem>>, vector<1x32xf32>
    %cst_53 = arith.constant dense<0.000000e+00> : vector<8xf32>
    %82 = vector.multi_reduction <add>, %79, %cst_53 [1] : vector<8x32xf32> to vector<8xf32>
    %83 = vector.shape_cast %82 : vector<8xf32> to vector<8x1xf32>
    %cst_54 = arith.constant 3.200000e+01 : f32
    %84 = vector.broadcast %cst_54 : f32 to vector<8x1xf32>
    %85 = arith.divf %83, %84 : vector<8x1xf32>
    %86 = vector.broadcast %85 : vector<8x1xf32> to vector<8x32xf32>
    %87 = arith.subf %79, %86 : vector<8x32xf32>
    %88 = arith.mulf %87, %87 : vector<8x32xf32>
    %cst_55 = arith.constant dense<0.000000e+00> : vector<8xf32>
    %89 = vector.multi_reduction <add>, %88, %cst_55 [1] : vector<8x32xf32> to vector<8xf32>
    %90 = vector.shape_cast %89 : vector<8xf32> to vector<8x1xf32>
    %cst_56 = arith.constant 3.200000e+01 : f32
    %91 = vector.broadcast %cst_56 : f32 to vector<8x1xf32>
    %92 = arith.divf %90, %91 : vector<8x1xf32>
    %93 = vector.broadcast %85 : vector<8x1xf32> to vector<8x32xf32>
    %94 = arith.subf %79, %93 : vector<8x32xf32>
    %cst_57 = arith.constant 9.99999996E-13 : f32
    %95 = vector.broadcast %cst_57 : f32 to vector<8x1xf32>
    %96 = arith.addf %92, %95 : vector<8x1xf32>
    %97 = math.rsqrt %96 : vector<8x1xf32>
    %98 = vector.broadcast %97 : vector<8x1xf32> to vector<8x32xf32>
    %99 = arith.mulf %94, %98 : vector<8x32xf32>
    %100 = vector.broadcast %80 : vector<1x32xf32> to vector<8x32xf32>
    %101 = arith.mulf %99, %100 : vector<8x32xf32>
    %102 = vector.broadcast %81 : vector<1x32xf32> to vector<8x32xf32>
    %103 = arith.addf %101, %102 : vector<8x32xf32>
    %104 = arith.truncf %103 : vector<8x32xf32> to vector<8x32xbf16>
    %c0_58 = arith.constant 0 : index
    %c0_59 = arith.constant 0 : index
    %105 = vector.load %arg16[%c0_58, %c0_59] : memref<32x64xbf16, #tpu.memory_space<vmem>>, vector<32x64xbf16>
    %cst_60 = arith.constant dense<0.000000e+00> : vector<8x64xf32>
    %106 = tpu.matmul %104, %105, %cst_60 {dimension_numbers = #tpu.dot_dimension_numbers<[1], [0], [0], [1], [0, 0, 1, 1], [], []>} : vector<8x32xbf16>, vector<32x64xbf16>, vector<8x64xf32> -> vector<8x64xf32>
    %c0_61 = arith.constant 0 : index
    %c0_62 = arith.constant 0 : index
    %107 = vector.load %arg17[%c0_61, %c0_62] : memref<1x64xf32, #tpu.memory_space<vmem>>, vector<1x64xf32>
    %108 = vector.broadcast %107 : vector<1x64xf32> to vector<8x64xf32>
    %109 = arith.addf %106, %108 : vector<8x64xf32>
    %cst_63 = arith.constant 0.000000e+00 : f32
    %110 = vector.broadcast %cst_63 : f32 to vector<8x64xf32>
    %111 = arith.maximumf %109, %110 : vector<8x64xf32>
    %112 = arith.truncf %111 : vector<8x64xf32> to vector<8x64xbf16>
    %c0_64 = arith.constant 0 : index
    %c0_65 = arith.constant 0 : index
    %113 = vector.load %arg18[%c0_64, %c0_65] : memref<64x32xbf16, #tpu.memory_space<vmem>>, vector<64x32xbf16>
    %cst_66 = arith.constant dense<0.000000e+00> : vector<8x32xf32>
    %114 = tpu.matmul %112, %113, %cst_66 {dimension_numbers = #tpu.dot_dimension_numbers<[1], [0], [0], [1], [0, 0, 1, 1], [], []>} : vector<8x64xbf16>, vector<64x32xbf16>, vector<8x32xf32> -> vector<8x32xf32>
    %c0_67 = arith.constant 0 : index
    %c0_68 = arith.constant 0 : index
    %115 = vector.load %arg19[%c0_67, %c0_68] : memref<1x32xf32, #tpu.memory_space<vmem>>, vector<1x32xf32>
    %116 = vector.broadcast %115 : vector<1x32xf32> to vector<8x32xf32>
    %117 = arith.addf %114, %116 : vector<8x32xf32>
    %118 = arith.addf %79, %117 : vector<8x32xf32>
    %c0_69 = arith.constant 0 : index
    %c0_70 = arith.constant 0 : index
    %c0_71 = arith.constant 0 : index
    %119 = vector.load %arg20[%c0_69, %c0_70, %c0_71] : memref<1x8x32xf32, #tpu.memory_space<vmem>>, vector<1x8x32xf32>
    %120 = vector.shape_cast %119 : vector<1x8x32xf32> to vector<8x32xf32>
    %121 = vector.shape_cast %118 : vector<8x32xf32> to vector<1x8x32xf32>
    tpu.vector_store %arg20[%c0_69, %c0_70, %c0_71], %121 {strides = array<i32>} : memref<1x8x32xf32, #tpu.memory_space<vmem>>, vector<1x8x32xf32>,
    return
  }
  func.func @transform_0(%arg0: i32) -> (i32, i32, i32) {
    %c0_i32 = arith.constant 0 : i32
    %c0_i32_0 = arith.constant 0 : i32
    %c0_i32_1 = arith.constant 0 : i32
    return %arg0, %c0_i32, %c0_i32_0 : i32, i32, i32
  }
  func.func @transform_1(%arg0: i32) -> (i32, i32) {
    %c0_i32 = arith.constant 0 : i32
    %c0_i32_0 = arith.constant 0 : i32
    %c0_i32_1 = arith.constant 0 : i32
    return %c0_i32, %c0_i32_0 : i32, i32
  }
  func.func @transform_2(%arg0: i32) -> (i32, i32) {
    %c0_i32 = arith.constant 0 : i32
    %c0_i32_0 = arith.constant 0 : i32
    %c0_i32_1 = arith.constant 0 : i32
    return %c0_i32, %c0_i32_0 : i32, i32
  }
  func.func @transform_3(%arg0: i32) -> (i32, i32, i32) {
    %c0_i32 = arith.constant 0 : i32
    %c0_i32_0 = arith.constant 0 : i32
    %c0_i32_1 = arith.constant 0 : i32
    %c0_i32_2 = arith.constant 0 : i32
    return %c0_i32, %c0_i32_0, %c0_i32_1 : i32, i32, i32
  }
  func.func @transform_4(%arg0: i32) -> (i32, i32, i32) {
    %c0_i32 = arith.constant 0 : i32
    %c0_i32_0 = arith.constant 0 : i32
    %c0_i32_1 = arith.constant 0 : i32
    %c0_i32_2 = arith.constant 0 : i32
    return %c0_i32, %c0_i32_0, %c0_i32_1 : i32, i32, i32
  }
  func.func @transform_5(%arg0: i32) -> (i32, i32, i32) {
    %c0_i32 = arith.constant 0 : i32
    %c0_i32_0 = arith.constant 0 : i32
    %c0_i32_1 = arith.constant 0 : i32
    %c0_i32_2 = arith.constant 0 : i32
    return %c0_i32, %c0_i32_0, %c0_i32_1 : i32, i32, i32
  }
  func.func @transform_6(%arg0: i32) -> (i32, i32, i32) {
    %c0_i32 = arith.constant 0 : i32
    %c0_i32_0 = arith.constant 0 : i32
    %c0_i32_1 = arith.constant 0 : i32
    %c0_i32_2 = arith.constant 0 : i32
    return %c0_i32, %c0_i32_0, %c0_i32_1 : i32, i32, i32
  }
  func.func @transform_7(%arg0: i32) -> (i32, i32, i32) {
    %c0_i32 = arith.constant 0 : i32
    %c0_i32_0 = arith.constant 0 : i32
    %c0_i32_1 = arith.constant 0 : i32
    %c0_i32_2 = arith.constant 0 : i32
    return %c0_i32, %c0_i32_0, %c0_i32_1 : i32, i32, i32
  }
  func.func @transform_8(%arg0: i32) -> (i32, i32, i32) {
    %c0_i32 = arith.constant 0 : i32
    %c0_i32_0 = arith.constant 0 : i32
    %c0_i32_1 = arith.constant 0 : i32
    %c0_i32_2 = arith.constant 0 : i32
    return %c0_i32, %c0_i32_0, %c0_i32_1 : i32, i32, i32
  }
  func.func @transform_9(%arg0: i32) -> (i32, i32, i32) {
    %c0_i32 = arith.constant 0 : i32
    %c0_i32_0 = arith.constant 0 : i32
    %c0_i32_1 = arith.constant 0 : i32
    %c0_i32_2 = arith.constant 0 : i32
    return %c0_i32, %c0_i32_0, %c0_i32_1 : i32, i32, i32
  }
  func.func @transform_10(%arg0: i32) -> (i32, i32, i32) {
    %c0_i32 = arith.constant 0 : i32
    %c0_i32_0 = arith.constant 0 : i32
    %c0_i32_1 = arith.constant 0 : i32
    %c0_i32_2 = arith.constant 0 : i32
    return %c0_i32, %c0_i32_0, %c0_i32_1 : i32, i32, i32
  }
  func.func @transform_11(%arg0: i32) -> (i32, i32, i32) {
    %c0_i32 = arith.constant 0 : i32
    %c0_i32_0 = arith.constant 0 : i32
    %c0_i32_1 = arith.constant 0 : i32
    %c0_i32_2 = arith.constant 0 : i32
    return %c0_i32, %c0_i32_0, %c0_i32_1 : i32, i32, i32
  }
  func.func @transform_12(%arg0: i32) -> (i32, i32) {
    %c0_i32 = arith.constant 0 : i32
    %c0_i32_0 = arith.constant 0 : i32
    %c0_i32_1 = arith.constant 0 : i32
    return %c0_i32, %c0_i32_0 : i32, i32
  }
  func.func @transform_13(%arg0: i32) -> (i32, i32) {
    %c0_i32 = arith.constant 0 : i32
    %c0_i32_0 = arith.constant 0 : i32
    %c0_i32_1 = arith.constant 0 : i32
    return %c0_i32, %c0_i32_0 : i32, i32
  }
  func.func @transform_14(%arg0: i32) -> (i32, i32) {
    %c0_i32 = arith.constant 0 : i32
    %c0_i32_0 = arith.constant 0 : i32
    %c0_i32_1 = arith.constant 0 : i32
    return %c0_i32, %c0_i32_0 : i32, i32
  }
  func.func @transform_15(%arg0: i32) -> (i32, i32) {
    %c0_i32 = arith.constant 0 : i32
    %c0_i32_0 = arith.constant 0 : i32
    %c0_i32_1 = arith.constant 0 : i32
    return %c0_i32, %c0_i32_0 : i32, i32
  }
  func.func @transform_16(%arg0: i32) -> (i32, i32) {
    %c0_i32 = arith.constant 0 : i32
    %c0_i32_0 = arith.constant 0 : i32
    %c0_i32_1 = arith.constant 0 : i32
    return %c0_i32, %c0_i32_0 : i32, i32
  }
  func.func @transform_17(%arg0: i32) -> (i32, i32) {
    %c0_i32 = arith.constant 0 : i32
    %c0_i32_0 = arith.constant 0 : i32
    %c0_i32_1 = arith.constant 0 : i32
    return %c0_i32, %c0_i32_0 : i32, i32
  }
  func.func @transform_18(%arg0: i32) -> (i32, i32) {
    %c0_i32 = arith.constant 0 : i32
    %c0_i32_0 = arith.constant 0 : i32
    %c0_i32_1 = arith.constant 0 : i32
    return %c0_i32, %c0_i32_0 : i32, i32
  }
  func.func @transform_19(%arg0: i32) -> (i32, i32, i32) {
    %c0_i32 = arith.constant 0 : i32
    %c0_i32_0 = arith.constant 0 : i32
    %c0_i32_1 = arith.constant 0 : i32
    return %arg0, %c0_i32, %c0_i32_0 : i32, i32, i32
  }
}

module attributes {stable_mosaic.version = 11 : i64} {
  func.func @_rel_encoder_layer_kernel(%arg0: i32, %arg1: memref<1x8x32xf32, #tpu.memory_space<vmem>>, %arg2: memref<1x32xf32, #tpu.memory_space<vmem>>, %arg3: memref<1x32xf32, #tpu.memory_space<vmem>>, %arg4: memref<4x32x8xbf16, #tpu.memory_space<vmem>>, %arg5: memref<4x1x8xf32, #tpu.memory_space<vmem>>, %arg6: memref<4x1x8xf32, #tpu.memory_space<vmem>>, %arg7: memref<4x32x8xbf16, #tpu.memory_space<vmem>>, %arg8: memref<4x1x8xf32, #tpu.memory_space<vmem>>, %arg9: memref<4x32x8xbf16, #tpu.memory_space<vmem>>, %arg10: memref<4x1x8xf32, #tpu.memory_space<vmem>>, %arg11: memref<4x16x8xbf16, #tpu.memory_space<vmem>>, %arg12: memref<4x8x32xbf16, #tpu.memory_space<vmem>>, %arg13: memref<1x32xf32, #tpu.memory_space<vmem>>, %arg14: memref<1x32xf32, #tpu.memory_space<vmem>>, %arg15: memref<1x32xf32, #tpu.memory_space<vmem>>, %arg16: memref<32x64xbf16, #tpu.memory_space<vmem>>, %arg17: memref<1x64xf32, #tpu.memory_space<vmem>>, %arg18: memref<64x32xbf16, #tpu.memory_space<vmem>>, %arg19: memref<1x32xf32, #tpu.memory_space<vmem>>, %arg20: memref<1x8x32xf32, #tpu.memory_space<vmem>>) attributes {dimension_semantics = [#tpu.dimension_semantics<parallel>], iteration_bounds = array<i64: 2>, scalar_prefetch = 0 : i64, scratch_operands = 0 : i64, tpu.core_type = #tpu.core_type<tc>, window_params = [{transform_indices = @transform_0, window_bounds = array<i64: 1, 8, 32>}, {pipeline_mode = #tpu.pipeline_mode<synchronous>, transform_indices = @transform_1, window_bounds = array<i64: 1, 32>}, {pipeline_mode = #tpu.pipeline_mode<synchronous>, transform_indices = @transform_2, window_bounds = array<i64: 1, 32>}, {pipeline_mode = #tpu.pipeline_mode<synchronous>, transform_indices = @transform_3, window_bounds = array<i64: 4, 32, 8>}, {pipeline_mode = #tpu.pipeline_mode<synchronous>, transform_indices = @transform_4, window_bounds = array<i64: 4, 1, 8>}, {pipeline_mode = #tpu.pipeline_mode<synchronous>, transform_indices = @transform_5, window_bounds = array<i64: 4, 1, 8>}, {pipeline_mode = #tpu.pipeline_mode<synchronous>, transform_indices = @transform_6, window_bounds = array<i64: 4, 32, 8>}, {pipeline_mode = #tpu.pipeline_mode<synchronous>, transform_indices = @transform_7, window_bounds = array<i64: 4, 1, 8>}, {pipeline_mode = #tpu.pipeline_mode<synchronous>, transform_indices = @transform_8, window_bounds = array<i64: 4, 32, 8>}, {pipeline_mode = #tpu.pipeline_mode<synchronous>, transform_indices = @transform_9, window_bounds = array<i64: 4, 1, 8>}, {pipeline_mode = #tpu.pipeline_mode<synchronous>, transform_indices = @transform_10, window_bounds = array<i64: 4, 16, 8>}, {pipeline_mode = #tpu.pipeline_mode<synchronous>, transform_indices = @transform_11, window_bounds = array<i64: 4, 8, 32>}, {pipeline_mode = #tpu.pipeline_mode<synchronous>, transform_indices = @transform_12, window_bounds = array<i64: 1, 32>}, {pipeline_mode = #tpu.pipeline_mode<synchronous>, transform_indices = @transform_13, window_bounds = array<i64: 1, 32>}, {pipeline_mode = #tpu.pipeline_mode<synchronous>, transform_indices = @transform_14, window_bounds = array<i64: 1, 32>}, {pipeline_mode = #tpu.pipeline_mode<synchronous>, transform_indices = @transform_15, window_bounds = array<i64: 32, 64>}, {pipeline_mode = #tpu.pipeline_mode<synchronous>, transform_indices = @transform_16, window_bounds = array<i64: 1, 64>}, {pipeline_mode = #tpu.pipeline_mode<synchronous>, transform_indices = @transform_17, window_bounds = array<i64: 64, 32>}, {pipeline_mode = #tpu.pipeline_mode<synchronous>, transform_indices = @transform_18, window_bounds = array<i64: 1, 32>}, {transform_indices = @transform_19, window_bounds = array<i64: 1, 8, 32>}]} {
    %c0 = arith.constant 0 : index
    %c0_0 = arith.constant 0 : index
    %c0_1 = arith.constant 0 : index
    %0 = vector.load %arg1[%c0, %c0_0, %c0_1] : memref<1x8x32xf32, #tpu.memory_space<vmem>>, vector<1x8x32xf32>
    %1 = vector.shape_cast %0 : vector<1x8x32xf32> to vector<8x32xf32>
    %c0_2 = arith.constant 0 : index
    %c0_3 = arith.constant 0 : index
    %2 = vector.load %arg2[%c0_2, %c0_3] : memref<1x32xf32, #tpu.memory_space<vmem>>, vector<1x32xf32>
    %c0_4 = arith.constant 0 : index
    %c0_5 = arith.constant 0 : index
    %3 = vector.load %arg3[%c0_4, %c0_5] : memref<1x32xf32, #tpu.memory_space<vmem>>, vector<1x32xf32>
    %cst = arith.constant dense<0.000000e+00> : vector<8xf32>
    %4 = vector.multi_reduction <add>, %1, %cst [1] : vector<8x32xf32> to vector<8xf32>
    %5 = vector.shape_cast %4 : vector<8xf32> to vector<8x1xf32>
    %cst_6 = arith.constant 3.200000e+01 : f32
    %6 = vector.broadcast %cst_6 : f32 to vector<8x1xf32>
    %7 = arith.divf %5, %6 : vector<8x1xf32>
    %8 = vector.broadcast %7 : vector<8x1xf32> to vector<8x32xf32>
    %9 = arith.subf %1, %8 : vector<8x32xf32>
    %10 = arith.mulf %9, %9 : vector<8x32xf32>
    %cst_7 = arith.constant dense<0.000000e+00> : vector<8xf32>
    %11 = vector.multi_reduction <add>, %10, %cst_7 [1] : vector<8x32xf32> to vector<8xf32>
    %12 = vector.shape_cast %11 : vector<8xf32> to vector<8x1xf32>
    %cst_8 = arith.constant 3.200000e+01 : f32
    %13 = vector.broadcast %cst_8 : f32 to vector<8x1xf32>
    %14 = arith.divf %12, %13 : vector<8x1xf32>
    %15 = vector.broadcast %7 : vector<8x1xf32> to vector<8x32xf32>
    %16 = arith.subf %1, %15 : vector<8x32xf32>
    %cst_9 = arith.constant 9.99999996E-13 : f32
    %17 = vector.broadcast %cst_9 : f32 to vector<8x1xf32>
    %18 = arith.addf %14, %17 : vector<8x1xf32>
    %19 = math.rsqrt %18 : vector<8x1xf32>
    %20 = vector.broadcast %19 : vector<8x1xf32> to vector<8x32xf32>
    %21 = arith.mulf %16, %20 : vector<8x32xf32>
    %22 = vector.broadcast %2 : vector<1x32xf32> to vector<8x32xf32>
    %23 = arith.mulf %21, %22 : vector<8x32xf32>
    %24 = vector.broadcast %3 : vector<1x32xf32> to vector<8x32xf32>
    %25 = arith.addf %23, %24 : vector<8x32xf32>
    %26 = arith.truncf %25 : vector<8x32xf32> to vector<8x32xbf16>
    %27 = vector.shape_cast %26 : vector<8x32xbf16> to vector<1x8x32xbf16>
    %28 = vector.shape_cast %27 : vector<1x8x32xbf16> to vector<1x8x32xbf16>
    %29 = vector.broadcast %28 : vector<1x8x32xbf16> to vector<4x8x32xbf16>
    %c0_10 = arith.constant 0 : index
    %c0_11 = arith.constant 0 : index
    %c0_12 = arith.constant 0 : index
    %30 = vector.load %arg4[%c0_10, %c0_11, %c0_12] : memref<4x32x8xbf16, #tpu.memory_space<vmem>>, vector<4x32x8xbf16>
    "tpu.trace_start"() <{level = 10 : i32, message = "htd,hdk->htk"}> : () -> ()
    %cst_13 = arith.constant dense<0.000000e+00> : vector<4x8x8xf32>
    %31 = tpu.matmul %29, %30, %cst_13 {dimension_numbers = #tpu.dot_dimension_numbers<[2], [1], [1], [2], [0, 0, 0, 1, 1, 2], [0], [0]>} : vector<4x8x32xbf16>, vector<4x32x8xbf16>, vector<4x8x8xf32> -> vector<4x8x8xf32>
    "tpu.trace_stop"() : () -> ()
    %c0_14 = arith.constant 0 : index
    %c0_15 = arith.constant 0 : index
    %c0_16 = arith.constant 0 : index
    %32 = vector.load %arg7[%c0_14, %c0_15, %c0_16] : memref<4x32x8xbf16, #tpu.memory_space<vmem>>, vector<4x32x8xbf16>
    "tpu.trace_start"() <{level = 10 : i32, message = "htd,hdk->htk"}> : () -> ()
    %cst_17 = arith.constant dense<0.000000e+00> : vector<4x8x8xf32>
    %33 = tpu.matmul %29, %32, %cst_17 {dimension_numbers = #tpu.dot_dimension_numbers<[2], [1], [1], [2], [0, 0, 0, 1, 1, 2], [0], [0]>} : vector<4x8x32xbf16>, vector<4x32x8xbf16>, vector<4x8x8xf32> -> vector<4x8x8xf32>
    "tpu.trace_stop"() : () -> ()
    %c0_18 = arith.constant 0 : index
    %c0_19 = arith.constant 0 : index
    %c0_20 = arith.constant 0 : index
    %34 = vector.load %arg8[%c0_18, %c0_19, %c0_20] : memref<4x1x8xf32, #tpu.memory_space<vmem>>, vector<4x1x8xf32>
    %35 = vector.broadcast %34 : vector<4x1x8xf32> to vector<4x8x8xf32>
    %36 = arith.addf %33, %35 : vector<4x8x8xf32>
    %c0_21 = arith.constant 0 : index
    %c0_22 = arith.constant 0 : index
    %c0_23 = arith.constant 0 : index
    %37 = vector.load %arg9[%c0_21, %c0_22, %c0_23] : memref<4x32x8xbf16, #tpu.memory_space<vmem>>, vector<4x32x8xbf16>
    "tpu.trace_start"() <{level = 10 : i32, message = "htd,hdk->htk"}> : () -> ()
    %cst_24 = arith.constant dense<0.000000e+00> : vector<4x8x8xf32>
    %38 = tpu.matmul %29, %37, %cst_24 {dimension_numbers = #tpu.dot_dimension_numbers<[2], [1], [1], [2], [0, 0, 0, 1, 1, 2], [0], [0]>} : vector<4x8x32xbf16>, vector<4x32x8xbf16>, vector<4x8x8xf32> -> vector<4x8x8xf32>
    "tpu.trace_stop"() : () -> ()
    %c0_25 = arith.constant 0 : index
    %c0_26 = arith.constant 0 : index
    %c0_27 = arith.constant 0 : index
    %39 = vector.load %arg10[%c0_25, %c0_26, %c0_27] : memref<4x1x8xf32, #tpu.memory_space<vmem>>, vector<4x1x8xf32>
    %40 = vector.broadcast %39 : vector<4x1x8xf32> to vector<4x8x8xf32>
    %41 = arith.addf %38, %40 : vector<4x8x8xf32>
    %c0_28 = arith.constant 0 : index
    %c0_29 = arith.constant 0 : index
    %c0_30 = arith.constant 0 : index
    %42 = vector.load %arg5[%c0_28, %c0_29, %c0_30] : memref<4x1x8xf32, #tpu.memory_space<vmem>>, vector<4x1x8xf32>
    %43 = vector.broadcast %42 : vector<4x1x8xf32> to vector<4x8x8xf32>
    %44 = arith.addf %31, %43 : vector<4x8x8xf32>
    %45 = arith.truncf %44 : vector<4x8x8xf32> to vector<4x8x8xbf16>
    %c0_31 = arith.constant 0 : index
    %c0_32 = arith.constant 0 : index
    %c0_33 = arith.constant 0 : index
    %46 = vector.load %arg6[%c0_31, %c0_32, %c0_33] : memref<4x1x8xf32, #tpu.memory_space<vmem>>, vector<4x1x8xf32>
    %47 = vector.broadcast %46 : vector<4x1x8xf32> to vector<4x8x8xf32>
    %48 = arith.addf %31, %47 : vector<4x8x8xf32>
    %49 = arith.truncf %48 : vector<4x8x8xf32> to vector<4x8x8xbf16>
    %50 = arith.truncf %36 : vector<4x8x8xf32> to vector<4x8x8xbf16>
    %51 = arith.truncf %41 : vector<4x8x8xf32> to vector<4x8x8xbf16>
    "tpu.trace_start"() <{level = 10 : i32, message = "htd,hsd->hts"}> : () -> ()
    %cst_34 = arith.constant dense<0.000000e+00> : vector<4x8x8xf32>
    %52 = tpu.matmul %45, %50, %cst_34 {dimension_numbers = #tpu.dot_dimension_numbers<[2], [2], [1], [1], [0, 0, 0, 1, 1, 1], [0], [0]>} : vector<4x8x8xbf16>, vector<4x8x8xbf16>, vector<4x8x8xf32> -> vector<4x8x8xf32>
    "tpu.trace_stop"() : () -> ()
    %c0_35 = arith.constant 0 : index
    %c0_36 = arith.constant 0 : index
    %c0_37 = arith.constant 0 : index
    %53 = vector.load %arg11[%c0_35, %c0_36, %c0_37] : memref<4x16x8xbf16, #tpu.memory_space<vmem>>, vector<4x16x8xbf16>
    "tpu.trace_start"() <{level = 10 : i32, message = "htd,hpd->htp"}> : () -> ()
    %cst_38 = arith.constant dense<0.000000e+00> : vector<4x8x16xf32>
    %54 = tpu.matmul %49, %53, %cst_38 {dimension_numbers = #tpu.dot_dimension_numbers<[2], [2], [1], [1], [0, 0, 0, 1, 1, 1], [0], [0]>} : vector<4x8x8xbf16>, vector<4x16x8xbf16>, vector<4x8x16xf32> -> vector<4x8x16xf32>
    "tpu.trace_stop"() : () -> ()
    %55 = vector.extract_strided_slice %54 {offsets = [0, 0, 7], sizes = [4, 1, 8], strides = [1, 1, 1]} : vector<4x8x16xf32> to vector<4x1x8xf32>
    %56 = vector.extract_strided_slice %54 {offsets = [0, 1, 6], sizes = [4, 1, 8], strides = [1, 1, 1]} : vector<4x8x16xf32> to vector<4x1x8xf32>
    %57 = vector.extract_strided_slice %54 {offsets = [0, 2, 5], sizes = [4, 1, 8], strides = [1, 1, 1]} : vector<4x8x16xf32> to vector<4x1x8xf32>
    %58 = vector.extract_strided_slice %54 {offsets = [0, 3, 4], sizes = [4, 1, 8], strides = [1, 1, 1]} : vector<4x8x16xf32> to vector<4x1x8xf32>
    %59 = vector.extract_strided_slice %54 {offsets = [0, 4, 3], sizes = [4, 1, 8], strides = [1, 1, 1]} : vector<4x8x16xf32> to vector<4x1x8xf32>
    %60 = vector.extract_strided_slice %54 {offsets = [0, 5, 2], sizes = [4, 1, 8], strides = [1, 1, 1]} : vector<4x8x16xf32> to vector<4x1x8xf32>
    %61 = vector.extract_strided_slice %54 {offsets = [0, 6, 1], sizes = [4, 1, 8], strides = [1, 1, 1]} : vector<4x8x16xf32> to vector<4x1x8xf32>
    %62 = vector.extract_strided_slice %54 {offsets = [0, 7, 0], sizes = [4, 1, 8], strides = [1, 1, 1]} : vector<4x8x16xf32> to vector<4x1x8xf32>
    %63 = tpu.concatenate %55, %56, %57, %58, %59, %60, %61, %62 in 1 : vector<4x1x8xf32>, vector<4x1x8xf32>, vector<4x1x8xf32>, vector<4x1x8xf32>, vector<4x1x8xf32>, vector<4x1x8xf32>, vector<4x1x8xf32>, vector<4x1x8xf32> -> vector<4x8x8xf32>
    %64 = arith.addf %52, %63 : vector<4x8x8xf32>
    %cst_39 = arith.constant dense<0xFF800000> : vector<4x8xf32>
    %65 = vector.multi_reduction <maximumf>, %64, %cst_39 [2] : vector<4x8x8xf32> to vector<4x8xf32>
    %66 = vector.shape_cast %65 : vector<4x8xf32> to vector<4x8x1xf32>
    %67 = vector.broadcast %66 : vector<4x8x1xf32> to vector<4x8x8xf32>
    %68 = arith.subf %64, %67 : vector<4x8x8xf32>
    %69 = math.exp %68 : vector<4x8x8xf32>
    %cst_40 = arith.constant dense<0.000000e+00> : vector<4x8xf32>
    %70 = vector.multi_reduction <add>, %69, %cst_40 [2] : vector<4x8x8xf32> to vector<4x8xf32>
    %71 = vector.shape_cast %70 : vector<4x8xf32> to vector<4x8x1xf32>
    %72 = tpu.reciprocal %71 {approx = true} : vector<4x8x1xf32> -> vector<4x8x1xf32>
    %73 = vector.broadcast %72 : vector<4x8x1xf32> to vector<4x8x8xf32>
    %74 = arith.mulf %69, %73 : vector<4x8x8xf32>
    %75 = arith.truncf %74 : vector<4x8x8xf32> to vector<4x8x8xbf16>
    "tpu.trace_start"() <{level = 10 : i32, message = "hts,hsd->htd"}> : () -> ()
    %cst_41 = arith.constant dense<0.000000e+00> : vector<4x8x8xf32>
    %76 = tpu.matmul %75, %51, %cst_41 {dimension_numbers = #tpu.dot_dimension_numbers<[2], [1], [1], [2], [0, 0, 0, 1, 1, 2], [0], [0]>} : vector<4x8x8xbf16>, vector<4x8x8xbf16>, vector<4x8x8xf32> -> vector<4x8x8xf32>
    "tpu.trace_stop"() : () -> ()
    %77 = arith.truncf %76 : vector<4x8x8xf32> to vector<4x8x8xbf16>
    %c0_42 = arith.constant 0 : index
    %c0_43 = arith.constant 0 : index
    %c0_44 = arith.constant 0 : index
    %78 = vector.load %arg12[%c0_42, %c0_43, %c0_44] : memref<4x8x32xbf16, #tpu.memory_space<vmem>>, vector<4x8x32xbf16>
    "tpu.trace_start"() <{level = 10 : i32, message = "htd,hde->hte"}> : () -> ()
    %cst_45 = arith.constant dense<0.000000e+00> : vector<4x8x32xf32>
    %79 = tpu.matmul %77, %78, %cst_45 {dimension_numbers = #tpu.dot_dimension_numbers<[2], [1], [1], [2], [0, 0, 0, 1, 1, 2], [0], [0]>} : vector<4x8x8xbf16>, vector<4x8x32xbf16>, vector<4x8x32xf32> -> vector<4x8x32xf32>
    "tpu.trace_stop"() : () -> ()
    %cst_46 = arith.constant dense<0.000000e+00> : vector<8x32xf32>
    %80 = vector.multi_reduction <add>, %79, %cst_46 [0] : vector<4x8x32xf32> to vector<8x32xf32>
    %81 = arith.addf %1, %80 : vector<8x32xf32>
    %c0_47 = arith.constant 0 : index
    %c0_48 = arith.constant 0 : index
    %82 = vector.load %arg13[%c0_47, %c0_48] : memref<1x32xf32, #tpu.memory_space<vmem>>, vector<1x32xf32>
    %83 = vector.broadcast %82 : vector<1x32xf32> to vector<8x32xf32>
    %84 = arith.addf %81, %83 : vector<8x32xf32>
    %c0_49 = arith.constant 0 : index
    %c0_50 = arith.constant 0 : index
    %85 = vector.load %arg14[%c0_49, %c0_50] : memref<1x32xf32, #tpu.memory_space<vmem>>, vector<1x32xf32>
    %c0_51 = arith.constant 0 : index
    %c0_52 = arith.constant 0 : index
    %86 = vector.load %arg15[%c0_51, %c0_52] : memref<1x32xf32, #tpu.memory_space<vmem>>, vector<1x32xf32>
    %cst_53 = arith.constant dense<0.000000e+00> : vector<8xf32>
    %87 = vector.multi_reduction <add>, %84, %cst_53 [1] : vector<8x32xf32> to vector<8xf32>
    %88 = vector.shape_cast %87 : vector<8xf32> to vector<8x1xf32>
    %cst_54 = arith.constant 3.200000e+01 : f32
    %89 = vector.broadcast %cst_54 : f32 to vector<8x1xf32>
    %90 = arith.divf %88, %89 : vector<8x1xf32>
    %91 = vector.broadcast %90 : vector<8x1xf32> to vector<8x32xf32>
    %92 = arith.subf %84, %91 : vector<8x32xf32>
    %93 = arith.mulf %92, %92 : vector<8x32xf32>
    %cst_55 = arith.constant dense<0.000000e+00> : vector<8xf32>
    %94 = vector.multi_reduction <add>, %93, %cst_55 [1] : vector<8x32xf32> to vector<8xf32>
    %95 = vector.shape_cast %94 : vector<8xf32> to vector<8x1xf32>
    %cst_56 = arith.constant 3.200000e+01 : f32
    %96 = vector.broadcast %cst_56 : f32 to vector<8x1xf32>
    %97 = arith.divf %95, %96 : vector<8x1xf32>
    %98 = vector.broadcast %90 : vector<8x1xf32> to vector<8x32xf32>
    %99 = arith.subf %84, %98 : vector<8x32xf32>
    %cst_57 = arith.constant 9.99999996E-13 : f32
    %100 = vector.broadcast %cst_57 : f32 to vector<8x1xf32>
    %101 = arith.addf %97, %100 : vector<8x1xf32>
    %102 = math.rsqrt %101 : vector<8x1xf32>
    %103 = vector.broadcast %102 : vector<8x1xf32> to vector<8x32xf32>
    %104 = arith.mulf %99, %103 : vector<8x32xf32>
    %105 = vector.broadcast %85 : vector<1x32xf32> to vector<8x32xf32>
    %106 = arith.mulf %104, %105 : vector<8x32xf32>
    %107 = vector.broadcast %86 : vector<1x32xf32> to vector<8x32xf32>
    %108 = arith.addf %106, %107 : vector<8x32xf32>
    %109 = arith.truncf %108 : vector<8x32xf32> to vector<8x32xbf16>
    %c0_58 = arith.constant 0 : index
    %c0_59 = arith.constant 0 : index
    %110 = vector.load %arg16[%c0_58, %c0_59] : memref<32x64xbf16, #tpu.memory_space<vmem>>, vector<32x64xbf16>
    %cst_60 = arith.constant dense<0.000000e+00> : vector<8x64xf32>
    %111 = tpu.matmul %109, %110, %cst_60 {dimension_numbers = #tpu.dot_dimension_numbers<[1], [0], [0], [1], [0, 0, 1, 1], [], []>} : vector<8x32xbf16>, vector<32x64xbf16>, vector<8x64xf32> -> vector<8x64xf32>
    %c0_61 = arith.constant 0 : index
    %c0_62 = arith.constant 0 : index
    %112 = vector.load %arg17[%c0_61, %c0_62] : memref<1x64xf32, #tpu.memory_space<vmem>>, vector<1x64xf32>
    %113 = vector.broadcast %112 : vector<1x64xf32> to vector<8x64xf32>
    %114 = arith.addf %111, %113 : vector<8x64xf32>
    %cst_63 = arith.constant 0.000000e+00 : f32
    %115 = vector.broadcast %cst_63 : f32 to vector<8x64xf32>
    %116 = arith.maximumf %114, %115 : vector<8x64xf32>
    %117 = arith.truncf %116 : vector<8x64xf32> to vector<8x64xbf16>
    %c0_64 = arith.constant 0 : index
    %c0_65 = arith.constant 0 : index
    %118 = vector.load %arg18[%c0_64, %c0_65] : memref<64x32xbf16, #tpu.memory_space<vmem>>, vector<64x32xbf16>
    %cst_66 = arith.constant dense<0.000000e+00> : vector<8x32xf32>
    %119 = tpu.matmul %117, %118, %cst_66 {dimension_numbers = #tpu.dot_dimension_numbers<[1], [0], [0], [1], [0, 0, 1, 1], [], []>} : vector<8x64xbf16>, vector<64x32xbf16>, vector<8x32xf32> -> vector<8x32xf32>
    %c0_67 = arith.constant 0 : index
    %c0_68 = arith.constant 0 : index
    %120 = vector.load %arg19[%c0_67, %c0_68] : memref<1x32xf32, #tpu.memory_space<vmem>>, vector<1x32xf32>
    %121 = vector.broadcast %120 : vector<1x32xf32> to vector<8x32xf32>
    %122 = arith.addf %119, %121 : vector<8x32xf32>
    %123 = arith.addf %84, %122 : vector<8x32xf32>
    %c0_69 = arith.constant 0 : index
    %c0_70 = arith.constant 0 : index
    %c0_71 = arith.constant 0 : index
    %124 = vector.load %arg20[%c0_69, %c0_70, %c0_71] : memref<1x8x32xf32, #tpu.memory_space<vmem>>, vector<1x8x32xf32>
    %125 = vector.shape_cast %124 : vector<1x8x32xf32> to vector<8x32xf32>
    %126 = vector.shape_cast %123 : vector<8x32xf32> to vector<1x8x32xf32>
    tpu.vector_store %arg20[%c0_69, %c0_70, %c0_71], %126 {strides = array<i32>} : memref<1x8x32xf32, #tpu.memory_space<vmem>>, vector<1x8x32xf32>,
    return
  }
  func.func @transform_0(%arg0: i32) -> (i32, i32, i32) {
    %c0_i32 = arith.constant 0 : i32
    %c0_i32_0 = arith.constant 0 : i32
    %c0_i32_1 = arith.constant 0 : i32
    return %arg0, %c0_i32, %c0_i32_0 : i32, i32, i32
  }
  func.func @transform_1(%arg0: i32) -> (i32, i32) {
    %c0_i32 = arith.constant 0 : i32
    %c0_i32_0 = arith.constant 0 : i32
    %c0_i32_1 = arith.constant 0 : i32
    return %c0_i32, %c0_i32_0 : i32, i32
  }
  func.func @transform_2(%arg0: i32) -> (i32, i32) {
    %c0_i32 = arith.constant 0 : i32
    %c0_i32_0 = arith.constant 0 : i32
    %c0_i32_1 = arith.constant 0 : i32
    return %c0_i32, %c0_i32_0 : i32, i32
  }
  func.func @transform_3(%arg0: i32) -> (i32, i32, i32) {
    %c0_i32 = arith.constant 0 : i32
    %c0_i32_0 = arith.constant 0 : i32
    %c0_i32_1 = arith.constant 0 : i32
    %c0_i32_2 = arith.constant 0 : i32
    return %c0_i32, %c0_i32_0, %c0_i32_1 : i32, i32, i32
  }
  func.func @transform_4(%arg0: i32) -> (i32, i32, i32) {
    %c0_i32 = arith.constant 0 : i32
    %c0_i32_0 = arith.constant 0 : i32
    %c0_i32_1 = arith.constant 0 : i32
    %c0_i32_2 = arith.constant 0 : i32
    return %c0_i32, %c0_i32_0, %c0_i32_1 : i32, i32, i32
  }
  func.func @transform_5(%arg0: i32) -> (i32, i32, i32) {
    %c0_i32 = arith.constant 0 : i32
    %c0_i32_0 = arith.constant 0 : i32
    %c0_i32_1 = arith.constant 0 : i32
    %c0_i32_2 = arith.constant 0 : i32
    return %c0_i32, %c0_i32_0, %c0_i32_1 : i32, i32, i32
  }
  func.func @transform_6(%arg0: i32) -> (i32, i32, i32) {
    %c0_i32 = arith.constant 0 : i32
    %c0_i32_0 = arith.constant 0 : i32
    %c0_i32_1 = arith.constant 0 : i32
    %c0_i32_2 = arith.constant 0 : i32
    return %c0_i32, %c0_i32_0, %c0_i32_1 : i32, i32, i32
  }
  func.func @transform_7(%arg0: i32) -> (i32, i32, i32) {
    %c0_i32 = arith.constant 0 : i32
    %c0_i32_0 = arith.constant 0 : i32
    %c0_i32_1 = arith.constant 0 : i32
    %c0_i32_2 = arith.constant 0 : i32
    return %c0_i32, %c0_i32_0, %c0_i32_1 : i32, i32, i32
  }
  func.func @transform_8(%arg0: i32) -> (i32, i32, i32) {
    %c0_i32 = arith.constant 0 : i32
    %c0_i32_0 = arith.constant 0 : i32
    %c0_i32_1 = arith.constant 0 : i32
    %c0_i32_2 = arith.constant 0 : i32
    return %c0_i32, %c0_i32_0, %c0_i32_1 : i32, i32, i32
  }
  func.func @transform_9(%arg0: i32) -> (i32, i32, i32) {
    %c0_i32 = arith.constant 0 : i32
    %c0_i32_0 = arith.constant 0 : i32
    %c0_i32_1 = arith.constant 0 : i32
    %c0_i32_2 = arith.constant 0 : i32
    return %c0_i32, %c0_i32_0, %c0_i32_1 : i32, i32, i32
  }
  func.func @transform_10(%arg0: i32) -> (i32, i32, i32) {
    %c0_i32 = arith.constant 0 : i32
    %c0_i32_0 = arith.constant 0 : i32
    %c0_i32_1 = arith.constant 0 : i32
    %c0_i32_2 = arith.constant 0 : i32
    return %c0_i32, %c0_i32_0, %c0_i32_1 : i32, i32, i32
  }
  func.func @transform_11(%arg0: i32) -> (i32, i32, i32) {
    %c0_i32 = arith.constant 0 : i32
    %c0_i32_0 = arith.constant 0 : i32
    %c0_i32_1 = arith.constant 0 : i32
    %c0_i32_2 = arith.constant 0 : i32
    return %c0_i32, %c0_i32_0, %c0_i32_1 : i32, i32, i32
  }
  func.func @transform_12(%arg0: i32) -> (i32, i32) {
    %c0_i32 = arith.constant 0 : i32
    %c0_i32_0 = arith.constant 0 : i32
    %c0_i32_1 = arith.constant 0 : i32
    return %c0_i32, %c0_i32_0 : i32, i32
  }
  func.func @transform_13(%arg0: i32) -> (i32, i32) {
    %c0_i32 = arith.constant 0 : i32
    %c0_i32_0 = arith.constant 0 : i32
    %c0_i32_1 = arith.constant 0 : i32
    return %c0_i32, %c0_i32_0 : i32, i32
  }
  func.func @transform_14(%arg0: i32) -> (i32, i32) {
    %c0_i32 = arith.constant 0 : i32
    %c0_i32_0 = arith.constant 0 : i32
    %c0_i32_1 = arith.constant 0 : i32
    return %c0_i32, %c0_i32_0 : i32, i32
  }
  func.func @transform_15(%arg0: i32) -> (i32, i32) {
    %c0_i32 = arith.constant 0 : i32
    %c0_i32_0 = arith.constant 0 : i32
    %c0_i32_1 = arith.constant 0 : i32
    return %c0_i32, %c0_i32_0 : i32, i32
  }
  func.func @transform_16(%arg0: i32) -> (i32, i32) {
    %c0_i32 = arith.constant 0 : i32
    %c0_i32_0 = arith.constant 0 : i32
    %c0_i32_1 = arith.constant 0 : i32
    return %c0_i32, %c0_i32_0 : i32, i32
  }
  func.func @transform_17(%arg0: i32) -> (i32, i32) {
    %c0_i32 = arith.constant 0 : i32
    %c0_i32_0 = arith.constant 0 : i32
    %c0_i32_1 = arith.constant 0 : i32
    return %c0_i32, %c0_i32_0 : i32, i32
  }
  func.func @transform_18(%arg0: i32) -> (i32, i32) {
    %c0_i32 = arith.constant 0 : i32
    %c0_i32_0 = arith.constant 0 : i32
    %c0_i32_1 = arith.constant 0 : i32
    return %c0_i32, %c0_i32_0 : i32, i32
  }
  func.func @transform_19(%arg0: i32) -> (i32, i32, i32) {
    %c0_i32 = arith.constant 0 : i32
    %c0_i32_0 = arith.constant 0 : i32
    %c0_i32_1 = arith.constant 0 : i32
    return %arg0, %c0_i32, %c0_i32_0 : i32, i32, i32
  }
}

module attributes {stable_mosaic.version = 11 : i64} {
  func.func @_rel_encoder_layer_kernel(%arg0: i32, %arg1: memref<1x8x32xf32, #tpu.memory_space<vmem>>, %arg2: memref<1x32xf32, #tpu.memory_space<vmem>>, %arg3: memref<1x32xf32, #tpu.memory_space<vmem>>, %arg4: memref<4x32x8xbf16, #tpu.memory_space<vmem>>, %arg5: memref<4x1x8xf32, #tpu.memory_space<vmem>>, %arg6: memref<4x1x8xf32, #tpu.memory_space<vmem>>, %arg7: memref<4x32x8xbf16, #tpu.memory_space<vmem>>, %arg8: memref<4x1x8xf32, #tpu.memory_space<vmem>>, %arg9: memref<4x32x8xbf16, #tpu.memory_space<vmem>>, %arg10: memref<4x1x8xf32, #tpu.memory_space<vmem>>, %arg11: memref<4x16x8xbf16, #tpu.memory_space<vmem>>, %arg12: memref<4x8x32xbf16, #tpu.memory_space<vmem>>, %arg13: memref<1x32xf32, #tpu.memory_space<vmem>>, %arg14: memref<1x32xf32, #tpu.memory_space<vmem>>, %arg15: memref<1x32xf32, #tpu.memory_space<vmem>>, %arg16: memref<32x64xbf16, #tpu.memory_space<vmem>>, %arg17: memref<1x64xf32, #tpu.memory_space<vmem>>, %arg18: memref<64x32xbf16, #tpu.memory_space<vmem>>, %arg19: memref<1x32xf32, #tpu.memory_space<vmem>>, %arg20: memref<1x8x32xf32, #tpu.memory_space<vmem>>) attributes {dimension_semantics = [#tpu.dimension_semantics<parallel>], iteration_bounds = array<i64: 2>, scalar_prefetch = 0 : i64, scratch_operands = 0 : i64, tpu.core_type = #tpu.core_type<tc>, window_params = [{transform_indices = @transform_0, window_bounds = array<i64: 1, 8, 32>}, {pipeline_mode = #tpu.pipeline_mode<synchronous>, transform_indices = @transform_1, window_bounds = array<i64: 1, 32>}, {pipeline_mode = #tpu.pipeline_mode<synchronous>, transform_indices = @transform_2, window_bounds = array<i64: 1, 32>}, {pipeline_mode = #tpu.pipeline_mode<synchronous>, transform_indices = @transform_3, window_bounds = array<i64: 4, 32, 8>}, {pipeline_mode = #tpu.pipeline_mode<synchronous>, transform_indices = @transform_4, window_bounds = array<i64: 4, 1, 8>}, {pipeline_mode = #tpu.pipeline_mode<synchronous>, transform_indices = @transform_5, window_bounds = array<i64: 4, 1, 8>}, {pipeline_mode = #tpu.pipeline_mode<synchronous>, transform_indices = @transform_6, window_bounds = array<i64: 4, 32, 8>}, {pipeline_mode = #tpu.pipeline_mode<synchronous>, transform_indices = @transform_7, window_bounds = array<i64: 4, 1, 8>}, {pipeline_mode = #tpu.pipeline_mode<synchronous>, transform_indices = @transform_8, window_bounds = array<i64: 4, 32, 8>}, {pipeline_mode = #tpu.pipeline_mode<synchronous>, transform_indices = @transform_9, window_bounds = array<i64: 4, 1, 8>}, {pipeline_mode = #tpu.pipeline_mode<synchronous>, transform_indices = @transform_10, window_bounds = array<i64: 4, 16, 8>}, {pipeline_mode = #tpu.pipeline_mode<synchronous>, transform_indices = @transform_11, window_bounds = array<i64: 4, 8, 32>}, {pipeline_mode = #tpu.pipeline_mode<synchronous>, transform_indices = @transform_12, window_bounds = array<i64: 1, 32>}, {pipeline_mode = #tpu.pipeline_mode<synchronous>, transform_indices = @transform_13, window_bounds = array<i64: 1, 32>}, {pipeline_mode = #tpu.pipeline_mode<synchronous>, transform_indices = @transform_14, window_bounds = array<i64: 1, 32>}, {pipeline_mode = #tpu.pipeline_mode<synchronous>, transform_indices = @transform_15, window_bounds = array<i64: 32, 64>}, {pipeline_mode = #tpu.pipeline_mode<synchronous>, transform_indices = @transform_16, window_bounds = array<i64: 1, 64>}, {pipeline_mode = #tpu.pipeline_mode<synchronous>, transform_indices = @transform_17, window_bounds = array<i64: 64, 32>}, {pipeline_mode = #tpu.pipeline_mode<synchronous>, transform_indices = @transform_18, window_bounds = array<i64: 1, 32>}, {transform_indices = @transform_19, window_bounds = array<i64: 1, 8, 32>}]} {
    %c0 = arith.constant 0 : index
    %c0_0 = arith.constant 0 : index
    %c0_1 = arith.constant 0 : index
    %0 = vector.load %arg1[%c0, %c0_0, %c0_1] : memref<1x8x32xf32, #tpu.memory_space<vmem>>, vector<1x8x32xf32>
    %1 = vector.shape_cast %0 : vector<1x8x32xf32> to vector<8x32xf32>
    %c0_2 = arith.constant 0 : index
    %c0_3 = arith.constant 0 : index
    %2 = vector.load %arg2[%c0_2, %c0_3] : memref<1x32xf32, #tpu.memory_space<vmem>>, vector<1x32xf32>
    %c0_4 = arith.constant 0 : index
    %c0_5 = arith.constant 0 : index
    %3 = vector.load %arg3[%c0_4, %c0_5] : memref<1x32xf32, #tpu.memory_space<vmem>>, vector<1x32xf32>
    %cst = arith.constant dense<0.000000e+00> : vector<8xf32>
    %4 = vector.multi_reduction <add>, %1, %cst [1] : vector<8x32xf32> to vector<8xf32>
    %5 = vector.shape_cast %4 : vector<8xf32> to vector<8x1xf32>
    %cst_6 = arith.constant 3.200000e+01 : f32
    %6 = vector.broadcast %cst_6 : f32 to vector<8x1xf32>
    %7 = arith.divf %5, %6 : vector<8x1xf32>
    %8 = vector.broadcast %7 : vector<8x1xf32> to vector<8x32xf32>
    %9 = arith.subf %1, %8 : vector<8x32xf32>
    %10 = arith.mulf %9, %9 : vector<8x32xf32>
    %cst_7 = arith.constant dense<0.000000e+00> : vector<8xf32>
    %11 = vector.multi_reduction <add>, %10, %cst_7 [1] : vector<8x32xf32> to vector<8xf32>
    %12 = vector.shape_cast %11 : vector<8xf32> to vector<8x1xf32>
    %cst_8 = arith.constant 3.200000e+01 : f32
    %13 = vector.broadcast %cst_8 : f32 to vector<8x1xf32>
    %14 = arith.divf %12, %13 : vector<8x1xf32>
    %15 = vector.broadcast %7 : vector<8x1xf32> to vector<8x32xf32>
    %16 = arith.subf %1, %15 : vector<8x32xf32>
    %cst_9 = arith.constant 9.99999996E-13 : f32
    %17 = vector.broadcast %cst_9 : f32 to vector<8x1xf32>
    %18 = arith.addf %14, %17 : vector<8x1xf32>
    %19 = math.rsqrt %18 : vector<8x1xf32>
    %20 = vector.broadcast %19 : vector<8x1xf32> to vector<8x32xf32>
    %21 = arith.mulf %16, %20 : vector<8x32xf32>
    %22 = vector.broadcast %2 : vector<1x32xf32> to vector<8x32xf32>
    %23 = arith.mulf %21, %22 : vector<8x32xf32>
    %24 = vector.broadcast %3 : vector<1x32xf32> to vector<8x32xf32>
    %25 = arith.addf %23, %24 : vector<8x32xf32>
    %26 = arith.truncf %25 : vector<8x32xf32> to vector<8x32xbf16>
    %27 = vector.shape_cast %26 : vector<8x32xbf16> to vector<1x8x32xbf16>
    %28 = vector.shape_cast %27 : vector<1x8x32xbf16> to vector<1x8x32xbf16>
    %29 = vector.broadcast %28 : vector<1x8x32xbf16> to vector<4x8x32xbf16>
    %c0_10 = arith.constant 0 : index
    %c0_11 = arith.constant 0 : index
    %c0_12 = arith.constant 0 : index
    %30 = vector.load %arg4[%c0_10, %c0_11, %c0_12] : memref<4x32x8xbf16, #tpu.memory_space<vmem>>, vector<4x32x8xbf16>
    "tpu.trace_start"() <{level = 10 : i32, message = "htd,hdk->htk"}> : () -> ()
    %cst_13 = arith.constant dense<0.000000e+00> : vector<4x8x8xf32>
    %31 = tpu.matmul %29, %30, %cst_13 {dimension_numbers = #tpu.dot_dimension_numbers<[2], [1], [1], [2], [0, 0, 0, 1, 1, 2], [0], [0]>} : vector<4x8x32xbf16>, vector<4x32x8xbf16>, vector<4x8x8xf32> -> vector<4x8x8xf32>
    "tpu.trace_stop"() : () -> ()
    %c0_14 = arith.constant 0 : index
    %c0_15 = arith.constant 0 : index
    %c0_16 = arith.constant 0 : index
    %32 = vector.load %arg7[%c0_14, %c0_15, %c0_16] : memref<4x32x8xbf16, #tpu.memory_space<vmem>>, vector<4x32x8xbf16>
    "tpu.trace_start"() <{level = 10 : i32, message = "htd,hdk->htk"}> : () -> ()
    %cst_17 = arith.constant dense<0.000000e+00> : vector<4x8x8xf32>
    %33 = tpu.matmul %29, %32, %cst_17 {dimension_numbers = #tpu.dot_dimension_numbers<[2], [1], [1], [2], [0, 0, 0, 1, 1, 2], [0], [0]>} : vector<4x8x32xbf16>, vector<4x32x8xbf16>, vector<4x8x8xf32> -> vector<4x8x8xf32>
    "tpu.trace_stop"() : () -> ()
    %c0_18 = arith.constant 0 : index
    %c0_19 = arith.constant 0 : index
    %c0_20 = arith.constant 0 : index
    %34 = vector.load %arg8[%c0_18, %c0_19, %c0_20] : memref<4x1x8xf32, #tpu.memory_space<vmem>>, vector<4x1x8xf32>
    %35 = vector.broadcast %34 : vector<4x1x8xf32> to vector<4x8x8xf32>
    %36 = arith.addf %33, %35 : vector<4x8x8xf32>
    %c0_21 = arith.constant 0 : index
    %c0_22 = arith.constant 0 : index
    %c0_23 = arith.constant 0 : index
    %37 = vector.load %arg9[%c0_21, %c0_22, %c0_23] : memref<4x32x8xbf16, #tpu.memory_space<vmem>>, vector<4x32x8xbf16>
    "tpu.trace_start"() <{level = 10 : i32, message = "htd,hdk->htk"}> : () -> ()
    %cst_24 = arith.constant dense<0.000000e+00> : vector<4x8x8xf32>
    %38 = tpu.matmul %29, %37, %cst_24 {dimension_numbers = #tpu.dot_dimension_numbers<[2], [1], [1], [2], [0, 0, 0, 1, 1, 2], [0], [0]>} : vector<4x8x32xbf16>, vector<4x32x8xbf16>, vector<4x8x8xf32> -> vector<4x8x8xf32>
    "tpu.trace_stop"() : () -> ()
    %c0_25 = arith.constant 0 : index
    %c0_26 = arith.constant 0 : index
    %c0_27 = arith.constant 0 : index
    %39 = vector.load %arg10[%c0_25, %c0_26, %c0_27] : memref<4x1x8xf32, #tpu.memory_space<vmem>>, vector<4x1x8xf32>
    %40 = vector.broadcast %39 : vector<4x1x8xf32> to vector<4x8x8xf32>
    %41 = arith.addf %38, %40 : vector<4x8x8xf32>
    %c0_28 = arith.constant 0 : index
    %c0_29 = arith.constant 0 : index
    %c0_30 = arith.constant 0 : index
    %42 = vector.load %arg5[%c0_28, %c0_29, %c0_30] : memref<4x1x8xf32, #tpu.memory_space<vmem>>, vector<4x1x8xf32>
    %43 = vector.broadcast %42 : vector<4x1x8xf32> to vector<4x8x8xf32>
    %44 = arith.addf %31, %43 : vector<4x8x8xf32>
    %45 = arith.truncf %44 : vector<4x8x8xf32> to vector<4x8x8xbf16>
    %c0_31 = arith.constant 0 : index
    %c0_32 = arith.constant 0 : index
    %c0_33 = arith.constant 0 : index
    %46 = vector.load %arg6[%c0_31, %c0_32, %c0_33] : memref<4x1x8xf32, #tpu.memory_space<vmem>>, vector<4x1x8xf32>
    %47 = vector.broadcast %46 : vector<4x1x8xf32> to vector<4x8x8xf32>
    %48 = arith.addf %31, %47 : vector<4x8x8xf32>
    %49 = arith.truncf %48 : vector<4x8x8xf32> to vector<4x8x8xbf16>
    %50 = arith.truncf %36 : vector<4x8x8xf32> to vector<4x8x8xbf16>
    %51 = arith.truncf %41 : vector<4x8x8xf32> to vector<4x8x8xbf16>
    "tpu.trace_start"() <{level = 10 : i32, message = "htd,hsd->hts"}> : () -> ()
    %cst_34 = arith.constant dense<0.000000e+00> : vector<4x8x8xf32>
    %52 = tpu.matmul %45, %50, %cst_34 {dimension_numbers = #tpu.dot_dimension_numbers<[2], [2], [1], [1], [0, 0, 0, 1, 1, 1], [0], [0]>} : vector<4x8x8xbf16>, vector<4x8x8xbf16>, vector<4x8x8xf32> -> vector<4x8x8xf32>
    "tpu.trace_stop"() : () -> ()
    %c0_35 = arith.constant 0 : index
    %c0_36 = arith.constant 0 : index
    %c0_37 = arith.constant 0 : index
    %53 = vector.load %arg11[%c0_35, %c0_36, %c0_37] : memref<4x16x8xbf16, #tpu.memory_space<vmem>>, vector<4x16x8xbf16>
    "tpu.trace_start"() <{level = 10 : i32, message = "htd,hpd->htp"}> : () -> ()
    %cst_38 = arith.constant dense<0.000000e+00> : vector<4x8x16xf32>
    %54 = tpu.matmul %49, %53, %cst_38 {dimension_numbers = #tpu.dot_dimension_numbers<[2], [2], [1], [1], [0, 0, 0, 1, 1, 1], [0], [0]>} : vector<4x8x8xbf16>, vector<4x16x8xbf16>, vector<4x8x16xf32> -> vector<4x8x16xf32>
    "tpu.trace_stop"() : () -> ()
    %55 = vector.extract_strided_slice %54 {offsets = [0, 0, 7], sizes = [4, 1, 8], strides = [1, 1, 1]} : vector<4x8x16xf32> to vector<4x1x8xf32>
    %56 = vector.extract_strided_slice %54 {offsets = [0, 1, 6], sizes = [4, 1, 8], strides = [1, 1, 1]} : vector<4x8x16xf32> to vector<4x1x8xf32>
    %57 = vector.extract_strided_slice %54 {offsets = [0, 2, 5], sizes = [4, 1, 8], strides = [1, 1, 1]} : vector<4x8x16xf32> to vector<4x1x8xf32>
    %58 = vector.extract_strided_slice %54 {offsets = [0, 3, 4], sizes = [4, 1, 8], strides = [1, 1, 1]} : vector<4x8x16xf32> to vector<4x1x8xf32>
    %59 = vector.extract_strided_slice %54 {offsets = [0, 4, 3], sizes = [4, 1, 8], strides = [1, 1, 1]} : vector<4x8x16xf32> to vector<4x1x8xf32>
    %60 = vector.extract_strided_slice %54 {offsets = [0, 5, 2], sizes = [4, 1, 8], strides = [1, 1, 1]} : vector<4x8x16xf32> to vector<4x1x8xf32>
    %61 = vector.extract_strided_slice %54 {offsets = [0, 6, 1], sizes = [4, 1, 8], strides = [1, 1, 1]} : vector<4x8x16xf32> to vector<4x1x8xf32>
    %62 = vector.extract_strided_slice %54 {offsets = [0, 7, 0], sizes = [4, 1, 8], strides = [1, 1, 1]} : vector<4x8x16xf32> to vector<4x1x8xf32>
    %63 = tpu.concatenate %55, %56, %57, %58, %59, %60, %61, %62 in 1 : vector<4x1x8xf32>, vector<4x1x8xf32>, vector<4x1x8xf32>, vector<4x1x8xf32>, vector<4x1x8xf32>, vector<4x1x8xf32>, vector<4x1x8xf32>, vector<4x1x8xf32> -> vector<4x8x8xf32>
    %64 = arith.addf %52, %63 : vector<4x8x8xf32>
    %cst_39 = arith.constant dense<0xFF800000> : vector<4x8xf32>
    %65 = vector.multi_reduction <maximumf>, %64, %cst_39 [2] : vector<4x8x8xf32> to vector<4x8xf32>
    %66 = vector.shape_cast %65 : vector<4x8xf32> to vector<4x8x1xf32>
    %67 = vector.broadcast %66 : vector<4x8x1xf32> to vector<4x8x8xf32>
    %68 = arith.subf %64, %67 : vector<4x8x8xf32>
    %69 = math.exp %68 : vector<4x8x8xf32>
    %cst_40 = arith.constant dense<0.000000e+00> : vector<4x8xf32>
    %70 = vector.multi_reduction <add>, %69, %cst_40 [2] : vector<4x8x8xf32> to vector<4x8xf32>
    %71 = vector.shape_cast %70 : vector<4x8xf32> to vector<4x8x1xf32>
    %72 = tpu.reciprocal %71 {approx = true} : vector<4x8x1xf32> -> vector<4x8x1xf32>
    %73 = vector.broadcast %72 : vector<4x8x1xf32> to vector<4x8x8xf32>
    %74 = arith.mulf %69, %73 : vector<4x8x8xf32>
    %75 = arith.truncf %74 : vector<4x8x8xf32> to vector<4x8x8xbf16>
    "tpu.trace_start"() <{level = 10 : i32, message = "hts,hsd->htd"}> : () -> ()
    %cst_41 = arith.constant dense<0.000000e+00> : vector<4x8x8xf32>
    %76 = tpu.matmul %75, %51, %cst_41 {dimension_numbers = #tpu.dot_dimension_numbers<[2], [1], [1], [2], [0, 0, 0, 1, 1, 2], [0], [0]>} : vector<4x8x8xbf16>, vector<4x8x8xbf16>, vector<4x8x8xf32> -> vector<4x8x8xf32>
    "tpu.trace_stop"() : () -> ()
    %77 = arith.truncf %76 : vector<4x8x8xf32> to vector<4x8x8xbf16>
    %c0_42 = arith.constant 0 : index
    %c0_43 = arith.constant 0 : index
    %c0_44 = arith.constant 0 : index
    %78 = vector.load %arg12[%c0_42, %c0_43, %c0_44] : memref<4x8x32xbf16, #tpu.memory_space<vmem>>, vector<4x8x32xbf16>
    "tpu.trace_start"() <{level = 10 : i32, message = "htd,hde->hte"}> : () -> ()
    %cst_45 = arith.constant dense<0.000000e+00> : vector<4x8x32xf32>
    %79 = tpu.matmul %77, %78, %cst_45 {dimension_numbers = #tpu.dot_dimension_numbers<[2], [1], [1], [2], [0, 0, 0, 1, 1, 2], [0], [0]>} : vector<4x8x8xbf16>, vector<4x8x32xbf16>, vector<4x8x32xf32> -> vector<4x8x32xf32>
    "tpu.trace_stop"() : () -> ()
    %cst_46 = arith.constant dense<0.000000e+00> : vector<8x32xf32>
    %80 = vector.multi_reduction <add>, %79, %cst_46 [0] : vector<4x8x32xf32> to vector<8x32xf32>
    %81 = arith.addf %1, %80 : vector<8x32xf32>
    %c0_47 = arith.constant 0 : index
    %c0_48 = arith.constant 0 : index
    %82 = vector.load %arg13[%c0_47, %c0_48] : memref<1x32xf32, #tpu.memory_space<vmem>>, vector<1x32xf32>
    %83 = vector.broadcast %82 : vector<1x32xf32> to vector<8x32xf32>
    %84 = arith.addf %81, %83 : vector<8x32xf32>
    %c0_49 = arith.constant 0 : index
    %c0_50 = arith.constant 0 : index
    %85 = vector.load %arg14[%c0_49, %c0_50] : memref<1x32xf32, #tpu.memory_space<vmem>>, vector<1x32xf32>
    %c0_51 = arith.constant 0 : index
    %c0_52 = arith.constant 0 : index
    %86 = vector.load %arg15[%c0_51, %c0_52] : memref<1x32xf32, #tpu.memory_space<vmem>>, vector<1x32xf32>
    %cst_53 = arith.constant dense<0.000000e+00> : vector<8xf32>
    %87 = vector.multi_reduction <add>, %84, %cst_53 [1] : vector<8x32xf32> to vector<8xf32>
    %88 = vector.shape_cast %87 : vector<8xf32> to vector<8x1xf32>
    %cst_54 = arith.constant 3.200000e+01 : f32
    %89 = vector.broadcast %cst_54 : f32 to vector<8x1xf32>
    %90 = arith.divf %88, %89 : vector<8x1xf32>
    %91 = vector.broadcast %90 : vector<8x1xf32> to vector<8x32xf32>
    %92 = arith.subf %84, %91 : vector<8x32xf32>
    %93 = arith.mulf %92, %92 : vector<8x32xf32>
    %cst_55 = arith.constant dense<0.000000e+00> : vector<8xf32>
    %94 = vector.multi_reduction <add>, %93, %cst_55 [1] : vector<8x32xf32> to vector<8xf32>
    %95 = vector.shape_cast %94 : vector<8xf32> to vector<8x1xf32>
    %cst_56 = arith.constant 3.200000e+01 : f32
    %96 = vector.broadcast %cst_56 : f32 to vector<8x1xf32>
    %97 = arith.divf %95, %96 : vector<8x1xf32>
    %98 = vector.broadcast %90 : vector<8x1xf32> to vector<8x32xf32>
    %99 = arith.subf %84, %98 : vector<8x32xf32>
    %cst_57 = arith.constant 9.99999996E-13 : f32
    %100 = vector.broadcast %cst_57 : f32 to vector<8x1xf32>
    %101 = arith.addf %97, %100 : vector<8x1xf32>
    %102 = math.rsqrt %101 : vector<8x1xf32>
    %103 = vector.broadcast %102 : vector<8x1xf32> to vector<8x32xf32>
    %104 = arith.mulf %99, %103 : vector<8x32xf32>
    %105 = vector.broadcast %85 : vector<1x32xf32> to vector<8x32xf32>
    %106 = arith.mulf %104, %105 : vector<8x32xf32>
    %107 = vector.broadcast %86 : vector<1x32xf32> to vector<8x32xf32>
    %108 = arith.addf %106, %107 : vector<8x32xf32>
    %109 = arith.truncf %108 : vector<8x32xf32> to vector<8x32xbf16>
    %c0_58 = arith.constant 0 : index
    %c0_59 = arith.constant 0 : index
    %110 = vector.load %arg16[%c0_58, %c0_59] : memref<32x64xbf16, #tpu.memory_space<vmem>>, vector<32x64xbf16>
    %cst_60 = arith.constant dense<0.000000e+00> : vector<8x64xf32>
    %111 = tpu.matmul %109, %110, %cst_60 {dimension_numbers = #tpu.dot_dimension_numbers<[1], [0], [0], [1], [0, 0, 1, 1], [], []>} : vector<8x32xbf16>, vector<32x64xbf16>, vector<8x64xf32> -> vector<8x64xf32>
    %c0_61 = arith.constant 0 : index
    %c0_62 = arith.constant 0 : index
    %112 = vector.load %arg17[%c0_61, %c0_62] : memref<1x64xf32, #tpu.memory_space<vmem>>, vector<1x64xf32>
    %113 = vector.broadcast %112 : vector<1x64xf32> to vector<8x64xf32>
    %114 = arith.addf %111, %113 : vector<8x64xf32>
    %cst_63 = arith.constant 0.000000e+00 : f32
    %115 = vector.broadcast %cst_63 : f32 to vector<8x64xf32>
    %116 = arith.maximumf %114, %115 : vector<8x64xf32>
    %117 = arith.truncf %116 : vector<8x64xf32> to vector<8x64xbf16>
    %c0_64 = arith.constant 0 : index
    %c0_65 = arith.constant 0 : index
    %118 = vector.load %arg18[%c0_64, %c0_65] : memref<64x32xbf16, #tpu.memory_space<vmem>>, vector<64x32xbf16>
    %cst_66 = arith.constant dense<0.000000e+00> : vector<8x32xf32>
    %119 = tpu.matmul %117, %118, %cst_66 {dimension_numbers = #tpu.dot_dimension_numbers<[1], [0], [0], [1], [0, 0, 1, 1], [], []>} : vector<8x64xbf16>, vector<64x32xbf16>, vector<8x32xf32> -> vector<8x32xf32>
    %c0_67 = arith.constant 0 : index
    %c0_68 = arith.constant 0 : index
    %120 = vector.load %arg19[%c0_67, %c0_68] : memref<1x32xf32, #tpu.memory_space<vmem>>, vector<1x32xf32>
    %121 = vector.broadcast %120 : vector<1x32xf32> to vector<8x32xf32>
    %122 = arith.addf %119, %121 : vector<8x32xf32>
    %123 = arith.addf %84, %122 : vector<8x32xf32>
    %c0_69 = arith.constant 0 : index
    %c0_70 = arith.constant 0 : index
    %c0_71 = arith.constant 0 : index
    %124 = vector.load %arg20[%c0_69, %c0_70, %c0_71] : memref<1x8x32xf32, #tpu.memory_space<vmem>>, vector<1x8x32xf32>
    %125 = vector.shape_cast %124 : vector<1x8x32xf32> to vector<8x32xf32>
    %126 = vector.shape_cast %123 : vector<8x32xf32> to vector<1x8x32xf32>
    tpu.vector_store %arg20[%c0_69, %c0_70, %c0_71], %126 {strides = array<i32>} : memref<1x8x32xf32, #tpu.memory_space<vmem>>, vector<1x8x32xf32>,
    return
  }
  func.func @transform_0(%arg0: i32) -> (i32, i32, i32) {
    %c0_i32 = arith.constant 0 : i32
    %c0_i32_0 = arith.constant 0 : i32
    %c0_i32_1 = arith.constant 0 : i32
    return %arg0, %c0_i32, %c0_i32_0 : i32, i32, i32
  }
  func.func @transform_1(%arg0: i32) -> (i32, i32) {
    %c0_i32 = arith.constant 0 : i32
    %c0_i32_0 = arith.constant 0 : i32
    %c0_i32_1 = arith.constant 0 : i32
    return %c0_i32, %c0_i32_0 : i32, i32
  }
  func.func @transform_2(%arg0: i32) -> (i32, i32) {
    %c0_i32 = arith.constant 0 : i32
    %c0_i32_0 = arith.constant 0 : i32
    %c0_i32_1 = arith.constant 0 : i32
    return %c0_i32, %c0_i32_0 : i32, i32
  }
  func.func @transform_3(%arg0: i32) -> (i32, i32, i32) {
    %c0_i32 = arith.constant 0 : i32
    %c0_i32_0 = arith.constant 0 : i32
    %c0_i32_1 = arith.constant 0 : i32
    %c0_i32_2 = arith.constant 0 : i32
    return %c0_i32, %c0_i32_0, %c0_i32_1 : i32, i32, i32
  }
  func.func @transform_4(%arg0: i32) -> (i32, i32, i32) {
    %c0_i32 = arith.constant 0 : i32
    %c0_i32_0 = arith.constant 0 : i32
    %c0_i32_1 = arith.constant 0 : i32
    %c0_i32_2 = arith.constant 0 : i32
    return %c0_i32, %c0_i32_0, %c0_i32_1 : i32, i32, i32
  }
  func.func @transform_5(%arg0: i32) -> (i32, i32, i32) {
    %c0_i32 = arith.constant 0 : i32
    %c0_i32_0 = arith.constant 0 : i32
    %c0_i32_1 = arith.constant 0 : i32
    %c0_i32_2 = arith.constant 0 : i32
    return %c0_i32, %c0_i32_0, %c0_i32_1 : i32, i32, i32
  }
  func.func @transform_6(%arg0: i32) -> (i32, i32, i32) {
    %c0_i32 = arith.constant 0 : i32
    %c0_i32_0 = arith.constant 0 : i32
    %c0_i32_1 = arith.constant 0 : i32
    %c0_i32_2 = arith.constant 0 : i32
    return %c0_i32, %c0_i32_0, %c0_i32_1 : i32, i32, i32
  }
  func.func @transform_7(%arg0: i32) -> (i32, i32, i32) {
    %c0_i32 = arith.constant 0 : i32
    %c0_i32_0 = arith.constant 0 : i32
    %c0_i32_1 = arith.constant 0 : i32
    %c0_i32_2 = arith.constant 0 : i32
    return %c0_i32, %c0_i32_0, %c0_i32_1 : i32, i32, i32
  }
  func.func @transform_8(%arg0: i32) -> (i32, i32, i32) {
    %c0_i32 = arith.constant 0 : i32
    %c0_i32_0 = arith.constant 0 : i32
    %c0_i32_1 = arith.constant 0 : i32
    %c0_i32_2 = arith.constant 0 : i32
    return %c0_i32, %c0_i32_0, %c0_i32_1 : i32, i32, i32
  }
  func.func @transform_9(%arg0: i32) -> (i32, i32, i32) {
    %c0_i32 = arith.constant 0 : i32
    %c0_i32_0 = arith.constant 0 : i32
    %c0_i32_1 = arith.constant 0 : i32
    %c0_i32_2 = arith.constant 0 : i32
    return %c0_i32, %c0_i32_0, %c0_i32_1 : i32, i32, i32
  }
  func.func @transform_10(%arg0: i32) -> (i32, i32, i32) {
    %c0_i32 = arith.constant 0 : i32
    %c0_i32_0 = arith.constant 0 : i32
    %c0_i32_1 = arith.constant 0 : i32
    %c0_i32_2 = arith.constant 0 : i32
    return %c0_i32, %c0_i32_0, %c0_i32_1 : i32, i32, i32
  }
  func.func @transform_11(%arg0: i32) -> (i32, i32, i32) {
    %c0_i32 = arith.constant 0 : i32
    %c0_i32_0 = arith.constant 0 : i32
    %c0_i32_1 = arith.constant 0 : i32
    %c0_i32_2 = arith.constant 0 : i32
    return %c0_i32, %c0_i32_0, %c0_i32_1 : i32, i32, i32
  }
  func.func @transform_12(%arg0: i32) -> (i32, i32) {
    %c0_i32 = arith.constant 0 : i32
    %c0_i32_0 = arith.constant 0 : i32
    %c0_i32_1 = arith.constant 0 : i32
    return %c0_i32, %c0_i32_0 : i32, i32
  }
  func.func @transform_13(%arg0: i32) -> (i32, i32) {
    %c0_i32 = arith.constant 0 : i32
    %c0_i32_0 = arith.constant 0 : i32
    %c0_i32_1 = arith.constant 0 : i32
    return %c0_i32, %c0_i32_0 : i32, i32
  }
  func.func @transform_14(%arg0: i32) -> (i32, i32) {
    %c0_i32 = arith.constant 0 : i32
    %c0_i32_0 = arith.constant 0 : i32
    %c0_i32_1 = arith.constant 0 : i32
    return %c0_i32, %c0_i32_0 : i32, i32
  }
  func.func @transform_15(%arg0: i32) -> (i32, i32) {
    %c0_i32 = arith.constant 0 : i32
    %c0_i32_0 = arith.constant 0 : i32
    %c0_i32_1 = arith.constant 0 : i32
    return %c0_i32, %c0_i32_0 : i32, i32
  }
  func.func @transform_16(%arg0: i32) -> (i32, i32) {
    %c0_i32 = arith.constant 0 : i32
    %c0_i32_0 = arith.constant 0 : i32
    %c0_i32_1 = arith.constant 0 : i32
    return %c0_i32, %c0_i32_0 : i32, i32
  }
  func.func @transform_17(%arg0: i32) -> (i32, i32) {
    %c0_i32 = arith.constant 0 : i32
    %c0_i32_0 = arith.constant 0 : i32
    %c0_i32_1 = arith.constant 0 : i32
    return %c0_i32, %c0_i32_0 : i32, i32
  }
  func.func @transform_18(%arg0: i32) -> (i32, i32) {
    %c0_i32 = arith.constant 0 : i32
    %c0_i32_0 = arith.constant 0 : i32
    %c0_i32_1 = arith.constant 0 : i32
    return %c0_i32, %c0_i32_0 : i32, i32
  }
  func.func @transform_19(%arg0: i32) -> (i32, i32, i32) {
    %c0_i32 = arith.constant 0 : i32
    %c0_i32_0 = arith.constant 0 : i32
    %c0_i32_1 = arith.constant 0 : i32
    return %arg0, %c0_i32, %c0_i32_0 : i32, i32, i32
  }
}

</mosaic_0001>

<bundles_post_ra>
// kernel: tpu_custom_call.1
= control target key start
LH: loop header
LB: loop body
LE: loop exit
PB: predicated region body
PF: predicated region fallthrough
CT: control target
= control target key end

     0   :  { %s3953_s0 = inlined_call_operand.vmem [shape: f32[2,8,32], index: 0, kind: input, shape index: {}]   ;;  %s3954_s1 = inlined_call_operand.vmem [shape: f32[1,32], index: 1, kind: input, shape index: {}]   ;;  %s3955_s2 = inlined_call_operand.vmem [shape: f32[1,32], index: 2, kind: input, shape index: {}]   ;;  %s3956_s3 = inlined_call_operand.vmem [shape: bf16[4,32,8], index: 3, kind: input, shape index: {}]   ;;  %s3957_s4 = inlined_call_operand.vmem [shape: f32[4,1,8], index: 4, kind: input, shape index: {}]   ;;  %s3958_s5 = inlined_call_operand.vmem [shape: f32[4,1,8], index: 5, kind: input, shape index: {}]   ;;  %s3959_s6 = inlined_call_operand.vmem [shape: bf16[4,32,8], index: 6, kind: input, shape index: {}]   ;;  %s3960_s7 = inlined_call_operand.vmem [shape: f32[4,1,8], index: 7, kind: input, shape index: {}]   ;;  %s3961_s8 = inlined_call_operand.vmem [shape: bf16[4,32,8], index: 8, kind: input, shape index: {}]   ;;  %s3962_s9 = inlined_call_operand.vmem [shape: f32[4,1,8], index: 9, kind: input, shape index: {}]   ;;  %s3963_s10 = inlined_call_operand.vmem [shape: bf16[4,16,8], index: 10, kind: input, shape index: {}]   ;;  %s3964_s11 = inlined_call_operand.vmem [shape: bf16[4,8,32], index: 11, kind: input, shape index: {}]   ;;  %s3965_s12 = inlined_call_operand.vmem [shape: f32[1,32], index: 12, kind: input, shape index: {}]   ;;  %s3966_s13 = inlined_call_operand.vmem [shape: f32[1,32], index: 13, kind: input, shape index: {}]   ;;  %s3967_s14 = inlined_call_operand.vmem [shape: f32[1,32], index: 14, kind: input, shape index: {}]   ;;  %s3968_s15 = inlined_call_operand.vmem [shape: bf16[32,64], index: 15, kind: input, shape index: {}]   ;;  %s3969_s16 = inlined_call_operand.vmem [shape: f32[1,64], index: 16, kind: input, shape index: {}]   ;;  %s3970_s17 = inlined_call_operand.vmem [shape: bf16[64,32], index: 17, kind: input, shape index: {}]   ;;  %s3971_s18 = inlined_call_operand.vmem [shape: f32[1,32], index: 18, kind: input, shape index: {}]   ;;  %s3972_s19 = inlined_call_operand.hbm [shape: f32[2,8,32], index: 19, kind: output, shape index: {}]  }
   0x1   :  { %3980 = sst [smem:[#allocation11_spill]] %s3953_s0 }
   0x2   :  { %3981 = sst [smem:[#allocation12_spill]] %s3954_s1 }
   0x3   :  { %3982 = sst [smem:[#allocation13_spill]] %s3955_s2 }
   0x4   :  { %3983 = sst [smem:[#allocation14_spill]] %s3956_s3 }
   0x5   :  { %24 = vsyncpa [#allocation3], 0 }
   0x6   :  { %26 = vsyncpa [#allocation3 + $0x1], 0  ;;  %s3432_s0 = smov 0   ;;  %s3434_s30 = smov 0  }
   0x7   :  { %s3436_s20 = smov 0   ;;  %s3438_s21 = smov 0  }
   0x8 LB: > { %3984 = sst [smem:[#allocation5_spill]] %s3298_s0  ;;  %s3453_s1 = sadd.s32 4294967295, %s3310_s21   ;;  %s3310_s21 = sphi %s3438_s21, %s4000_s21   ;;  %s3306_s20 = sphi %s3436_s20, %s4002_s20   ;;  %s3302_s30 = sphi %s3434_s30, %s4004_s30   ;;  %s3298_s0 = sphi %s3432_s0, %s4003_s0  }
   0x9   : > { %3985 = sst [smem:[#allocation6_spill]] %s3306_s20  ;;  %s2752_s22 = sadd.s32 4294967294, %s3310_s21  }
   0xa   : > { %3986 = sst [smem:[#allocation7_spill]] %s3310_s21  ;;  %s3457_s2 = sadd.s32 1, %s3310_s21  }
   0xb   : > { %3987 = sst [smem:[#allocation8_spill]] %s3457_s2  ;;  %s443_s23 = sadd.s32 1, %s3306_s20 }
   0xc   : > { %s440_s24 = ssub.s32 %s3310_s21, %s3457_s2  ;;  %p453_p0 = scmp.ne.s32.totalorder %s3306_s20, %s3302_s30 }
   0xd   : > { %p441_p1 = scmp.eq.s32.totalorder %s440_s24, 0  ;;  %p454_p2 = scmp.eq.s32.totalorder %s3453_s1, 1 }
   0xe   : > { %p459_p3 = scmp.ne.s32.totalorder %s3302_s30, %s3298_s0  ;;  %p460_p4 = scmp.eq.s32.totalorder %s2752_s22, 1 }
   0xf   : > { %s3468_s25 = scalar_select %p441_p1, %s3306_s20, %s443_s23  }
  0x10   : > { %p3470_p5 = por %p454_p2, %p453_p0  ;;  %p3474_p6 = por %p460_p4, %p459_p3 }
  0x11   : > { %3988 = sst [smem:[#allocation9_spill]] %s3468_s25  ;;  %p2755_p7 = scmp.ge.s32.totalorder %s3310_s21, 1 }
  0x12   : > { %s3990_s26 = scalar_select %p3474_p6, 1, 0 }
  0x13   : > { %p539_p8 = scmp.lt.s32.totalorder %s3310_s21, 3 }
  0x14   : > { %3991 = sst [smem:[#allocation10_spill]] %s3990_s26 }
  0x15   : > { %p540_p9 = pnand %p2755_p7, %p539_p8 }
  0x16   : > { %p594_p10 = scmp.lt.s32.totalorder (!%p540_p9), %s3453_s1, 1  ;;  %s3992_s23 = sld [smem:[#allocation11_spill]] (!%p540_p9) }
  0x17   : > { %543 = sbr.rel (%p540_p9) target bundleno = 2579 (0xa13), region = 96  ;;  %s3993_s20 = sld [smem:[#allocation14_spill]] (!%p540_p9) }
  0x18   : > { %s3996_s22 = sld [smem:[#allocation13_spill]] (!%p540_p9)  ;;  %s3317_s29 = smov (!%p540_p9), 48  }
  0x19   : > { %s3318_s0 = smov (!%p540_p9), 16   ;;  %s3319_s21 = smov (!%p540_p9), 64  }
  0x1a   : > { %s3323_s25 = smov (!%p540_p9), 83   ;;  %s3324_s26 = smov (!%p540_p9), 113  }
  0x1c   : > { %s595_s27 = scalar_select %p594_p10, %s3453_s1, 1  ;;  %vm602_vm0 = vcmask 261120   ;;  %v3312_v9 = vmov 0.0   ;;  %vm3313_vm1 = vmmov 0   ;;  %v3203_v26 = vld [vmem:[%s3959_s6 + $0x8] sm:$0xff]   ;;  %v3204_v27 = vld [vmem:[%s3959_s6 + $0x18] sm:$0xff]  }
  0x1d   : > { %s3994_s2 = smov %s3993_s20  ;;  %v3195_v7 = vld [vmem:[%s3993_s20 + $0x8] sm:$0xff]   ;;  %2925 = vmatprep.subr.bf16.mxu0 %v3312_v9  ;;  %2933 = vmatprep.subr.bf16.mxu1 %v3312_v9  ;;  %v3205_v28 = vld [vmem:[%s3959_s6] sm:$0xff]   ;;  %v3206_v29 = vld [vmem:[%s3959_s6 + $0x10] sm:$0xff]   ;;  %vm1456_vm2 = vcmask 64512   ;;  %vm2107_vm3 = vcmask 1043456   ;;  %s3322_s20 = smov 112  }
  0x1e   : > { %s2757_s28 = sshll.u32 %s595_s27, 3  ;;  %v3196_v8 = vld [vmem:[%s3994_s2 + $0x18] sm:$0xff]   ;;  %2926 = vmatpush3.bf16.msra.mxu0 %v3195_v7  ;;  %v3197_v10 = vld [vmem:[%s3994_s2] sm:$0xff]   ;;  %v3198_v11 = vld [vmem:[%s3994_s2 + $0x10] sm:$0xff]   ;;  %2929 = vmatprep.mubr.msk.bf16.mxu0 %vm3313_vm1, %v3312_v9  ;;  %s3995_s27 = sld [smem:[#allocation12_spill]]  ;;  %vm1752_vm4 = vcmask 130048  }
  0x1f   : > { %s3485_s24 = scalar_lea.vmem %s3992_s23, %s2757_s28  ;;  %2934 = vmatpush3.bf16.msra.mxu1 %v3196_v8  ;;  %2927 = vmatprep.subr.bf16.mxu0 %v3312_v9  ;;  %v2759_v18 = vld [vmem:[%s3996_s22] ss:$0 sm:$0xff]  ;;  %v3199_v21 = vld [vmem:[%s3994_s2 + $0x28] sm:$0xff]   ;;  %v3200_v22 = vld [vmem:[%s3994_s2 + $0x38] sm:$0xff]   ;;  %s3320_s28 = smov 96   ;;  %vm1755_vm5 = vcmask 392192  }
  0x20   : > { %v599_v0 = vld [vmem:[%s3485_s24] sm:$0xff]  ;;  %2935 = vmatprep.subr.bf16.mxu1 %v3312_v9  ;;  %2937 = vmatprep.mubr.msk.bf16.mxu1 %vm3313_vm1, %v3312_v9  ;;  %v3202_v25 = vld [vmem:[%s3994_s2 + $0x30] sm:$0xff]   ;;  %v3207_v30 = vld [vmem:[%s3959_s6 + $0x28] sm:$0xff]   ;;  %s3321_s22 = smov 80   ;;  %vm1757_vm6 = vcmask 523264   ;;  %vm1759_vm7 = vcmask 654336  }
  0x21   : > { %v603_v1 = vsel %vm602_vm0, %v599_v0, 0.0  ;;  %v3201_v24 = vld [vmem:[%s3994_s2 + $0x20] sm:$0xff]   ;;  %v3208_v31 = vld [vmem:[%s3959_s6 + $0x38] sm:$0xff]   ;;  %v3210_v33 = vld [vmem:[%s3959_s6 + $0x30] sm:$0xff]   ;;  %vm1761_vm8 = vcmask 785408   ;;  %vm1763_vm9 = vcmask 916480  }
  0x22   : > { %604 = vadd.xlane.f32.xlu0 %v603_v1  ;;  %2928 = vmatpush3.bf16.msra.mxu0 %v3197_v10  ;;  %v3209_v32 = vld [vmem:[%s3959_s6 + $0x20] sm:$0xff]   ;;  %v3211_v34 = vld [vmem:[%s3961_s8 + $0x8] sm:$0xff]   ;;  %v3212_v35 = vld [vmem:[%s3961_s8 + $0x18] sm:$0xff]   ;;  %s3325_s23 = smov 53  }
  0x23   : > { %2936 = vmatpush3.bf16.msra.mxu1 %v3198_v11  ;;  %2941 = vmatprep.subr.bf16.mxu0 %v3312_v9  ;;  %v3213_v36 = vld [vmem:[%s3961_s8] sm:$0xff]   ;;  %v3214_v37 = vld [vmem:[%s3961_s8 + $0x10] sm:$0xff]   ;;  %v3215_v38 = vld [vmem:[%s3961_s8 + $0x28] sm:$0xff]  }
  0x24   : > { %2949 = vmatprep.subr.bf16.mxu1 %v3312_v9  ;;  %v2758_v16 = vld [vmem:[%s3995_s27] ss:$0 sm:$0xff]  ;;  %v3216_v39 = vld [vmem:[%s3961_s8 + $0x38] sm:$0xff]   ;;  %v3218_v41 = vld [vmem:[%s3961_s8 + $0x30] sm:$0xff]   ;;  %s3316_s27 = smov 32  }
  0x25   : > { %v3217_v40 = vld [vmem:[%s3961_s8 + $0x20] sm:$0xff]   ;;  %v3220_v43 = vld [vmem:[%s3963_s10 + $0x8] sm:$0xff]   ;;  %v3221_v48 = vld [vmem:[%s3963_s10 + $0x10] sm:$0xff]  }
  0x26   : > { %v3219_v42 = vld [vmem:[%s3963_s10] sm:$0xff]   ;;  %v1512_v45 = vsel %vm1456_vm2, %v3220_v43, 0  ;;  %v3222_v49 = vld [vmem:[%s3963_s10 + $0x18] sm:$0xff]   ;;  %v1563_v58 = vsel %vm1456_vm2, %v3221_v48, 0 }
  0x27   : > { %v1461_v44 = vsel %vm1456_vm2, %v3219_v42, 0  ;;  %v2808_v46 = vld [vmem:[%s3958_s5] ss:$0 sm:$0xff]  ;;  %v2809_v47 = vld [vmem:[%s3958_s5 + $0x1] ss:$0 sm:$0xff]  ;;  %v1614_v59 = vsel %vm1456_vm2, %v3222_v49, 0 }
  0x28   : > { %v2811_v1 = vld [vmem:[%s3958_s5 + $0x3] ss:$0 sm:$0xff] }
  0x29   : > { %v2807_v48 = vld [vmem:[%s3957_s4 + $0x3] ss:$0 sm:$0xff] }
  0xab   : > { %v605_v2 = vpop.xlane.xlu0 %604 }
  0xac   : > { %v607_v3 = vmul.f32 0.03125, %v605_v2 }
  0xae   : > { %v608_v4 = vsub.f32 %v599_v0, %v607_v3  ;;  %v2810_v0 = vld [vmem:[%s3958_s5 + $0x2] ss:$0 sm:$0xff] }
  0xb0   : > { %v609_v5 = vmul.f32 %v608_v4, %v608_v4 }
  0xb2   : > { %v610_v6 = vsel %vm602_vm0, %v609_v5, 0.0 }
  0xb3   : > { %611 = vadd.xlane.f32.xlu0 %v610_v6 }
 0x13c   : > { %v612_v12 = vpop.xlane.xlu0 %611 }
 0x13d   : > { %v613_v13 = vmul.f32 0.03125, %v612_v12 }
 0x13f   : > { %v614_v14 = vadd.f32 1e-12, %v613_v13 }
 0x141   : > { %3229 = vrsqrt.f32 %v614_v14 }
 0x14e   : > { %v3230_v15 = vpop.eup %3229 }
 0x14f   : > { %v616_v17 = vmul.f32 %v3230_v15, %v608_v4  ;;  %v2772_v15 = vld [vmem:[%s3960_s7] ss:$0 sm:$0xff] }
 0x151   : > { %v623_v19 = vmul.f32 %v2758_v16, %v616_v17  ;;  %v2773_v16 = vld [vmem:[%s3960_s7 + $0x1] ss:$0 sm:$0xff] }
 0x153   : > { %v630_v20 = vadd.f32 %v2759_v18, %v623_v19 }
 0x155   : > { %v3524_v23 = vpack.c.bf16 %v630_v20, %v630_v20 }
 0x157   : > { %2930 = vmatmul.mubr.msk.bf16.vlgmr.msra.gmra.mxu0 %vm602_vm0, %v3524_v23  ;;  %2938 = vmatmul.mubr.msk.bf16.vlgmr.msra.gmra.mxu1 %vm602_vm0, %v3524_v23 }
 0x158   : > { %2942 = vmatpush3.bf16.msra.mxu0 %v3199_v21  ;;  %2950 = vmatpush3.bf16.msra.mxu1 %v3200_v22 }
 0x159   : > { %2943 = vmatprep.subr.bf16.mxu0 %v3312_v9  ;;  %2951 = vmatprep.subr.bf16.mxu1 %v3312_v9 }
 0x15a   : > { %2945 = vmatprep.mubr.msk.bf16.mxu0 %vm3313_vm1, %v3312_v9  ;;  %2953 = vmatprep.mubr.msk.bf16.mxu1 %vm3313_vm1, %v3312_v9 }
 0x15c   : > { %2944 = vmatpush3.bf16.msra.mxu0 %v3201_v24  ;;  %2952 = vmatpush3.bf16.msra.mxu1 %v3202_v25  ;;  %v2804_v25 = vld [vmem:[%s3957_s4] ss:$0 sm:$0xff] }
 0x15d   : > { %2957 = vmatprep.subr.bf16.mxu0 %v3312_v9  ;;  %2965 = vmatprep.subr.bf16.mxu1 %v3312_v9 }
 0x15f   : > { %2946 = vmatmul.mubr.msk.bf16.vlgmr.msra.gmra.mxu0 %vm602_vm0, %v3524_v23  ;;  %2954 = vmatmul.mubr.msk.bf16.vlgmr.msra.gmra.mxu1 %vm602_vm0, %v3524_v23 }
 0x160   : > { %2958 = vmatpush3.bf16.msra.mxu0 %v3203_v26  ;;  %2966 = vmatpush3.bf16.msra.mxu1 %v3204_v27  ;;  %v2805_v26 = vld [vmem:[%s3957_s4 + $0x1] ss:$0 sm:$0xff] }
 0x161   : > { %2959 = vmatprep.subr.bf16.mxu0 %v3312_v9  ;;  %2967 = vmatprep.subr.bf16.mxu1 %v3312_v9 }
 0x162   : > { %2961 = vmatprep.mubr.msk.bf16.mxu0 %vm3313_vm1, %v3312_v9  ;;  %2969 = vmatprep.mubr.msk.bf16.mxu1 %vm3313_vm1, %v3312_v9 }
 0x164   : > { %2960 = vmatpush3.bf16.msra.mxu0 %v3205_v28  ;;  %2968 = vmatpush3.bf16.msra.mxu1 %v3206_v29 }
 0x165   : > { %2973 = vmatprep.subr.bf16.mxu0 %v3312_v9  ;;  %2981 = vmatprep.subr.bf16.mxu1 %v3312_v9 }
 0x167   : > { %2962 = vmatmul.mubr.msk.bf16.vlgmr.msra.gmra.mxu0 %vm602_vm0, %v3524_v23  ;;  %2970 = vmatmul.mubr.msk.bf16.vlgmr.msra.gmra.mxu1 %vm602_vm0, %v3524_v23 }
 0x168   : > { %2974 = vmatpush3.bf16.msra.mxu0 %v3207_v30  ;;  %2982 = vmatpush3.bf16.msra.mxu1 %v3208_v31 }
 0x169   : > { %2975 = vmatprep.subr.bf16.mxu0 %v3312_v9  ;;  %2983 = vmatprep.subr.bf16.mxu1 %v3312_v9 }
 0x16a   : > { %2977 = vmatprep.mubr.msk.bf16.mxu0 %vm3313_vm1, %v3312_v9  ;;  %2985 = vmatprep.mubr.msk.bf16.mxu1 %vm3313_vm1, %v3312_v9 }
 0x16c   : > { %2976 = vmatpush3.bf16.msra.mxu0 %v3209_v32  ;;  %2984 = vmatpush3.bf16.msra.mxu1 %v3210_v33  ;;  %v2774_v33 = vld [vmem:[%s3960_s7 + $0x2] ss:$0 sm:$0xff] }
 0x16d   : > { %2989 = vmatprep.subr.bf16.mxu0 %v3312_v9  ;;  %2997 = vmatprep.subr.bf16.mxu1 %v3312_v9 }
 0x16f   : > { %2978 = vmatmul.mubr.msk.bf16.vlgmr.msra.gmra.mxu0 %vm602_vm0, %v3524_v23  ;;  %2986 = vmatmul.mubr.msk.bf16.vlgmr.msra.gmra.mxu1 %vm602_vm0, %v3524_v23 }
 0x170   : > { %2990 = vmatpush3.bf16.msra.mxu0 %v3211_v34  ;;  %2998 = vmatpush3.bf16.msra.mxu1 %v3212_v35  ;;  %v2775_v34 = vld [vmem:[%s3960_s7 + $0x3] ss:$0 sm:$0xff] }
 0x171   : > { %2991 = vmatprep.subr.bf16.mxu0 %v3312_v9  ;;  %2999 = vmatprep.subr.bf16.mxu1 %v3312_v9 }
 0x172   : > { %2993 = vmatprep.mubr.msk.bf16.mxu0 %vm3313_vm1, %v3312_v9  ;;  %3001 = vmatprep.mubr.msk.bf16.mxu1 %vm3313_vm1, %v3312_v9 }
 0x174   : > { %2992 = vmatpush3.bf16.msra.mxu0 %v3213_v36  ;;  %3000 = vmatpush3.bf16.msra.mxu1 %v3214_v37 }
 0x175   : > { %3005 = vmatprep.subr.bf16.mxu0 %v3312_v9  ;;  %3013 = vmatprep.subr.bf16.mxu1 %v3312_v9 }
 0x177   : > { %2994 = vmatmul.mubr.msk.bf16.vlgmr.msra.gmra.mxu0 %vm602_vm0, %v3524_v23  ;;  %3002 = vmatmul.mubr.msk.bf16.vlgmr.msra.gmra.mxu1 %vm602_vm0, %v3524_v23 }
 0x178   : > { %3006 = vmatpush3.bf16.msra.mxu0 %v3215_v38  ;;  %3014 = vmatpush3.bf16.msra.mxu1 %v3216_v39 }
 0x179   : > { %3007 = vmatprep.subr.bf16.mxu0 %v3312_v9  ;;  %3015 = vmatprep.subr.bf16.mxu1 %v3312_v9 }
 0x17a   : > { %3009 = vmatprep.mubr.msk.bf16.mxu0 %vm3313_vm1, %v3312_v9  ;;  %3017 = vmatprep.mubr.msk.bf16.mxu1 %vm3313_vm1, %v3312_v9 }
 0x17c   : > { %3008 = vmatpush3.bf16.msra.mxu0 %v3217_v40  ;;  %3016 = vmatpush3.bf16.msra.mxu1 %v3218_v41 }
 0x17d   : > { %3021 = vmatprep.subr.bf16.mxu0 %v3312_v9  ;;  %3027 = vmatprep.subr.bf16.mxu1 %v3312_v9 }
 0x17f   : > { %3010 = vmatmul.mubr.msk.bf16.vlgmr.msra.gmra.mxu0 %vm602_vm0, %v3524_v23  ;;  %3018 = vmatmul.mubr.msk.bf16.vlgmr.msra.gmra.mxu1 %vm602_vm0, %v3524_v23 }
 0x180   : > { %3022 = vmatpush3.bf16.xpose.msra.mxu0 %v1461_v44  ;;  %3028 = vmatpush3.bf16.xpose.msra.mxu1 %v1512_v45 }
 0x181   : > { %3023 = vmatprep.mubr.msk.bf16.mxu0 %vm3313_vm1, %v3312_v9  ;;  %3029 = vmatprep.mubr.msk.bf16.mxu1 %vm3313_vm1, %v3312_v9 }
 0x182   : > { %3033 = vmatprep.subr.bf16.mxu0 %v3312_v9  ;;  %3039 = vmatprep.subr.bf16.mxu1 %v3312_v9 }
 0x217   : > { %v697_v50 = vpop.f32.mrf.mxu0  ;;  %v749_v51 = vpop.f32.mrf.mxu1 }
 0x218   : > { %v1427_v52 = vadd.f32 %v2808_v46, %v697_v50  ;;  %v1428_v53 = vadd.f32 %v2809_v47, %v749_v51  ;;  %v1391_v35 = vadd.f32 %v2804_v25, %v697_v50  ;;  %v1392_v36 = vadd.f32 %v2805_v26, %v749_v51  ;;  %v2806_v47 = vld [vmem:[%s3957_s4 + $0x2] ss:$0 sm:$0xff] }
 0x219   : > { %v2931_v54 = vpop.f32.mrf.mxu0  ;;  %v2939_v55 = vpop.f32.mrf.mxu1 }
 0x21a   : > { %v1431_v56 = vpack.c.bf16 %v1427_v52, %v1427_v52  ;;  %v1432_v57 = vpack.c.bf16 %v1428_v53, %v1428_v53  ;;  %v1395_v43 = vpack.c.bf16 %v1391_v35, %v1391_v35  ;;  %v1396_v44 = vpack.c.bf16 %v1392_v36, %v1392_v36  ;;  %v2788_v55 = vld [vmem:[%s3962_s9] ss:$0 sm:$0xff] }
 0x21b   : > { %v700_v60 = vpop.f32.mrf.mxu0  ;;  %v752_v61 = vpop.f32.mrf.mxu1 }
 0x21c   : > { %3024 = vmatmul.mubr.msk.bf16.vlgmr.msra.gmra.mxu0 %vm1456_vm2, %v1431_v56  ;;  %3030 = vmatmul.mubr.msk.bf16.vlgmr.msra.gmra.mxu1 %vm1456_vm2, %v1432_v57  ;;  %v2789_v56 = vld [vmem:[%s3962_s9 + $0x1] ss:$0 sm:$0xff] }
 0x21d   : > { %3034 = vmatpush3.bf16.xpose.msra.mxu0 %v1563_v58  ;;  %3040 = vmatpush3.bf16.xpose.msra.mxu1 %v1614_v59  ;;  %v2932_v62 = vpop.f32.mrf.mxu0  ;;  %v2940_v63 = vpop.f32.mrf.mxu1 }
 0x21e   : > { %3035 = vmatprep.mubr.msk.bf16.mxu0 %vm3313_vm1, %v3312_v9  ;;  %3041 = vmatprep.mubr.msk.bf16.mxu1 %vm3313_vm1, %v3312_v9 }
 0x21f   : > { %v3684_v2 = vpop.f32.mrf.mxu0  ;;  %v3686_v3 = vpop.f32.mrf.mxu1  ;;  %3045 = vmatprep.subr.bf16.mxu0 %v3312_v9  ;;  %3051 = vmatprep.subr.bf16.mxu1 %v3312_v9 }
 0x220   : > { %v1429_v4 = vadd.f32 %v2810_v0, %v3684_v2  ;;  %v1430_v5 = vadd.f32 %v2811_v1, %v3686_v3  ;;  %v1393_v57 = vadd.f32 %v2806_v47, %v3684_v2  ;;  %v1394_v58 = vadd.f32 %v2807_v48, %v3686_v3 }
 0x221   : > { %v2947_v6 = vpop.f32.mrf.mxu0  ;;  %v2955_v7 = vpop.f32.mrf.mxu1 }
 0x222   : > { %v1433_v8 = vpack.c.bf16 %v1429_v4, %v1429_v4  ;;  %v1434_v10 = vpack.c.bf16 %v1430_v5, %v1430_v5  ;;  %v1397_v1 = vpack.c.bf16 %v1393_v57, %v1393_v57  ;;  %v1398_v2 = vpack.c.bf16 %v1394_v58, %v1394_v58 }
 0x223   : > { %v804_v11 = vpop.f32.mrf.mxu0  ;;  %v856_v12 = vpop.f32.mrf.mxu1 }
 0x224   : > { %3036 = vmatmul.mubr.msk.bf16.vlgmr.msra.gmra.mxu0 %vm1456_vm2, %v1433_v8  ;;  %3042 = vmatmul.mubr.msk.bf16.vlgmr.msra.gmra.mxu1 %vm1456_vm2, %v1434_v10 }
 0x225   : > { %v2948_v13 = vpop.f32.mrf.mxu0  ;;  %v2956_v14 = vpop.f32.mrf.mxu1  ;;  %3047 = vmatprep.mubr.msk.bf16.mxu0 %vm3313_vm1, %v3312_v9  ;;  %3053 = vmatprep.mubr.msk.bf16.mxu1 %vm3313_vm1, %v3312_v9 }
 0x227   : > { %v949_v17 = vpop.f32.mrf.mxu0  ;;  %v1001_v18 = vpop.f32.mrf.mxu1 }
 0x228   : > { %v950_v19 = vadd.f32 %v2772_v15, %v949_v17  ;;  %v1002_v20 = vadd.f32 %v2773_v16, %v1001_v18 }
 0x229   : > { %v2963_v21 = vpop.f32.mrf.mxu0  ;;  %v2971_v22 = vpop.f32.mrf.mxu1 }
 0x22a   : > { %v1435_v23 = vpack.c.bf16 %v950_v19, %v950_v19  ;;  %v1436_v24 = vpack.c.bf16 %v1002_v20, %v1002_v20  ;;  %v3314_v20 = vmov 1983009808   ;;  %v1661_v22 = vlaneseq }
 0x22b   : > { %v952_v27 = vpop.f32.mrf.mxu0  ;;  %v1004_v28 = vpop.f32.mrf.mxu1  ;;  %v1659_v21 = vunpack.c.l.s4 %v3314_v20 }
 0x22c   : > { %v1876_v29 = vsel %vm1456_vm2, %v1435_v23, 0  ;;  %v1922_v30 = vsel %vm1456_vm2, %v1436_v24, 0  ;;  %v3315_v27 = vmov 1934713408  }
 0x22d   : > { %v2964_v31 = vpop.f32.mrf.mxu0  ;;  %v2972_v32 = vpop.f32.mrf.mxu1  ;;  %3046 = vmatpush3.bf16.xpose.msra.mxu0 %v1876_v29  ;;  %3052 = vmatpush3.bf16.xpose.msra.mxu1 %v1922_v30  ;;  %v1691_v28 = vunpack.c.l.s4 %v3315_v27  ;;  %v1660_v29 = vunpack.c.0.s8 %v1659_v21  ;;  %v1662_v30 = vshrl.u32 %v1661_v22, 7 }
 0x22e   : > { %3057 = vmatprep.subr.bf16.mxu0 %v3312_v9  ;;  %3063 = vmatprep.subr.bf16.mxu1 %v3312_v9 }
 0x22f   : > { %v1053_v37 = vpop.f32.mrf.mxu0  ;;  %v1105_v38 = vpop.f32.mrf.mxu1  ;;  %v1692_v35 = vunpack.c.0.s8 %v1691_v28  ;;  %v3758_v36 = vsub.s32 %v1660_v29, %v1662_v30 }
 0x230   : > { %v1054_v39 = vadd.f32 %v2774_v33, %v1053_v37  ;;  %v1106_v40 = vadd.f32 %v2775_v34, %v1105_v38 }
 0x231   : > { %v2979_v41 = vpop.f32.mrf.mxu0  ;;  %v2987_v42 = vpop.f32.mrf.mxu1 }
 0x232   : > { %v1437_v45 = vpack.c.bf16 %v1054_v39, %v1054_v39  ;;  %v1438_v46 = vpack.c.bf16 %v1106_v40, %v1106_v40 }
 0x233   : > { %v1056_v49 = vpop.f32.mrf.mxu0  ;;  %v1108_v50 = vpop.f32.mrf.mxu1 }
 0x234   : > { %v1968_v51 = vsel %vm1456_vm2, %v1437_v45, 0  ;;  %v2014_v52 = vsel %vm1456_vm2, %v1438_v46, 0  ;;  %3048 = vmatmul.mubr.msk.bf16.vlgmr.msra.gmra.mxu0 %vm1456_vm2, %v1395_v43  ;;  %3054 = vmatmul.mubr.msk.bf16.vlgmr.msra.gmra.mxu1 %vm1456_vm2, %v1396_v44  ;;  %v3760_v43 = vsub.s32 %v1692_v35, %v1662_v30 }
 0x235   : > { %v2980_v53 = vpop.f32.mrf.mxu0  ;;  %v2988_v54 = vpop.f32.mrf.mxu1  ;;  %3058 = vmatpush3.bf16.xpose.msra.mxu0 %v1968_v51  ;;  %3064 = vmatpush3.bf16.xpose.msra.mxu1 %v2014_v52 }
 0x236   : > { %3059 = vmatprep.mubr.msk.bf16.mxu0 %vm3313_vm1, %v3312_v9  ;;  %3065 = vmatprep.mubr.msk.bf16.mxu1 %vm3313_vm1, %v3312_v9 }
 0x237   : > { %v1201_v59 = vpop.f32.mrf.mxu0  ;;  %v1253_v60 = vpop.f32.mrf.mxu1  ;;  %3069 = vmatprep.subr.bf16.mxu0 %v3312_v9  ;;  %3075 = vmatprep.subr.bf16.mxu1 %v3312_v9 }
 0x238   : > { %v1202_v61 = vadd.f32 %v2788_v55, %v1201_v59  ;;  %v1254_v62 = vadd.f32 %v2789_v56, %v1253_v60 }
 0x239   : > { %v2995_v63 = vpop.f32.mrf.mxu0  ;;  %v3003_v0 = vpop.f32.mrf.mxu1 }
 0x23a   : > { %v1439_v3 = vpack.c.bf16 %v1202_v61, %v1202_v61  ;;  %v1440_v4 = vpack.c.bf16 %v1254_v62, %v1254_v62 }
 0x23b   : > { %v1204_v5 = vpop.f32.mrf.mxu0  ;;  %v1256_v6 = vpop.f32.mrf.mxu1 }
 0x23c   : > { %v2109_v7 = vsel %vm2107_vm3, %v1439_v3, 0  ;;  %v2155_v8 = vsel %vm2107_vm3, %v1440_v4, 0  ;;  %3060 = vmatmul.mubr.msk.bf16.vlgmr.msra.gmra.mxu0 %vm1456_vm2, %v1397_v1  ;;  %3066 = vmatmul.mubr.msk.bf16.vlgmr.msra.gmra.mxu1 %vm1456_vm2, %v1398_v2 }
 0x23d   : > { %v2996_v10 = vpop.f32.mrf.mxu0  ;;  %v3004_v11 = vpop.f32.mrf.mxu1  ;;  %3070 = vmatpush3.bf16.msra.mxu0 %v2109_v7  ;;  %3076 = vmatpush3.bf16.msra.mxu1 %v2155_v8 }
 0x23e   : > { %3071 = vmatprep.mubr.msk.bf16.mxu0 %vm3313_vm1, %v3312_v9  ;;  %3077 = vmatprep.mubr.msk.bf16.mxu1 %vm3313_vm1, %v3312_v9 }
 0x23f   : > { %v3752_v12 = vpop.f32.mrf.mxu0  ;;  %v3754_v13 = vpop.f32.mrf.mxu1  ;;  %3081 = vmatprep.subr.bf16.mxu0 %v3312_v9  ;;  %3087 = vmatprep.subr.bf16.mxu1 %v3312_v9 }
 0x241   : > { %v3011_v14 = vpop.f32.mrf.mxu0  ;;  %v3019_v15 = vpop.f32.mrf.mxu1 }
 0x243   : > { %v1308_v16 = vpop.f32.mrf.mxu0  ;;  %v1360_v17 = vpop.f32.mrf.mxu1 }
 0x245   : > { %v3012_v18 = vpop.f32.mrf.mxu0  ;;  %v3020_v19 = vpop.f32.mrf.mxu1 }
 0x2dc   : > { %v1497_v23 = vpop.f32.mrf.mxu0  ;;  %v1548_v24 = vpop.f32.mrf.mxu1 }
 0x2de   : > { %v3025_v25 = vpop.f32.mrf.mxu0  ;;  %v3031_v26 = vpop.f32.mrf.mxu1 }
 0x2e0   : > { %v1500_v31 = vpop.f32.mrf.mxu0  ;;  %v1551_v32 = vpop.f32.mrf.mxu1 }
 0x2e2   : > { %v3026_v33 = vpop.f32.mrf.mxu0  ;;  %v3032_v34 = vpop.f32.mrf.mxu1 }
 0x2e4   : > { %v1599_v37 = vpop.f32.mrf.mxu0  ;;  %v1650_v38 = vpop.f32.mrf.mxu1 }
 0x2e5   : > { %v1656_v39 = vcombine.low %v1497_v23, %v1599_v37  ;;  %v1672_v40 = vcombine.low %v1548_v24, %v1650_v38  ;;  %v1657_v44 = vcombine.high %v1497_v23, %v1599_v37  ;;  %v1673_v46 = vcombine.high %v1548_v24, %v1650_v38 }
 0x2e6   : > { %v3037_v41 = vpop.f32.mrf.mxu0  ;;  %v3043_v42 = vpop.f32.mrf.mxu1 }
 0x2e7   : > { %v1664_v45 = vrot.slane %v1656_v39, %v3758_v36  ;;  %v1680_v47 = vrot.slane %v1672_v40, %v3758_v36  ;;  %v1671_v54 = vrot.slane %v1657_v44, %v3758_v36  ;;  %v1687_v55 = vrot.slane %v1673_v46, %v3758_v36 }
 0x2e8   : > { %v1602_v48 = vpop.f32.mrf.mxu0  ;;  %v1653_v49 = vpop.f32.mrf.mxu1 }
 0x2e9   : > { %v1688_v50 = vcombine.low %v1664_v45, %v1680_v47  ;;  %v1689_v51 = vcombine.high %v1664_v45, %v1680_v47  ;;  %v1704_v59 = vcombine.low %v1671_v54, %v1687_v55  ;;  %v1705_v61 = vcombine.high %v1671_v54, %v1687_v55 }
 0x2ea   : > { %v3038_v52 = vpop.f32.mrf.mxu0  ;;  %v3044_v53 = vpop.f32.mrf.mxu1 }
 0x2eb   : > { %v1703_v56 = vrot.slane %v1689_v51, %v3760_v43  ;;  %v1696_v57 = vrot.slane %v1688_v50, %v3760_v43  ;;  %v1712_v62 = vrot.slane %v1704_v59, %v3760_v43  ;;  %v1719_v3 = vrot.slane %v1705_v61, %v3760_v43 }
 0x2ed   : > { %1729 = vrot.lane.b32.xlu1 %v1703_v56, %s3316_s27  ;;  %v1721_v58 = vcombine.high %v1703_v56, %v3312_v9  ;;  %v1720_v60 = vcombine.high %v1696_v57, %v3312_v9  ;;  %v1722_v8 = vcombine.high %v1712_v62, %v3312_v9  ;;  %v1723_v16 = vcombine.high %v1719_v3, %v3312_v9  ;;  %s3326_s27 = smov 98  }
 0x2ef   : > { %1733 = vrot.lane.b32.xlu0 %v1721_v58, %s3317_s29  ;;  %s3327_s29 = smov 23  }
 0x2f1   : > { %1725 = vrot.lane.b32.xlu1 %v1720_v60, %s3318_s0  ;;  %s3328_s0 = smov 68  }
 0x2f4   : > { %v3771_v63 = vpop.f32.mrf.mxu0  ;;  %v3773_v0 = vpop.f32.mrf.mxu1 }
 0x2f5   : > { %1737 = vrot.lane.b32.xlu1 %v1712_v62, %s3319_s21  ;;  %s3329_s21 = smov 38  }
 0x2f6   : > { %v3049_v1 = vpop.f32.mrf.mxu0  ;;  %v3055_v2 = vpop.f32.mrf.mxu1 }
 0x2f8   : > { %v1915_v4 = vpop.f32.mrf.mxu0  ;;  %v1961_v5 = vpop.f32.mrf.mxu1 }
 0x2f9   : > { %1745 = vrot.lane.b32.xlu1 %v1719_v3, %s3320_s28  ;;  %s3330_s28 = smov 121  }
 0x2fa   : > { %v3050_v6 = vpop.f32.mrf.mxu0  ;;  %v3056_v7 = vpop.f32.mrf.mxu1 }
 0x2fc   : > { %v3777_v10 = vpop.f32.mrf.mxu0  ;;  %v3779_v11 = vpop.f32.mrf.mxu1 }
 0x2fd   : > { %1741 = vrot.lane.b32.xlu1 %v1722_v8, %s3321_s22  ;;  %s591_s22 = sand.u32 1, %s3302_s30  }
 0x2fe   : > { %v3061_v14 = vpop.f32.mrf.mxu0  ;;  %v3067_v15 = vpop.f32.mrf.mxu1 }
 0x300   : > { %v2007_v17 = vpop.f32.mrf.mxu0  ;;  %v2053_v18 = vpop.f32.mrf.mxu1 }
 0x301   : > { %1749 = vrot.lane.b32.xlu1 %v1723_v16, %s3322_s20  ;;  %s2756_s20 = sshll.u32 %s591_s22, 3 }
 0x302   : > { %v3062_v19 = vpop.f32.mrf.mxu0  ;;  %v3068_v20 = vpop.f32.mrf.mxu1 }
 0x35f   : > { %v1730_v21 = vpop.permute.xlu1 %1729 }
 0x361   : > { %v1734_v26 = vpop.permute.xlu0 %1733 }
 0x363   : > { %v1726_v22 = vpop.permute.xlu1 %1725 }
 0x364   : > { %v1753_v23 = vsel %vm1752_vm4, %v1696_v57, %v1726_v22 }
 0x365   : > { %v1754_v25 = vsel %vm602_vm0, %v1753_v23, %v1730_v21 }
 0x366   : > { %v1756_v28 = vsel %vm1755_vm5, %v1754_v25, %v1734_v26 }
 0x367   : > { %v1738_v24 = vpop.permute.xlu1 %1737 }
 0x368   : > { %v1758_v29 = vsel %vm1757_vm6, %v1756_v28, %v1738_v24 }
 0x36b   : > { %v1746_v27 = vpop.permute.xlu1 %1745 }
 0x36f   : > { %v1742_v30 = vpop.permute.xlu1 %1741 }
 0x370   : > { %v1760_v31 = vsel %vm1759_vm7, %v1758_v29, %v1742_v30 }
 0x371   : > { %v1762_v32 = vsel %vm1761_vm8, %v1760_v31, %v1746_v27 }
 0x373   : > { %v1750_v33 = vpop.permute.xlu1 %1749 }
 0x374   : > { %v1764_v34 = vsel %vm1763_vm9, %v1762_v32, %v1750_v33 }
 0x375   : > { %1770 = vrot.lane.b32.xlu0 %v1764_v34, %s3323_s25  ;;  %1766 = vrot.lane.b32.xlu1 %v1764_v34, %s3324_s26 }
 0x379   : > { %1774 = vrot.lane.b32.xlu0 %v1764_v34, %s3325_s23  ;;  %1768 = vrot.lane.b32.xlu1 %v1764_v34, %s3326_s27  ;;  %s2846_s23 = sshll.u32 %s3453_s1, 7  ;;  %s593_s27 = scalar_lea.vmem [#allocation2], %s2756_s20 }
 0x37a   : > { %s2680_s1 = scalar_lea.sflag [#allocation3], %s591_s22  ;;  %s3331_s20 = smov [#allocation2]  }
 0x37b   : > { %s3254_s25 = sshll.u32 %s3331_s20, 4  ;;  %s3255_s25 = int_to_ptr.vmem [resolvable:$false] %s3254_s25 }
 0x37c   : > { %s3256_s26 = scalar_lea.vmem %s3255_s25, 256 }
 0x37d   : > { %1778 = vrot.lane.b32.xlu0 %v1764_v34, %s3327_s29  ;;  %1772 = vrot.lane.b32.xlu1 %v1764_v34, %s3328_s0  ;;  %s2693_s29 = sshll.u32 %s593_s27, 4  ;;  %s3913_s29 = int_to_ptr.vmem [resolvable:$true] %s2693_s29 }
 0x37e   : > { %p3257_p0 = scmp.lt.s32.totalorder %s3913_s29, %s3255_s25 }
 0x381   : > { %1776 = vrot.lane.b32.xlu1 %v1764_v34, %s3329_s21  ;;  %s3911_s21 = scalar_lea.hbm %s3972_s19, %s2846_s23 }
 0x385   : > { %1780 = vrot.lane.b32.xlu1 %v1764_v34, %s3330_s28 }
 0x3e7   : > { %v1771_v35 = vpop.permute.xlu0 %1770  ;;  %v1767_v37 = vpop.permute.xlu1 %1766 }
 0x3e8   : > { %1782 = vrot.lane.b32.xlu0 %v1767_v37, %s3330_s28 }
 0x3eb   : > { %v1769_v38 = vpop.permute.xlu1 %1768  ;;  %v1775_v39 = vpop.permute.xlu0 %1774 }
 0x3ec   : > { %1786 = vrot.lane.b32.xlu0 %v1771_v35, %s3330_s28  ;;  %1784 = vrot.lane.b32.xlu1 %v1769_v38, %s3330_s28 }
 0x3ef   : > { %v1773_v40 = vpop.permute.xlu1 %1772  ;;  %v1779_v41 = vpop.permute.xlu0 %1778 }
 0x3f0   : > { %1790 = vrot.lane.b32.xlu0 %v1775_v39, %s3330_s28  ;;  %1788 = vrot.lane.b32.xlu1 %v1773_v40, %s3330_s28 }
 0x3f3   : > { %v1777_v42 = vpop.permute.xlu1 %1776 }
 0x3f4   : > { %1794 = vrot.lane.b32.xlu0 %v1779_v41, %s3330_s28  ;;  %1792 = vrot.lane.b32.xlu1 %v1777_v42, %s3330_s28  ;;  %v2791_v42 = vld [vmem:[%s3962_s9 + $0x3] ss:$0 sm:$0xff]  ;;  %s3250_s28 = scalar_lea.vmem %s3913_s29, 128 }
 0x3f5   : > { %p3251_p11 = scmp.ne.s32.totalorder %s3913_s29, %s3250_s28  ;;  %p3258_p1 = scmp.lt.s32.totalorder %s3256_s26, %s3250_s28 }
 0x3f7   : > { %v1781_v44 = vpop.permute.xlu1 %1780  ;;  %p3252_p12 = pnand %p3251_p11, %p3470_p5  ;;  %p3259_p2 = por %p3258_p1, %p3257_p0 }
 0x3f9   : > { %p3253_p13 = pneg %p3252_p12 }
 0x3fb   : > { %p3260_p3 = pnand %p3259_p2, %p3253_p13 }
 0x45a   : > { %v1783_v45 = vpop.permute.xlu0 %1782 }
 0x45e   : > { %v1787_v46 = vpop.permute.xlu0 %1786  ;;  %v1785_v47 = vpop.permute.xlu1 %1784 }
 0x45f   : > { %v1812_v48 = vcombine.low %v1783_v45, %v1787_v46  ;;  %v1804_v49 = vcombine.low %v1781_v44, %v1785_v47  ;;  %v2790_v44 = vld [vmem:[%s3962_s9 + $0x2] ss:$0 sm:$0xff]  ;;  %v1358_v45 = vadd.f32 %v2791_v42, %v3754_v13 }
 0x460   : > { %v1306_v46 = vadd.f32 %v2790_v44, %v3752_v12 }
 0x461   : > { %v1819_v52 = vrot.slane %v1812_v48, %v3758_v36  ;;  %v1811_v53 = vrot.slane %v1804_v49, %v3758_v36  ;;  %v1442_v49 = vpack.c.bf16 %v1358_v45, %v1358_v45 }
 0x462   : > { %v1791_v50 = vpop.permute.xlu0 %1790  ;;  %v1789_v51 = vpop.permute.xlu1 %1788 }
 0x463   : > { %v1836_v58 = vcombine.low %v1811_v53, %v1819_v52  ;;  %v1837_v59 = vcombine.high %v1811_v53, %v1819_v52 }
 0x465   : > { %v1844_v2 = vrot.slane %v1836_v58, %v3760_v43  ;;  %v1851_v4 = vrot.slane %v1837_v59, %v3760_v43  ;;  %v2294_v59 = vld [vmem:[%s3964_s11 + $0x4] sm:$0xf] }
 0x466   : > { %v1795_v54 = vpop.permute.xlu0 %1794  ;;  %v1793_v55 = vpop.permute.xlu1 %1792 }
 0x467   : > { %v1828_v56 = vcombine.low %v1791_v50, %v1795_v54  ;;  %v1820_v57 = vcombine.low %v1789_v51, %v1793_v55  ;;  %v1441_v51 = vpack.c.bf16 %v1306_v46, %v1306_v46 }
 0x469   : > { %v1835_v60 = vrot.slane %v1828_v56, %v3758_v36  ;;  %v1827_v61 = vrot.slane %v1820_v57, %v3758_v36  ;;  %v2247_v57 = vsel %vm2107_vm3, %v1442_v49, 0  ;;  %v2201_v58 = vsel %vm2107_vm3, %v1441_v51, 0  ;;  %v3249_v51 = vld [vmem:[%s3485_s24] sm:$0xff] }
 0x46b   : > { %v1852_v62 = vcombine.low %v1827_v61, %v1835_v60  ;;  %v1853_v1 = vcombine.high %v1827_v61, %v1835_v60  ;;  %v2293_v60 = vld [vmem:[%s3964_s11] sm:$0xf] }
 0x46d   : > { %v1860_v3 = vrot.slane %v1852_v62, %v3760_v43  ;;  %v1867_v5 = vrot.slane %v1853_v1, %v3760_v43  ;;  %v2347_v62 = vsel %vm2107_vm3, %v2294_v59, 0  ;;  %v3223_v59 = vld [vmem:[%s3968_s15 + $0x8] sm:$0xff]  }
 0x46f   : > { %v1869_v6 = vcombine.high %v1844_v2, %v1860_v3  ;;  %v1868_v7 = vcombine.low %v1844_v2, %v1860_v3  ;;  %v1871_v8 = vcombine.high %v1851_v4, %v1867_v5  ;;  %v1870_v14 = vcombine.low %v1851_v4, %v1867_v5  ;;  %v2296_v3 = vld [vmem:[%s3964_s11 + $0xc] sm:$0xf]  ;;  %v2295_v4 = vld [vmem:[%s3964_s11 + $0x8] sm:$0xf] }
 0x470   : > { %v2301_v2 = vsel %vm2107_vm3, %v2293_v60, 0  ;;  %v3224_v60 = vld [vmem:[%s3968_s15] sm:$0xff]  }
 0x471   : > { %v1959_v15 = vadd.f32 %v3773_v0, %v1869_v6  ;;  %v1913_v16 = vadd.f32 %v3771_v63, %v1868_v7  ;;  %v2051_v18 = vadd.f32 %v3779_v11, %v1871_v8  ;;  %v2005_v19 = vadd.f32 %v3777_v10, %v1870_v14 }
 0x472   : > { %v2439_v8 = vsel %vm2107_vm3, %v2296_v3, 0 }
 0x473   : > { %v2059_v36 = vsel %vm1456_vm2, %v1959_v15, -inf  ;;  %v2056_v17 = vsel %vm1456_vm2, %v1913_v16, -inf  ;;  %v2065_v43 = vsel %vm1456_vm2, %v2051_v18, -inf  ;;  %v2062_v20 = vsel %vm1456_vm2, %v2005_v19, -inf }
 0x474   : > { %2060 = vmax.xlane.f32.xlu0 %v2059_v36  ;;  %2057 = vmax.xlane.f32.xlu1 %v2056_v17 }
 0x478   : > { %2066 = vmax.xlane.f32.xlu1 %v2065_v43  ;;  %2063 = vmax.xlane.f32.xlu0 %v2062_v20 }
 0x4fd   : > { %v2061_v21 = vpop.xlane.xlu0 %2060  ;;  %v2058_v0 = vpop.xlane.xlu1 %2057 }
 0x4fe   : > { %v2069_v22 = vsub.f32 %v1959_v15, %v2061_v21  ;;  %v2068_v63 = vsub.f32 %v1913_v16, %v2058_v0  ;;  %v2393_v16 = vsel %vm2107_vm3, %v2295_v4, 0 }
 0x500   : > { %v2074_v23 = vmul.f32 1.442695, %v2069_v22  ;;  %v2072_v24 = vmul.f32 1.442695, %v2068_v63 }
 0x501   : > { %v2067_v25 = vpop.xlane.xlu1 %2066  ;;  %v2064_v26 = vpop.xlane.xlu0 %2063 }
 0x502   : > { %3231 = vpow2.f32 %v2074_v23  ;;  %v2071_v11 = vsub.f32 %v2051_v18, %v2067_v25  ;;  %v2070_v27 = vsub.f32 %v2005_v19, %v2064_v26 }
 0x503   : > { %3233 = vpow2.f32 %v2072_v24 }
 0x504   : > { %v2078_v10 = vmul.f32 1.442695, %v2071_v11  ;;  %v2076_v28 = vmul.f32 1.442695, %v2070_v27 }
 0x506   : > { %3235 = vpow2.f32 %v2078_v10 }
 0x507   : > { %3237 = vpow2.f32 %v2076_v28 }
 0x50f   : > { %v3232_v29 = vpop.eup %3231 }
 0x510   : > { %v3234_v30 = vpop.eup %3233  ;;  %v2083_v31 = vsel %vm1456_vm2, %v3232_v29, 0.0 }
 0x511   : > { %2084 = vadd.xlane.f32.xlu1 %v2083_v31  ;;  %v2080_v32 = vsel %vm1456_vm2, %v3234_v30, 0.0 }
 0x512   : > { %2081 = vadd.xlane.f32.xlu0 %v2080_v32 }
 0x513   : > { %v3236_v33 = vpop.eup %3235 }
 0x514   : > { %v3238_v34 = vpop.eup %3237  ;;  %v2089_v35 = vsel %vm1456_vm2, %v3236_v33, 0.0 }
 0x515   : > { %2090 = vadd.xlane.f32.xlu1 %v2089_v35  ;;  %v2086_v37 = vsel %vm1456_vm2, %v3238_v34, 0.0 }
 0x516   : > { %2087 = vadd.xlane.f32.xlu0 %v2086_v37 }
 0x59a   : > { %v2085_v38 = vpop.xlane.xlu1 %2084 }
 0x59b   : > { %3239 = vrcp.f32 %v2085_v38  ;;  %v2082_v39 = vpop.xlane.xlu0 %2081 }
 0x59c   : > { %3241 = vrcp.f32 %v2082_v39 }
 0x59e   : > { %v2091_v40 = vpop.xlane.xlu1 %2090 }
 0x59f   : > { %3243 = vrcp.f32 %v2091_v40  ;;  %v2088_v41 = vpop.xlane.xlu0 %2087 }
 0x5a0   : > { %3245 = vrcp.f32 %v2088_v41 }
 0x5a8   : > { %v3240_v47 = vpop.eup %3239 }
 0x5a9   : > { %v3242_v48 = vpop.eup %3241  ;;  %v2097_v50 = vmul.f32 %v3240_v47, %v3232_v29 }
 0x5aa   : > { %v2096_v52 = vmul.f32 %v3242_v48, %v3234_v30 }
 0x5ab   : > { %v2101_v53 = vpack.c.bf16 %v2097_v50, %v2097_v50  ;;  %v2832_v50 = vld [vmem:[%s3965_s12] ss:$0 sm:$0xff] }
 0x5ac   : > { %v3244_v54 = vpop.eup %3243  ;;  %v2100_v55 = vpack.c.bf16 %v2096_v52, %v2096_v52 }
 0x5ad   : > { %v3246_v56 = vpop.eup %3245  ;;  %3078 = vmatmul.mubr.msk.bf16.vlgmr.msra.gmra.mxu1 %vm1456_vm2, %v2101_v53  ;;  %v2099_v12 = vmul.f32 %v3244_v54, %v3236_v33 }
 0x5ae   : > { %3072 = vmatmul.mubr.msk.bf16.vlgmr.msra.gmra.mxu0 %vm1456_vm2, %v2100_v55  ;;  %3088 = vmatpush3.bf16.msra.mxu1 %v2247_v57  ;;  %v2098_v13 = vmul.f32 %v3246_v56, %v3238_v34 }
 0x5af   : > { %3082 = vmatpush3.bf16.msra.mxu0 %v2201_v58  ;;  %3083 = vmatprep.mubr.msk.bf16.mxu0 %vm3313_vm1, %v3312_v9  ;;  %v2103_v61 = vpack.c.bf16 %v2099_v12, %v2099_v12 }
 0x5b0   : > { %3089 = vmatprep.mubr.msk.bf16.mxu1 %vm3313_vm1, %v3312_v9  ;;  %3093 = vmatprep.subr.bf16.mxu0 %v3312_v9  ;;  %v2102_v1 = vpack.c.bf16 %v2098_v13, %v2098_v13 }
 0x5b1   : > { %3099 = vmatprep.subr.bf16.mxu1 %v3312_v9 }
 0x5b5   : > { %3090 = vmatmul.mubr.msk.bf16.vlgmr.msra.gmra.mxu1 %vm1456_vm2, %v2103_v61  ;;  %v3225_v61 = vld [vmem:[%s3970_s17 + $0x18] sm:$0xff]  }
 0x5b6   : > { %3084 = vmatmul.mubr.msk.bf16.vlgmr.msra.gmra.mxu0 %vm1456_vm2, %v2102_v1  ;;  %3100 = vmatpush3.bf16.msra.mxu1 %v2347_v62  ;;  %v3226_v62 = vld [vmem:[%s3970_s17 + $0x10] sm:$0xff]  }
 0x5b7   : > { %3094 = vmatpush3.bf16.msra.mxu0 %v2301_v2  ;;  %3095 = vmatprep.mubr.msk.bf16.mxu0 %vm3313_vm1, %v3312_v9 }
 0x5b8   : > { %3101 = vmatprep.mubr.msk.bf16.mxu1 %vm3313_vm1, %v3312_v9  ;;  %3105 = vmatprep.subr.bf16.mxu0 %v3312_v9 }
 0x5b9   : > { %3111 = vmatprep.subr.bf16.mxu1 %v3312_v9 }
 0x66d   : > { %v2191_v5 = vpop.f32.mrf.mxu1 }
 0x66e   : > { %v2145_v6 = vpop.f32.mrf.mxu0  ;;  %v2290_v7 = vpack.c.bf16 %v2191_v5, %v2191_v5  ;;  %v2833_v5 = vld [vmem:[%s3966_s13] ss:$0 sm:$0xff] }
 0x66f   : > { %v2289_v14 = vpack.c.bf16 %v2145_v6, %v2145_v6  ;;  %v3079_v15 = vpop.f32.mrf.mxu1 }
 0x670   : > { %v3073_v36 = vpop.f32.mrf.mxu0  ;;  %3102 = vmatmul.mubr.msk.bf16.vlgmr.msra.gmra.mxu1 %vm1456_vm2, %v2290_v7  ;;  %v2834_v7 = vld [vmem:[%s3967_s14] ss:$0 sm:$0xff] }
 0x671   : > { %3096 = vmatmul.mubr.msk.bf16.vlgmr.msra.gmra.mxu0 %vm1456_vm2, %v2289_v14  ;;  %v2194_v17 = vpop.f32.mrf.mxu1  ;;  %3112 = vmatpush3.bf16.msra.mxu1 %v2439_v8  ;;  %v3228_v36 = vld [vmem:[%s3970_s17] sm:$0xff]  }
 0x672   : > { %3106 = vmatpush3.bf16.msra.mxu0 %v2393_v16  ;;  %v2148_v18 = vpop.f32.mrf.mxu0  ;;  %3107 = vmatprep.mubr.msk.bf16.mxu0 %vm3313_vm1, %v3312_v9  ;;  %v3227_v16 = vld [vmem:[%s3970_s17 + $0x8] sm:$0xff]   ;;  %v2835_v17 = vld [vmem:[%s3969_s16] ss:$0 sm:$0xff] }
 0x673   : > { %v3080_v19 = vpop.f32.mrf.mxu1  ;;  %3113 = vmatprep.mubr.msk.bf16.mxu1 %vm3313_vm1, %v3312_v9  ;;  %3117 = vmatprep.subr.bf16.mxu0 %v3312_v9 }
 0x674   : > { %v3074_v43 = vpop.f32.mrf.mxu0  ;;  %3125 = vmatprep.subr.bf16.mxu1 %v3312_v9 }
 0x675   : > { %v2283_v20 = vpop.f32.mrf.mxu1 }
 0x676   : > { %v2237_v21 = vpop.f32.mrf.mxu0  ;;  %v2292_v0 = vpack.c.bf16 %v2283_v20, %v2283_v20 }
 0x677   : > { %v2291_v22 = vpack.c.bf16 %v2237_v21, %v2237_v21  ;;  %v3091_v63 = vpop.f32.mrf.mxu1 }
 0x678   : > { %v3085_v23 = vpop.f32.mrf.mxu0  ;;  %3114 = vmatmul.mubr.msk.bf16.vlgmr.msra.gmra.mxu1 %vm1456_vm2, %v2292_v0 }
 0x679   : > { %3108 = vmatmul.mubr.msk.bf16.vlgmr.msra.gmra.mxu0 %vm1456_vm2, %v2291_v22  ;;  %v2286_v24 = vpop.f32.mrf.mxu1  ;;  %3133 = vmatprep.mubr.msk.bf16.mxu1 %vm3313_vm1, %v3312_v9 }
 0x67a   : > { %v2240_v25 = vpop.f32.mrf.mxu0  ;;  %3121 = vmatprep.mubr.msk.bf16.mxu0 %vm3313_vm1, %v3312_v9  ;;  %3118 = vmatpush3.bf16.msra.mxu0 %v3223_v59 }
 0x67b   : > { %v3092_v26 = vpop.f32.mrf.mxu1  ;;  %3119 = vmatprep.subr.bf16.mxu0 %v3312_v9  ;;  %3126 = vmatpush3.bf16.msra.mxu1 %v3225_v61 }
 0x67c   : > { %v3086_v11 = vpop.f32.mrf.mxu0  ;;  %3127 = vmatprep.subr.bf16.mxu1 %v3312_v9 }
 0x67e   : > { %3120 = vmatpush3.bf16.msra.mxu0 %v3224_v60 }
 0x67f   : > { %3128 = vmatpush3.bf16.msra.mxu1 %v3226_v62 }
 0x680   : > { %3129 = vmatprep.subr.bf16.mxu1 %v3312_v9 }
 0x683   : > { %3130 = vmatpush3.bf16.msra.mxu1 %v3227_v16 }
 0x684   : > { %3131 = vmatprep.subr.bf16.mxu1 %v3312_v9  ;;  %v2839_v9 = vld [vmem:[%s3971_s18] ss:$0 sm:$0xff] }
 0x687   : > { %3132 = vmatpush3.bf16.msra.mxu1 %v3228_v36 }
 0x730   : > { %v2383_v27 = vpop.f32.mrf.mxu1 }
 0x731   : > { %v2337_v10 = vpop.f32.mrf.mxu0  ;;  %v2482_v33 = vsel %vm602_vm0, %v2383_v27, 0.0 }
 0x732   : > { %v3103_v28 = vpop.f32.mrf.mxu1  ;;  %v2481_v32 = vsel %vm602_vm0, %v2337_v10, 0.0 }
 0x733   : > { %v3097_v29 = vpop.f32.mrf.mxu0  ;;  %v2483_v38 = vadd.f32 %v2482_v33, %v2481_v32 }
 0x734   : > { %v2386_v30 = vpop.f32.mrf.mxu1 }
 0x735   : > { %v2340_v31 = vpop.f32.mrf.mxu0 }
 0x736   : > { %v3104_v34 = vpop.f32.mrf.mxu1 }
 0x737   : > { %v3098_v35 = vpop.f32.mrf.mxu0 }
 0x738   : > { %v2475_v37 = vpop.f32.mrf.mxu1 }
 0x739   : > { %v2429_v39 = vpop.f32.mrf.mxu0  ;;  %v2486_v45 = vsel %vm602_vm0, %v2475_v37, 0.0 }
 0x73a   : > { %v2484_v40 = vsel %vm602_vm0, %v2429_v39, 0.0  ;;  %v3115_v41 = vpop.f32.mrf.mxu1 }
 0x73b   : > { %v2485_v42 = vadd.f32 %v2484_v40, %v2483_v38  ;;  %v3109_v44 = vpop.f32.mrf.mxu0 }
 0x73c   : > { %v2478_v46 = vpop.f32.mrf.mxu1 }
 0x73d   : > { %v2487_v47 = vadd.f32 %v2486_v45, %v2485_v42  ;;  %v2432_v48 = vpop.f32.mrf.mxu0 }
 0x73e   : > { %v3116_v49 = vpop.f32.mrf.mxu1 }
 0x73f   : > { %v2488_v52 = vadd.f32 %v3249_v51, %v2487_v47  ;;  %v3110_v53 = vpop.f32.mrf.mxu0 }
 0x741   : > { %v2496_v54 = vadd.f32 %v2832_v50, %v2488_v52 }
 0x743   : > { %v2499_v55 = vsel %vm602_vm0, %v2496_v54, 0.0 }
 0x744   : > { %2500 = vadd.xlane.f32.xlu0 %v2499_v55 }
 0x7cd   : > { %v2501_v56 = vpop.xlane.xlu0 %2500 }
 0x7ce   : > { %v2502_v57 = vmul.f32 0.03125, %v2501_v56 }
 0x7d0   : > { %v2503_v58 = vsub.f32 %v2496_v54, %v2502_v57 }
 0x7d2   : > { %v2504_v12 = vmul.f32 %v2503_v58, %v2503_v58 }
 0x7d4   : > { %v2505_v13 = vsel %vm602_vm0, %v2504_v12, 0.0 }
 0x7d5   : > { %2506 = vadd.xlane.f32.xlu1 %v2505_v13 }
 0x85e   : > { %v2507_v1 = vpop.xlane.xlu1 %2506 }
 0x85f   : > { %v2508_v2 = vmul.f32 0.03125, %v2507_v1 }
 0x861   : > { %v2509_v3 = vadd.f32 1e-12, %v2508_v2 }
 0x863   : > { %3247 = vrsqrt.f32 %v2509_v3 }
 0x870   : > { %v3248_v4 = vpop.eup %3247 }
 0x871   : > { %v2511_v6 = vmul.f32 %v3248_v4, %v2503_v58 }
 0x873   : > { %v2518_v8 = vmul.f32 %v2833_v5, %v2511_v6 }
 0x875   : > { %v2525_v14 = vadd.f32 %v2834_v7, %v2518_v8 }
 0x877   : > { %v2526_v15 = vpack.c.bf16 %v2525_v14, %v2525_v14 }
 0x879   : > { %3122 = vmatmul.mubr.msk.bf16.vlgmr.msra.gmra.mxu0 %vm602_vm0, %v2526_v15 }
 0x939   : > { %v2587_v18 = vpop.f32.mrf.mxu0 }
 0x93a   : > { %v2588_v19 = vadd.f32 %v2835_v17, %v2587_v18 }
 0x93b   : > { %v3123_v43 = vpop.f32.mrf.mxu0 }
 0x93c   : > { %v2593_v20 = vmax.f32 %v2588_v19, 0.0 }
 0x93d   : > { %v2590_v21 = vpop.f32.mrf.mxu0 }
 0x93e   : > { %v2594_v0 = vpack.c.bf16 %v2593_v20, %v2593_v20 }
 0x93f   : > { %v3124_v22 = vpop.f32.mrf.mxu0 }
 0x940   : > { %3134 = vmatmul.mubr.msk.bf16.vlgmr.msra.gmra.mxu1 %vm1757_vm6, %v2594_v0 }
 0xa00   : > { %v2671_v63 = vpop.f32.mrf.mxu1 }
 0xa01   : > { %v2672_v23 = vadd.f32 %v2839_v9, %v2671_v63 }
 0xa02   : > { %v3135_v24 = vpop.f32.mrf.mxu1 }
 0xa03   : > { %v2677_v25 = vadd.f32 %v2672_v23, %v2496_v54 }
 0xa04   : > { %v2674_v26 = vpop.f32.mrf.mxu1 }
 0xa05   : > { %2678 = vst.msk [vmem:[%s593_s27] sm:$0xff] %vm602_vm0, %v2677_v25 }
 0xa06   : > { %v3136_v11 = vpop.f32.mrf.mxu1 }
 0xa07   : > { %3263 = shalt.err (!%p3260_p3)
}
 0xa08   : > { %s3264_s23 = scalar_lea.hbm %s3911_s21, 128  ;;  %s3268_s24 = scalar_lea.hbm %s3972_s19, 256 }
 0xa09   : > { %p3265_p4 = scmp.ne.s32.totalorder %s3911_s21, %s3264_s23  ;;  %p3269_p9 = scmp.lt.s32.totalorder %s3911_s21, %s3972_s19 }
 0xa0a   : > { %p3270_p10 = scmp.lt.s32.totalorder %s3268_s24, %s3264_s23 }
 0xa0b   : > { %p3266_p7 = pnand %p3265_p4, %p3470_p5 }
 0xa0c   : > { %p3271_p11 = por %p3270_p10, %p3269_p9 }
 0xa0d   : > { %p3267_p8 = pneg %p3266_p7 }
 0xa0f   : > { %p3272_p12 = pnand %p3271_p11, %p3267_p8 }
 0xa11   : > { %3275 = shalt.err (!%p3272_p12)
}
 0xa12   : > { %3137 = dma.vmem_to_hbm [thread:$0]  (%p3470_p5), %s3913_s29, 128, %s3911_s21, %s2680_s1  }
 0xa13 PF: > { %s3997_s28 = sld [smem:[#allocation7_spill]] }
 0xa14   : > { %s3998_s25 = sld [smem:[#allocation5_spill]] }
 0xa19   : > { %p3143_p13 = scmp.ge.s32.totalorder %s3997_s28, 2 }
 0xa1a   : > { %s2705_s22 = sand.u32 1, %s3998_s25  }
 0xa1b   : > { %p3140_p0 = pnand %p3143_p13, %p3474_p6  ;;  %s2706_s27 = scalar_lea.sflag [#allocation3], %s2705_s22 }
 0xa1d   : > { %p3141_p1 = pneg %p3140_p0 }
 0xa1f   : > { %3293 = dma.done.wait (%p3141_p1), %s2706_s27, 128  }
 0xa20   : > { %3295 = vsyncadd (%p3141_p1), %s2706_s27, 4294967168  ;;  %s4000_s21 = sld [smem:[#allocation8_spill]]  ;;  %s4003_s0 = smov %s3302_s30 }
 0xa21   : > { %s4001_s23 = sld [smem:[#allocation6_spill]] }
 0xa22   : > { %s4002_s20 = sld [smem:[#allocation9_spill]] }
 0xa26   : > { %p29_p2 = scmp.ge.s32.totalorder %s4000_s21, 4  }
 0xa27   : > { %s4004_s30 = smov %s4001_s23 }
 0xa28   :  { %31 = sbr.rel (!%p29_p2) target bundleno = 8 (0x8), region = 131 }
 0xa2d   :  { %2711 = vsyncpa [#allocation3], 1 }
 0xa2e   :  { %2713 = vsyncpa [#allocation3 + $0x1], 1 }

// kernel: tpu_custom_call.1
= control target key start
LH: loop header
LB: loop body
LE: loop exit
PB: predicated region body
PF: predicated region fallthrough
CT: control target
= control target key end

     0   :  { %s3953_s0 = inlined_call_operand.vmem [shape: f32[2,8,32], index: 0, kind: input, shape index: {}]   ;;  %s3954_s1 = inlined_call_operand.vmem [shape: f32[1,32], index: 1, kind: input, shape index: {}]   ;;  %s3955_s2 = inlined_call_operand.vmem [shape: f32[1,32], index: 2, kind: input, shape index: {}]   ;;  %s3956_s3 = inlined_call_operand.vmem [shape: bf16[4,32,8], index: 3, kind: input, shape index: {}]   ;;  %s3957_s4 = inlined_call_operand.vmem [shape: f32[4,1,8], index: 4, kind: input, shape index: {}]   ;;  %s3958_s5 = inlined_call_operand.vmem [shape: f32[4,1,8], index: 5, kind: input, shape index: {}]   ;;  %s3959_s6 = inlined_call_operand.vmem [shape: bf16[4,32,8], index: 6, kind: input, shape index: {}]   ;;  %s3960_s7 = inlined_call_operand.vmem [shape: f32[4,1,8], index: 7, kind: input, shape index: {}]   ;;  %s3961_s8 = inlined_call_operand.vmem [shape: bf16[4,32,8], index: 8, kind: input, shape index: {}]   ;;  %s3962_s9 = inlined_call_operand.vmem [shape: f32[4,1,8], index: 9, kind: input, shape index: {}]   ;;  %s3963_s10 = inlined_call_operand.vmem [shape: bf16[4,16,8], index: 10, kind: input, shape index: {}]   ;;  %s3964_s11 = inlined_call_operand.vmem [shape: bf16[4,8,32], index: 11, kind: input, shape index: {}]   ;;  %s3965_s12 = inlined_call_operand.vmem [shape: f32[1,32], index: 12, kind: input, shape index: {}]   ;;  %s3966_s13 = inlined_call_operand.vmem [shape: f32[1,32], index: 13, kind: input, shape index: {}]   ;;  %s3967_s14 = inlined_call_operand.vmem [shape: f32[1,32], index: 14, kind: input, shape index: {}]   ;;  %s3968_s15 = inlined_call_operand.vmem [shape: bf16[32,64], index: 15, kind: input, shape index: {}]   ;;  %s3969_s16 = inlined_call_operand.vmem [shape: f32[1,64], index: 16, kind: input, shape index: {}]   ;;  %s3970_s17 = inlined_call_operand.vmem [shape: bf16[64,32], index: 17, kind: input, shape index: {}]   ;;  %s3971_s18 = inlined_call_operand.vmem [shape: f32[1,32], index: 18, kind: input, shape index: {}]   ;;  %s3972_s19 = inlined_call_operand.hbm [shape: f32[2,8,32], index: 19, kind: output, shape index: {}]  }
   0x1   :  { %3980 = sst [smem:[#allocation11_spill]] %s3953_s0 }
   0x2   :  { %3981 = sst [smem:[#allocation12_spill]] %s3954_s1 }
   0x3   :  { %3982 = sst [smem:[#allocation13_spill]] %s3955_s2 }
   0x4   :  { %3983 = sst [smem:[#allocation14_spill]] %s3956_s3 }
   0x5   :  { %24 = vsyncpa [#allocation3], 0 }
   0x6   :  { %26 = vsyncpa [#allocation3 + $0x1], 0  ;;  %s3432_s0 = smov 0   ;;  %s3434_s30 = smov 0  }
   0x7   :  { %s3436_s20 = smov 0   ;;  %s3438_s21 = smov 0  }
   0x8 LB: > { %3984 = sst [smem:[#allocation5_spill]] %s3298_s0  ;;  %s3453_s1 = sadd.s32 4294967295, %s3310_s21   ;;  %s3310_s21 = sphi %s3438_s21, %s4000_s21   ;;  %s3306_s20 = sphi %s3436_s20, %s4002_s20   ;;  %s3302_s30 = sphi %s3434_s30, %s4004_s30   ;;  %s3298_s0 = sphi %s3432_s0, %s4003_s0  }
   0x9   : > { %3985 = sst [smem:[#allocation6_spill]] %s3306_s20  ;;  %s2752_s22 = sadd.s32 4294967294, %s3310_s21  }
   0xa   : > { %3986 = sst [smem:[#allocation7_spill]] %s3310_s21  ;;  %s3457_s2 = sadd.s32 1, %s3310_s21  }
   0xb   : > { %3987 = sst [smem:[#allocation8_spill]] %s3457_s2  ;;  %s443_s23 = sadd.s32 1, %s3306_s20 }
   0xc   : > { %s440_s24 = ssub.s32 %s3310_s21, %s3457_s2  ;;  %p453_p0 = scmp.ne.s32.totalorder %s3306_s20, %s3302_s30 }
   0xd   : > { %p441_p1 = scmp.eq.s32.totalorder %s440_s24, 0  ;;  %p454_p2 = scmp.eq.s32.totalorder %s3453_s1, 1 }
   0xe   : > { %p459_p3 = scmp.ne.s32.totalorder %s3302_s30, %s3298_s0  ;;  %p460_p4 = scmp.eq.s32.totalorder %s2752_s22, 1 }
   0xf   : > { %s3468_s25 = scalar_select %p441_p1, %s3306_s20, %s443_s23  }
  0x10   : > { %p3470_p5 = por %p454_p2, %p453_p0  ;;  %p3474_p6 = por %p460_p4, %p459_p3 }
  0x11   : > { %3988 = sst [smem:[#allocation9_spill]] %s3468_s25  ;;  %p2755_p7 = scmp.ge.s32.totalorder %s3310_s21, 1 }
  0x12   : > { %s3990_s26 = scalar_select %p3474_p6, 1, 0 }
  0x13   : > { %p539_p8 = scmp.lt.s32.totalorder %s3310_s21, 3 }
  0x14   : > { %3991 = sst [smem:[#allocation10_spill]] %s3990_s26 }
  0x15   : > { %p540_p9 = pnand %p2755_p7, %p539_p8 }
  0x16   : > { %p594_p10 = scmp.lt.s32.totalorder (!%p540_p9), %s3453_s1, 1  ;;  %s3992_s23 = sld [smem:[#allocation11_spill]] (!%p540_p9) }
  0x17   : > { %543 = sbr.rel (%p540_p9) target bundleno = 2579 (0xa13), region = 96  ;;  %s3993_s20 = sld [smem:[#allocation14_spill]] (!%p540_p9) }
  0x18   : > { %s3996_s22 = sld [smem:[#allocation13_spill]] (!%p540_p9)  ;;  %s3317_s29 = smov (!%p540_p9), 48  }
  0x19   : > { %s3318_s0 = smov (!%p540_p9), 16   ;;  %s3319_s21 = smov (!%p540_p9), 64  }
  0x1a   : > { %s3323_s25 = smov (!%p540_p9), 83   ;;  %s3324_s26 = smov (!%p540_p9), 113  }
  0x1c   : > { %s595_s27 = scalar_select %p594_p10, %s3453_s1, 1  ;;  %vm602_vm0 = vcmask 261120   ;;  %v3312_v9 = vmov 0.0   ;;  %vm3313_vm1 = vmmov 0   ;;  %v3203_v26 = vld [vmem:[%s3959_s6 + $0x8] sm:$0xff]   ;;  %v3204_v27 = vld [vmem:[%s3959_s6 + $0x18] sm:$0xff]  }
  0x1d   : > { %s3994_s2 = smov %s3993_s20  ;;  %v3195_v7 = vld [vmem:[%s3993_s20 + $0x8] sm:$0xff]   ;;  %2925 = vmatprep.subr.bf16.mxu0 %v3312_v9  ;;  %2933 = vmatprep.subr.bf16.mxu1 %v3312_v9  ;;  %v3205_v28 = vld [vmem:[%s3959_s6] sm:$0xff]   ;;  %v3206_v29 = vld [vmem:[%s3959_s6 + $0x10] sm:$0xff]   ;;  %vm1456_vm2 = vcmask 64512   ;;  %vm2107_vm3 = vcmask 1043456   ;;  %s3322_s20 = smov 112  }
  0x1e   : > { %s2757_s28 = sshll.u32 %s595_s27, 3  ;;  %v3196_v8 = vld [vmem:[%s3994_s2 + $0x18] sm:$0xff]   ;;  %2926 = vmatpush3.bf16.msra.mxu0 %v3195_v7  ;;  %v3197_v10 = vld [vmem:[%s3994_s2] sm:$0xff]   ;;  %v3198_v11 = vld [vmem:[%s3994_s2 + $0x10] sm:$0xff]   ;;  %2929 = vmatprep.mubr.msk.bf16.mxu0 %vm3313_vm1, %v3312_v9  ;;  %s3995_s27 = sld [smem:[#allocation12_spill]]  ;;  %vm1752_vm4 = vcmask 130048  }
  0x1f   : > { %s3485_s24 = scalar_lea.vmem %s3992_s23, %s2757_s28  ;;  %2934 = vmatpush3.bf16.msra.mxu1 %v3196_v8  ;;  %2927 = vmatprep.subr.bf16.mxu0 %v3312_v9  ;;  %v2759_v18 = vld [vmem:[%s3996_s22] ss:$0 sm:$0xff]  ;;  %v3199_v21 = vld [vmem:[%s3994_s2 + $0x28] sm:$0xff]   ;;  %v3200_v22 = vld [vmem:[%s3994_s2 + $0x38] sm:$0xff]   ;;  %s3320_s28 = smov 96   ;;  %vm1755_vm5 = vcmask 392192  }
  0x20   : > { %v599_v0 = vld [vmem:[%s3485_s24] sm:$0xff]  ;;  %2935 = vmatprep.subr.bf16.mxu1 %v3312_v9  ;;  %2937 = vmatprep.mubr.msk.bf16.mxu1 %vm3313_vm1, %v3312_v9  ;;  %v3202_v25 = vld [vmem:[%s3994_s2 + $0x30] sm:$0xff]   ;;  %v3207_v30 = vld [vmem:[%s3959_s6 + $0x28] sm:$0xff]   ;;  %s3321_s22 = smov 80   ;;  %vm1757_vm6 = vcmask 523264   ;;  %vm1759_vm7 = vcmask 654336  }
  0x21   : > { %v603_v1 = vsel %vm602_vm0, %v599_v0, 0.0  ;;  %v3201_v24 = vld [vmem:[%s3994_s2 + $0x20] sm:$0xff]   ;;  %v3208_v31 = vld [vmem:[%s3959_s6 + $0x38] sm:$0xff]   ;;  %v3210_v33 = vld [vmem:[%s3959_s6 + $0x30] sm:$0xff]   ;;  %vm1761_vm8 = vcmask 785408   ;;  %vm1763_vm9 = vcmask 916480  }
  0x22   : > { %604 = vadd.xlane.f32.xlu0 %v603_v1  ;;  %2928 = vmatpush3.bf16.msra.mxu0 %v3197_v10  ;;  %v3209_v32 = vld [vmem:[%s3959_s6 + $0x20] sm:$0xff]   ;;  %v3211_v34 = vld [vmem:[%s3961_s8 + $0x8] sm:$0xff]   ;;  %v3212_v35 = vld [vmem:[%s3961_s8 + $0x18] sm:$0xff]   ;;  %s3325_s23 = smov 53  }
  0x23   : > { %2936 = vmatpush3.bf16.msra.mxu1 %v3198_v11  ;;  %2941 = vmatprep.subr.bf16.mxu0 %v3312_v9  ;;  %v3213_v36 = vld [vmem:[%s3961_s8] sm:$0xff]   ;;  %v3214_v37 = vld [vmem:[%s3961_s8 + $0x10] sm:$0xff]   ;;  %v3215_v38 = vld [vmem:[%s3961_s8 + $0x28] sm:$0xff]  }
  0x24   : > { %2949 = vmatprep.subr.bf16.mxu1 %v3312_v9  ;;  %v2758_v16 = vld [vmem:[%s3995_s27] ss:$0 sm:$0xff]  ;;  %v3216_v39 = vld [vmem:[%s3961_s8 + $0x38] sm:$0xff]   ;;  %v3218_v41 = vld [vmem:[%s3961_s8 + $0x30] sm:$0xff]   ;;  %s3316_s27 = smov 32  }
  0x25   : > { %v3217_v40 = vld [vmem:[%s3961_s8 + $0x20] sm:$0xff]   ;;  %v3220_v43 = vld [vmem:[%s3963_s10 + $0x8] sm:$0xff]   ;;  %v3221_v48 = vld [vmem:[%s3963_s10 + $0x10] sm:$0xff]  }
  0x26   : > { %v3219_v42 = vld [vmem:[%s3963_s10] sm:$0xff]   ;;  %v1512_v45 = vsel %vm1456_vm2, %v3220_v43, 0  ;;  %v3222_v49 = vld [vmem:[%s3963_s10 + $0x18] sm:$0xff]   ;;  %v1563_v58 = vsel %vm1456_vm2, %v3221_v48, 0 }
  0x27   : > { %v1461_v44 = vsel %vm1456_vm2, %v3219_v42, 0  ;;  %v2808_v46 = vld [vmem:[%s3958_s5] ss:$0 sm:$0xff]  ;;  %v2809_v47 = vld [vmem:[%s3958_s5 + $0x1] ss:$0 sm:$0xff]  ;;  %v1614_v59 = vsel %vm1456_vm2, %v3222_v49, 0 }
  0x28   : > { %v2811_v1 = vld [vmem:[%s3958_s5 + $0x3] ss:$0 sm:$0xff] }
  0x29   : > { %v2807_v48 = vld [vmem:[%s3957_s4 + $0x3] ss:$0 sm:$0xff] }
  0xab   : > { %v605_v2 = vpop.xlane.xlu0 %604 }
  0xac   : > { %v607_v3 = vmul.f32 0.03125, %v605_v2 }
  0xae   : > { %v608_v4 = vsub.f32 %v599_v0, %v607_v3  ;;  %v2810_v0 = vld [vmem:[%s3958_s5 + $0x2] ss:$0 sm:$0xff] }
  0xb0   : > { %v609_v5 = vmul.f32 %v608_v4, %v608_v4 }
  0xb2   : > { %v610_v6 = vsel %vm602_vm0, %v609_v5, 0.0 }
  0xb3   : > { %611 = vadd.xlane.f32.xlu0 %v610_v6 }
 0x13c   : > { %v612_v12 = vpop.xlane.xlu0 %611 }
 0x13d   : > { %v613_v13 = vmul.f32 0.03125, %v612_v12 }
 0x13f   : > { %v614_v14 = vadd.f32 1e-12, %v613_v13 }
 0x141   : > { %3229 = vrsqrt.f32 %v614_v14 }
 0x14e   : > { %v3230_v15 = vpop.eup %3229 }
 0x14f   : > { %v616_v17 = vmul.f32 %v3230_v15, %v608_v4  ;;  %v2772_v15 = vld [vmem:[%s3960_s7] ss:$0 sm:$0xff] }
 0x151   : > { %v623_v19 = vmul.f32 %v2758_v16, %v616_v17  ;;  %v2773_v16 = vld [vmem:[%s3960_s7 + $0x1] ss:$0 sm:$0xff] }
 0x153   : > { %v630_v20 = vadd.f32 %v2759_v18, %v623_v19 }
 0x155   : > { %v3524_v23 = vpack.c.bf16 %v630_v20, %v630_v20 }
 0x157   : > { %2930 = vmatmul.mubr.msk.bf16.vlgmr.msra.gmra.mxu0 %vm602_vm0, %v3524_v23  ;;  %2938 = vmatmul.mubr.msk.bf16.vlgmr.msra.gmra.mxu1 %vm602_vm0, %v3524_v23 }
 0x158   : > { %2942 = vmatpush3.bf16.msra.mxu0 %v3199_v21  ;;  %2950 = vmatpush3.bf16.msra.mxu1 %v3200_v22 }
 0x159   : > { %2943 = vmatprep.subr.bf16.mxu0 %v3312_v9  ;;  %2951 = vmatprep.subr.bf16.mxu1 %v3312_v9 }
 0x15a   : > { %2945 = vmatprep.mubr.msk.bf16.mxu0 %vm3313_vm1, %v3312_v9  ;;  %2953 = vmatprep.mubr.msk.bf16.mxu1 %vm3313_vm1, %v3312_v9 }
 0x15c   : > { %2944 = vmatpush3.bf16.msra.mxu0 %v3201_v24  ;;  %2952 = vmatpush3.bf16.msra.mxu1 %v3202_v25  ;;  %v2804_v25 = vld [vmem:[%s3957_s4] ss:$0 sm:$0xff] }
 0x15d   : > { %2957 = vmatprep.subr.bf16.mxu0 %v3312_v9  ;;  %2965 = vmatprep.subr.bf16.mxu1 %v3312_v9 }
 0x15f   : > { %2946 = vmatmul.mubr.msk.bf16.vlgmr.msra.gmra.mxu0 %vm602_vm0, %v3524_v23  ;;  %2954 = vmatmul.mubr.msk.bf16.vlgmr.msra.gmra.mxu1 %vm602_vm0, %v3524_v23 }
 0x160   : > { %2958 = vmatpush3.bf16.msra.mxu0 %v3203_v26  ;;  %2966 = vmatpush3.bf16.msra.mxu1 %v3204_v27  ;;  %v2805_v26 = vld [vmem:[%s3957_s4 + $0x1] ss:$0 sm:$0xff] }
 0x161   : > { %2959 = vmatprep.subr.bf16.mxu0 %v3312_v9  ;;  %2967 = vmatprep.subr.bf16.mxu1 %v3312_v9 }
 0x162   : > { %2961 = vmatprep.mubr.msk.bf16.mxu0 %vm3313_vm1, %v3312_v9  ;;  %2969 = vmatprep.mubr.msk.bf16.mxu1 %vm3313_vm1, %v3312_v9 }
 0x164   : > { %2960 = vmatpush3.bf16.msra.mxu0 %v3205_v28  ;;  %2968 = vmatpush3.bf16.msra.mxu1 %v3206_v29 }
 0x165   : > { %2973 = vmatprep.subr.bf16.mxu0 %v3312_v9  ;;  %2981 = vmatprep.subr.bf16.mxu1 %v3312_v9 }
 0x167   : > { %2962 = vmatmul.mubr.msk.bf16.vlgmr.msra.gmra.mxu0 %vm602_vm0, %v3524_v23  ;;  %2970 = vmatmul.mubr.msk.bf16.vlgmr.msra.gmra.mxu1 %vm602_vm0, %v3524_v23 }
 0x168   : > { %2974 = vmatpush3.bf16.msra.mxu0 %v3207_v30  ;;  %2982 = vmatpush3.bf16.msra.mxu1 %v3208_v31 }
 0x169   : > { %2975 = vmatprep.subr.bf16.mxu0 %v3312_v9  ;;  %2983 = vmatprep.subr.bf16.mxu1 %v3312_v9 }
 0x16a   : > { %2977 = vmatprep.mubr.msk.bf16.mxu0 %vm3313_vm1, %v3312_v9  ;;  %2985 = vmatprep.mubr.msk.bf16.mxu1 %vm3313_vm1, %v3312_v9 }
 0x16c   : > { %2976 = vmatpush3.bf16.msra.mxu0 %v3209_v32  ;;  %2984 = vmatpush3.bf16.msra.mxu1 %v3210_v33  ;;  %v2774_v33 = vld [vmem:[%s3960_s7 + $0x2] ss:$0 sm:$0xff] }
 0x16d   : > { %2989 = vmatprep.subr.bf16.mxu0 %v3312_v9  ;;  %2997 = vmatprep.subr.bf16.mxu1 %v3312_v9 }
 0x16f   : > { %2978 = vmatmul.mubr.msk.bf16.vlgmr.msra.gmra.mxu0 %vm602_vm0, %v3524_v23  ;;  %2986 = vmatmul.mubr.msk.bf16.vlgmr.msra.gmra.mxu1 %vm602_vm0, %v3524_v23 }
 0x170   : > { %2990 = vmatpush3.bf16.msra.mxu0 %v3211_v34  ;;  %2998 = vmatpush3.bf16.msra.mxu1 %v3212_v35  ;;  %v2775_v34 = vld [vmem:[%s3960_s7 + $0x3] ss:$0 sm:$0xff] }
 0x171   : > { %2991 = vmatprep.subr.bf16.mxu0 %v3312_v9  ;;  %2999 = vmatprep.subr.bf16.mxu1 %v3312_v9 }
 0x172   : > { %2993 = vmatprep.mubr.msk.bf16.mxu0 %vm3313_vm1, %v3312_v9  ;;  %3001 = vmatprep.mubr.msk.bf16.mxu1 %vm3313_vm1, %v3312_v9 }
 0x174   : > { %2992 = vmatpush3.bf16.msra.mxu0 %v3213_v36  ;;  %3000 = vmatpush3.bf16.msra.mxu1 %v3214_v37 }
 0x175   : > { %3005 = vmatprep.subr.bf16.mxu0 %v3312_v9  ;;  %3013 = vmatprep.subr.bf16.mxu1 %v3312_v9 }
 0x177   : > { %2994 = vmatmul.mubr.msk.bf16.vlgmr.msra.gmra.mxu0 %vm602_vm0, %v3524_v23  ;;  %3002 = vmatmul.mubr.msk.bf16.vlgmr.msra.gmra.mxu1 %vm602_vm0, %v3524_v23 }
 0x178   : > { %3006 = vmatpush3.bf16.msra.mxu0 %v3215_v38  ;;  %3014 = vmatpush3.bf16.msra.mxu1 %v3216_v39 }
 0x179   : > { %3007 = vmatprep.subr.bf16.mxu0 %v3312_v9  ;;  %3015 = vmatprep.subr.bf16.mxu1 %v3312_v9 }
 0x17a   : > { %3009 = vmatprep.mubr.msk.bf16.mxu0 %vm3313_vm1, %v3312_v9  ;;  %3017 = vmatprep.mubr.msk.bf16.mxu1 %vm3313_vm1, %v3312_v9 }
 0x17c   : > { %3008 = vmatpush3.bf16.msra.mxu0 %v3217_v40  ;;  %3016 = vmatpush3.bf16.msra.mxu1 %v3218_v41 }
 0x17d   : > { %3021 = vmatprep.subr.bf16.mxu0 %v3312_v9  ;;  %3027 = vmatprep.subr.bf16.mxu1 %v3312_v9 }
 0x17f   : > { %3010 = vmatmul.mubr.msk.bf16.vlgmr.msra.gmra.mxu0 %vm602_vm0, %v3524_v23  ;;  %3018 = vmatmul.mubr.msk.bf16.vlgmr.msra.gmra.mxu1 %vm602_vm0, %v3524_v23 }
 0x180   : > { %3022 = vmatpush3.bf16.xpose.msra.mxu0 %v1461_v44  ;;  %3028 = vmatpush3.bf16.xpose.msra.mxu1 %v1512_v45 }
 0x181   : > { %3023 = vmatprep.mubr.msk.bf16.mxu0 %vm3313_vm1, %v3312_v9  ;;  %3029 = vmatprep.mubr.msk.bf16.mxu1 %vm3313_vm1, %v3312_v9 }
 0x182   : > { %3033 = vmatprep.subr.bf16.mxu0 %v3312_v9  ;;  %3039 = vmatprep.subr.bf16.mxu1 %v3312_v9 }
 0x217   : > { %v697_v50 = vpop.f32.mrf.mxu0  ;;  %v749_v51 = vpop.f32.mrf.mxu1 }
 0x218   : > { %v1427_v52 = vadd.f32 %v2808_v46, %v697_v50  ;;  %v1428_v53 = vadd.f32 %v2809_v47, %v749_v51  ;;  %v1391_v35 = vadd.f32 %v2804_v25, %v697_v50  ;;  %v1392_v36 = vadd.f32 %v2805_v26, %v749_v51  ;;  %v2806_v47 = vld [vmem:[%s3957_s4 + $0x2] ss:$0 sm:$0xff] }
 0x219   : > { %v2931_v54 = vpop.f32.mrf.mxu0  ;;  %v2939_v55 = vpop.f32.mrf.mxu1 }
 0x21a   : > { %v1431_v56 = vpack.c.bf16 %v1427_v52, %v1427_v52  ;;  %v1432_v57 = vpack.c.bf16 %v1428_v53, %v1428_v53  ;;  %v1395_v43 = vpack.c.bf16 %v1391_v35, %v1391_v35  ;;  %v1396_v44 = vpack.c.bf16 %v1392_v36, %v1392_v36  ;;  %v2788_v55 = vld [vmem:[%s3962_s9] ss:$0 sm:$0xff] }
 0x21b   : > { %v700_v60 = vpop.f32.mrf.mxu0  ;;  %v752_v61 = vpop.f32.mrf.mxu1 }
 0x21c   : > { %3024 = vmatmul.mubr.msk.bf16.vlgmr.msra.gmra.mxu0 %vm1456_vm2, %v1431_v56  ;;  %3030 = vmatmul.mubr.msk.bf16.vlgmr.msra.gmra.mxu1 %vm1456_vm2, %v1432_v57  ;;  %v2789_v56 = vld [vmem:[%s3962_s9 + $0x1] ss:$0 sm:$0xff] }
 0x21d   : > { %3034 = vmatpush3.bf16.xpose.msra.mxu0 %v1563_v58  ;;  %3040 = vmatpush3.bf16.xpose.msra.mxu1 %v1614_v59  ;;  %v2932_v62 = vpop.f32.mrf.mxu0  ;;  %v2940_v63 = vpop.f32.mrf.mxu1 }
 0x21e   : > { %3035 = vmatprep.mubr.msk.bf16.mxu0 %vm3313_vm1, %v3312_v9  ;;  %3041 = vmatprep.mubr.msk.bf16.mxu1 %vm3313_vm1, %v3312_v9 }
 0x21f   : > { %v3684_v2 = vpop.f32.mrf.mxu0  ;;  %v3686_v3 = vpop.f32.mrf.mxu1  ;;  %3045 = vmatprep.subr.bf16.mxu0 %v3312_v9  ;;  %3051 = vmatprep.subr.bf16.mxu1 %v3312_v9 }
 0x220   : > { %v1429_v4 = vadd.f32 %v2810_v0, %v3684_v2  ;;  %v1430_v5 = vadd.f32 %v2811_v1, %v3686_v3  ;;  %v1393_v57 = vadd.f32 %v2806_v47, %v3684_v2  ;;  %v1394_v58 = vadd.f32 %v2807_v48, %v3686_v3 }
 0x221   : > { %v2947_v6 = vpop.f32.mrf.mxu0  ;;  %v2955_v7 = vpop.f32.mrf.mxu1 }
 0x222   : > { %v1433_v8 = vpack.c.bf16 %v1429_v4, %v1429_v4  ;;  %v1434_v10 = vpack.c.bf16 %v1430_v5, %v1430_v5  ;;  %v1397_v1 = vpack.c.bf16 %v1393_v57, %v1393_v57  ;;  %v1398_v2 = vpack.c.bf16 %v1394_v58, %v1394_v58 }
 0x223   : > { %v804_v11 = vpop.f32.mrf.mxu0  ;;  %v856_v12 = vpop.f32.mrf.mxu1 }
 0x224   : > { %3036 = vmatmul.mubr.msk.bf16.vlgmr.msra.gmra.mxu0 %vm1456_vm2, %v1433_v8  ;;  %3042 = vmatmul.mubr.msk.bf16.vlgmr.msra.gmra.mxu1 %vm1456_vm2, %v1434_v10 }
 0x225   : > { %v2948_v13 = vpop.f32.mrf.mxu0  ;;  %v2956_v14 = vpop.f32.mrf.mxu1  ;;  %3047 = vmatprep.mubr.msk.bf16.mxu0 %vm3313_vm1, %v3312_v9  ;;  %3053 = vmatprep.mubr.msk.bf16.mxu1 %vm3313_vm1, %v3312_v9 }
 0x227   : > { %v949_v17 = vpop.f32.mrf.mxu0  ;;  %v1001_v18 = vpop.f32.mrf.mxu1 }
 0x228   : > { %v950_v19 = vadd.f32 %v2772_v15, %v949_v17  ;;  %v1002_v20 = vadd.f32 %v2773_v16, %v1001_v18 }
 0x229   : > { %v2963_v21 = vpop.f32.mrf.mxu0  ;;  %v2971_v22 = vpop.f32.mrf.mxu1 }
 0x22a   : > { %v1435_v23 = vpack.c.bf16 %v950_v19, %v950_v19  ;;  %v1436_v24 = vpack.c.bf16 %v1002_v20, %v1002_v20  ;;  %v3314_v20 = vmov 1983009808   ;;  %v1661_v22 = vlaneseq }
 0x22b   : > { %v952_v27 = vpop.f32.mrf.mxu0  ;;  %v1004_v28 = vpop.f32.mrf.mxu1  ;;  %v1659_v21 = vunpack.c.l.s4 %v3314_v20 }
 0x22c   : > { %v1876_v29 = vsel %vm1456_vm2, %v1435_v23, 0  ;;  %v1922_v30 = vsel %vm1456_vm2, %v1436_v24, 0  ;;  %v3315_v27 = vmov 1934713408  }
 0x22d   : > { %v2964_v31 = vpop.f32.mrf.mxu0  ;;  %v2972_v32 = vpop.f32.mrf.mxu1  ;;  %3046 = vmatpush3.bf16.xpose.msra.mxu0 %v1876_v29  ;;  %3052 = vmatpush3.bf16.xpose.msra.mxu1 %v1922_v30  ;;  %v1691_v28 = vunpack.c.l.s4 %v3315_v27  ;;  %v1660_v29 = vunpack.c.0.s8 %v1659_v21  ;;  %v1662_v30 = vshrl.u32 %v1661_v22, 7 }
 0x22e   : > { %3057 = vmatprep.subr.bf16.mxu0 %v3312_v9  ;;  %3063 = vmatprep.subr.bf16.mxu1 %v3312_v9 }
 0x22f   : > { %v1053_v37 = vpop.f32.mrf.mxu0  ;;  %v1105_v38 = vpop.f32.mrf.mxu1  ;;  %v1692_v35 = vunpack.c.0.s8 %v1691_v28  ;;  %v3758_v36 = vsub.s32 %v1660_v29, %v1662_v30 }
 0x230   : > { %v1054_v39 = vadd.f32 %v2774_v33, %v1053_v37  ;;  %v1106_v40 = vadd.f32 %v2775_v34, %v1105_v38 }
 0x231   : > { %v2979_v41 = vpop.f32.mrf.mxu0  ;;  %v2987_v42 = vpop.f32.mrf.mxu1 }
 0x232   : > { %v1437_v45 = vpack.c.bf16 %v1054_v39, %v1054_v39  ;;  %v1438_v46 = vpack.c.bf16 %v1106_v40, %v1106_v40 }
 0x233   : > { %v1056_v49 = vpop.f32.mrf.mxu0  ;;  %v1108_v50 = vpop.f32.mrf.mxu1 }
 0x234   : > { %v1968_v51 = vsel %vm1456_vm2, %v1437_v45, 0  ;;  %v2014_v52 = vsel %vm1456_vm2, %v1438_v46, 0  ;;  %3048 = vmatmul.mubr.msk.bf16.vlgmr.msra.gmra.mxu0 %vm1456_vm2, %v1395_v43  ;;  %3054 = vmatmul.mubr.msk.bf16.vlgmr.msra.gmra.mxu1 %vm1456_vm2, %v1396_v44  ;;  %v3760_v43 = vsub.s32 %v1692_v35, %v1662_v30 }
 0x235   : > { %v2980_v53 = vpop.f32.mrf.mxu0  ;;  %v2988_v54 = vpop.f32.mrf.mxu1  ;;  %3058 = vmatpush3.bf16.xpose.msra.mxu0 %v1968_v51  ;;  %3064 = vmatpush3.bf16.xpose.msra.mxu1 %v2014_v52 }
 0x236   : > { %3059 = vmatprep.mubr.msk.bf16.mxu0 %vm3313_vm1, %v3312_v9  ;;  %3065 = vmatprep.mubr.msk.bf16.mxu1 %vm3313_vm1, %v3312_v9 }
 0x237   : > { %v1201_v59 = vpop.f32.mrf.mxu0  ;;  %v1253_v60 = vpop.f32.mrf.mxu1  ;;  %3069 = vmatprep.subr.bf16.mxu0 %v3312_v9  ;;  %3075 = vmatprep.subr.bf16.mxu1 %v3312_v9 }
 0x238   : > { %v1202_v61 = vadd.f32 %v2788_v55, %v1201_v59  ;;  %v1254_v62 = vadd.f32 %v2789_v56, %v1253_v60 }
 0x239   : > { %v2995_v63 = vpop.f32.mrf.mxu0  ;;  %v3003_v0 = vpop.f32.mrf.mxu1 }
 0x23a   : > { %v1439_v3 = vpack.c.bf16 %v1202_v61, %v1202_v61  ;;  %v1440_v4 = vpack.c.bf16 %v1254_v62, %v1254_v62 }
 0x23b   : > { %v1204_v5 = vpop.f32.mrf.mxu0  ;;  %v1256_v6 = vpop.f32.mrf.mxu1 }
 0x23c   : > { %v2109_v7 = vsel %vm2107_vm3, %v1439_v3, 0  ;;  %v2155_v8 = vsel %vm2107_vm3, %v1440_v4, 0  ;;  %3060 = vmatmul.mubr.msk.bf16.vlgmr.msra.gmra.mxu0 %vm1456_vm2, %v1397_v1  ;;  %3066 = vmatmul.mubr.msk.bf16.vlgmr.msra.gmra.mxu1 %vm1456_vm2, %v1398_v2 }
 0x23d   : > { %v2996_v10 = vpop.f32.mrf.mxu0  ;;  %v3004_v11 = vpop.f32.mrf.mxu1  ;;  %3070 = vmatpush3.bf16.msra.mxu0 %v2109_v7  ;;  %3076 = vmatpush3.bf16.msra.mxu1 %v2155_v8 }
 0x23e   : > { %3071 = vmatprep.mubr.msk.bf16.mxu0 %vm3313_vm1, %v3312_v9  ;;  %3077 = vmatprep.mubr.msk.bf16.mxu1 %vm3313_vm1, %v3312_v9 }
 0x23f   : > { %v3752_v12 = vpop.f32.mrf.mxu0  ;;  %v3754_v13 = vpop.f32.mrf.mxu1  ;;  %3081 = vmatprep.subr.bf16.mxu0 %v3312_v9  ;;  %3087 = vmatprep.subr.bf16.mxu1 %v3312_v9 }
 0x241   : > { %v3011_v14 = vpop.f32.mrf.mxu0  ;;  %v3019_v15 = vpop.f32.mrf.mxu1 }
 0x243   : > { %v1308_v16 = vpop.f32.mrf.mxu0  ;;  %v1360_v17 = vpop.f32.mrf.mxu1 }
 0x245   : > { %v3012_v18 = vpop.f32.mrf.mxu0  ;;  %v3020_v19 = vpop.f32.mrf.mxu1 }
 0x2dc   : > { %v1497_v23 = vpop.f32.mrf.mxu0  ;;  %v1548_v24 = vpop.f32.mrf.mxu1 }
 0x2de   : > { %v3025_v25 = vpop.f32.mrf.mxu0  ;;  %v3031_v26 = vpop.f32.mrf.mxu1 }
 0x2e0   : > { %v1500_v31 = vpop.f32.mrf.mxu0  ;;  %v1551_v32 = vpop.f32.mrf.mxu1 }
 0x2e2   : > { %v3026_v33 = vpop.f32.mrf.mxu0  ;;  %v3032_v34 = vpop.f32.mrf.mxu1 }
 0x2e4   : > { %v1599_v37 = vpop.f32.mrf.mxu0  ;;  %v1650_v38 = vpop.f32.mrf.mxu1 }
 0x2e5   : > { %v1656_v39 = vcombine.low %v1497_v23, %v1599_v37  ;;  %v1672_v40 = vcombine.low %v1548_v24, %v1650_v38  ;;  %v1657_v44 = vcombine.high %v1497_v23, %v1599_v37  ;;  %v1673_v46 = vcombine.high %v1548_v24, %v1650_v38 }
 0x2e6   : > { %v3037_v41 = vpop.f32.mrf.mxu0  ;;  %v3043_v42 = vpop.f32.mrf.mxu1 }
 0x2e7   : > { %v1664_v45 = vrot.slane %v1656_v39, %v3758_v36  ;;  %v1680_v47 = vrot.slane %v1672_v40, %v3758_v36  ;;  %v1671_v54 = vrot.slane %v1657_v44, %v3758_v36  ;;  %v1687_v55 = vrot.slane %v1673_v46, %v3758_v36 }
 0x2e8   : > { %v1602_v48 = vpop.f32.mrf.mxu0  ;;  %v1653_v49 = vpop.f32.mrf.mxu1 }
 0x2e9   : > { %v1688_v50 = vcombine.low %v1664_v45, %v1680_v47  ;;  %v1689_v51 = vcombine.high %v1664_v45, %v1680_v47  ;;  %v1704_v59 = vcombine.low %v1671_v54, %v1687_v55  ;;  %v1705_v61 = vcombine.high %v1671_v54, %v1687_v55 }
 0x2ea   : > { %v3038_v52 = vpop.f32.mrf.mxu0  ;;  %v3044_v53 = vpop.f32.mrf.mxu1 }
 0x2eb   : > { %v1703_v56 = vrot.slane %v1689_v51, %v3760_v43  ;;  %v1696_v57 = vrot.slane %v1688_v50, %v3760_v43  ;;  %v1712_v62 = vrot.slane %v1704_v59, %v3760_v43  ;;  %v1719_v3 = vrot.slane %v1705_v61, %v3760_v43 }
 0x2ed   : > { %1729 = vrot.lane.b32.xlu1 %v1703_v56, %s3316_s27  ;;  %v1721_v58 = vcombine.high %v1703_v56, %v3312_v9  ;;  %v1720_v60 = vcombine.high %v1696_v57, %v3312_v9  ;;  %v1722_v8 = vcombine.high %v1712_v62, %v3312_v9  ;;  %v1723_v16 = vcombine.high %v1719_v3, %v3312_v9  ;;  %s3326_s27 = smov 98  }
 0x2ef   : > { %1733 = vrot.lane.b32.xlu0 %v1721_v58, %s3317_s29  ;;  %s3327_s29 = smov 23  }
 0x2f1   : > { %1725 = vrot.lane.b32.xlu1 %v1720_v60, %s3318_s0  ;;  %s3328_s0 = smov 68  }
 0x2f4   : > { %v3771_v63 = vpop.f32.mrf.mxu0  ;;  %v3773_v0 = vpop.f32.mrf.mxu1 }
 0x2f5   : > { %1737 = vrot.lane.b32.xlu1 %v1712_v62, %s3319_s21  ;;  %s3329_s21 = smov 38  }
 0x2f6   : > { %v3049_v1 = vpop.f32.mrf.mxu0  ;;  %v3055_v2 = vpop.f32.mrf.mxu1 }
 0x2f8   : > { %v1915_v4 = vpop.f32.mrf.mxu0  ;;  %v1961_v5 = vpop.f32.mrf.mxu1 }
 0x2f9   : > { %1745 = vrot.lane.b32.xlu1 %v1719_v3, %s3320_s28  ;;  %s3330_s28 = smov 121  }
 0x2fa   : > { %v3050_v6 = vpop.f32.mrf.mxu0  ;;  %v3056_v7 = vpop.f32.mrf.mxu1 }
 0x2fc   : > { %v3777_v10 = vpop.f32.mrf.mxu0  ;;  %v3779_v11 = vpop.f32.mrf.mxu1 }
 0x2fd   : > { %1741 = vrot.lane.b32.xlu1 %v1722_v8, %s3321_s22  ;;  %s591_s22 = sand.u32 1, %s3302_s30  }
 0x2fe   : > { %v3061_v14 = vpop.f32.mrf.mxu0  ;;  %v3067_v15 = vpop.f32.mrf.mxu1 }
 0x300   : > { %v2007_v17 = vpop.f32.mrf.mxu0  ;;  %v2053_v18 = vpop.f32.mrf.mxu1 }
 0x301   : > { %1749 = vrot.lane.b32.xlu1 %v1723_v16, %s3322_s20  ;;  %s2756_s20 = sshll.u32 %s591_s22, 3 }
 0x302   : > { %v3062_v19 = vpop.f32.mrf.mxu0  ;;  %v3068_v20 = vpop.f32.mrf.mxu1 }
 0x35f   : > { %v1730_v21 = vpop.permute.xlu1 %1729 }
 0x361   : > { %v1734_v26 = vpop.permute.xlu0 %1733 }
 0x363   : > { %v1726_v22 = vpop.permute.xlu1 %1725 }
 0x364   : > { %v1753_v23 = vsel %vm1752_vm4, %v1696_v57, %v1726_v22 }
 0x365   : > { %v1754_v25 = vsel %vm602_vm0, %v1753_v23, %v1730_v21 }
 0x366   : > { %v1756_v28 = vsel %vm1755_vm5, %v1754_v25, %v1734_v26 }
 0x367   : > { %v1738_v24 = vpop.permute.xlu1 %1737 }
 0x368   : > { %v1758_v29 = vsel %vm1757_vm6, %v1756_v28, %v1738_v24 }
 0x36b   : > { %v1746_v27 = vpop.permute.xlu1 %1745 }
 0x36f   : > { %v1742_v30 = vpop.permute.xlu1 %1741 }
 0x370   : > { %v1760_v31 = vsel %vm1759_vm7, %v1758_v29, %v1742_v30 }
 0x371   : > { %v1762_v32 = vsel %vm1761_vm8, %v1760_v31, %v1746_v27 }
 0x373   : > { %v1750_v33 = vpop.permute.xlu1 %1749 }
 0x374   : > { %v1764_v34 = vsel %vm1763_vm9, %v1762_v32, %v1750_v33 }
 0x375   : > { %1770 = vrot.lane.b32.xlu0 %v1764_v34, %s3323_s25  ;;  %1766 = vrot.lane.b32.xlu1 %v1764_v34, %s3324_s26 }
 0x379   : > { %1774 = vrot.lane.b32.xlu0 %v1764_v34, %s3325_s23  ;;  %1768 = vrot.lane.b32.xlu1 %v1764_v34, %s3326_s27  ;;  %s2846_s23 = sshll.u32 %s3453_s1, 7  ;;  %s593_s27 = scalar_lea.vmem [#allocation2], %s2756_s20 }
 0x37a   : > { %s2680_s1 = scalar_lea.sflag [#allocation3], %s591_s22  ;;  %s3331_s20 = smov [#allocation2]  }
 0x37b   : > { %s3254_s25 = sshll.u32 %s3331_s20, 4  ;;  %s3255_s25 = int_to_ptr.vmem [resolvable:$false] %s3254_s25 }
 0x37c   : > { %s3256_s26 = scalar_lea.vmem %s3255_s25, 256 }
 0x37d   : > { %1778 = vrot.lane.b32.xlu0 %v1764_v34, %s3327_s29  ;;  %1772 = vrot.lane.b32.xlu1 %v1764_v34, %s3328_s0  ;;  %s2693_s29 = sshll.u32 %s593_s27, 4  ;;  %s3913_s29 = int_to_ptr.vmem [resolvable:$true] %s2693_s29 }
 0x37e   : > { %p3257_p0 = scmp.lt.s32.totalorder %s3913_s29, %s3255_s25 }
 0x381   : > { %1776 = vrot.lane.b32.xlu1 %v1764_v34, %s3329_s21  ;;  %s3911_s21 = scalar_lea.hbm %s3972_s19, %s2846_s23 }
 0x385   : > { %1780 = vrot.lane.b32.xlu1 %v1764_v34, %s3330_s28 }
 0x3e7   : > { %v1771_v35 = vpop.permute.xlu0 %1770  ;;  %v1767_v37 = vpop.permute.xlu1 %1766 }
 0x3e8   : > { %1782 = vrot.lane.b32.xlu0 %v1767_v37, %s3330_s28 }
 0x3eb   : > { %v1769_v38 = vpop.permute.xlu1 %1768  ;;  %v1775_v39 = vpop.permute.xlu0 %1774 }
 0x3ec   : > { %1786 = vrot.lane.b32.xlu0 %v1771_v35, %s3330_s28  ;;  %1784 = vrot.lane.b32.xlu1 %v1769_v38, %s3330_s28 }
 0x3ef   : > { %v1773_v40 = vpop.permute.xlu1 %1772  ;;  %v1779_v41 = vpop.permute.xlu0 %1778 }
 0x3f0   : > { %1790 = vrot.lane.b32.xlu0 %v1775_v39, %s3330_s28  ;;  %1788 = vrot.lane.b32.xlu1 %v1773_v40, %s3330_s28 }
 0x3f3   : > { %v1777_v42 = vpop.permute.xlu1 %1776 }
 0x3f4   : > { %1794 = vrot.lane.b32.xlu0 %v1779_v41, %s3330_s28  ;;  %1792 = vrot.lane.b32.xlu1 %v1777_v42, %s3330_s28  ;;  %v2791_v42 = vld [vmem:[%s3962_s9 + $0x3] ss:$0 sm:$0xff]  ;;  %s3250_s28 = scalar_lea.vmem %s3913_s29, 128 }
 0x3f5   : > { %p3251_p11 = scmp.ne.s32.totalorder %s3913_s29, %s3250_s28  ;;  %p3258_p1 = scmp.lt.s32.totalorder %s3256_s26, %s3250_s28 }
 0x3f7   : > { %v1781_v44 = vpop.permute.xlu1 %1780  ;;  %p3252_p12 = pnand %p3251_p11, %p3470_p5  ;;  %p3259_p2 = por %p3258_p1, %p3257_p0 }
 0x3f9   : > { %p3253_p13 = pneg %p3252_p12 }
 0x3fb   : > { %p3260_p3 = pnand %p3259_p2, %p3253_p13 }
 0x45a   : > { %v1783_v45 = vpop.permute.xlu0 %1782 }
 0x45e   : > { %v1787_v46 = vpop.permute.xlu0 %1786  ;;  %v1785_v47 = vpop.permute.xlu1 %1784 }
 0x45f   : > { %v1812_v48 = vcombine.low %v1783_v45, %v1787_v46  ;;  %v1804_v49 = vcombine.low %v1781_v44, %v1785_v47  ;;  %v2790_v44 = vld [vmem:[%s3962_s9 + $0x2] ss:$0 sm:$0xff]  ;;  %v1358_v45 = vadd.f32 %v2791_v42, %v3754_v13 }
 0x460   : > { %v1306_v46 = vadd.f32 %v2790_v44, %v3752_v12 }
 0x461   : > { %v1819_v52 = vrot.slane %v1812_v48, %v3758_v36  ;;  %v1811_v53 = vrot.slane %v1804_v49, %v3758_v36  ;;  %v1442_v49 = vpack.c.bf16 %v1358_v45, %v1358_v45 }
 0x462   : > { %v1791_v50 = vpop.permute.xlu0 %1790  ;;  %v1789_v51 = vpop.permute.xlu1 %1788 }
 0x463   : > { %v1836_v58 = vcombine.low %v1811_v53, %v1819_v52  ;;  %v1837_v59 = vcombine.high %v1811_v53, %v1819_v52 }
 0x465   : > { %v1844_v2 = vrot.slane %v1836_v58, %v3760_v43  ;;  %v1851_v4 = vrot.slane %v1837_v59, %v3760_v43  ;;  %v2294_v59 = vld [vmem:[%s3964_s11 + $0x4] sm:$0xf] }
 0x466   : > { %v1795_v54 = vpop.permute.xlu0 %1794  ;;  %v1793_v55 = vpop.permute.xlu1 %1792 }
 0x467   : > { %v1828_v56 = vcombine.low %v1791_v50, %v1795_v54  ;;  %v1820_v57 = vcombine.low %v1789_v51, %v1793_v55  ;;  %v1441_v51 = vpack.c.bf16 %v1306_v46, %v1306_v46 }
 0x469   : > { %v1835_v60 = vrot.slane %v1828_v56, %v3758_v36  ;;  %v1827_v61 = vrot.slane %v1820_v57, %v3758_v36  ;;  %v2247_v57 = vsel %vm2107_vm3, %v1442_v49, 0  ;;  %v2201_v58 = vsel %vm2107_vm3, %v1441_v51, 0  ;;  %v3249_v51 = vld [vmem:[%s3485_s24] sm:$0xff] }
 0x46b   : > { %v1852_v62 = vcombine.low %v1827_v61, %v1835_v60  ;;  %v1853_v1 = vcombine.high %v1827_v61, %v1835_v60  ;;  %v2293_v60 = vld [vmem:[%s3964_s11] sm:$0xf] }
 0x46d   : > { %v1860_v3 = vrot.slane %v1852_v62, %v3760_v43  ;;  %v1867_v5 = vrot.slane %v1853_v1, %v3760_v43  ;;  %v2347_v62 = vsel %vm2107_vm3, %v2294_v59, 0  ;;  %v3223_v59 = vld [vmem:[%s3968_s15 + $0x8] sm:$0xff]  }
 0x46f   : > { %v1869_v6 = vcombine.high %v1844_v2, %v1860_v3  ;;  %v1868_v7 = vcombine.low %v1844_v2, %v1860_v3  ;;  %v1871_v8 = vcombine.high %v1851_v4, %v1867_v5  ;;  %v1870_v14 = vcombine.low %v1851_v4, %v1867_v5  ;;  %v2296_v3 = vld [vmem:[%s3964_s11 + $0xc] sm:$0xf]  ;;  %v2295_v4 = vld [vmem:[%s3964_s11 + $0x8] sm:$0xf] }
 0x470   : > { %v2301_v2 = vsel %vm2107_vm3, %v2293_v60, 0  ;;  %v3224_v60 = vld [vmem:[%s3968_s15] sm:$0xff]  }
 0x471   : > { %v1959_v15 = vadd.f32 %v3773_v0, %v1869_v6  ;;  %v1913_v16 = vadd.f32 %v3771_v63, %v1868_v7  ;;  %v2051_v18 = vadd.f32 %v3779_v11, %v1871_v8  ;;  %v2005_v19 = vadd.f32 %v3777_v10, %v1870_v14 }
 0x472   : > { %v2439_v8 = vsel %vm2107_vm3, %v2296_v3, 0 }
 0x473   : > { %v2059_v36 = vsel %vm1456_vm2, %v1959_v15, -inf  ;;  %v2056_v17 = vsel %vm1456_vm2, %v1913_v16, -inf  ;;  %v2065_v43 = vsel %vm1456_vm2, %v2051_v18, -inf  ;;  %v2062_v20 = vsel %vm1456_vm2, %v2005_v19, -inf }
 0x474   : > { %2060 = vmax.xlane.f32.xlu0 %v2059_v36  ;;  %2057 = vmax.xlane.f32.xlu1 %v2056_v17 }
 0x478   : > { %2066 = vmax.xlane.f32.xlu1 %v2065_v43  ;;  %2063 = vmax.xlane.f32.xlu0 %v2062_v20 }
 0x4fd   : > { %v2061_v21 = vpop.xlane.xlu0 %2060  ;;  %v2058_v0 = vpop.xlane.xlu1 %2057 }
 0x4fe   : > { %v2069_v22 = vsub.f32 %v1959_v15, %v2061_v21  ;;  %v2068_v63 = vsub.f32 %v1913_v16, %v2058_v0  ;;  %v2393_v16 = vsel %vm2107_vm3, %v2295_v4, 0 }
 0x500   : > { %v2074_v23 = vmul.f32 1.442695, %v2069_v22  ;;  %v2072_v24 = vmul.f32 1.442695, %v2068_v63 }
 0x501   : > { %v2067_v25 = vpop.xlane.xlu1 %2066  ;;  %v2064_v26 = vpop.xlane.xlu0 %2063 }
 0x502   : > { %3231 = vpow2.f32 %v2074_v23  ;;  %v2071_v11 = vsub.f32 %v2051_v18, %v2067_v25  ;;  %v2070_v27 = vsub.f32 %v2005_v19, %v2064_v26 }
 0x503   : > { %3233 = vpow2.f32 %v2072_v24 }
 0x504   : > { %v2078_v10 = vmul.f32 1.442695, %v2071_v11  ;;  %v2076_v28 = vmul.f32 1.442695, %v2070_v27 }
 0x506   : > { %3235 = vpow2.f32 %v2078_v10 }
 0x507   : > { %3237 = vpow2.f32 %v2076_v28 }
 0x50f   : > { %v3232_v29 = vpop.eup %3231 }
 0x510   : > { %v3234_v30 = vpop.eup %3233  ;;  %v2083_v31 = vsel %vm1456_vm2, %v3232_v29, 0.0 }
 0x511   : > { %2084 = vadd.xlane.f32.xlu1 %v2083_v31  ;;  %v2080_v32 = vsel %vm1456_vm2, %v3234_v30, 0.0 }
 0x512   : > { %2081 = vadd.xlane.f32.xlu0 %v2080_v32 }
 0x513   : > { %v3236_v33 = vpop.eup %3235 }
 0x514   : > { %v3238_v34 = vpop.eup %3237  ;;  %v2089_v35 = vsel %vm1456_vm2, %v3236_v33, 0.0 }
 0x515   : > { %2090 = vadd.xlane.f32.xlu1 %v2089_v35  ;;  %v2086_v37 = vsel %vm1456_vm2, %v3238_v34, 0.0 }
 0x516   : > { %2087 = vadd.xlane.f32.xlu0 %v2086_v37 }
 0x59a   : > { %v2085_v38 = vpop.xlane.xlu1 %2084 }
 0x59b   : > { %3239 = vrcp.f32 %v2085_v38  ;;  %v2082_v39 = vpop.xlane.xlu0 %2081 }
 0x59c   : > { %3241 = vrcp.f32 %v2082_v39 }
 0x59e   : > { %v2091_v40 = vpop.xlane.xlu1 %2090 }
 0x59f   : > { %3243 = vrcp.f32 %v2091_v40  ;;  %v2088_v41 = vpop.xlane.xlu0 %2087 }
 0x5a0   : > { %3245 = vrcp.f32 %v2088_v41 }
 0x5a8   : > { %v3240_v47 = vpop.eup %3239 }
 0x5a9   : > { %v3242_v48 = vpop.eup %3241  ;;  %v2097_v50 = vmul.f32 %v3240_v47, %v3232_v29 }
 0x5aa   : > { %v2096_v52 = vmul.f32 %v3242_v48, %v3234_v30 }
 0x5ab   : > { %v2101_v53 = vpack.c.bf16 %v2097_v50, %v2097_v50  ;;  %v2832_v50 = vld [vmem:[%s3965_s12] ss:$0 sm:$0xff] }
 0x5ac   : > { %v3244_v54 = vpop.eup %3243  ;;  %v2100_v55 = vpack.c.bf16 %v2096_v52, %v2096_v52 }
 0x5ad   : > { %v3246_v56 = vpop.eup %3245  ;;  %3078 = vmatmul.mubr.msk.bf16.vlgmr.msra.gmra.mxu1 %vm1456_vm2, %v2101_v53  ;;  %v2099_v12 = vmul.f32 %v3244_v54, %v3236_v33 }
 0x5ae   : > { %3072 = vmatmul.mubr.msk.bf16.vlgmr.msra.gmra.mxu0 %vm1456_vm2, %v2100_v55  ;;  %3088 = vmatpush3.bf16.msra.mxu1 %v2247_v57  ;;  %v2098_v13 = vmul.f32 %v3246_v56, %v3238_v34 }
 0x5af   : > { %3082 = vmatpush3.bf16.msra.mxu0 %v2201_v58  ;;  %3083 = vmatprep.mubr.msk.bf16.mxu0 %vm3313_vm1, %v3312_v9  ;;  %v2103_v61 = vpack.c.bf16 %v2099_v12, %v2099_v12 }
 0x5b0   : > { %3089 = vmatprep.mubr.msk.bf16.mxu1 %vm3313_vm1, %v3312_v9  ;;  %3093 = vmatprep.subr.bf16.mxu0 %v3312_v9  ;;  %v2102_v1 = vpack.c.bf16 %v2098_v13, %v2098_v13 }
 0x5b1   : > { %3099 = vmatprep.subr.bf16.mxu1 %v3312_v9 }
 0x5b5   : > { %3090 = vmatmul.mubr.msk.bf16.vlgmr.msra.gmra.mxu1 %vm1456_vm2, %v2103_v61  ;;  %v3225_v61 = vld [vmem:[%s3970_s17 + $0x18] sm:$0xff]  }
 0x5b6   : > { %3084 = vmatmul.mubr.msk.bf16.vlgmr.msra.gmra.mxu0 %vm1456_vm2, %v2102_v1  ;;  %3100 = vmatpush3.bf16.msra.mxu1 %v2347_v62  ;;  %v3226_v62 = vld [vmem:[%s3970_s17 + $0x10] sm:$0xff]  }
 0x5b7   : > { %3094 = vmatpush3.bf16.msra.mxu0 %v2301_v2  ;;  %3095 = vmatprep.mubr.msk.bf16.mxu0 %vm3313_vm1, %v3312_v9 }
 0x5b8   : > { %3101 = vmatprep.mubr.msk.bf16.mxu1 %vm3313_vm1, %v3312_v9  ;;  %3105 = vmatprep.subr.bf16.mxu0 %v3312_v9 }
 0x5b9   : > { %3111 = vmatprep.subr.bf16.mxu1 %v3312_v9 }
 0x66d   : > { %v2191_v5 = vpop.f32.mrf.mxu1 }
 0x66e   : > { %v2145_v6 = vpop.f32.mrf.mxu0  ;;  %v2290_v7 = vpack.c.bf16 %v2191_v5, %v2191_v5  ;;  %v2833_v5 = vld [vmem:[%s3966_s13] ss:$0 sm:$0xff] }
 0x66f   : > { %v2289_v14 = vpack.c.bf16 %v2145_v6, %v2145_v6  ;;  %v3079_v15 = vpop.f32.mrf.mxu1 }
 0x670   : > { %v3073_v36 = vpop.f32.mrf.mxu0  ;;  %3102 = vmatmul.mubr.msk.bf16.vlgmr.msra.gmra.mxu1 %vm1456_vm2, %v2290_v7  ;;  %v2834_v7 = vld [vmem:[%s3967_s14] ss:$0 sm:$0xff] }
 0x671   : > { %3096 = vmatmul.mubr.msk.bf16.vlgmr.msra.gmra.mxu0 %vm1456_vm2, %v2289_v14  ;;  %v2194_v17 = vpop.f32.mrf.mxu1  ;;  %3112 = vmatpush3.bf16.msra.mxu1 %v2439_v8  ;;  %v3228_v36 = vld [vmem:[%s3970_s17] sm:$0xff]  }
 0x672   : > { %3106 = vmatpush3.bf16.msra.mxu0 %v2393_v16  ;;  %v2148_v18 = vpop.f32.mrf.mxu0  ;;  %3107 = vmatprep.mubr.msk.bf16.mxu0 %vm3313_vm1, %v3312_v9  ;;  %v3227_v16 = vld [vmem:[%s3970_s17 + $0x8] sm:$0xff]   ;;  %v2835_v17 = vld [vmem:[%s3969_s16] ss:$0 sm:$0xff] }
 0x673   : > { %v3080_v19 = vpop.f32.mrf.mxu1  ;;  %3113 = vmatprep.mubr.msk.bf16.mxu1 %vm3313_vm1, %v3312_v9  ;;  %3117 = vmatprep.subr.bf16.mxu0 %v3312_v9 }
 0x674   : > { %v3074_v43 = vpop.f32.mrf.mxu0  ;;  %3125 = vmatprep.subr.bf16.mxu1 %v3312_v9 }
 0x675   : > { %v2283_v20 = vpop.f32.mrf.mxu1 }
 0x676   : > { %v2237_v21 = vpop.f32.mrf.mxu0  ;;  %v2292_v0 = vpack.c.bf16 %v2283_v20, %v2283_v20 }
 0x677   : > { %v2291_v22 = vpack.c.bf16 %v2237_v21, %v2237_v21  ;;  %v3091_v63 = vpop.f32.mrf.mxu1 }
 0x678   : > { %v3085_v23 = vpop.f32.mrf.mxu0  ;;  %3114 = vmatmul.mubr.msk.bf16.vlgmr.msra.gmra.mxu1 %vm1456_vm2, %v2292_v0 }
 0x679   : > { %3108 = vmatmul.mubr.msk.bf16.vlgmr.msra.gmra.mxu0 %vm1456_vm2, %v2291_v22  ;;  %v2286_v24 = vpop.f32.mrf.mxu1  ;;  %3133 = vmatprep.mubr.msk.bf16.mxu1 %vm3313_vm1, %v3312_v9 }
 0x67a   : > { %v2240_v25 = vpop.f32.mrf.mxu0  ;;  %3121 = vmatprep.mubr.msk.bf16.mxu0 %vm3313_vm1, %v3312_v9  ;;  %3118 = vmatpush3.bf16.msra.mxu0 %v3223_v59 }
 0x67b   : > { %v3092_v26 = vpop.f32.mrf.mxu1  ;;  %3119 = vmatprep.subr.bf16.mxu0 %v3312_v9  ;;  %3126 = vmatpush3.bf16.msra.mxu1 %v3225_v61 }
 0x67c   : > { %v3086_v11 = vpop.f32.mrf.mxu0  ;;  %3127 = vmatprep.subr.bf16.mxu1 %v3312_v9 }
 0x67e   : > { %3120 = vmatpush3.bf16.msra.mxu0 %v3224_v60 }
 0x67f   : > { %3128 = vmatpush3.bf16.msra.mxu1 %v3226_v62 }
 0x680   : > { %3129 = vmatprep.subr.bf16.mxu1 %v3312_v9 }
 0x683   : > { %3130 = vmatpush3.bf16.msra.mxu1 %v3227_v16 }
 0x684   : > { %3131 = vmatprep.subr.bf16.mxu1 %v3312_v9  ;;  %v2839_v9 = vld [vmem:[%s3971_s18] ss:$0 sm:$0xff] }
 0x687   : > { %3132 = vmatpush3.bf16.msra.mxu1 %v3228_v36 }
 0x730   : > { %v2383_v27 = vpop.f32.mrf.mxu1 }
 0x731   : > { %v2337_v10 = vpop.f32.mrf.mxu0  ;;  %v2482_v33 = vsel %vm602_vm0, %v2383_v27, 0.0 }
 0x732   : > { %v3103_v28 = vpop.f32.mrf.mxu1  ;;  %v2481_v32 = vsel %vm602_vm0, %v2337_v10, 0.0 }
 0x733   : > { %v3097_v29 = vpop.f32.mrf.mxu0  ;;  %v2483_v38 = vadd.f32 %v2482_v33, %v2481_v32 }
 0x734   : > { %v2386_v30 = vpop.f32.mrf.mxu1 }
 0x735   : > { %v2340_v31 = vpop.f32.mrf.mxu0 }
 0x736   : > { %v3104_v34 = vpop.f32.mrf.mxu1 }
 0x737   : > { %v3098_v35 = vpop.f32.mrf.mxu0 }
 0x738   : > { %v2475_v37 = vpop.f32.mrf.mxu1 }
 0x739   : > { %v2429_v39 = vpop.f32.mrf.mxu0  ;;  %v2486_v45 = vsel %vm602_vm0, %v2475_v37, 0.0 }
 0x73a   : > { %v2484_v40 = vsel %vm602_vm0, %v2429_v39, 0.0  ;;  %v3115_v41 = vpop.f32.mrf.mxu1 }
 0x73b   : > { %v2485_v42 = vadd.f32 %v2484_v40, %v2483_v38  ;;  %v3109_v44 = vpop.f32.mrf.mxu0 }
 0x73c   : > { %v2478_v46 = vpop.f32.mrf.mxu1 }
 0x73d   : > { %v2487_v47 = vadd.f32 %v2486_v45, %v2485_v42  ;;  %v2432_v48 = vpop.f32.mrf.mxu0 }
 0x73e   : > { %v3116_v49 = vpop.f32.mrf.mxu1 }
 0x73f   : > { %v2488_v52 = vadd.f32 %v3249_v51, %v2487_v47  ;;  %v3110_v53 = vpop.f32.mrf.mxu0 }
 0x741   : > { %v2496_v54 = vadd.f32 %v2832_v50, %v2488_v52 }
 0x743   : > { %v2499_v55 = vsel %vm602_vm0, %v2496_v54, 0.0 }
 0x744   : > { %2500 = vadd.xlane.f32.xlu0 %v2499_v55 }
 0x7cd   : > { %v2501_v56 = vpop.xlane.xlu0 %2500 }
 0x7ce   : > { %v2502_v57 = vmul.f32 0.03125, %v2501_v56 }
 0x7d0   : > { %v2503_v58 = vsub.f32 %v2496_v54, %v2502_v57 }
 0x7d2   : > { %v2504_v12 = vmul.f32 %v2503_v58, %v2503_v58 }
 0x7d4   : > { %v2505_v13 = vsel %vm602_vm0, %v2504_v12, 0.0 }
 0x7d5   : > { %2506 = vadd.xlane.f32.xlu1 %v2505_v13 }
 0x85e   : > { %v2507_v1 = vpop.xlane.xlu1 %2506 }
 0x85f   : > { %v2508_v2 = vmul.f32 0.03125, %v2507_v1 }
 0x861   : > { %v2509_v3 = vadd.f32 1e-12, %v2508_v2 }
 0x863   : > { %3247 = vrsqrt.f32 %v2509_v3 }
 0x870   : > { %v3248_v4 = vpop.eup %3247 }
 0x871   : > { %v2511_v6 = vmul.f32 %v3248_v4, %v2503_v58 }
 0x873   : > { %v2518_v8 = vmul.f32 %v2833_v5, %v2511_v6 }
 0x875   : > { %v2525_v14 = vadd.f32 %v2834_v7, %v2518_v8 }
 0x877   : > { %v2526_v15 = vpack.c.bf16 %v2525_v14, %v2525_v14 }
 0x879   : > { %3122 = vmatmul.mubr.msk.bf16.vlgmr.msra.gmra.mxu0 %vm602_vm0, %v2526_v15 }
 0x939   : > { %v2587_v18 = vpop.f32.mrf.mxu0 }
 0x93a   : > { %v2588_v19 = vadd.f32 %v2835_v17, %v2587_v18 }
 0x93b   : > { %v3123_v43 = vpop.f32.mrf.mxu0 }
 0x93c   : > { %v2593_v20 = vmax.f32 %v2588_v19, 0.0 }
 0x93d   : > { %v2590_v21 = vpop.f32.mrf.mxu0 }
 0x93e   : > { %v2594_v0 = vpack.c.bf16 %v2593_v20, %v2593_v20 }
 0x93f   : > { %v3124_v22 = vpop.f32.mrf.mxu0 }
 0x940   : > { %3134 = vmatmul.mubr.msk.bf16.vlgmr.msra.gmra.mxu1 %vm1757_vm6, %v2594_v0 }
 0xa00   : > { %v2671_v63 = vpop.f32.mrf.mxu1 }
 0xa01   : > { %v2672_v23 = vadd.f32 %v2839_v9, %v2671_v63 }
 0xa02   : > { %v3135_v24 = vpop.f32.mrf.mxu1 }
 0xa03   : > { %v2677_v25 = vadd.f32 %v2672_v23, %v2496_v54 }
 0xa04   : > { %v2674_v26 = vpop.f32.mrf.mxu1 }
 0xa05   : > { %2678 = vst.msk [vmem:[%s593_s27] sm:$0xff] %vm602_vm0, %v2677_v25 }
 0xa06   : > { %v3136_v11 = vpop.f32.mrf.mxu1 }
 0xa07   : > { %3263 = shalt.err (!%p3260_p3)
}
 0xa08   : > { %s3264_s23 = scalar_lea.hbm %s3911_s21, 128  ;;  %s3268_s24 = scalar_lea.hbm %s3972_s19, 256 }
 0xa09   : > { %p3265_p4 = scmp.ne.s32.totalorder %s3911_s21, %s3264_s23  ;;  %p3269_p9 = scmp.lt.s32.totalorder %s3911_s21, %s3972_s19 }
 0xa0a   : > { %p3270_p10 = scmp.lt.s32.totalorder %s3268_s24, %s3264_s23 }
 0xa0b   : > { %p3266_p7 = pnand %p3265_p4, %p3470_p5 }
 0xa0c   : > { %p3271_p11 = por %p3270_p10, %p3269_p9 }
 0xa0d   : > { %p3267_p8 = pneg %p3266_p7 }
 0xa0f   : > { %p3272_p12 = pnand %p3271_p11, %p3267_p8 }
 0xa11   : > { %3275 = shalt.err (!%p3272_p12)
}
 0xa12   : > { %3137 = dma.vmem_to_hbm [thread:$0]  (%p3470_p5), %s3913_s29, 128, %s3911_s21, %s2680_s1  }
 0xa13 PF: > { %s3997_s28 = sld [smem:[#allocation7_spill]] }
 0xa14   : > { %s3998_s25 = sld [smem:[#allocation5_spill]] }
 0xa19   : > { %p3143_p13 = scmp.ge.s32.totalorder %s3997_s28, 2 }
 0xa1a   : > { %s2705_s22 = sand.u32 1, %s3998_s25  }
 0xa1b   : > { %p3140_p0 = pnand %p3143_p13, %p3474_p6  ;;  %s2706_s27 = scalar_lea.sflag [#allocation3], %s2705_s22 }
 0xa1d   : > { %p3141_p1 = pneg %p3140_p0 }
 0xa1f   : > { %3293 = dma.done.wait (%p3141_p1), %s2706_s27, 128  }
 0xa20   : > { %3295 = vsyncadd (%p3141_p1), %s2706_s27, 4294967168  ;;  %s4000_s21 = sld [smem:[#allocation8_spill]]  ;;  %s4003_s0 = smov %s3302_s30 }
 0xa21   : > { %s4001_s23 = sld [smem:[#allocation6_spill]] }
 0xa22   : > { %s4002_s20 = sld [smem:[#allocation9_spill]] }
 0xa26   : > { %p29_p2 = scmp.ge.s32.totalorder %s4000_s21, 4  }
 0xa27   : > { %s4004_s30 = smov %s4001_s23 }
 0xa28   :  { %31 = sbr.rel (!%p29_p2) target bundleno = 8 (0x8), region = 131 }
 0xa2d   :  { %2711 = vsyncpa [#allocation3], 1 }
 0xa2e   :  { %2713 = vsyncpa [#allocation3 + $0x1], 1 }

// kernel: tpu_custom_call.1
= control target key start
LH: loop header
LB: loop body
LE: loop exit
PB: predicated region body
PF: predicated region fallthrough
CT: control target
= control target key end

     0   :  { %s3927_s0 = inlined_call_operand.vmem [shape: f32[2,8,32], index: 0, kind: input, shape index: {}]   ;;  %s3928_s1 = inlined_call_operand.vmem [shape: f32[1,32], index: 1, kind: input, shape index: {}]   ;;  %s3929_s2 = inlined_call_operand.vmem [shape: f32[1,32], index: 2, kind: input, shape index: {}]   ;;  %s3930_s3 = inlined_call_operand.vmem [shape: bf16[4,32,8], index: 3, kind: input, shape index: {}]   ;;  %s3931_s4 = inlined_call_operand.vmem [shape: f32[4,1,8], index: 4, kind: input, shape index: {}]   ;;  %s3932_s5 = inlined_call_operand.vmem [shape: f32[4,1,8], index: 5, kind: input, shape index: {}]   ;;  %s3933_s6 = inlined_call_operand.vmem [shape: bf16[4,32,8], index: 6, kind: input, shape index: {}]   ;;  %s3934_s7 = inlined_call_operand.vmem [shape: f32[4,1,8], index: 7, kind: input, shape index: {}]   ;;  %s3935_s8 = inlined_call_operand.vmem [shape: bf16[4,32,8], index: 8, kind: input, shape index: {}]   ;;  %s3936_s9 = inlined_call_operand.vmem [shape: f32[4,1,8], index: 9, kind: input, shape index: {}]   ;;  %s3937_s10 = inlined_call_operand.vmem [shape: bf16[4,16,8], index: 10, kind: input, shape index: {}]   ;;  %s3938_s11 = inlined_call_operand.vmem [shape: bf16[4,8,32], index: 11, kind: input, shape index: {}]   ;;  %s3939_s12 = inlined_call_operand.vmem [shape: f32[1,32], index: 12, kind: input, shape index: {}]   ;;  %s3940_s13 = inlined_call_operand.vmem [shape: f32[1,32], index: 13, kind: input, shape index: {}]   ;;  %s3941_s14 = inlined_call_operand.vmem [shape: f32[1,32], index: 14, kind: input, shape index: {}]   ;;  %s3942_s15 = inlined_call_operand.vmem [shape: bf16[32,64], index: 15, kind: input, shape index: {}]   ;;  %s3943_s16 = inlined_call_operand.vmem [shape: f32[1,64], index: 16, kind: input, shape index: {}]   ;;  %s3944_s17 = inlined_call_operand.vmem [shape: bf16[64,32], index: 17, kind: input, shape index: {}]   ;;  %s3945_s18 = inlined_call_operand.vmem [shape: f32[1,32], index: 18, kind: input, shape index: {}]   ;;  %s3946_s19 = inlined_call_operand.hbm [shape: f32[2,8,32], index: 19, kind: output, shape index: {}]  }
   0x1   :  { %3954 = sst [smem:[#allocation11_spill]] %s3927_s0 }
   0x2   :  { %3955 = sst [smem:[#allocation12_spill]] %s3928_s1 }
   0x3   :  { %3956 = sst [smem:[#allocation13_spill]] %s3929_s2 }
   0x4   :  { %3957 = sst [smem:[#allocation14_spill]] %s3930_s3 }
   0x5   :  { %24 = vsyncpa [#allocation3], 0 }
   0x6   :  { %26 = vsyncpa [#allocation3 + $0x1], 0  ;;  %s3337_s0 = smov 0   ;;  %s3339_s30 = smov 0  }
   0x7   :  { %s3341_s20 = smov 0   ;;  %s3343_s21 = smov 0  }
   0x8 LB: > { %3958 = sst [smem:[#allocation5_spill]] %s3212_s0  ;;  %s3358_s1 = sadd.s32 4294967295, %s3224_s21   ;;  %s3224_s21 = sphi %s3343_s21, %s3974_s21   ;;  %s3220_s20 = sphi %s3341_s20, %s3976_s20   ;;  %s3216_s30 = sphi %s3339_s30, %s3978_s30   ;;  %s3212_s0 = sphi %s3337_s0, %s3977_s0  }
   0x9   : > { %3959 = sst [smem:[#allocation6_spill]] %s3220_s20  ;;  %s2675_s22 = sadd.s32 4294967294, %s3224_s21  }
   0xa   : > { %3960 = sst [smem:[#allocation7_spill]] %s3224_s21  ;;  %s3362_s2 = sadd.s32 1, %s3224_s21  }
   0xb   : > { %3961 = sst [smem:[#allocation8_spill]] %s3362_s2  ;;  %s443_s23 = sadd.s32 1, %s3220_s20 }
   0xc   : > { %s440_s24 = ssub.s32 %s3224_s21, %s3362_s2  ;;  %p453_p0 = scmp.ne.s32.totalorder %s3220_s20, %s3216_s30 }
   0xd   : > { %p441_p1 = scmp.eq.s32.totalorder %s440_s24, 0  ;;  %p454_p2 = scmp.eq.s32.totalorder %s3358_s1, 1 }
   0xe   : > { %p459_p3 = scmp.ne.s32.totalorder %s3216_s30, %s3212_s0  ;;  %p460_p4 = scmp.eq.s32.totalorder %s2675_s22, 1 }
   0xf   : > { %s3373_s25 = scalar_select %p441_p1, %s3220_s20, %s443_s23  }
  0x10   : > { %p3375_p5 = por %p454_p2, %p453_p0  ;;  %p3379_p6 = por %p460_p4, %p459_p3 }
  0x11   : > { %3962 = sst [smem:[#allocation9_spill]] %s3373_s25  ;;  %p2678_p7 = scmp.ge.s32.totalorder %s3224_s21, 1 }
  0x12   : > { %s3964_s26 = scalar_select %p3379_p6, 1, 0 }
  0x13   : > { %p539_p8 = scmp.lt.s32.totalorder %s3224_s21, 3 }
  0x14   : > { %3965 = sst [smem:[#allocation10_spill]] %s3964_s26 }
  0x15   : > { %p540_p9 = pnand %p2678_p7, %p539_p8 }
  0x16   : > { %p594_p10 = scmp.lt.s32.totalorder (!%p540_p9), %s3358_s1, 1  ;;  %s3966_s23 = sld [smem:[#allocation11_spill]] (!%p540_p9) }
  0x17   : > { %543 = sbr.rel (%p540_p9) target bundleno = 2460 (0x99c), region = 96  ;;  %s3967_s20 = sld [smem:[#allocation14_spill]] (!%p540_p9) }
  0x18   : > { %s3970_s22 = sld [smem:[#allocation13_spill]] (!%p540_p9)  ;;  %s3229_s29 = smov (!%p540_p9), 6  }
  0x19   : > { %s3230_s0 = smov (!%p540_p9), 2   ;;  %s3231_s21 = smov (!%p540_p9), 7  }
  0x1a   : > { %s3235_s25 = smov (!%p540_p9), 121   ;;  %s591_s26 = sand.u32 (!%p540_p9), 1, %s3216_s30  }
  0x1c   : > { %s595_s27 = scalar_select %p594_p10, %s3358_s1, 1  ;;  %vm602_vm0 = vcmask 261120   ;;  %v3226_v9 = vmov 0.0   ;;  %vm3227_vm1 = vmmov 0   ;;  %v3117_v26 = vld [vmem:[%s3933_s6 + $0x8] sm:$0xff]   ;;  %v3118_v27 = vld [vmem:[%s3933_s6 + $0x18] sm:$0xff]  }
  0x1d   : > { %s3968_s2 = smov %s3967_s20  ;;  %v3109_v7 = vld [vmem:[%s3967_s20 + $0x8] sm:$0xff]   ;;  %2848 = vmatprep.subr.bf16.mxu0 %v3226_v9  ;;  %2856 = vmatprep.subr.bf16.mxu1 %v3226_v9  ;;  %v3119_v28 = vld [vmem:[%s3933_s6] sm:$0xff]   ;;  %v3120_v29 = vld [vmem:[%s3933_s6 + $0x10] sm:$0xff]   ;;  %vm1456_vm2 = vcmask 64512   ;;  %vm1759_vm3 = vcmask 1043456   ;;  %s3234_s20 = smov 5  }
  0x1e   : > { %s2680_s28 = sshll.u32 %s595_s27, 3  ;;  %v3110_v8 = vld [vmem:[%s3968_s2 + $0x18] sm:$0xff]   ;;  %2849 = vmatpush3.bf16.msra.mxu0 %v3109_v7  ;;  %v3111_v10 = vld [vmem:[%s3968_s2] sm:$0xff]   ;;  %v3112_v11 = vld [vmem:[%s3968_s2 + $0x10] sm:$0xff]   ;;  %2852 = vmatprep.mubr.msk.bf16.mxu0 %vm3227_vm1, %v3226_v9  ;;  %s3969_s27 = sld [smem:[#allocation12_spill]]  ;;  %vm1744_vm4 = vcmask 1040384  }
  0x1f   : > { %s3390_s24 = scalar_lea.vmem %s3966_s23, %s2680_s28  ;;  %2857 = vmatpush3.bf16.msra.mxu1 %v3110_v8  ;;  %2850 = vmatprep.subr.bf16.mxu0 %v3226_v9  ;;  %v2682_v18 = vld [vmem:[%s3970_s22] ss:$0 sm:$0xff]  ;;  %v3113_v21 = vld [vmem:[%s3968_s2 + $0x28] sm:$0xff]   ;;  %v3114_v22 = vld [vmem:[%s3968_s2 + $0x38] sm:$0xff]   ;;  %s3232_s28 = smov 3   ;;  %vm1749_vm5 = vcmask 1041408  }
  0x20   : > { %v599_v0 = vld [vmem:[%s3390_s24] sm:$0xff]  ;;  %2858 = vmatprep.subr.bf16.mxu1 %v3226_v9  ;;  %2860 = vmatprep.mubr.msk.bf16.mxu1 %vm3227_vm1, %v3226_v9  ;;  %v3116_v25 = vld [vmem:[%s3968_s2 + $0x30] sm:$0xff]   ;;  %v3121_v30 = vld [vmem:[%s3933_s6 + $0x28] sm:$0xff]   ;;  %s3233_s22 = smov 4   ;;  %vm1754_vm6 = vcmask 1042432   ;;  %vm1764_vm7 = vcmask 1044480  }
  0x21   : > { %v603_v1 = vsel %vm602_vm0, %v599_v0, 0.0  ;;  %v3115_v24 = vld [vmem:[%s3968_s2 + $0x20] sm:$0xff]   ;;  %v3122_v31 = vld [vmem:[%s3933_s6 + $0x38] sm:$0xff]   ;;  %v3124_v33 = vld [vmem:[%s3933_s6 + $0x30] sm:$0xff]   ;;  %vm1769_vm8 = vcmask 1045504   ;;  %vm1774_vm9 = vcmask 1046528  }
  0x22   : > { %604 = vadd.xlane.f32.xlu0 %v603_v1  ;;  %2851 = vmatpush3.bf16.msra.mxu0 %v3111_v10  ;;  %v3123_v32 = vld [vmem:[%s3933_s6 + $0x20] sm:$0xff]   ;;  %v3125_v34 = vld [vmem:[%s3935_s8 + $0x8] sm:$0xff]   ;;  %v3126_v35 = vld [vmem:[%s3935_s8 + $0x18] sm:$0xff]   ;;  %vm2556_vm10 = vcmask 523264   ;;  %s2679_s23 = sshll.u32 %s591_s26, 3 }
  0x23   : > { %2859 = vmatpush3.bf16.msra.mxu1 %v3112_v11  ;;  %2864 = vmatprep.subr.bf16.mxu0 %v3226_v9  ;;  %v3127_v36 = vld [vmem:[%s3935_s8] sm:$0xff]   ;;  %v3128_v37 = vld [vmem:[%s3935_s8 + $0x10] sm:$0xff]   ;;  %v3129_v38 = vld [vmem:[%s3935_s8 + $0x28] sm:$0xff]  }
  0x24   : > { %2872 = vmatprep.subr.bf16.mxu1 %v3226_v9  ;;  %v2681_v16 = vld [vmem:[%s3969_s27] ss:$0 sm:$0xff]  ;;  %v3130_v39 = vld [vmem:[%s3935_s8 + $0x38] sm:$0xff]   ;;  %v3132_v41 = vld [vmem:[%s3935_s8 + $0x30] sm:$0xff]   ;;  %s3228_s27 = smov 1  }
  0x25   : > { %v3131_v40 = vld [vmem:[%s3935_s8 + $0x20] sm:$0xff]   ;;  %v3134_v43 = vld [vmem:[%s3937_s10 + $0x8] sm:$0xff]   ;;  %v3135_v48 = vld [vmem:[%s3937_s10 + $0x10] sm:$0xff]  }
  0x26   : > { %v3133_v42 = vld [vmem:[%s3937_s10] sm:$0xff]   ;;  %v1512_v45 = vsel %vm1456_vm2, %v3134_v43, 0  ;;  %v3136_v49 = vld [vmem:[%s3937_s10 + $0x18] sm:$0xff]   ;;  %v1563_v58 = vsel %vm1456_vm2, %v3135_v48, 0 }
  0x27   : > { %v1461_v44 = vsel %vm1456_vm2, %v3133_v42, 0  ;;  %v2731_v46 = vld [vmem:[%s3932_s5] ss:$0 sm:$0xff]  ;;  %v2732_v47 = vld [vmem:[%s3932_s5 + $0x1] ss:$0 sm:$0xff]  ;;  %v1614_v59 = vsel %vm1456_vm2, %v3136_v49, 0 }
  0x28   : > { %v2734_v1 = vld [vmem:[%s3932_s5 + $0x3] ss:$0 sm:$0xff] }
  0x29   : > { %v2730_v48 = vld [vmem:[%s3931_s4 + $0x3] ss:$0 sm:$0xff] }
  0xab   : > { %v605_v2 = vpop.xlane.xlu0 %604 }
  0xac   : > { %v607_v3 = vmul.f32 0.03125, %v605_v2 }
  0xae   : > { %v608_v4 = vsub.f32 %v599_v0, %v607_v3  ;;  %v2733_v0 = vld [vmem:[%s3932_s5 + $0x2] ss:$0 sm:$0xff] }
  0xb0   : > { %v609_v5 = vmul.f32 %v608_v4, %v608_v4 }
  0xb2   : > { %v610_v6 = vsel %vm602_vm0, %v609_v5, 0.0 }
  0xb3   : > { %611 = vadd.xlane.f32.xlu0 %v610_v6 }
 0x13c   : > { %v612_v12 = vpop.xlane.xlu0 %611 }
 0x13d   : > { %v613_v13 = vmul.f32 0.03125, %v612_v12 }
 0x13f   : > { %v614_v14 = vadd.f32 1e-12, %v613_v13 }
 0x141   : > { %3143 = vrsqrt.f32 %v614_v14 }
 0x14e   : > { %v3144_v15 = vpop.eup %3143 }
 0x14f   : > { %v616_v17 = vmul.f32 %v3144_v15, %v608_v4  ;;  %v2695_v15 = vld [vmem:[%s3934_s7] ss:$0 sm:$0xff] }
 0x151   : > { %v623_v19 = vmul.f32 %v2681_v16, %v616_v17  ;;  %v2696_v16 = vld [vmem:[%s3934_s7 + $0x1] ss:$0 sm:$0xff] }
 0x153   : > { %v630_v20 = vadd.f32 %v2682_v18, %v623_v19 }
 0x155   : > { %v3429_v23 = vpack.c.bf16 %v630_v20, %v630_v20 }
 0x157   : > { %2853 = vmatmul.mubr.msk.bf16.vlgmr.msra.gmra.mxu0 %vm602_vm0, %v3429_v23  ;;  %2861 = vmatmul.mubr.msk.bf16.vlgmr.msra.gmra.mxu1 %vm602_vm0, %v3429_v23 }
 0x158   : > { %2865 = vmatpush3.bf16.msra.mxu0 %v3113_v21  ;;  %2873 = vmatpush3.bf16.msra.mxu1 %v3114_v22 }
 0x159   : > { %2866 = vmatprep.subr.bf16.mxu0 %v3226_v9  ;;  %2874 = vmatprep.subr.bf16.mxu1 %v3226_v9 }
 0x15a   : > { %2868 = vmatprep.mubr.msk.bf16.mxu0 %vm3227_vm1, %v3226_v9  ;;  %2876 = vmatprep.mubr.msk.bf16.mxu1 %vm3227_vm1, %v3226_v9 }
 0x15c   : > { %2867 = vmatpush3.bf16.msra.mxu0 %v3115_v24  ;;  %2875 = vmatpush3.bf16.msra.mxu1 %v3116_v25  ;;  %v2727_v25 = vld [vmem:[%s3931_s4] ss:$0 sm:$0xff] }
 0x15d   : > { %2880 = vmatprep.subr.bf16.mxu0 %v3226_v9  ;;  %2888 = vmatprep.subr.bf16.mxu1 %v3226_v9 }
 0x15f   : > { %2869 = vmatmul.mubr.msk.bf16.vlgmr.msra.gmra.mxu0 %vm602_vm0, %v3429_v23  ;;  %2877 = vmatmul.mubr.msk.bf16.vlgmr.msra.gmra.mxu1 %vm602_vm0, %v3429_v23 }
 0x160   : > { %2881 = vmatpush3.bf16.msra.mxu0 %v3117_v26  ;;  %2889 = vmatpush3.bf16.msra.mxu1 %v3118_v27  ;;  %v2728_v26 = vld [vmem:[%s3931_s4 + $0x1] ss:$0 sm:$0xff] }
 0x161   : > { %2882 = vmatprep.subr.bf16.mxu0 %v3226_v9  ;;  %2890 = vmatprep.subr.bf16.mxu1 %v3226_v9 }
 0x162   : > { %2884 = vmatprep.mubr.msk.bf16.mxu0 %vm3227_vm1, %v3226_v9  ;;  %2892 = vmatprep.mubr.msk.bf16.mxu1 %vm3227_vm1, %v3226_v9 }
 0x164   : > { %2883 = vmatpush3.bf16.msra.mxu0 %v3119_v28  ;;  %2891 = vmatpush3.bf16.msra.mxu1 %v3120_v29 }
 0x165   : > { %2896 = vmatprep.subr.bf16.mxu0 %v3226_v9  ;;  %2904 = vmatprep.subr.bf16.mxu1 %v3226_v9 }
 0x167   : > { %2885 = vmatmul.mubr.msk.bf16.vlgmr.msra.gmra.mxu0 %vm602_vm0, %v3429_v23  ;;  %2893 = vmatmul.mubr.msk.bf16.vlgmr.msra.gmra.mxu1 %vm602_vm0, %v3429_v23 }
 0x168   : > { %2897 = vmatpush3.bf16.msra.mxu0 %v3121_v30  ;;  %2905 = vmatpush3.bf16.msra.mxu1 %v3122_v31 }
 0x169   : > { %2898 = vmatprep.subr.bf16.mxu0 %v3226_v9  ;;  %2906 = vmatprep.subr.bf16.mxu1 %v3226_v9 }
 0x16a   : > { %2900 = vmatprep.mubr.msk.bf16.mxu0 %vm3227_vm1, %v3226_v9  ;;  %2908 = vmatprep.mubr.msk.bf16.mxu1 %vm3227_vm1, %v3226_v9 }
 0x16c   : > { %2899 = vmatpush3.bf16.msra.mxu0 %v3123_v32  ;;  %2907 = vmatpush3.bf16.msra.mxu1 %v3124_v33  ;;  %v2697_v33 = vld [vmem:[%s3934_s7 + $0x2] ss:$0 sm:$0xff] }
 0x16d   : > { %2912 = vmatprep.subr.bf16.mxu0 %v3226_v9  ;;  %2920 = vmatprep.subr.bf16.mxu1 %v3226_v9 }
 0x16f   : > { %2901 = vmatmul.mubr.msk.bf16.vlgmr.msra.gmra.mxu0 %vm602_vm0, %v3429_v23  ;;  %2909 = vmatmul.mubr.msk.bf16.vlgmr.msra.gmra.mxu1 %vm602_vm0, %v3429_v23 }
 0x170   : > { %2913 = vmatpush3.bf16.msra.mxu0 %v3125_v34  ;;  %2921 = vmatpush3.bf16.msra.mxu1 %v3126_v35  ;;  %v2698_v34 = vld [vmem:[%s3934_s7 + $0x3] ss:$0 sm:$0xff] }
 0x171   : > { %2914 = vmatprep.subr.bf16.mxu0 %v3226_v9  ;;  %2922 = vmatprep.subr.bf16.mxu1 %v3226_v9 }
 0x172   : > { %2916 = vmatprep.mubr.msk.bf16.mxu0 %vm3227_vm1, %v3226_v9  ;;  %2924 = vmatprep.mubr.msk.bf16.mxu1 %vm3227_vm1, %v3226_v9 }
 0x174   : > { %2915 = vmatpush3.bf16.msra.mxu0 %v3127_v36  ;;  %2923 = vmatpush3.bf16.msra.mxu1 %v3128_v37 }
 0x175   : > { %2928 = vmatprep.subr.bf16.mxu0 %v3226_v9  ;;  %2936 = vmatprep.subr.bf16.mxu1 %v3226_v9 }
 0x177   : > { %2917 = vmatmul.mubr.msk.bf16.vlgmr.msra.gmra.mxu0 %vm602_vm0, %v3429_v23  ;;  %2925 = vmatmul.mubr.msk.bf16.vlgmr.msra.gmra.mxu1 %vm602_vm0, %v3429_v23 }
 0x178   : > { %2929 = vmatpush3.bf16.msra.mxu0 %v3129_v38  ;;  %2937 = vmatpush3.bf16.msra.mxu1 %v3130_v39 }
 0x179   : > { %2930 = vmatprep.subr.bf16.mxu0 %v3226_v9  ;;  %2938 = vmatprep.subr.bf16.mxu1 %v3226_v9 }
 0x17a   : > { %2932 = vmatprep.mubr.msk.bf16.mxu0 %vm3227_vm1, %v3226_v9  ;;  %2940 = vmatprep.mubr.msk.bf16.mxu1 %vm3227_vm1, %v3226_v9 }
 0x17c   : > { %2931 = vmatpush3.bf16.msra.mxu0 %v3131_v40  ;;  %2939 = vmatpush3.bf16.msra.mxu1 %v3132_v41 }
 0x17d   : > { %2944 = vmatprep.subr.bf16.mxu0 %v3226_v9  ;;  %2950 = vmatprep.subr.bf16.mxu1 %v3226_v9 }
 0x17f   : > { %2933 = vmatmul.mubr.msk.bf16.vlgmr.msra.gmra.mxu0 %vm602_vm0, %v3429_v23  ;;  %2941 = vmatmul.mubr.msk.bf16.vlgmr.msra.gmra.mxu1 %vm602_vm0, %v3429_v23 }
 0x180   : > { %2945 = vmatpush3.bf16.xpose.msra.mxu0 %v1461_v44  ;;  %2951 = vmatpush3.bf16.xpose.msra.mxu1 %v1512_v45 }
 0x181   : > { %2946 = vmatprep.mubr.msk.bf16.mxu0 %vm3227_vm1, %v3226_v9  ;;  %2952 = vmatprep.mubr.msk.bf16.mxu1 %vm3227_vm1, %v3226_v9 }
 0x182   : > { %2956 = vmatprep.subr.bf16.mxu0 %v3226_v9  ;;  %2962 = vmatprep.subr.bf16.mxu1 %v3226_v9 }
 0x217   : > { %v697_v50 = vpop.f32.mrf.mxu0  ;;  %v749_v51 = vpop.f32.mrf.mxu1 }
 0x218   : > { %v1427_v52 = vadd.f32 %v2731_v46, %v697_v50  ;;  %v1428_v53 = vadd.f32 %v2732_v47, %v749_v51  ;;  %v1391_v35 = vadd.f32 %v2727_v25, %v697_v50  ;;  %v1392_v36 = vadd.f32 %v2728_v26, %v749_v51  ;;  %v2729_v47 = vld [vmem:[%s3931_s4 + $0x2] ss:$0 sm:$0xff] }
 0x219   : > { %v2854_v54 = vpop.f32.mrf.mxu0  ;;  %v2862_v55 = vpop.f32.mrf.mxu1 }
 0x21a   : > { %v1431_v56 = vpack.c.bf16 %v1427_v52, %v1427_v52  ;;  %v1432_v57 = vpack.c.bf16 %v1428_v53, %v1428_v53  ;;  %v1395_v43 = vpack.c.bf16 %v1391_v35, %v1391_v35  ;;  %v1396_v44 = vpack.c.bf16 %v1392_v36, %v1392_v36  ;;  %v2711_v55 = vld [vmem:[%s3936_s9] ss:$0 sm:$0xff] }
 0x21b   : > { %v700_v60 = vpop.f32.mrf.mxu0  ;;  %v752_v61 = vpop.f32.mrf.mxu1 }
 0x21c   : > { %2947 = vmatmul.mubr.msk.bf16.vlgmr.msra.gmra.mxu0 %vm1456_vm2, %v1431_v56  ;;  %2953 = vmatmul.mubr.msk.bf16.vlgmr.msra.gmra.mxu1 %vm1456_vm2, %v1432_v57  ;;  %v2712_v56 = vld [vmem:[%s3936_s9 + $0x1] ss:$0 sm:$0xff] }
 0x21d   : > { %v2855_v62 = vpop.f32.mrf.mxu0  ;;  %v2863_v63 = vpop.f32.mrf.mxu1  ;;  %2957 = vmatpush3.bf16.xpose.msra.mxu0 %v1563_v58  ;;  %2963 = vmatpush3.bf16.xpose.msra.mxu1 %v1614_v59 }
 0x21e   : > { %2958 = vmatprep.mubr.msk.bf16.mxu0 %vm3227_vm1, %v3226_v9  ;;  %2964 = vmatprep.mubr.msk.bf16.mxu1 %vm3227_vm1, %v3226_v9 }
 0x21f   : > { %v3589_v2 = vpop.f32.mrf.mxu0  ;;  %v3591_v3 = vpop.f32.mrf.mxu1  ;;  %2968 = vmatprep.subr.bf16.mxu0 %v3226_v9  ;;  %2974 = vmatprep.subr.bf16.mxu1 %v3226_v9 }
 0x220   : > { %v1429_v4 = vadd.f32 %v2733_v0, %v3589_v2  ;;  %v1430_v5 = vadd.f32 %v2734_v1, %v3591_v3  ;;  %v1393_v57 = vadd.f32 %v2729_v47, %v3589_v2  ;;  %v1394_v58 = vadd.f32 %v2730_v48, %v3591_v3 }
 0x221   : > { %v2870_v6 = vpop.f32.mrf.mxu0  ;;  %v2878_v7 = vpop.f32.mrf.mxu1 }
 0x222   : > { %v1433_v8 = vpack.c.bf16 %v1429_v4, %v1429_v4  ;;  %v1434_v10 = vpack.c.bf16 %v1430_v5, %v1430_v5  ;;  %v1397_v1 = vpack.c.bf16 %v1393_v57, %v1393_v57  ;;  %v1398_v2 = vpack.c.bf16 %v1394_v58, %v1394_v58 }
 0x223   : > { %v804_v11 = vpop.f32.mrf.mxu0  ;;  %v856_v12 = vpop.f32.mrf.mxu1 }
 0x224   : > { %2959 = vmatmul.mubr.msk.bf16.vlgmr.msra.gmra.mxu0 %vm1456_vm2, %v1433_v8  ;;  %2965 = vmatmul.mubr.msk.bf16.vlgmr.msra.gmra.mxu1 %vm1456_vm2, %v1434_v10 }
 0x225   : > { %v2871_v13 = vpop.f32.mrf.mxu0  ;;  %v2879_v14 = vpop.f32.mrf.mxu1  ;;  %2970 = vmatprep.mubr.msk.bf16.mxu0 %vm3227_vm1, %v3226_v9  ;;  %2976 = vmatprep.mubr.msk.bf16.mxu1 %vm3227_vm1, %v3226_v9 }
 0x227   : > { %v949_v17 = vpop.f32.mrf.mxu0  ;;  %v1001_v18 = vpop.f32.mrf.mxu1 }
 0x228   : > { %v950_v19 = vadd.f32 %v2695_v15, %v949_v17  ;;  %v1002_v20 = vadd.f32 %v2696_v16, %v1001_v18 }
 0x229   : > { %v2886_v21 = vpop.f32.mrf.mxu0  ;;  %v2894_v22 = vpop.f32.mrf.mxu1 }
 0x22a   : > { %v1435_v23 = vpack.c.bf16 %v950_v19, %v950_v19  ;;  %v1436_v24 = vpack.c.bf16 %v1002_v20, %v1002_v20 }
 0x22b   : > { %v952_v27 = vpop.f32.mrf.mxu0  ;;  %v1004_v28 = vpop.f32.mrf.mxu1 }
 0x22c   : > { %v1787_v29 = vsel %vm1456_vm2, %v1435_v23, 0  ;;  %v1837_v30 = vsel %vm1456_vm2, %v1436_v24, 0 }
 0x22d   : > { %v2887_v31 = vpop.f32.mrf.mxu0  ;;  %v2895_v32 = vpop.f32.mrf.mxu1  ;;  %2969 = vmatpush3.bf16.xpose.msra.mxu0 %v1787_v29  ;;  %2975 = vmatpush3.bf16.xpose.msra.mxu1 %v1837_v30 }
 0x22e   : > { %2980 = vmatprep.subr.bf16.mxu0 %v3226_v9  ;;  %2986 = vmatprep.subr.bf16.mxu1 %v3226_v9 }
 0x22f   : > { %v1053_v37 = vpop.f32.mrf.mxu0  ;;  %v1105_v38 = vpop.f32.mrf.mxu1 }
 0x230   : > { %v1054_v39 = vadd.f32 %v2697_v33, %v1053_v37  ;;  %v1106_v40 = vadd.f32 %v2698_v34, %v1105_v38 }
 0x231   : > { %v2902_v41 = vpop.f32.mrf.mxu0  ;;  %v2910_v42 = vpop.f32.mrf.mxu1 }
 0x232   : > { %v1437_v45 = vpack.c.bf16 %v1054_v39, %v1054_v39  ;;  %v1438_v46 = vpack.c.bf16 %v1106_v40, %v1106_v40 }
 0x233   : > { %v1056_v49 = vpop.f32.mrf.mxu0  ;;  %v1108_v50 = vpop.f32.mrf.mxu1 }
 0x234   : > { %v1887_v51 = vsel %vm1456_vm2, %v1437_v45, 0  ;;  %v1937_v52 = vsel %vm1456_vm2, %v1438_v46, 0  ;;  %2971 = vmatmul.mubr.msk.bf16.vlgmr.msra.gmra.mxu0 %vm1456_vm2, %v1395_v43  ;;  %2977 = vmatmul.mubr.msk.bf16.vlgmr.msra.gmra.mxu1 %vm1456_vm2, %v1396_v44 }
 0x235   : > { %v2903_v53 = vpop.f32.mrf.mxu0  ;;  %v2911_v54 = vpop.f32.mrf.mxu1  ;;  %2981 = vmatpush3.bf16.xpose.msra.mxu0 %v1887_v51  ;;  %2987 = vmatpush3.bf16.xpose.msra.mxu1 %v1937_v52 }
 0x236   : > { %2982 = vmatprep.mubr.msk.bf16.mxu0 %vm3227_vm1, %v3226_v9  ;;  %2988 = vmatprep.mubr.msk.bf16.mxu1 %vm3227_vm1, %v3226_v9 }
 0x237   : > { %v1201_v59 = vpop.f32.mrf.mxu0  ;;  %v1253_v60 = vpop.f32.mrf.mxu1  ;;  %2992 = vmatprep.subr.bf16.mxu0 %v3226_v9  ;;  %2998 = vmatprep.subr.bf16.mxu1 %v3226_v9 }
 0x238   : > { %v1202_v61 = vadd.f32 %v2711_v55, %v1201_v59  ;;  %v1254_v62 = vadd.f32 %v2712_v56, %v1253_v60 }
 0x239   : > { %v2918_v63 = vpop.f32.mrf.mxu0  ;;  %v2926_v0 = vpop.f32.mrf.mxu1 }
 0x23a   : > { %v1439_v3 = vpack.c.bf16 %v1202_v61, %v1202_v61  ;;  %v1440_v4 = vpack.c.bf16 %v1254_v62, %v1254_v62 }
 0x23b   : > { %v1204_v5 = vpop.f32.mrf.mxu0  ;;  %v1256_v6 = vpop.f32.mrf.mxu1 }
 0x23c   : > { %v2031_v7 = vsel %vm1759_vm3, %v1439_v3, 0  ;;  %v2077_v8 = vsel %vm1759_vm3, %v1440_v4, 0  ;;  %2983 = vmatmul.mubr.msk.bf16.vlgmr.msra.gmra.mxu0 %vm1456_vm2, %v1397_v1  ;;  %2989 = vmatmul.mubr.msk.bf16.vlgmr.msra.gmra.mxu1 %vm1456_vm2, %v1398_v2 }
 0x23d   : > { %v2919_v10 = vpop.f32.mrf.mxu0  ;;  %v2927_v11 = vpop.f32.mrf.mxu1  ;;  %2993 = vmatpush3.bf16.msra.mxu0 %v2031_v7  ;;  %2999 = vmatpush3.bf16.msra.mxu1 %v2077_v8 }
 0x23e   : > { %2994 = vmatprep.mubr.msk.bf16.mxu0 %vm3227_vm1, %v3226_v9  ;;  %3004 = vmatprep.subr.bf16.mxu0 %v3226_v9 }
 0x23f   : > { %v3656_v12 = vpop.f32.mrf.mxu0  ;;  %v3658_v13 = vpop.f32.mrf.mxu1  ;;  %3000 = vmatprep.mubr.msk.bf16.mxu1 %vm3227_vm1, %v3226_v9  ;;  %3010 = vmatprep.subr.bf16.mxu1 %v3226_v9 }
 0x241   : > { %v2934_v14 = vpop.f32.mrf.mxu0  ;;  %v2942_v15 = vpop.f32.mrf.mxu1 }
 0x243   : > { %v1308_v16 = vpop.f32.mrf.mxu0  ;;  %v1360_v17 = vpop.f32.mrf.mxu1 }
 0x245   : > { %v2935_v18 = vpop.f32.mrf.mxu0  ;;  %v2943_v19 = vpop.f32.mrf.mxu1 }
 0x2dc   : > { %v3663_v20 = vpop.f32.mrf.mxu0  ;;  %v3665_v21 = vpop.f32.mrf.mxu1 }
 0x2dd   : > { %1662 = vrot.lane.b32.xlu0 %v3665_v21, %s3228_s27  ;;  %1660 = vrot.lane.b32.xlu1 %v3663_v20, %s3228_s27 }
 0x2de   : > { %v2948_v22 = vpop.f32.mrf.mxu0  ;;  %v2954_v23 = vpop.f32.mrf.mxu1 }
 0x2e0   : > { %v1500_v24 = vpop.f32.mrf.mxu0  ;;  %v1551_v25 = vpop.f32.mrf.mxu1 }
 0x2e1   : > { %1720 = vrot.lane.b32.xlu0 %v3663_v20, %s3229_s29  ;;  %1672 = vrot.lane.b32.xlu1 %v3663_v20, %s3230_s0 }
 0x2e2   : > { %v2949_v26 = vpop.f32.mrf.mxu0  ;;  %v2955_v27 = vpop.f32.mrf.mxu1 }
 0x2e4   : > { %v3675_v28 = vpop.f32.mrf.mxu0  ;;  %v3677_v29 = vpop.f32.mrf.mxu1 }
 0x2e5   : > { %1732 = vrot.lane.b32.xlu0 %v3663_v20, %s3231_s21  ;;  %1684 = vrot.lane.b32.xlu1 %v3663_v20, %s3232_s28 }
 0x2e6   : > { %v2960_v30 = vpop.f32.mrf.mxu0  ;;  %v2966_v31 = vpop.f32.mrf.mxu1 }
 0x2e8   : > { %v1602_v32 = vpop.f32.mrf.mxu0  ;;  %v1653_v33 = vpop.f32.mrf.mxu1 }
 0x2e9   : > { %1674 = vrot.lane.b32.xlu1 %v3665_v21, %s3230_s0  ;;  %1664 = vrot.lane.b32.xlu0 %v3675_v28, %s3228_s27 }
 0x2ea   : > { %v2961_v34 = vpop.f32.mrf.mxu0  ;;  %v2967_v35 = vpop.f32.mrf.mxu1 }
 0x2ed   : > { %1696 = vrot.lane.b32.xlu1 %v3663_v20, %s3233_s22  ;;  %1676 = vrot.lane.b32.xlu0 %v3675_v28, %s3230_s0 }
 0x2f1   : > { %1686 = vrot.lane.b32.xlu1 %v3665_v21, %s3232_s28  ;;  %1688 = vrot.lane.b32.xlu0 %v3675_v28, %s3232_s28 }
 0x2f4   : > { %v3695_v36 = vpop.f32.mrf.mxu0  ;;  %v3697_v37 = vpop.f32.mrf.mxu1 }
 0x2f5   : > { %1708 = vrot.lane.b32.xlu1 %v3663_v20, %s3234_s20  ;;  %1700 = vrot.lane.b32.xlu0 %v3675_v28, %s3233_s22 }
 0x2f6   : > { %v2972_v38 = vpop.f32.mrf.mxu0  ;;  %v2978_v39 = vpop.f32.mrf.mxu1 }
 0x2f8   : > { %v1826_v40 = vpop.f32.mrf.mxu0  ;;  %v1876_v41 = vpop.f32.mrf.mxu1 }
 0x2f9   : > { %1698 = vrot.lane.b32.xlu1 %v3665_v21, %s3233_s22  ;;  %1712 = vrot.lane.b32.xlu0 %v3675_v28, %s3234_s20 }
 0x2fa   : > { %v2973_v42 = vpop.f32.mrf.mxu0  ;;  %v2979_v43 = vpop.f32.mrf.mxu1 }
 0x2fc   : > { %v3705_v44 = vpop.f32.mrf.mxu0  ;;  %v3707_v45 = vpop.f32.mrf.mxu1 }
 0x2fd   : > { %1710 = vrot.lane.b32.xlu1 %v3665_v21, %s3234_s20  ;;  %1724 = vrot.lane.b32.xlu0 %v3675_v28, %s3229_s29 }
 0x2fe   : > { %v2984_v46 = vpop.f32.mrf.mxu0  ;;  %v2990_v47 = vpop.f32.mrf.mxu1 }
 0x300   : > { %v1926_v48 = vpop.f32.mrf.mxu0  ;;  %v1976_v49 = vpop.f32.mrf.mxu1 }
 0x301   : > { %1722 = vrot.lane.b32.xlu1 %v3665_v21, %s3229_s29  ;;  %1736 = vrot.lane.b32.xlu0 %v3675_v28, %s3231_s21 }
 0x302   : > { %v2985_v50 = vpop.f32.mrf.mxu0  ;;  %v2991_v51 = vpop.f32.mrf.mxu1 }
 0x305   : > { %1734 = vrot.lane.b32.xlu1 %v3665_v21, %s3231_s21  ;;  %1738 = vrot.lane.b32.xlu0 %v3677_v29, %s3231_s21  ;;  %s593_s21 = scalar_lea.vmem [#allocation2], %s2679_s23  ;;  %s3236_s23 = smov [#allocation2]  }
 0x309   : > { %1666 = vrot.lane.b32.xlu1 %v3677_v29, %s3228_s27  ;;  %s3168_s27 = sshll.u32 %s3236_s23, 4  ;;  %s3169_s27 = int_to_ptr.vmem [resolvable:$false] %s3168_s27 }
 0x30d   : > { %1678 = vrot.lane.b32.xlu1 %v3677_v29, %s3230_s0  ;;  %s2769_s0 = sshll.u32 %s3358_s1, 7  ;;  %s2603_s1 = scalar_lea.sflag [#allocation3], %s591_s26 }
 0x311   : > { %1690 = vrot.lane.b32.xlu1 %v3677_v29, %s3232_s28 }
 0x315   : > { %1702 = vrot.lane.b32.xlu1 %v3677_v29, %s3233_s22 }
 0x319   : > { %1714 = vrot.lane.b32.xlu1 %v3677_v29, %s3234_s20  ;;  %s3885_s20 = scalar_lea.hbm %s3946_s19, %s2769_s0 }
 0x31d   : > { %1726 = vrot.lane.b32.xlu1 %v3677_v29, %s3229_s29  ;;  %s3170_s29 = scalar_lea.vmem %s3169_s27, 256 }
 0x34f   : > { %v1663_v52 = vpop.permute.xlu0 %1662  ;;  %v1661_v53 = vpop.permute.xlu1 %1660 }
 0x350   : > { %v1745_v0 = vsel %vm1744_vm4, %v3663_v20, %v1661_v53  ;;  %v1746_v20 = vsel %vm1744_vm4, %v3665_v21, %v1663_v52 }
 0x353   : > { %v1721_v54 = vpop.permute.xlu0 %1720  ;;  %v1673_v55 = vpop.permute.xlu1 %1672 }
 0x354   : > { %v1750_v1 = vsel %vm1749_vm5, %v1745_v0, %v1673_v55 }
 0x357   : > { %v1733_v56 = vpop.permute.xlu0 %1732  ;;  %v1685_v57 = vpop.permute.xlu1 %1684 }
 0x358   : > { %v1755_v2 = vsel %vm1754_vm6, %v1750_v1, %v1685_v57 }
 0x35b   : > { %v1675_v58 = vpop.permute.xlu1 %1674  ;;  %v1665_v59 = vpop.permute.xlu0 %1664 }
 0x35c   : > { %v1747_v14 = vsel %vm1744_vm4, %v3675_v28, %v1665_v59  ;;  %v1751_v23 = vsel %vm1749_vm5, %v1746_v20, %v1675_v58 }
 0x35f   : > { %v1697_v60 = vpop.permute.xlu1 %1696  ;;  %v1677_v61 = vpop.permute.xlu0 %1676 }
 0x360   : > { %v1760_v3 = vsel %vm1759_vm3, %v1755_v2, %v1697_v60  ;;  %v1752_v15 = vsel %vm1749_vm5, %v1747_v14, %v1677_v61 }
 0x363   : > { %v1687_v62 = vpop.permute.xlu1 %1686  ;;  %v1689_v63 = vpop.permute.xlu0 %1688 }
 0x364   : > { %v1757_v18 = vsel %vm1754_vm6, %v1752_v15, %v1689_v63  ;;  %v1756_v27 = vsel %vm1754_vm6, %v1751_v23, %v1687_v62 }
 0x367   : > { %v1709_v4 = vpop.permute.xlu1 %1708  ;;  %v1701_v5 = vpop.permute.xlu0 %1700 }
 0x368   : > { %v1765_v6 = vsel %vm1764_vm7, %v1760_v3, %v1709_v4  ;;  %v1762_v19 = vsel %vm1759_vm3, %v1757_v18, %v1701_v5 }
 0x369   : > { %v1770_v7 = vsel %vm1769_vm8, %v1765_v6, %v1721_v54 }
 0x36a   : > { %v1775_v8 = vsel %vm1774_vm9, %v1770_v7, %v1733_v56 }
 0x36b   : > { %1780 = vrot.lane.b32.xlu1 %v1775_v8, %s3235_s25  ;;  %v1699_v10 = vpop.permute.xlu1 %1698  ;;  %v1713_v11 = vpop.permute.xlu0 %1712 }
 0x36c   : > { %v1767_v22 = vsel %vm1764_vm7, %v1762_v19, %v1713_v11  ;;  %v1761_v30 = vsel %vm1759_vm3, %v1756_v27, %v1699_v10  ;;  %v2713_v19 = vld [vmem:[%s3936_s9 + $0x2] ss:$0 sm:$0xff] }
 0x36d   : > { %v1306_v20 = vadd.f32 %v2713_v19, %v3656_v12  ;;  %v2714_v12 = vld [vmem:[%s3936_s9 + $0x3] ss:$0 sm:$0xff] }
 0x36f   : > { %v1711_v16 = vpop.permute.xlu1 %1710  ;;  %v1725_v17 = vpop.permute.xlu0 %1724 }
 0x370   : > { %v1772_v24 = vsel %vm1769_vm8, %v1767_v22, %v1725_v17  ;;  %v1766_v31 = vsel %vm1764_vm7, %v1761_v30, %v1711_v16  ;;  %v1358_v30 = vadd.f32 %v2714_v12, %v3658_v13  ;;  %v2755_v12 = vld [vmem:[%s3939_s12] ss:$0 sm:$0xff] }
 0x373   : > { %v1723_v25 = vpop.permute.xlu1 %1722  ;;  %v1737_v26 = vpop.permute.xlu0 %1736 }
 0x374   : > { %v1777_v28 = vsel %vm1774_vm9, %v1772_v24, %v1737_v26  ;;  %v1771_v21 = vsel %vm1769_vm8, %v1766_v31, %v1723_v25  ;;  %v1441_v24 = vpack.c.bf16 %v1306_v20, %v1306_v20 }
 0x375   : > { %1880 = vrot.lane.b32.xlu1 %v1777_v28, %s3235_s25 }
 0x376   : > { %v2123_v28 = vsel %vm1759_vm3, %v1441_v24, 0 }
 0x377   : > { %v1735_v32 = vpop.permute.xlu1 %1734  ;;  %v1739_v49 = vpop.permute.xlu0 %1738 }
 0x378   : > { %v1776_v33 = vsel %vm1774_vm9, %v1771_v21, %v1735_v32  ;;  %v1442_v21 = vpack.c.bf16 %v1358_v30, %v1358_v30  ;;  %v3163_v30 = vld [vmem:[%s3390_s24] sm:$0xff]  ;;  %s2616_s24 = sshll.u32 %s593_s21, 4  ;;  %s3887_s24 = int_to_ptr.vmem [resolvable:$true] %s2616_s24 }
 0x379   : > { %1830 = vrot.lane.b32.xlu0 %v1776_v33, %s3235_s25  ;;  %p3171_p0 = scmp.lt.s32.totalorder %s3887_s24, %s3169_s27 }
 0x37b   : > { %v1667_v34 = vpop.permute.xlu1 %1666 }
 0x37c   : > { %v1748_v40 = vsel %vm1744_vm4, %v3677_v29, %v1667_v34 }
 0x37f   : > { %v1679_v35 = vpop.permute.xlu1 %1678 }
 0x380   : > { %v1753_v42 = vsel %vm1749_vm5, %v1748_v40, %v1679_v35  ;;  %v2169_v35 = vsel %vm1759_vm3, %v1442_v21, 0 }
 0x383   : > { %v1691_v38 = vpop.permute.xlu1 %1690 }
 0x384   : > { %v1758_v43 = vsel %vm1754_vm6, %v1753_v42, %v1691_v38 }
 0x387   : > { %v1703_v39 = vpop.permute.xlu1 %1702 }
 0x388   : > { %v1763_v46 = vsel %vm1759_vm3, %v1758_v43, %v1703_v39  ;;  %v2215_v43 = vld [vmem:[%s3938_s11] sm:$0xf] }
 0x38b   : > { %v1715_v41 = vpop.permute.xlu1 %1714 }
 0x38c   : > { %v1768_v47 = vsel %vm1764_vm7, %v1763_v46, %v1715_v41  ;;  %v2223_v46 = vsel %vm1759_vm3, %v2215_v43, 0  ;;  %v3139_v43 = vld [vmem:[%s3944_s17 + $0x18] sm:$0xff]  }
 0x38f   : > { %v1727_v48 = vpop.permute.xlu1 %1726 }
 0x390   : > { %v1773_v50 = vsel %vm1769_vm8, %v1768_v47, %v1727_v48  ;;  %v2216_v47 = vld [vmem:[%s3938_s11 + $0x4] sm:$0xf] }
 0x391   : > { %v1778_v51 = vsel %vm1774_vm9, %v1773_v50, %v1739_v49  ;;  %v2269_v48 = vsel %vm1759_vm3, %v2216_v47, 0  ;;  %v2217_v49 = vld [vmem:[%s3938_s11 + $0x8] sm:$0xf] }
 0x392   : > { %1930 = vrot.lane.b32.xlu0 %v1778_v51, %s3235_s25  ;;  %s3164_s25 = scalar_lea.vmem %s3887_s24, 128 }
 0x393   : > { %p3165_p11 = scmp.ne.s32.totalorder %s3887_s24, %s3164_s25  ;;  %p3172_p1 = scmp.lt.s32.totalorder %s3170_s29, %s3164_s25 }
 0x395   : > { %p3166_p12 = pnand %p3165_p11, %p3375_p5  ;;  %p3173_p2 = por %p3172_p1, %p3171_p0 }
 0x397   : > { %p3167_p13 = pneg %p3166_p12 }
 0x399   : > { %p3174_p3 = pnand %p3173_p2, %p3167_p13 }
 0x3dd   : > { %v1781_v52 = vpop.permute.xlu1 %1780 }
 0x3de   : > { %v1824_v29 = vadd.f32 %v3695_v36, %v1781_v52  ;;  %v2315_v52 = vsel %vm1759_vm3, %v2217_v49, 0 }
 0x3e0   : > { %v1979_v53 = vsel %vm1456_vm2, %v1824_v29, -inf }
 0x3e1   : > { %1980 = vmax.xlane.f32.xlu1 %v1979_v53 }
 0x3e7   : > { %v1881_v54 = vpop.permute.xlu1 %1880 }
 0x3e8   : > { %v1924_v57 = vadd.f32 %v3705_v44, %v1881_v54 }
 0x3ea   : > { %v1985_v59 = vsel %vm1456_vm2, %v1924_v57, -inf }
 0x3eb   : > { %v1831_v55 = vpop.permute.xlu0 %1830 }
 0x3ec   : > { %v1874_v56 = vadd.f32 %v3697_v37, %v1831_v55  ;;  %v2218_v55 = vld [vmem:[%s3938_s11 + $0xc] sm:$0xf] }
 0x3ee   : > { %v1982_v58 = vsel %vm1456_vm2, %v1874_v56, -inf }
 0x3ef   : > { %1983 = vmax.xlane.f32.xlu0 %v1982_v58  ;;  %v2361_v58 = vsel %vm1759_vm3, %v2218_v55, 0 }
 0x3f3   : > { %1986 = vmax.xlane.f32.xlu0 %v1985_v59 }
 0x404   : > { %v1931_v60 = vpop.permute.xlu0 %1930 }
 0x405   : > { %v1974_v61 = vadd.f32 %v3707_v45, %v1931_v60 }
 0x407   : > { %v1988_v36 = vsel %vm1456_vm2, %v1974_v61, -inf }
 0x408   : > { %1989 = vmax.xlane.f32.xlu1 %v1988_v36 }
 0x46a   : > { %v1981_v62 = vpop.xlane.xlu1 %1980 }
 0x46b   : > { %v1991_v63 = vsub.f32 %v1824_v29, %v1981_v62 }
 0x46d   : > { %v1995_v0 = vmul.f32 1.442695, %v1991_v63 }
 0x46f   : > { %3145 = vpow2.f32 %v1995_v0 }
 0x478   : > { %v1984_v1 = vpop.xlane.xlu0 %1983 }
 0x479   : > { %v1992_v37 = vsub.f32 %v1874_v56, %v1984_v1 }
 0x47b   : > { %v1997_v2 = vmul.f32 1.442695, %v1992_v37 }
 0x47c   : > { %v3146_v44 = vpop.eup %3145  ;;  %v1987_v3 = vpop.xlane.xlu0 %1986 }
 0x47d   : > { %3147 = vpow2.f32 %v1997_v2  ;;  %v1993_v4 = vsub.f32 %v1924_v57, %v1987_v3  ;;  %v2003_v5 = vsel %vm1456_vm2, %v3146_v44, 0.0 }
 0x47e   : > { %2004 = vadd.xlane.f32.xlu0 %v2003_v5 }
 0x47f   : > { %v1999_v6 = vmul.f32 1.442695, %v1993_v4 }
 0x481   : > { %3149 = vpow2.f32 %v1999_v6 }
 0x48a   : > { %v3148_v45 = vpop.eup %3147 }
 0x48b   : > { %v2006_v7 = vsel %vm1456_vm2, %v3148_v45, 0.0 }
 0x48c   : > { %2007 = vadd.xlane.f32.xlu1 %v2006_v7 }
 0x48e   : > { %v3150_v8 = vpop.eup %3149 }
 0x48f   : > { %v2009_v10 = vsel %vm1456_vm2, %v3150_v8, 0.0 }
 0x490   : > { %2010 = vadd.xlane.f32.xlu0 %v2009_v10 }
 0x491   : > { %v1990_v11 = vpop.xlane.xlu1 %1989 }
 0x492   : > { %v1994_v14 = vsub.f32 %v1974_v61, %v1990_v11 }
 0x494   : > { %v2001_v15 = vmul.f32 1.442695, %v1994_v14 }
 0x496   : > { %3151 = vpow2.f32 %v2001_v15 }
 0x4a3   : > { %v3152_v16 = vpop.eup %3151 }
 0x4a4   : > { %v2012_v17 = vsel %vm1456_vm2, %v3152_v16, 0.0 }
 0x4a5   : > { %2013 = vadd.xlane.f32.xlu1 %v2012_v17 }
 0x507   : > { %v2005_v18 = vpop.xlane.xlu0 %2004 }
 0x508   : > { %3153 = vrcp.f32 %v2005_v18 }
 0x515   : > { %v3154_v22 = vpop.eup %3153  ;;  %v2008_v23 = vpop.xlane.xlu1 %2007 }
 0x516   : > { %3155 = vrcp.f32 %v2008_v23  ;;  %v2019_v25 = vmul.f32 %v3154_v22, %v3146_v44 }
 0x518   : > { %v2023_v26 = vpack.c.bf16 %v2019_v25, %v2019_v25 }
 0x519   : > { %v2011_v27 = vpop.xlane.xlu0 %2010 }
 0x51a   : > { %3157 = vrcp.f32 %v2011_v27  ;;  %2995 = vmatmul.mubr.msk.bf16.vlgmr.msra.gmra.mxu0 %vm1456_vm2, %v2023_v26 }
 0x51b   : > { %3005 = vmatpush3.bf16.msra.mxu0 %v2123_v28  ;;  %3006 = vmatprep.mubr.msk.bf16.mxu0 %vm3227_vm1, %v3226_v9 }
 0x51c   : > { %3016 = vmatprep.subr.bf16.mxu0 %v3226_v9 }
 0x523   : > { %v3156_v31 = vpop.eup %3155 }
 0x524   : > { %v2020_v32 = vmul.f32 %v3156_v31, %v3148_v45 }
 0x526   : > { %v2024_v33 = vpack.c.bf16 %v2020_v32, %v2020_v32 }
 0x527   : > { %v3158_v34 = vpop.eup %3157 }
 0x528   : > { %3001 = vmatmul.mubr.msk.bf16.vlgmr.msra.gmra.mxu1 %vm1456_vm2, %v2024_v33  ;;  %v2021_v38 = vmul.f32 %v3158_v34, %v3150_v8 }
 0x529   : > { %3011 = vmatpush3.bf16.msra.mxu1 %v2169_v35  ;;  %3012 = vmatprep.mubr.msk.bf16.mxu1 %vm3227_vm1, %v3226_v9 }
 0x52a   : > { %v2025_v39 = vpack.c.bf16 %v2021_v38, %v2021_v38  ;;  %3022 = vmatprep.subr.bf16.mxu1 %v3226_v9 }
 0x52c   : > { %3007 = vmatmul.mubr.msk.bf16.vlgmr.msra.gmra.mxu0 %vm1456_vm2, %v2025_v39 }
 0x52d   : > { %3018 = vmatprep.mubr.msk.bf16.mxu0 %vm3227_vm1, %v3226_v9  ;;  %3017 = vmatpush3.bf16.msra.mxu0 %v2223_v46  ;;  %v3140_v46 = vld [vmem:[%s3944_s17 + $0x10] sm:$0xff]  }
 0x52e   : > { %v2014_v13 = vpop.xlane.xlu1 %2013  ;;  %3028 = vmatprep.subr.bf16.mxu0 %v3226_v9 }
 0x52f   : > { %3159 = vrcp.f32 %v2014_v13 }
 0x53c   : > { %v3160_v40 = vpop.eup %3159 }
 0x53d   : > { %v2022_v41 = vmul.f32 %v3160_v40, %v3152_v16 }
 0x53f   : > { %v2026_v42 = vpack.c.bf16 %v2022_v41, %v2022_v41  ;;  %v3137_v41 = vld [vmem:[%s3942_s15 + $0x8] sm:$0xff]  }
 0x541   : > { %3013 = vmatmul.mubr.msk.bf16.vlgmr.msra.gmra.mxu1 %vm1456_vm2, %v2026_v42  ;;  %v3138_v42 = vld [vmem:[%s3942_s15] sm:$0xff]  }
 0x542   : > { %3024 = vmatprep.mubr.msk.bf16.mxu1 %vm3227_vm1, %v3226_v9  ;;  %3023 = vmatpush3.bf16.msra.mxu1 %v2269_v48 }
 0x543   : > { %3034 = vmatprep.subr.bf16.mxu1 %v3226_v9 }
 0x5da   : > { %v2067_v50 = vpop.f32.mrf.mxu0 }
 0x5db   : > { %v2211_v51 = vpack.c.bf16 %v2067_v50, %v2067_v50 }
 0x5dc   : > { %v2996_v29 = vpop.f32.mrf.mxu0 }
 0x5dd   : > { %3019 = vmatmul.mubr.msk.bf16.vlgmr.msra.gmra.mxu0 %vm1456_vm2, %v2211_v51  ;;  %v2756_v51 = vld [vmem:[%s3940_s13] ss:$0 sm:$0xff] }
 0x5de   : > { %v2070_v53 = vpop.f32.mrf.mxu0  ;;  %3029 = vmatpush3.bf16.msra.mxu0 %v2315_v52  ;;  %3030 = vmatprep.mubr.msk.bf16.mxu0 %vm3227_vm1, %v3226_v9  ;;  %v2757_v29 = vld [vmem:[%s3941_s14] ss:$0 sm:$0xff] }
 0x5df   : > { %3040 = vmatprep.subr.bf16.mxu0 %v3226_v9 }
 0x5e0   : > { %v2997_v54 = vpop.f32.mrf.mxu0 }
 0x5e8   : > { %v2113_v56 = vpop.f32.mrf.mxu1 }
 0x5e9   : > { %v2212_v57 = vpack.c.bf16 %v2113_v56, %v2113_v56  ;;  %v3141_v56 = vld [vmem:[%s3944_s17 + $0x8] sm:$0xff]  }
 0x5ea   : > { %v3002_v59 = vpop.f32.mrf.mxu1 }
 0x5eb   : > { %3025 = vmatmul.mubr.msk.bf16.vlgmr.msra.gmra.mxu1 %vm1456_vm2, %v2212_v57  ;;  %v3142_v57 = vld [vmem:[%s3944_s17] sm:$0xff]  }
 0x5ec   : > { %v2116_v60 = vpop.f32.mrf.mxu1  ;;  %v2159_v61 = vpop.f32.mrf.mxu0  ;;  %3035 = vmatpush3.bf16.msra.mxu1 %v2361_v58  ;;  %3036 = vmatprep.mubr.msk.bf16.mxu1 %vm3227_vm1, %v3226_v9  ;;  %v2758_v58 = vld [vmem:[%s3943_s16] ss:$0 sm:$0xff] }
 0x5ed   : > { %v2213_v36 = vpack.c.bf16 %v2159_v61, %v2159_v61  ;;  %3048 = vmatprep.subr.bf16.mxu1 %v3226_v9 }
 0x5ee   : > { %v3003_v62 = vpop.f32.mrf.mxu1  ;;  %v3008_v63 = vpop.f32.mrf.mxu0 }
 0x5ef   : > { %3031 = vmatmul.mubr.msk.bf16.vlgmr.msra.gmra.mxu0 %vm1456_vm2, %v2213_v36 }
 0x5f0   : > { %v2162_v0 = vpop.f32.mrf.mxu0  ;;  %3044 = vmatprep.mubr.msk.bf16.mxu0 %vm3227_vm1, %v3226_v9  ;;  %3041 = vmatpush3.bf16.msra.mxu0 %v3137_v41 }
 0x5f1   : > { %3042 = vmatprep.subr.bf16.mxu0 %v3226_v9 }
 0x5f2   : > { %v3009_v1 = vpop.f32.mrf.mxu0 }
 0x5f4   : > { %3043 = vmatpush3.bf16.msra.mxu0 %v3138_v42 }
 0x601   : > { %v2205_v37 = vpop.f32.mrf.mxu1 }
 0x602   : > { %v2214_v2 = vpack.c.bf16 %v2205_v37, %v2205_v37 }
 0x603   : > { %v3014_v44 = vpop.f32.mrf.mxu1 }
 0x604   : > { %3037 = vmatmul.mubr.msk.bf16.vlgmr.msra.gmra.mxu1 %vm1456_vm2, %v2214_v2 }
 0x605   : > { %v2208_v3 = vpop.f32.mrf.mxu1  ;;  %3056 = vmatprep.mubr.msk.bf16.mxu1 %vm3227_vm1, %v3226_v9  ;;  %3049 = vmatpush3.bf16.msra.mxu1 %v3139_v43 }
 0x606   : > { %3050 = vmatprep.subr.bf16.mxu1 %v3226_v9 }
 0x607   : > { %v3015_v4 = vpop.f32.mrf.mxu1 }
 0x609   : > { %3051 = vmatpush3.bf16.msra.mxu1 %v3140_v46 }
 0x60a   : > { %3052 = vmatprep.subr.bf16.mxu1 %v3226_v9 }
 0x60d   : > { %3053 = vmatpush3.bf16.msra.mxu1 %v3141_v56 }
 0x60e   : > { %3054 = vmatprep.subr.bf16.mxu1 %v3226_v9  ;;  %v2762_v9 = vld [vmem:[%s3945_s18] ss:$0 sm:$0xff] }
 0x611   : > { %3055 = vmatpush3.bf16.msra.mxu1 %v3142_v57 }
 0x69d   : > { %v2259_v5 = vpop.f32.mrf.mxu0 }
 0x69e   : > { %v2403_v20 = vsel %vm602_vm0, %v2259_v5, 0.0 }
 0x69f   : > { %v3020_v6 = vpop.f32.mrf.mxu0 }
 0x6a1   : > { %v2262_v45 = vpop.f32.mrf.mxu0 }
 0x6a3   : > { %v3021_v7 = vpop.f32.mrf.mxu0 }
 0x6ab   : > { %v2305_v8 = vpop.f32.mrf.mxu1 }
 0x6ac   : > { %v2404_v19 = vsel %vm602_vm0, %v2305_v8, 0.0 }
 0x6ad   : > { %v3026_v10 = vpop.f32.mrf.mxu1  ;;  %v2405_v23 = vadd.f32 %v2404_v19, %v2403_v20 }
 0x6af   : > { %v2308_v11 = vpop.f32.mrf.mxu1  ;;  %v2351_v14 = vpop.f32.mrf.mxu0 }
 0x6b0   : > { %v2406_v22 = vsel %vm602_vm0, %v2351_v14, 0.0 }
 0x6b1   : > { %v3027_v15 = vpop.f32.mrf.mxu1  ;;  %v3032_v16 = vpop.f32.mrf.mxu0  ;;  %v2407_v24 = vadd.f32 %v2406_v22, %v2405_v23 }
 0x6b3   : > { %v2354_v17 = vpop.f32.mrf.mxu0 }
 0x6b5   : > { %v3033_v18 = vpop.f32.mrf.mxu0 }
 0x6c4   : > { %v2397_v25 = vpop.f32.mrf.mxu1 }
 0x6c5   : > { %v2408_v26 = vsel %vm602_vm0, %v2397_v25, 0.0 }
 0x6c6   : > { %v2409_v27 = vadd.f32 %v2408_v26, %v2407_v24  ;;  %v3038_v28 = vpop.f32.mrf.mxu1 }
 0x6c8   : > { %v2410_v31 = vadd.f32 %v3163_v30, %v2409_v27  ;;  %v2400_v21 = vpop.f32.mrf.mxu1 }
 0x6ca   : > { %v3039_v32 = vpop.f32.mrf.mxu1  ;;  %v2418_v33 = vadd.f32 %v2755_v12, %v2410_v31 }
 0x6cc   : > { %v2421_v34 = vsel %vm602_vm0, %v2418_v33, 0.0 }
 0x6cd   : > { %2422 = vadd.xlane.f32.xlu0 %v2421_v34 }
 0x756   : > { %v2423_v35 = vpop.xlane.xlu0 %2422 }
 0x757   : > { %v2424_v38 = vmul.f32 0.03125, %v2423_v35 }
 0x759   : > { %v2425_v39 = vsub.f32 %v2418_v33, %v2424_v38 }
 0x75b   : > { %v2426_v13 = vmul.f32 %v2425_v39, %v2425_v39 }
 0x75d   : > { %v2427_v40 = vsel %vm602_vm0, %v2426_v13, 0.0 }
 0x75e   : > { %2428 = vadd.xlane.f32.xlu1 %v2427_v40 }
 0x7e7   : > { %v2429_v47 = vpop.xlane.xlu1 %2428 }
 0x7e8   : > { %v2430_v48 = vmul.f32 0.03125, %v2429_v47 }
 0x7ea   : > { %v2431_v49 = vadd.f32 1e-12, %v2430_v48 }
 0x7ec   : > { %3161 = vrsqrt.f32 %v2431_v49 }
 0x7f9   : > { %v3162_v50 = vpop.eup %3161 }
 0x7fa   : > { %v2433_v52 = vmul.f32 %v3162_v50, %v2425_v39 }
 0x7fc   : > { %v2440_v53 = vmul.f32 %v2756_v51, %v2433_v52 }
 0x7fe   : > { %v2447_v54 = vadd.f32 %v2757_v29, %v2440_v53 }
 0x800   : > { %v2448_v55 = vpack.c.bf16 %v2447_v54, %v2447_v54 }
 0x802   : > { %3045 = vmatmul.mubr.msk.bf16.vlgmr.msra.gmra.mxu0 %vm602_vm0, %v2448_v55 }
 0x8c2   : > { %v2509_v59 = vpop.f32.mrf.mxu0 }
 0x8c3   : > { %v2510_v60 = vadd.f32 %v2758_v58, %v2509_v59 }
 0x8c4   : > { %v3046_v61 = vpop.f32.mrf.mxu0 }
 0x8c5   : > { %v2515_v36 = vmax.f32 %v2510_v60, 0.0 }
 0x8c6   : > { %v2512_v62 = vpop.f32.mrf.mxu0 }
 0x8c7   : > { %v2516_v63 = vpack.c.bf16 %v2515_v36, %v2515_v36 }
 0x8c8   : > { %v3047_v0 = vpop.f32.mrf.mxu0 }
 0x8c9   : > { %3057 = vmatmul.mubr.msk.bf16.vlgmr.msra.gmra.mxu1 %vm2556_vm10, %v2516_v63 }
 0x989   : > { %v2594_v1 = vpop.f32.mrf.mxu1 }
 0x98a   : > { %v2595_v37 = vadd.f32 %v2762_v9, %v2594_v1 }
 0x98b   : > { %v3058_v2 = vpop.f32.mrf.mxu1 }
 0x98c   : > { %v2600_v44 = vadd.f32 %v2595_v37, %v2418_v33 }
 0x98d   : > { %v2597_v3 = vpop.f32.mrf.mxu1 }
 0x98e   : > { %2601 = vst.msk [vmem:[%s593_s21] sm:$0xff] %vm602_vm0, %v2600_v44 }
 0x98f   : > { %v3059_v4 = vpop.f32.mrf.mxu1 }
 0x990   : > { %3177 = shalt.err (!%p3174_p3)
}
 0x991   : > { %s3178_s0 = scalar_lea.hbm %s3885_s20, 128  ;;  %s3182_s28 = scalar_lea.hbm %s3946_s19, 256 }
 0x992   : > { %p3179_p4 = scmp.ne.s32.totalorder %s3885_s20, %s3178_s0  ;;  %p3183_p9 = scmp.lt.s32.totalorder %s3885_s20, %s3946_s19 }
 0x993   : > { %p3184_p10 = scmp.lt.s32.totalorder %s3182_s28, %s3178_s0 }
 0x994   : > { %p3180_p7 = pnand %p3179_p4, %p3375_p5 }
 0x995   : > { %p3185_p11 = por %p3184_p10, %p3183_p9 }
 0x996   : > { %p3181_p8 = pneg %p3180_p7 }
 0x998   : > { %p3186_p12 = pnand %p3185_p11, %p3181_p8 }
 0x99a   : > { %3189 = shalt.err (!%p3186_p12)
}
 0x99b   : > { %3060 = dma.vmem_to_hbm [thread:$0]  (%p3375_p5), %s3887_s24, 128, %s3885_s20, %s2603_s1  }
 0x99c PF: > { %s3971_s25 = sld [smem:[#allocation7_spill]] }
 0x99d   : > { %s3972_s27 = sld [smem:[#allocation5_spill]] }
 0x9a2   : > { %p3066_p13 = scmp.ge.s32.totalorder %s3971_s25, 2 }
 0x9a3   : > { %s2628_s26 = sand.u32 1, %s3972_s27  }
 0x9a4   : > { %p3063_p0 = pnand %p3066_p13, %p3379_p6  ;;  %s2629_s21 = scalar_lea.sflag [#allocation3], %s2628_s26 }
 0x9a6   : > { %p3064_p1 = pneg %p3063_p0 }
 0x9a8   : > { %3207 = dma.done.wait (%p3064_p1), %s2629_s21, 128  }
 0x9a9   : > { %3209 = vsyncadd (%p3064_p1), %s2629_s21, 4294967168  ;;  %s3974_s21 = sld [smem:[#allocation8_spill]]  ;;  %s3977_s0 = smov %s3216_s30 }
 0x9aa   : > { %s3975_s28 = sld [smem:[#allocation6_spill]] }
 0x9ab   : > { %s3976_s20 = sld [smem:[#allocation9_spill]] }
 0x9af   : > { %p29_p2 = scmp.ge.s32.totalorder %s3974_s21, 4  }
 0x9b0   : > { %s3978_s30 = smov %s3975_s28 }
 0x9b1   :  { %31 = sbr.rel (!%p29_p2) target bundleno = 8 (0x8), region = 131 }
 0x9b6   :  { %2634 = vsyncpa [#allocation3], 1 }
 0x9b7   :  { %2636 = vsyncpa [#allocation3 + $0x1], 1 }

// kernel: tpu_custom_call.1
= control target key start
LH: loop header
LB: loop body
LE: loop exit
PB: predicated region body
PF: predicated region fallthrough
CT: control target
= control target key end

     0   :  { %s3927_s0 = inlined_call_operand.vmem [shape: f32[2,8,32], index: 0, kind: input, shape index: {}]   ;;  %s3928_s1 = inlined_call_operand.vmem [shape: f32[1,32], index: 1, kind: input, shape index: {}]   ;;  %s3929_s2 = inlined_call_operand.vmem [shape: f32[1,32], index: 2, kind: input, shape index: {}]   ;;  %s3930_s3 = inlined_call_operand.vmem [shape: bf16[4,32,8], index: 3, kind: input, shape index: {}]   ;;  %s3931_s4 = inlined_call_operand.vmem [shape: f32[4,1,8], index: 4, kind: input, shape index: {}]   ;;  %s3932_s5 = inlined_call_operand.vmem [shape: f32[4,1,8], index: 5, kind: input, shape index: {}]   ;;  %s3933_s6 = inlined_call_operand.vmem [shape: bf16[4,32,8], index: 6, kind: input, shape index: {}]   ;;  %s3934_s7 = inlined_call_operand.vmem [shape: f32[4,1,8], index: 7, kind: input, shape index: {}]   ;;  %s3935_s8 = inlined_call_operand.vmem [shape: bf16[4,32,8], index: 8, kind: input, shape index: {}]   ;;  %s3936_s9 = inlined_call_operand.vmem [shape: f32[4,1,8], index: 9, kind: input, shape index: {}]   ;;  %s3937_s10 = inlined_call_operand.vmem [shape: bf16[4,16,8], index: 10, kind: input, shape index: {}]   ;;  %s3938_s11 = inlined_call_operand.vmem [shape: bf16[4,8,32], index: 11, kind: input, shape index: {}]   ;;  %s3939_s12 = inlined_call_operand.vmem [shape: f32[1,32], index: 12, kind: input, shape index: {}]   ;;  %s3940_s13 = inlined_call_operand.vmem [shape: f32[1,32], index: 13, kind: input, shape index: {}]   ;;  %s3941_s14 = inlined_call_operand.vmem [shape: f32[1,32], index: 14, kind: input, shape index: {}]   ;;  %s3942_s15 = inlined_call_operand.vmem [shape: bf16[32,64], index: 15, kind: input, shape index: {}]   ;;  %s3943_s16 = inlined_call_operand.vmem [shape: f32[1,64], index: 16, kind: input, shape index: {}]   ;;  %s3944_s17 = inlined_call_operand.vmem [shape: bf16[64,32], index: 17, kind: input, shape index: {}]   ;;  %s3945_s18 = inlined_call_operand.vmem [shape: f32[1,32], index: 18, kind: input, shape index: {}]   ;;  %s3946_s19 = inlined_call_operand.hbm [shape: f32[2,8,32], index: 19, kind: output, shape index: {}]  }
   0x1   :  { %3954 = sst [smem:[#allocation11_spill]] %s3927_s0 }
   0x2   :  { %3955 = sst [smem:[#allocation12_spill]] %s3928_s1 }
   0x3   :  { %3956 = sst [smem:[#allocation13_spill]] %s3929_s2 }
   0x4   :  { %3957 = sst [smem:[#allocation14_spill]] %s3930_s3 }
   0x5   :  { %24 = vsyncpa [#allocation3], 0 }
   0x6   :  { %26 = vsyncpa [#allocation3 + $0x1], 0  ;;  %s3337_s0 = smov 0   ;;  %s3339_s30 = smov 0  }
   0x7   :  { %s3341_s20 = smov 0   ;;  %s3343_s21 = smov 0  }
   0x8 LB: > { %3958 = sst [smem:[#allocation5_spill]] %s3212_s0  ;;  %s3358_s1 = sadd.s32 4294967295, %s3224_s21   ;;  %s3224_s21 = sphi %s3343_s21, %s3974_s21   ;;  %s3220_s20 = sphi %s3341_s20, %s3976_s20   ;;  %s3216_s30 = sphi %s3339_s30, %s3978_s30   ;;  %s3212_s0 = sphi %s3337_s0, %s3977_s0  }
   0x9   : > { %3959 = sst [smem:[#allocation6_spill]] %s3220_s20  ;;  %s2675_s22 = sadd.s32 4294967294, %s3224_s21  }
   0xa   : > { %3960 = sst [smem:[#allocation7_spill]] %s3224_s21  ;;  %s3362_s2 = sadd.s32 1, %s3224_s21  }
   0xb   : > { %3961 = sst [smem:[#allocation8_spill]] %s3362_s2  ;;  %s443_s23 = sadd.s32 1, %s3220_s20 }
   0xc   : > { %s440_s24 = ssub.s32 %s3224_s21, %s3362_s2  ;;  %p453_p0 = scmp.ne.s32.totalorder %s3220_s20, %s3216_s30 }
   0xd   : > { %p441_p1 = scmp.eq.s32.totalorder %s440_s24, 0  ;;  %p454_p2 = scmp.eq.s32.totalorder %s3358_s1, 1 }
   0xe   : > { %p459_p3 = scmp.ne.s32.totalorder %s3216_s30, %s3212_s0  ;;  %p460_p4 = scmp.eq.s32.totalorder %s2675_s22, 1 }
   0xf   : > { %s3373_s25 = scalar_select %p441_p1, %s3220_s20, %s443_s23  }
  0x10   : > { %p3375_p5 = por %p454_p2, %p453_p0  ;;  %p3379_p6 = por %p460_p4, %p459_p3 }
  0x11   : > { %3962 = sst [smem:[#allocation9_spill]] %s3373_s25  ;;  %p2678_p7 = scmp.ge.s32.totalorder %s3224_s21, 1 }
  0x12   : > { %s3964_s26 = scalar_select %p3379_p6, 1, 0 }
  0x13   : > { %p539_p8 = scmp.lt.s32.totalorder %s3224_s21, 3 }
  0x14   : > { %3965 = sst [smem:[#allocation10_spill]] %s3964_s26 }
  0x15   : > { %p540_p9 = pnand %p2678_p7, %p539_p8 }
  0x16   : > { %p594_p10 = scmp.lt.s32.totalorder (!%p540_p9), %s3358_s1, 1  ;;  %s3966_s23 = sld [smem:[#allocation11_spill]] (!%p540_p9) }
  0x17   : > { %543 = sbr.rel (%p540_p9) target bundleno = 2460 (0x99c), region = 96  ;;  %s3967_s20 = sld [smem:[#allocation14_spill]] (!%p540_p9) }
  0x18   : > { %s3970_s22 = sld [smem:[#allocation13_spill]] (!%p540_p9)  ;;  %s3229_s29 = smov (!%p540_p9), 6  }
  0x19   : > { %s3230_s0 = smov (!%p540_p9), 2   ;;  %s3231_s21 = smov (!%p540_p9), 7  }
  0x1a   : > { %s3235_s25 = smov (!%p540_p9), 121   ;;  %s591_s26 = sand.u32 (!%p540_p9), 1, %s3216_s30  }
  0x1c   : > { %s595_s27 = scalar_select %p594_p10, %s3358_s1, 1  ;;  %vm602_vm0 = vcmask 261120   ;;  %v3226_v9 = vmov 0.0   ;;  %vm3227_vm1 = vmmov 0   ;;  %v3117_v26 = vld [vmem:[%s3933_s6 + $0x8] sm:$0xff]   ;;  %v3118_v27 = vld [vmem:[%s3933_s6 + $0x18] sm:$0xff]  }
  0x1d   : > { %s3968_s2 = smov %s3967_s20  ;;  %v3109_v7 = vld [vmem:[%s3967_s20 + $0x8] sm:$0xff]   ;;  %2848 = vmatprep.subr.bf16.mxu0 %v3226_v9  ;;  %2856 = vmatprep.subr.bf16.mxu1 %v3226_v9  ;;  %v3119_v28 = vld [vmem:[%s3933_s6] sm:$0xff]   ;;  %v3120_v29 = vld [vmem:[%s3933_s6 + $0x10] sm:$0xff]   ;;  %vm1456_vm2 = vcmask 64512   ;;  %vm1759_vm3 = vcmask 1043456   ;;  %s3234_s20 = smov 5  }
  0x1e   : > { %s2680_s28 = sshll.u32 %s595_s27, 3  ;;  %v3110_v8 = vld [vmem:[%s3968_s2 + $0x18] sm:$0xff]   ;;  %2849 = vmatpush3.bf16.msra.mxu0 %v3109_v7  ;;  %v3111_v10 = vld [vmem:[%s3968_s2] sm:$0xff]   ;;  %v3112_v11 = vld [vmem:[%s3968_s2 + $0x10] sm:$0xff]   ;;  %2852 = vmatprep.mubr.msk.bf16.mxu0 %vm3227_vm1, %v3226_v9  ;;  %s3969_s27 = sld [smem:[#allocation12_spill]]  ;;  %vm1744_vm4 = vcmask 1040384  }
  0x1f   : > { %s3390_s24 = scalar_lea.vmem %s3966_s23, %s2680_s28  ;;  %2857 = vmatpush3.bf16.msra.mxu1 %v3110_v8  ;;  %2850 = vmatprep.subr.bf16.mxu0 %v3226_v9  ;;  %v2682_v18 = vld [vmem:[%s3970_s22] ss:$0 sm:$0xff]  ;;  %v3113_v21 = vld [vmem:[%s3968_s2 + $0x28] sm:$0xff]   ;;  %v3114_v22 = vld [vmem:[%s3968_s2 + $0x38] sm:$0xff]   ;;  %s3232_s28 = smov 3   ;;  %vm1749_vm5 = vcmask 1041408  }
  0x20   : > { %v599_v0 = vld [vmem:[%s3390_s24] sm:$0xff]  ;;  %2858 = vmatprep.subr.bf16.mxu1 %v3226_v9  ;;  %2860 = vmatprep.mubr.msk.bf16.mxu1 %vm3227_vm1, %v3226_v9  ;;  %v3116_v25 = vld [vmem:[%s3968_s2 + $0x30] sm:$0xff]   ;;  %v3121_v30 = vld [vmem:[%s3933_s6 + $0x28] sm:$0xff]   ;;  %s3233_s22 = smov 4   ;;  %vm1754_vm6 = vcmask 1042432   ;;  %vm1764_vm7 = vcmask 1044480  }
  0x21   : > { %v603_v1 = vsel %vm602_vm0, %v599_v0, 0.0  ;;  %v3115_v24 = vld [vmem:[%s3968_s2 + $0x20] sm:$0xff]   ;;  %v3122_v31 = vld [vmem:[%s3933_s6 + $0x38] sm:$0xff]   ;;  %v3124_v33 = vld [vmem:[%s3933_s6 + $0x30] sm:$0xff]   ;;  %vm1769_vm8 = vcmask 1045504   ;;  %vm1774_vm9 = vcmask 1046528  }
  0x22   : > { %604 = vadd.xlane.f32.xlu0 %v603_v1  ;;  %2851 = vmatpush3.bf16.msra.mxu0 %v3111_v10  ;;  %v3123_v32 = vld [vmem:[%s3933_s6 + $0x20] sm:$0xff]   ;;  %v3125_v34 = vld [vmem:[%s3935_s8 + $0x8] sm:$0xff]   ;;  %v3126_v35 = vld [vmem:[%s3935_s8 + $0x18] sm:$0xff]   ;;  %vm2556_vm10 = vcmask 523264   ;;  %s2679_s23 = sshll.u32 %s591_s26, 3 }
  0x23   : > { %2859 = vmatpush3.bf16.msra.mxu1 %v3112_v11  ;;  %2864 = vmatprep.subr.bf16.mxu0 %v3226_v9  ;;  %v3127_v36 = vld [vmem:[%s3935_s8] sm:$0xff]   ;;  %v3128_v37 = vld [vmem:[%s3935_s8 + $0x10] sm:$0xff]   ;;  %v3129_v38 = vld [vmem:[%s3935_s8 + $0x28] sm:$0xff]  }
  0x24   : > { %2872 = vmatprep.subr.bf16.mxu1 %v3226_v9  ;;  %v2681_v16 = vld [vmem:[%s3969_s27] ss:$0 sm:$0xff]  ;;  %v3130_v39 = vld [vmem:[%s3935_s8 + $0x38] sm:$0xff]   ;;  %v3132_v41 = vld [vmem:[%s3935_s8 + $0x30] sm:$0xff]   ;;  %s3228_s27 = smov 1  }
  0x25   : > { %v3131_v40 = vld [vmem:[%s3935_s8 + $0x20] sm:$0xff]   ;;  %v3134_v43 = vld [vmem:[%s3937_s10 + $0x8] sm:$0xff]   ;;  %v3135_v48 = vld [vmem:[%s3937_s10 + $0x10] sm:$0xff]  }
  0x26   : > { %v3133_v42 = vld [vmem:[%s3937_s10] sm:$0xff]   ;;  %v1512_v45 = vsel %vm1456_vm2, %v3134_v43, 0  ;;  %v3136_v49 = vld [vmem:[%s3937_s10 + $0x18] sm:$0xff]   ;;  %v1563_v58 = vsel %vm1456_vm2, %v3135_v48, 0 }
  0x27   : > { %v1461_v44 = vsel %vm1456_vm2, %v3133_v42, 0  ;;  %v2731_v46 = vld [vmem:[%s3932_s5] ss:$0 sm:$0xff]  ;;  %v2732_v47 = vld [vmem:[%s3932_s5 + $0x1] ss:$0 sm:$0xff]  ;;  %v1614_v59 = vsel %vm1456_vm2, %v3136_v49, 0 }
  0x28   : > { %v2734_v1 = vld [vmem:[%s3932_s5 + $0x3] ss:$0 sm:$0xff] }
  0x29   : > { %v2730_v48 = vld [vmem:[%s3931_s4 + $0x3] ss:$0 sm:$0xff] }
  0xab   : > { %v605_v2 = vpop.xlane.xlu0 %604 }
  0xac   : > { %v607_v3 = vmul.f32 0.03125, %v605_v2 }
  0xae   : > { %v608_v4 = vsub.f32 %v599_v0, %v607_v3  ;;  %v2733_v0 = vld [vmem:[%s3932_s5 + $0x2] ss:$0 sm:$0xff] }
  0xb0   : > { %v609_v5 = vmul.f32 %v608_v4, %v608_v4 }
  0xb2   : > { %v610_v6 = vsel %vm602_vm0, %v609_v5, 0.0 }
  0xb3   : > { %611 = vadd.xlane.f32.xlu0 %v610_v6 }
 0x13c   : > { %v612_v12 = vpop.xlane.xlu0 %611 }
 0x13d   : > { %v613_v13 = vmul.f32 0.03125, %v612_v12 }
 0x13f   : > { %v614_v14 = vadd.f32 1e-12, %v613_v13 }
 0x141   : > { %3143 = vrsqrt.f32 %v614_v14 }
 0x14e   : > { %v3144_v15 = vpop.eup %3143 }
 0x14f   : > { %v616_v17 = vmul.f32 %v3144_v15, %v608_v4  ;;  %v2695_v15 = vld [vmem:[%s3934_s7] ss:$0 sm:$0xff] }
 0x151   : > { %v623_v19 = vmul.f32 %v2681_v16, %v616_v17  ;;  %v2696_v16 = vld [vmem:[%s3934_s7 + $0x1] ss:$0 sm:$0xff] }
 0x153   : > { %v630_v20 = vadd.f32 %v2682_v18, %v623_v19 }
 0x155   : > { %v3429_v23 = vpack.c.bf16 %v630_v20, %v630_v20 }
 0x157   : > { %2853 = vmatmul.mubr.msk.bf16.vlgmr.msra.gmra.mxu0 %vm602_vm0, %v3429_v23  ;;  %2861 = vmatmul.mubr.msk.bf16.vlgmr.msra.gmra.mxu1 %vm602_vm0, %v3429_v23 }
 0x158   : > { %2865 = vmatpush3.bf16.msra.mxu0 %v3113_v21  ;;  %2873 = vmatpush3.bf16.msra.mxu1 %v3114_v22 }
 0x159   : > { %2866 = vmatprep.subr.bf16.mxu0 %v3226_v9  ;;  %2874 = vmatprep.subr.bf16.mxu1 %v3226_v9 }
 0x15a   : > { %2868 = vmatprep.mubr.msk.bf16.mxu0 %vm3227_vm1, %v3226_v9  ;;  %2876 = vmatprep.mubr.msk.bf16.mxu1 %vm3227_vm1, %v3226_v9 }
 0x15c   : > { %2867 = vmatpush3.bf16.msra.mxu0 %v3115_v24  ;;  %2875 = vmatpush3.bf16.msra.mxu1 %v3116_v25  ;;  %v2727_v25 = vld [vmem:[%s3931_s4] ss:$0 sm:$0xff] }
 0x15d   : > { %2880 = vmatprep.subr.bf16.mxu0 %v3226_v9  ;;  %2888 = vmatprep.subr.bf16.mxu1 %v3226_v9 }
 0x15f   : > { %2869 = vmatmul.mubr.msk.bf16.vlgmr.msra.gmra.mxu0 %vm602_vm0, %v3429_v23  ;;  %2877 = vmatmul.mubr.msk.bf16.vlgmr.msra.gmra.mxu1 %vm602_vm0, %v3429_v23 }
 0x160   : > { %2881 = vmatpush3.bf16.msra.mxu0 %v3117_v26  ;;  %2889 = vmatpush3.bf16.msra.mxu1 %v3118_v27  ;;  %v2728_v26 = vld [vmem:[%s3931_s4 + $0x1] ss:$0 sm:$0xff] }
 0x161   : > { %2882 = vmatprep.subr.bf16.mxu0 %v3226_v9  ;;  %2890 = vmatprep.subr.bf16.mxu1 %v3226_v9 }
 0x162   : > { %2884 = vmatprep.mubr.msk.bf16.mxu0 %vm3227_vm1, %v3226_v9  ;;  %2892 = vmatprep.mubr.msk.bf16.mxu1 %vm3227_vm1, %v3226_v9 }
 0x164   : > { %2883 = vmatpush3.bf16.msra.mxu0 %v3119_v28  ;;  %2891 = vmatpush3.bf16.msra.mxu1 %v3120_v29 }
 0x165   : > { %2896 = vmatprep.subr.bf16.mxu0 %v3226_v9  ;;  %2904 = vmatprep.subr.bf16.mxu1 %v3226_v9 }
 0x167   : > { %2885 = vmatmul.mubr.msk.bf16.vlgmr.msra.gmra.mxu0 %vm602_vm0, %v3429_v23  ;;  %2893 = vmatmul.mubr.msk.bf16.vlgmr.msra.gmra.mxu1 %vm602_vm0, %v3429_v23 }
 0x168   : > { %2897 = vmatpush3.bf16.msra.mxu0 %v3121_v30  ;;  %2905 = vmatpush3.bf16.msra.mxu1 %v3122_v31 }
 0x169   : > { %2898 = vmatprep.subr.bf16.mxu0 %v3226_v9  ;;  %2906 = vmatprep.subr.bf16.mxu1 %v3226_v9 }
 0x16a   : > { %2900 = vmatprep.mubr.msk.bf16.mxu0 %vm3227_vm1, %v3226_v9  ;;  %2908 = vmatprep.mubr.msk.bf16.mxu1 %vm3227_vm1, %v3226_v9 }
 0x16c   : > { %2899 = vmatpush3.bf16.msra.mxu0 %v3123_v32  ;;  %2907 = vmatpush3.bf16.msra.mxu1 %v3124_v33  ;;  %v2697_v33 = vld [vmem:[%s3934_s7 + $0x2] ss:$0 sm:$0xff] }
 0x16d   : > { %2912 = vmatprep.subr.bf16.mxu0 %v3226_v9  ;;  %2920 = vmatprep.subr.bf16.mxu1 %v3226_v9 }
 0x16f   : > { %2901 = vmatmul.mubr.msk.bf16.vlgmr.msra.gmra.mxu0 %vm602_vm0, %v3429_v23  ;;  %2909 = vmatmul.mubr.msk.bf16.vlgmr.msra.gmra.mxu1 %vm602_vm0, %v3429_v23 }
 0x170   : > { %2913 = vmatpush3.bf16.msra.mxu0 %v3125_v34  ;;  %2921 = vmatpush3.bf16.msra.mxu1 %v3126_v35  ;;  %v2698_v34 = vld [vmem:[%s3934_s7 + $0x3] ss:$0 sm:$0xff] }
 0x171   : > { %2914 = vmatprep.subr.bf16.mxu0 %v3226_v9  ;;  %2922 = vmatprep.subr.bf16.mxu1 %v3226_v9 }
 0x172   : > { %2916 = vmatprep.mubr.msk.bf16.mxu0 %vm3227_vm1, %v3226_v9  ;;  %2924 = vmatprep.mubr.msk.bf16.mxu1 %vm3227_vm1, %v3226_v9 }
 0x174   : > { %2915 = vmatpush3.bf16.msra.mxu0 %v3127_v36  ;;  %2923 = vmatpush3.bf16.msra.mxu1 %v3128_v37 }
 0x175   : > { %2928 = vmatprep.subr.bf16.mxu0 %v3226_v9  ;;  %2936 = vmatprep.subr.bf16.mxu1 %v3226_v9 }
 0x177   : > { %2917 = vmatmul.mubr.msk.bf16.vlgmr.msra.gmra.mxu0 %vm602_vm0, %v3429_v23  ;;  %2925 = vmatmul.mubr.msk.bf16.vlgmr.msra.gmra.mxu1 %vm602_vm0, %v3429_v23 }
 0x178   : > { %2929 = vmatpush3.bf16.msra.mxu0 %v3129_v38  ;;  %2937 = vmatpush3.bf16.msra.mxu1 %v3130_v39 }
 0x179   : > { %2930 = vmatprep.subr.bf16.mxu0 %v3226_v9  ;;  %2938 = vmatprep.subr.bf16.mxu1 %v3226_v9 }
 0x17a   : > { %2932 = vmatprep.mubr.msk.bf16.mxu0 %vm3227_vm1, %v3226_v9  ;;  %2940 = vmatprep.mubr.msk.bf16.mxu1 %vm3227_vm1, %v3226_v9 }
 0x17c   : > { %2931 = vmatpush3.bf16.msra.mxu0 %v3131_v40  ;;  %2939 = vmatpush3.bf16.msra.mxu1 %v3132_v41 }
 0x17d   : > { %2944 = vmatprep.subr.bf16.mxu0 %v3226_v9  ;;  %2950 = vmatprep.subr.bf16.mxu1 %v3226_v9 }
 0x17f   : > { %2933 = vmatmul.mubr.msk.bf16.vlgmr.msra.gmra.mxu0 %vm602_vm0, %v3429_v23  ;;  %2941 = vmatmul.mubr.msk.bf16.vlgmr.msra.gmra.mxu1 %vm602_vm0, %v3429_v23 }
 0x180   : > { %2945 = vmatpush3.bf16.xpose.msra.mxu0 %v1461_v44  ;;  %2951 = vmatpush3.bf16.xpose.msra.mxu1 %v1512_v45 }
 0x181   : > { %2946 = vmatprep.mubr.msk.bf16.mxu0 %vm3227_vm1, %v3226_v9  ;;  %2952 = vmatprep.mubr.msk.bf16.mxu1 %vm3227_vm1, %v3226_v9 }
 0x182   : > { %2956 = vmatprep.subr.bf16.mxu0 %v3226_v9  ;;  %2962 = vmatprep.subr.bf16.mxu1 %v3226_v9 }
 0x217   : > { %v697_v50 = vpop.f32.mrf.mxu0  ;;  %v749_v51 = vpop.f32.mrf.mxu1 }
 0x218   : > { %v1427_v52 = vadd.f32 %v2731_v46, %v697_v50  ;;  %v1428_v53 = vadd.f32 %v2732_v47, %v749_v51  ;;  %v1391_v35 = vadd.f32 %v2727_v25, %v697_v50  ;;  %v1392_v36 = vadd.f32 %v2728_v26, %v749_v51  ;;  %v2729_v47 = vld [vmem:[%s3931_s4 + $0x2] ss:$0 sm:$0xff] }
 0x219   : > { %v2854_v54 = vpop.f32.mrf.mxu0  ;;  %v2862_v55 = vpop.f32.mrf.mxu1 }
 0x21a   : > { %v1431_v56 = vpack.c.bf16 %v1427_v52, %v1427_v52  ;;  %v1432_v57 = vpack.c.bf16 %v1428_v53, %v1428_v53  ;;  %v1395_v43 = vpack.c.bf16 %v1391_v35, %v1391_v35  ;;  %v1396_v44 = vpack.c.bf16 %v1392_v36, %v1392_v36  ;;  %v2711_v55 = vld [vmem:[%s3936_s9] ss:$0 sm:$0xff] }
 0x21b   : > { %v700_v60 = vpop.f32.mrf.mxu0  ;;  %v752_v61 = vpop.f32.mrf.mxu1 }
 0x21c   : > { %2947 = vmatmul.mubr.msk.bf16.vlgmr.msra.gmra.mxu0 %vm1456_vm2, %v1431_v56  ;;  %2953 = vmatmul.mubr.msk.bf16.vlgmr.msra.gmra.mxu1 %vm1456_vm2, %v1432_v57  ;;  %v2712_v56 = vld [vmem:[%s3936_s9 + $0x1] ss:$0 sm:$0xff] }
 0x21d   : > { %v2855_v62 = vpop.f32.mrf.mxu0  ;;  %v2863_v63 = vpop.f32.mrf.mxu1  ;;  %2957 = vmatpush3.bf16.xpose.msra.mxu0 %v1563_v58  ;;  %2963 = vmatpush3.bf16.xpose.msra.mxu1 %v1614_v59 }
 0x21e   : > { %2958 = vmatprep.mubr.msk.bf16.mxu0 %vm3227_vm1, %v3226_v9  ;;  %2964 = vmatprep.mubr.msk.bf16.mxu1 %vm3227_vm1, %v3226_v9 }
 0x21f   : > { %v3589_v2 = vpop.f32.mrf.mxu0  ;;  %v3591_v3 = vpop.f32.mrf.mxu1  ;;  %2968 = vmatprep.subr.bf16.mxu0 %v3226_v9  ;;  %2974 = vmatprep.subr.bf16.mxu1 %v3226_v9 }
 0x220   : > { %v1429_v4 = vadd.f32 %v2733_v0, %v3589_v2  ;;  %v1430_v5 = vadd.f32 %v2734_v1, %v3591_v3  ;;  %v1393_v57 = vadd.f32 %v2729_v47, %v3589_v2  ;;  %v1394_v58 = vadd.f32 %v2730_v48, %v3591_v3 }
 0x221   : > { %v2870_v6 = vpop.f32.mrf.mxu0  ;;  %v2878_v7 = vpop.f32.mrf.mxu1 }
 0x222   : > { %v1433_v8 = vpack.c.bf16 %v1429_v4, %v1429_v4  ;;  %v1434_v10 = vpack.c.bf16 %v1430_v5, %v1430_v5  ;;  %v1397_v1 = vpack.c.bf16 %v1393_v57, %v1393_v57  ;;  %v1398_v2 = vpack.c.bf16 %v1394_v58, %v1394_v58 }
 0x223   : > { %v804_v11 = vpop.f32.mrf.mxu0  ;;  %v856_v12 = vpop.f32.mrf.mxu1 }
 0x224   : > { %2959 = vmatmul.mubr.msk.bf16.vlgmr.msra.gmra.mxu0 %vm1456_vm2, %v1433_v8  ;;  %2965 = vmatmul.mubr.msk.bf16.vlgmr.msra.gmra.mxu1 %vm1456_vm2, %v1434_v10 }
 0x225   : > { %v2871_v13 = vpop.f32.mrf.mxu0  ;;  %v2879_v14 = vpop.f32.mrf.mxu1  ;;  %2970 = vmatprep.mubr.msk.bf16.mxu0 %vm3227_vm1, %v3226_v9  ;;  %2976 = vmatprep.mubr.msk.bf16.mxu1 %vm3227_vm1, %v3226_v9 }
 0x227   : > { %v949_v17 = vpop.f32.mrf.mxu0  ;;  %v1001_v18 = vpop.f32.mrf.mxu1 }
 0x228   : > { %v950_v19 = vadd.f32 %v2695_v15, %v949_v17  ;;  %v1002_v20 = vadd.f32 %v2696_v16, %v1001_v18 }
 0x229   : > { %v2886_v21 = vpop.f32.mrf.mxu0  ;;  %v2894_v22 = vpop.f32.mrf.mxu1 }
 0x22a   : > { %v1435_v23 = vpack.c.bf16 %v950_v19, %v950_v19  ;;  %v1436_v24 = vpack.c.bf16 %v1002_v20, %v1002_v20 }
 0x22b   : > { %v952_v27 = vpop.f32.mrf.mxu0  ;;  %v1004_v28 = vpop.f32.mrf.mxu1 }
 0x22c   : > { %v1787_v29 = vsel %vm1456_vm2, %v1435_v23, 0  ;;  %v1837_v30 = vsel %vm1456_vm2, %v1436_v24, 0 }
 0x22d   : > { %v2887_v31 = vpop.f32.mrf.mxu0  ;;  %v2895_v32 = vpop.f32.mrf.mxu1  ;;  %2969 = vmatpush3.bf16.xpose.msra.mxu0 %v1787_v29  ;;  %2975 = vmatpush3.bf16.xpose.msra.mxu1 %v1837_v30 }
 0x22e   : > { %2980 = vmatprep.subr.bf16.mxu0 %v3226_v9  ;;  %2986 = vmatprep.subr.bf16.mxu1 %v3226_v9 }
 0x22f   : > { %v1053_v37 = vpop.f32.mrf.mxu0  ;;  %v1105_v38 = vpop.f32.mrf.mxu1 }
 0x230   : > { %v1054_v39 = vadd.f32 %v2697_v33, %v1053_v37  ;;  %v1106_v40 = vadd.f32 %v2698_v34, %v1105_v38 }
 0x231   : > { %v2902_v41 = vpop.f32.mrf.mxu0  ;;  %v2910_v42 = vpop.f32.mrf.mxu1 }
 0x232   : > { %v1437_v45 = vpack.c.bf16 %v1054_v39, %v1054_v39  ;;  %v1438_v46 = vpack.c.bf16 %v1106_v40, %v1106_v40 }
 0x233   : > { %v1056_v49 = vpop.f32.mrf.mxu0  ;;  %v1108_v50 = vpop.f32.mrf.mxu1 }
 0x234   : > { %v1887_v51 = vsel %vm1456_vm2, %v1437_v45, 0  ;;  %v1937_v52 = vsel %vm1456_vm2, %v1438_v46, 0  ;;  %2971 = vmatmul.mubr.msk.bf16.vlgmr.msra.gmra.mxu0 %vm1456_vm2, %v1395_v43  ;;  %2977 = vmatmul.mubr.msk.bf16.vlgmr.msra.gmra.mxu1 %vm1456_vm2, %v1396_v44 }
 0x235   : > { %v2903_v53 = vpop.f32.mrf.mxu0  ;;  %v2911_v54 = vpop.f32.mrf.mxu1  ;;  %2981 = vmatpush3.bf16.xpose.msra.mxu0 %v1887_v51  ;;  %2987 = vmatpush3.bf16.xpose.msra.mxu1 %v1937_v52 }
 0x236   : > { %2982 = vmatprep.mubr.msk.bf16.mxu0 %vm3227_vm1, %v3226_v9  ;;  %2988 = vmatprep.mubr.msk.bf16.mxu1 %vm3227_vm1, %v3226_v9 }
 0x237   : > { %v1201_v59 = vpop.f32.mrf.mxu0  ;;  %v1253_v60 = vpop.f32.mrf.mxu1  ;;  %2992 = vmatprep.subr.bf16.mxu0 %v3226_v9  ;;  %2998 = vmatprep.subr.bf16.mxu1 %v3226_v9 }
 0x238   : > { %v1202_v61 = vadd.f32 %v2711_v55, %v1201_v59  ;;  %v1254_v62 = vadd.f32 %v2712_v56, %v1253_v60 }
 0x239   : > { %v2918_v63 = vpop.f32.mrf.mxu0  ;;  %v2926_v0 = vpop.f32.mrf.mxu1 }
 0x23a   : > { %v1439_v3 = vpack.c.bf16 %v1202_v61, %v1202_v61  ;;  %v1440_v4 = vpack.c.bf16 %v1254_v62, %v1254_v62 }
 0x23b   : > { %v1204_v5 = vpop.f32.mrf.mxu0  ;;  %v1256_v6 = vpop.f32.mrf.mxu1 }
 0x23c   : > { %v2031_v7 = vsel %vm1759_vm3, %v1439_v3, 0  ;;  %v2077_v8 = vsel %vm1759_vm3, %v1440_v4, 0  ;;  %2983 = vmatmul.mubr.msk.bf16.vlgmr.msra.gmra.mxu0 %vm1456_vm2, %v1397_v1  ;;  %2989 = vmatmul.mubr.msk.bf16.vlgmr.msra.gmra.mxu1 %vm1456_vm2, %v1398_v2 }
 0x23d   : > { %v2919_v10 = vpop.f32.mrf.mxu0  ;;  %v2927_v11 = vpop.f32.mrf.mxu1  ;;  %2993 = vmatpush3.bf16.msra.mxu0 %v2031_v7  ;;  %2999 = vmatpush3.bf16.msra.mxu1 %v2077_v8 }
 0x23e   : > { %2994 = vmatprep.mubr.msk.bf16.mxu0 %vm3227_vm1, %v3226_v9  ;;  %3004 = vmatprep.subr.bf16.mxu0 %v3226_v9 }
 0x23f   : > { %v3656_v12 = vpop.f32.mrf.mxu0  ;;  %v3658_v13 = vpop.f32.mrf.mxu1  ;;  %3000 = vmatprep.mubr.msk.bf16.mxu1 %vm3227_vm1, %v3226_v9  ;;  %3010 = vmatprep.subr.bf16.mxu1 %v3226_v9 }
 0x241   : > { %v2934_v14 = vpop.f32.mrf.mxu0  ;;  %v2942_v15 = vpop.f32.mrf.mxu1 }
 0x243   : > { %v1308_v16 = vpop.f32.mrf.mxu0  ;;  %v1360_v17 = vpop.f32.mrf.mxu1 }
 0x245   : > { %v2935_v18 = vpop.f32.mrf.mxu0  ;;  %v2943_v19 = vpop.f32.mrf.mxu1 }
 0x2dc   : > { %v3663_v20 = vpop.f32.mrf.mxu0  ;;  %v3665_v21 = vpop.f32.mrf.mxu1 }
 0x2dd   : > { %1662 = vrot.lane.b32.xlu0 %v3665_v21, %s3228_s27  ;;  %1660 = vrot.lane.b32.xlu1 %v3663_v20, %s3228_s27 }
 0x2de   : > { %v2948_v22 = vpop.f32.mrf.mxu0  ;;  %v2954_v23 = vpop.f32.mrf.mxu1 }
 0x2e0   : > { %v1500_v24 = vpop.f32.mrf.mxu0  ;;  %v1551_v25 = vpop.f32.mrf.mxu1 }
 0x2e1   : > { %1720 = vrot.lane.b32.xlu0 %v3663_v20, %s3229_s29  ;;  %1672 = vrot.lane.b32.xlu1 %v3663_v20, %s3230_s0 }
 0x2e2   : > { %v2949_v26 = vpop.f32.mrf.mxu0  ;;  %v2955_v27 = vpop.f32.mrf.mxu1 }
 0x2e4   : > { %v3675_v28 = vpop.f32.mrf.mxu0  ;;  %v3677_v29 = vpop.f32.mrf.mxu1 }
 0x2e5   : > { %1732 = vrot.lane.b32.xlu0 %v3663_v20, %s3231_s21  ;;  %1684 = vrot.lane.b32.xlu1 %v3663_v20, %s3232_s28 }
 0x2e6   : > { %v2960_v30 = vpop.f32.mrf.mxu0  ;;  %v2966_v31 = vpop.f32.mrf.mxu1 }
 0x2e8   : > { %v1602_v32 = vpop.f32.mrf.mxu0  ;;  %v1653_v33 = vpop.f32.mrf.mxu1 }
 0x2e9   : > { %1674 = vrot.lane.b32.xlu1 %v3665_v21, %s3230_s0  ;;  %1664 = vrot.lane.b32.xlu0 %v3675_v28, %s3228_s27 }
 0x2ea   : > { %v2961_v34 = vpop.f32.mrf.mxu0  ;;  %v2967_v35 = vpop.f32.mrf.mxu1 }
 0x2ed   : > { %1696 = vrot.lane.b32.xlu1 %v3663_v20, %s3233_s22  ;;  %1676 = vrot.lane.b32.xlu0 %v3675_v28, %s3230_s0 }
 0x2f1   : > { %1686 = vrot.lane.b32.xlu1 %v3665_v21, %s3232_s28  ;;  %1688 = vrot.lane.b32.xlu0 %v3675_v28, %s3232_s28 }
 0x2f4   : > { %v3695_v36 = vpop.f32.mrf.mxu0  ;;  %v3697_v37 = vpop.f32.mrf.mxu1 }
 0x2f5   : > { %1708 = vrot.lane.b32.xlu1 %v3663_v20, %s3234_s20  ;;  %1700 = vrot.lane.b32.xlu0 %v3675_v28, %s3233_s22 }
 0x2f6   : > { %v2972_v38 = vpop.f32.mrf.mxu0  ;;  %v2978_v39 = vpop.f32.mrf.mxu1 }
 0x2f8   : > { %v1826_v40 = vpop.f32.mrf.mxu0  ;;  %v1876_v41 = vpop.f32.mrf.mxu1 }
 0x2f9   : > { %1698 = vrot.lane.b32.xlu1 %v3665_v21, %s3233_s22  ;;  %1712 = vrot.lane.b32.xlu0 %v3675_v28, %s3234_s20 }
 0x2fa   : > { %v2973_v42 = vpop.f32.mrf.mxu0  ;;  %v2979_v43 = vpop.f32.mrf.mxu1 }
 0x2fc   : > { %v3705_v44 = vpop.f32.mrf.mxu0  ;;  %v3707_v45 = vpop.f32.mrf.mxu1 }
 0x2fd   : > { %1710 = vrot.lane.b32.xlu1 %v3665_v21, %s3234_s20  ;;  %1724 = vrot.lane.b32.xlu0 %v3675_v28, %s3229_s29 }
 0x2fe   : > { %v2984_v46 = vpop.f32.mrf.mxu0  ;;  %v2990_v47 = vpop.f32.mrf.mxu1 }
 0x300   : > { %v1926_v48 = vpop.f32.mrf.mxu0  ;;  %v1976_v49 = vpop.f32.mrf.mxu1 }
 0x301   : > { %1722 = vrot.lane.b32.xlu1 %v3665_v21, %s3229_s29  ;;  %1736 = vrot.lane.b32.xlu0 %v3675_v28, %s3231_s21 }
 0x302   : > { %v2985_v50 = vpop.f32.mrf.mxu0  ;;  %v2991_v51 = vpop.f32.mrf.mxu1 }
 0x305   : > { %1734 = vrot.lane.b32.xlu1 %v3665_v21, %s3231_s21  ;;  %1738 = vrot.lane.b32.xlu0 %v3677_v29, %s3231_s21  ;;  %s593_s21 = scalar_lea.vmem [#allocation2], %s2679_s23  ;;  %s3236_s23 = smov [#allocation2]  }
 0x309   : > { %1666 = vrot.lane.b32.xlu1 %v3677_v29, %s3228_s27  ;;  %s3168_s27 = sshll.u32 %s3236_s23, 4  ;;  %s3169_s27 = int_to_ptr.vmem [resolvable:$false] %s3168_s27 }
 0x30d   : > { %1678 = vrot.lane.b32.xlu1 %v3677_v29, %s3230_s0  ;;  %s2769_s0 = sshll.u32 %s3358_s1, 7  ;;  %s2603_s1 = scalar_lea.sflag [#allocation3], %s591_s26 }
 0x311   : > { %1690 = vrot.lane.b32.xlu1 %v3677_v29, %s3232_s28 }
 0x315   : > { %1702 = vrot.lane.b32.xlu1 %v3677_v29, %s3233_s22 }
 0x319   : > { %1714 = vrot.lane.b32.xlu1 %v3677_v29, %s3234_s20  ;;  %s3885_s20 = scalar_lea.hbm %s3946_s19, %s2769_s0 }
 0x31d   : > { %1726 = vrot.lane.b32.xlu1 %v3677_v29, %s3229_s29  ;;  %s3170_s29 = scalar_lea.vmem %s3169_s27, 256 }
 0x34f   : > { %v1663_v52 = vpop.permute.xlu0 %1662  ;;  %v1661_v53 = vpop.permute.xlu1 %1660 }
 0x350   : > { %v1745_v0 = vsel %vm1744_vm4, %v3663_v20, %v1661_v53  ;;  %v1746_v20 = vsel %vm1744_vm4, %v3665_v21, %v1663_v52 }
 0x353   : > { %v1721_v54 = vpop.permute.xlu0 %1720  ;;  %v1673_v55 = vpop.permute.xlu1 %1672 }
 0x354   : > { %v1750_v1 = vsel %vm1749_vm5, %v1745_v0, %v1673_v55 }
 0x357   : > { %v1733_v56 = vpop.permute.xlu0 %1732  ;;  %v1685_v57 = vpop.permute.xlu1 %1684 }
 0x358   : > { %v1755_v2 = vsel %vm1754_vm6, %v1750_v1, %v1685_v57 }
 0x35b   : > { %v1675_v58 = vpop.permute.xlu1 %1674  ;;  %v1665_v59 = vpop.permute.xlu0 %1664 }
 0x35c   : > { %v1747_v14 = vsel %vm1744_vm4, %v3675_v28, %v1665_v59  ;;  %v1751_v23 = vsel %vm1749_vm5, %v1746_v20, %v1675_v58 }
 0x35f   : > { %v1697_v60 = vpop.permute.xlu1 %1696  ;;  %v1677_v61 = vpop.permute.xlu0 %1676 }
 0x360   : > { %v1760_v3 = vsel %vm1759_vm3, %v1755_v2, %v1697_v60  ;;  %v1752_v15 = vsel %vm1749_vm5, %v1747_v14, %v1677_v61 }
 0x363   : > { %v1687_v62 = vpop.permute.xlu1 %1686  ;;  %v1689_v63 = vpop.permute.xlu0 %1688 }
 0x364   : > { %v1757_v18 = vsel %vm1754_vm6, %v1752_v15, %v1689_v63  ;;  %v1756_v27 = vsel %vm1754_vm6, %v1751_v23, %v1687_v62 }
 0x367   : > { %v1709_v4 = vpop.permute.xlu1 %1708  ;;  %v1701_v5 = vpop.permute.xlu0 %1700 }
 0x368   : > { %v1765_v6 = vsel %vm1764_vm7, %v1760_v3, %v1709_v4  ;;  %v1762_v19 = vsel %vm1759_vm3, %v1757_v18, %v1701_v5 }
 0x369   : > { %v1770_v7 = vsel %vm1769_vm8, %v1765_v6, %v1721_v54 }
 0x36a   : > { %v1775_v8 = vsel %vm1774_vm9, %v1770_v7, %v1733_v56 }
 0x36b   : > { %1780 = vrot.lane.b32.xlu1 %v1775_v8, %s3235_s25  ;;  %v1699_v10 = vpop.permute.xlu1 %1698  ;;  %v1713_v11 = vpop.permute.xlu0 %1712 }
 0x36c   : > { %v1767_v22 = vsel %vm1764_vm7, %v1762_v19, %v1713_v11  ;;  %v1761_v30 = vsel %vm1759_vm3, %v1756_v27, %v1699_v10  ;;  %v2713_v19 = vld [vmem:[%s3936_s9 + $0x2] ss:$0 sm:$0xff] }
 0x36d   : > { %v1306_v20 = vadd.f32 %v2713_v19, %v3656_v12  ;;  %v2714_v12 = vld [vmem:[%s3936_s9 + $0x3] ss:$0 sm:$0xff] }
 0x36f   : > { %v1711_v16 = vpop.permute.xlu1 %1710  ;;  %v1725_v17 = vpop.permute.xlu0 %1724 }
 0x370   : > { %v1772_v24 = vsel %vm1769_vm8, %v1767_v22, %v1725_v17  ;;  %v1766_v31 = vsel %vm1764_vm7, %v1761_v30, %v1711_v16  ;;  %v1358_v30 = vadd.f32 %v2714_v12, %v3658_v13  ;;  %v2755_v12 = vld [vmem:[%s3939_s12] ss:$0 sm:$0xff] }
 0x373   : > { %v1723_v25 = vpop.permute.xlu1 %1722  ;;  %v1737_v26 = vpop.permute.xlu0 %1736 }
 0x374   : > { %v1777_v28 = vsel %vm1774_vm9, %v1772_v24, %v1737_v26  ;;  %v1771_v21 = vsel %vm1769_vm8, %v1766_v31, %v1723_v25  ;;  %v1441_v24 = vpack.c.bf16 %v1306_v20, %v1306_v20 }
 0x375   : > { %1880 = vrot.lane.b32.xlu1 %v1777_v28, %s3235_s25 }
 0x376   : > { %v2123_v28 = vsel %vm1759_vm3, %v1441_v24, 0 }
 0x377   : > { %v1735_v32 = vpop.permute.xlu1 %1734  ;;  %v1739_v49 = vpop.permute.xlu0 %1738 }
 0x378   : > { %v1776_v33 = vsel %vm1774_vm9, %v1771_v21, %v1735_v32  ;;  %v1442_v21 = vpack.c.bf16 %v1358_v30, %v1358_v30  ;;  %v3163_v30 = vld [vmem:[%s3390_s24] sm:$0xff]  ;;  %s2616_s24 = sshll.u32 %s593_s21, 4  ;;  %s3887_s24 = int_to_ptr.vmem [resolvable:$true] %s2616_s24 }
 0x379   : > { %1830 = vrot.lane.b32.xlu0 %v1776_v33, %s3235_s25  ;;  %p3171_p0 = scmp.lt.s32.totalorder %s3887_s24, %s3169_s27 }
 0x37b   : > { %v1667_v34 = vpop.permute.xlu1 %1666 }
 0x37c   : > { %v1748_v40 = vsel %vm1744_vm4, %v3677_v29, %v1667_v34 }
 0x37f   : > { %v1679_v35 = vpop.permute.xlu1 %1678 }
 0x380   : > { %v1753_v42 = vsel %vm1749_vm5, %v1748_v40, %v1679_v35  ;;  %v2169_v35 = vsel %vm1759_vm3, %v1442_v21, 0 }
 0x383   : > { %v1691_v38 = vpop.permute.xlu1 %1690 }
 0x384   : > { %v1758_v43 = vsel %vm1754_vm6, %v1753_v42, %v1691_v38 }
 0x387   : > { %v1703_v39 = vpop.permute.xlu1 %1702 }
 0x388   : > { %v1763_v46 = vsel %vm1759_vm3, %v1758_v43, %v1703_v39  ;;  %v2215_v43 = vld [vmem:[%s3938_s11] sm:$0xf] }
 0x38b   : > { %v1715_v41 = vpop.permute.xlu1 %1714 }
 0x38c   : > { %v1768_v47 = vsel %vm1764_vm7, %v1763_v46, %v1715_v41  ;;  %v2223_v46 = vsel %vm1759_vm3, %v2215_v43, 0  ;;  %v3139_v43 = vld [vmem:[%s3944_s17 + $0x18] sm:$0xff]  }
 0x38f   : > { %v1727_v48 = vpop.permute.xlu1 %1726 }
 0x390   : > { %v1773_v50 = vsel %vm1769_vm8, %v1768_v47, %v1727_v48  ;;  %v2216_v47 = vld [vmem:[%s3938_s11 + $0x4] sm:$0xf] }
 0x391   : > { %v1778_v51 = vsel %vm1774_vm9, %v1773_v50, %v1739_v49  ;;  %v2269_v48 = vsel %vm1759_vm3, %v2216_v47, 0  ;;  %v2217_v49 = vld [vmem:[%s3938_s11 + $0x8] sm:$0xf] }
 0x392   : > { %1930 = vrot.lane.b32.xlu0 %v1778_v51, %s3235_s25  ;;  %s3164_s25 = scalar_lea.vmem %s3887_s24, 128 }
 0x393   : > { %p3165_p11 = scmp.ne.s32.totalorder %s3887_s24, %s3164_s25  ;;  %p3172_p1 = scmp.lt.s32.totalorder %s3170_s29, %s3164_s25 }
 0x395   : > { %p3166_p12 = pnand %p3165_p11, %p3375_p5  ;;  %p3173_p2 = por %p3172_p1, %p3171_p0 }
 0x397   : > { %p3167_p13 = pneg %p3166_p12 }
 0x399   : > { %p3174_p3 = pnand %p3173_p2, %p3167_p13 }
 0x3dd   : > { %v1781_v52 = vpop.permute.xlu1 %1780 }
 0x3de   : > { %v1824_v29 = vadd.f32 %v3695_v36, %v1781_v52  ;;  %v2315_v52 = vsel %vm1759_vm3, %v2217_v49, 0 }
 0x3e0   : > { %v1979_v53 = vsel %vm1456_vm2, %v1824_v29, -inf }
 0x3e1   : > { %1980 = vmax.xlane.f32.xlu1 %v1979_v53 }
 0x3e7   : > { %v1881_v54 = vpop.permute.xlu1 %1880 }
 0x3e8   : > { %v1924_v57 = vadd.f32 %v3705_v44, %v1881_v54 }
 0x3ea   : > { %v1985_v59 = vsel %vm1456_vm2, %v1924_v57, -inf }
 0x3eb   : > { %v1831_v55 = vpop.permute.xlu0 %1830 }
 0x3ec   : > { %v1874_v56 = vadd.f32 %v3697_v37, %v1831_v55  ;;  %v2218_v55 = vld [vmem:[%s3938_s11 + $0xc] sm:$0xf] }
 0x3ee   : > { %v1982_v58 = vsel %vm1456_vm2, %v1874_v56, -inf }
 0x3ef   : > { %1983 = vmax.xlane.f32.xlu0 %v1982_v58  ;;  %v2361_v58 = vsel %vm1759_vm3, %v2218_v55, 0 }
 0x3f3   : > { %1986 = vmax.xlane.f32.xlu0 %v1985_v59 }
 0x404   : > { %v1931_v60 = vpop.permute.xlu0 %1930 }
 0x405   : > { %v1974_v61 = vadd.f32 %v3707_v45, %v1931_v60 }
 0x407   : > { %v1988_v36 = vsel %vm1456_vm2, %v1974_v61, -inf }
 0x408   : > { %1989 = vmax.xlane.f32.xlu1 %v1988_v36 }
 0x46a   : > { %v1981_v62 = vpop.xlane.xlu1 %1980 }
 0x46b   : > { %v1991_v63 = vsub.f32 %v1824_v29, %v1981_v62 }
 0x46d   : > { %v1995_v0 = vmul.f32 1.442695, %v1991_v63 }
 0x46f   : > { %3145 = vpow2.f32 %v1995_v0 }
 0x478   : > { %v1984_v1 = vpop.xlane.xlu0 %1983 }
 0x479   : > { %v1992_v37 = vsub.f32 %v1874_v56, %v1984_v1 }
 0x47b   : > { %v1997_v2 = vmul.f32 1.442695, %v1992_v37 }
 0x47c   : > { %v3146_v44 = vpop.eup %3145  ;;  %v1987_v3 = vpop.xlane.xlu0 %1986 }
 0x47d   : > { %3147 = vpow2.f32 %v1997_v2  ;;  %v1993_v4 = vsub.f32 %v1924_v57, %v1987_v3  ;;  %v2003_v5 = vsel %vm1456_vm2, %v3146_v44, 0.0 }
 0x47e   : > { %2004 = vadd.xlane.f32.xlu0 %v2003_v5 }
 0x47f   : > { %v1999_v6 = vmul.f32 1.442695, %v1993_v4 }
 0x481   : > { %3149 = vpow2.f32 %v1999_v6 }
 0x48a   : > { %v3148_v45 = vpop.eup %3147 }
 0x48b   : > { %v2006_v7 = vsel %vm1456_vm2, %v3148_v45, 0.0 }
 0x48c   : > { %2007 = vadd.xlane.f32.xlu1 %v2006_v7 }
 0x48e   : > { %v3150_v8 = vpop.eup %3149 }
 0x48f   : > { %v2009_v10 = vsel %vm1456_vm2, %v3150_v8, 0.0 }
 0x490   : > { %2010 = vadd.xlane.f32.xlu0 %v2009_v10 }
 0x491   : > { %v1990_v11 = vpop.xlane.xlu1 %1989 }
 0x492   : > { %v1994_v14 = vsub.f32 %v1974_v61, %v1990_v11 }
 0x494   : > { %v2001_v15 = vmul.f32 1.442695, %v1994_v14 }
 0x496   : > { %3151 = vpow2.f32 %v2001_v15 }
 0x4a3   : > { %v3152_v16 = vpop.eup %3151 }
 0x4a4   : > { %v2012_v17 = vsel %vm1456_vm2, %v3152_v16, 0.0 }
 0x4a5   : > { %2013 = vadd.xlane.f32.xlu1 %v2012_v17 }
 0x507   : > { %v2005_v18 = vpop.xlane.xlu0 %2004 }
 0x508   : > { %3153 = vrcp.f32 %v2005_v18 }
 0x515   : > { %v3154_v22 = vpop.eup %3153  ;;  %v2008_v23 = vpop.xlane.xlu1 %2007 }
 0x516   : > { %3155 = vrcp.f32 %v2008_v23  ;;  %v2019_v25 = vmul.f32 %v3154_v22, %v3146_v44 }
 0x518   : > { %v2023_v26 = vpack.c.bf16 %v2019_v25, %v2019_v25 }
 0x519   : > { %v2011_v27 = vpop.xlane.xlu0 %2010 }
 0x51a   : > { %3157 = vrcp.f32 %v2011_v27  ;;  %2995 = vmatmul.mubr.msk.bf16.vlgmr.msra.gmra.mxu0 %vm1456_vm2, %v2023_v26 }
 0x51b   : > { %3005 = vmatpush3.bf16.msra.mxu0 %v2123_v28  ;;  %3006 = vmatprep.mubr.msk.bf16.mxu0 %vm3227_vm1, %v3226_v9 }
 0x51c   : > { %3016 = vmatprep.subr.bf16.mxu0 %v3226_v9 }
 0x523   : > { %v3156_v31 = vpop.eup %3155 }
 0x524   : > { %v2020_v32 = vmul.f32 %v3156_v31, %v3148_v45 }
 0x526   : > { %v2024_v33 = vpack.c.bf16 %v2020_v32, %v2020_v32 }
 0x527   : > { %v3158_v34 = vpop.eup %3157 }
 0x528   : > { %3001 = vmatmul.mubr.msk.bf16.vlgmr.msra.gmra.mxu1 %vm1456_vm2, %v2024_v33  ;;  %v2021_v38 = vmul.f32 %v3158_v34, %v3150_v8 }
 0x529   : > { %3011 = vmatpush3.bf16.msra.mxu1 %v2169_v35  ;;  %3012 = vmatprep.mubr.msk.bf16.mxu1 %vm3227_vm1, %v3226_v9 }
 0x52a   : > { %v2025_v39 = vpack.c.bf16 %v2021_v38, %v2021_v38  ;;  %3022 = vmatprep.subr.bf16.mxu1 %v3226_v9 }
 0x52c   : > { %3007 = vmatmul.mubr.msk.bf16.vlgmr.msra.gmra.mxu0 %vm1456_vm2, %v2025_v39 }
 0x52d   : > { %3018 = vmatprep.mubr.msk.bf16.mxu0 %vm3227_vm1, %v3226_v9  ;;  %3017 = vmatpush3.bf16.msra.mxu0 %v2223_v46  ;;  %v3140_v46 = vld [vmem:[%s3944_s17 + $0x10] sm:$0xff]  }
 0x52e   : > { %v2014_v13 = vpop.xlane.xlu1 %2013  ;;  %3028 = vmatprep.subr.bf16.mxu0 %v3226_v9 }
 0x52f   : > { %3159 = vrcp.f32 %v2014_v13 }
 0x53c   : > { %v3160_v40 = vpop.eup %3159 }
 0x53d   : > { %v2022_v41 = vmul.f32 %v3160_v40, %v3152_v16 }
 0x53f   : > { %v2026_v42 = vpack.c.bf16 %v2022_v41, %v2022_v41  ;;  %v3137_v41 = vld [vmem:[%s3942_s15 + $0x8] sm:$0xff]  }
 0x541   : > { %3013 = vmatmul.mubr.msk.bf16.vlgmr.msra.gmra.mxu1 %vm1456_vm2, %v2026_v42  ;;  %v3138_v42 = vld [vmem:[%s3942_s15] sm:$0xff]  }
 0x542   : > { %3024 = vmatprep.mubr.msk.bf16.mxu1 %vm3227_vm1, %v3226_v9  ;;  %3023 = vmatpush3.bf16.msra.mxu1 %v2269_v48 }
 0x543   : > { %3034 = vmatprep.subr.bf16.mxu1 %v3226_v9 }
 0x5da   : > { %v2067_v50 = vpop.f32.mrf.mxu0 }
 0x5db   : > { %v2211_v51 = vpack.c.bf16 %v2067_v50, %v2067_v50 }
 0x5dc   : > { %v2996_v29 = vpop.f32.mrf.mxu0 }
 0x5dd   : > { %3019 = vmatmul.mubr.msk.bf16.vlgmr.msra.gmra.mxu0 %vm1456_vm2, %v2211_v51  ;;  %v2756_v51 = vld [vmem:[%s3940_s13] ss:$0 sm:$0xff] }
 0x5de   : > { %v2070_v53 = vpop.f32.mrf.mxu0  ;;  %3029 = vmatpush3.bf16.msra.mxu0 %v2315_v52  ;;  %3030 = vmatprep.mubr.msk.bf16.mxu0 %vm3227_vm1, %v3226_v9  ;;  %v2757_v29 = vld [vmem:[%s3941_s14] ss:$0 sm:$0xff] }
 0x5df   : > { %3040 = vmatprep.subr.bf16.mxu0 %v3226_v9 }
 0x5e0   : > { %v2997_v54 = vpop.f32.mrf.mxu0 }
 0x5e8   : > { %v2113_v56 = vpop.f32.mrf.mxu1 }
 0x5e9   : > { %v2212_v57 = vpack.c.bf16 %v2113_v56, %v2113_v56  ;;  %v3141_v56 = vld [vmem:[%s3944_s17 + $0x8] sm:$0xff]  }
 0x5ea   : > { %v3002_v59 = vpop.f32.mrf.mxu1 }
 0x5eb   : > { %3025 = vmatmul.mubr.msk.bf16.vlgmr.msra.gmra.mxu1 %vm1456_vm2, %v2212_v57  ;;  %v3142_v57 = vld [vmem:[%s3944_s17] sm:$0xff]  }
 0x5ec   : > { %v2116_v60 = vpop.f32.mrf.mxu1  ;;  %v2159_v61 = vpop.f32.mrf.mxu0  ;;  %3035 = vmatpush3.bf16.msra.mxu1 %v2361_v58  ;;  %3036 = vmatprep.mubr.msk.bf16.mxu1 %vm3227_vm1, %v3226_v9  ;;  %v2758_v58 = vld [vmem:[%s3943_s16] ss:$0 sm:$0xff] }
 0x5ed   : > { %v2213_v36 = vpack.c.bf16 %v2159_v61, %v2159_v61  ;;  %3048 = vmatprep.subr.bf16.mxu1 %v3226_v9 }
 0x5ee   : > { %v3003_v62 = vpop.f32.mrf.mxu1  ;;  %v3008_v63 = vpop.f32.mrf.mxu0 }
 0x5ef   : > { %3031 = vmatmul.mubr.msk.bf16.vlgmr.msra.gmra.mxu0 %vm1456_vm2, %v2213_v36 }
 0x5f0   : > { %v2162_v0 = vpop.f32.mrf.mxu0  ;;  %3044 = vmatprep.mubr.msk.bf16.mxu0 %vm3227_vm1, %v3226_v9  ;;  %3041 = vmatpush3.bf16.msra.mxu0 %v3137_v41 }
 0x5f1   : > { %3042 = vmatprep.subr.bf16.mxu0 %v3226_v9 }
 0x5f2   : > { %v3009_v1 = vpop.f32.mrf.mxu0 }
 0x5f4   : > { %3043 = vmatpush3.bf16.msra.mxu0 %v3138_v42 }
 0x601   : > { %v2205_v37 = vpop.f32.mrf.mxu1 }
 0x602   : > { %v2214_v2 = vpack.c.bf16 %v2205_v37, %v2205_v37 }
 0x603   : > { %v3014_v44 = vpop.f32.mrf.mxu1 }
 0x604   : > { %3037 = vmatmul.mubr.msk.bf16.vlgmr.msra.gmra.mxu1 %vm1456_vm2, %v2214_v2 }
 0x605   : > { %v2208_v3 = vpop.f32.mrf.mxu1  ;;  %3056 = vmatprep.mubr.msk.bf16.mxu1 %vm3227_vm1, %v3226_v9  ;;  %3049 = vmatpush3.bf16.msra.mxu1 %v3139_v43 }
 0x606   : > { %3050 = vmatprep.subr.bf16.mxu1 %v3226_v9 }
 0x607   : > { %v3015_v4 = vpop.f32.mrf.mxu1 }
 0x609   : > { %3051 = vmatpush3.bf16.msra.mxu1 %v3140_v46 }
 0x60a   : > { %3052 = vmatprep.subr.bf16.mxu1 %v3226_v9 }
 0x60d   : > { %3053 = vmatpush3.bf16.msra.mxu1 %v3141_v56 }
 0x60e   : > { %3054 = vmatprep.subr.bf16.mxu1 %v3226_v9  ;;  %v2762_v9 = vld [vmem:[%s3945_s18] ss:$0 sm:$0xff] }
 0x611   : > { %3055 = vmatpush3.bf16.msra.mxu1 %v3142_v57 }
 0x69d   : > { %v2259_v5 = vpop.f32.mrf.mxu0 }
 0x69e   : > { %v2403_v20 = vsel %vm602_vm0, %v2259_v5, 0.0 }
 0x69f   : > { %v3020_v6 = vpop.f32.mrf.mxu0 }
 0x6a1   : > { %v2262_v45 = vpop.f32.mrf.mxu0 }
 0x6a3   : > { %v3021_v7 = vpop.f32.mrf.mxu0 }
 0x6ab   : > { %v2305_v8 = vpop.f32.mrf.mxu1 }
 0x6ac   : > { %v2404_v19 = vsel %vm602_vm0, %v2305_v8, 0.0 }
 0x6ad   : > { %v3026_v10 = vpop.f32.mrf.mxu1  ;;  %v2405_v23 = vadd.f32 %v2404_v19, %v2403_v20 }
 0x6af   : > { %v2308_v11 = vpop.f32.mrf.mxu1  ;;  %v2351_v14 = vpop.f32.mrf.mxu0 }
 0x6b0   : > { %v2406_v22 = vsel %vm602_vm0, %v2351_v14, 0.0 }
 0x6b1   : > { %v3027_v15 = vpop.f32.mrf.mxu1  ;;  %v3032_v16 = vpop.f32.mrf.mxu0  ;;  %v2407_v24 = vadd.f32 %v2406_v22, %v2405_v23 }
 0x6b3   : > { %v2354_v17 = vpop.f32.mrf.mxu0 }
 0x6b5   : > { %v3033_v18 = vpop.f32.mrf.mxu0 }
 0x6c4   : > { %v2397_v25 = vpop.f32.mrf.mxu1 }
 0x6c5   : > { %v2408_v26 = vsel %vm602_vm0, %v2397_v25, 0.0 }
 0x6c6   : > { %v2409_v27 = vadd.f32 %v2408_v26, %v2407_v24  ;;  %v3038_v28 = vpop.f32.mrf.mxu1 }
 0x6c8   : > { %v2410_v31 = vadd.f32 %v3163_v30, %v2409_v27  ;;  %v2400_v21 = vpop.f32.mrf.mxu1 }
 0x6ca   : > { %v3039_v32 = vpop.f32.mrf.mxu1  ;;  %v2418_v33 = vadd.f32 %v2755_v12, %v2410_v31 }
 0x6cc   : > { %v2421_v34 = vsel %vm602_vm0, %v2418_v33, 0.0 }
 0x6cd   : > { %2422 = vadd.xlane.f32.xlu0 %v2421_v34 }
 0x756   : > { %v2423_v35 = vpop.xlane.xlu0 %2422 }
 0x757   : > { %v2424_v38 = vmul.f32 0.03125, %v2423_v35 }
 0x759   : > { %v2425_v39 = vsub.f32 %v2418_v33, %v2424_v38 }
 0x75b   : > { %v2426_v13 = vmul.f32 %v2425_v39, %v2425_v39 }
 0x75d   : > { %v2427_v40 = vsel %vm602_vm0, %v2426_v13, 0.0 }
 0x75e   : > { %2428 = vadd.xlane.f32.xlu1 %v2427_v40 }
 0x7e7   : > { %v2429_v47 = vpop.xlane.xlu1 %2428 }
 0x7e8   : > { %v2430_v48 = vmul.f32 0.03125, %v2429_v47 }
 0x7ea   : > { %v2431_v49 = vadd.f32 1e-12, %v2430_v48 }
 0x7ec   : > { %3161 = vrsqrt.f32 %v2431_v49 }
 0x7f9   : > { %v3162_v50 = vpop.eup %3161 }
 0x7fa   : > { %v2433_v52 = vmul.f32 %v3162_v50, %v2425_v39 }
 0x7fc   : > { %v2440_v53 = vmul.f32 %v2756_v51, %v2433_v52 }
 0x7fe   : > { %v2447_v54 = vadd.f32 %v2757_v29, %v2440_v53 }
 0x800   : > { %v2448_v55 = vpack.c.bf16 %v2447_v54, %v2447_v54 }
 0x802   : > { %3045 = vmatmul.mubr.msk.bf16.vlgmr.msra.gmra.mxu0 %vm602_vm0, %v2448_v55 }
 0x8c2   : > { %v2509_v59 = vpop.f32.mrf.mxu0 }
 0x8c3   : > { %v2510_v60 = vadd.f32 %v2758_v58, %v2509_v59 }
 0x8c4   : > { %v3046_v61 = vpop.f32.mrf.mxu0 }
 0x8c5   : > { %v2515_v36 = vmax.f32 %v2510_v60, 0.0 }
 0x8c6   : > { %v2512_v62 = vpop.f32.mrf.mxu0 }
 0x8c7   : > { %v2516_v63 = vpack.c.bf16 %v2515_v36, %v2515_v36 }
 0x8c8   : > { %v3047_v0 = vpop.f32.mrf.mxu0 }
 0x8c9   : > { %3057 = vmatmul.mubr.msk.bf16.vlgmr.msra.gmra.mxu1 %vm2556_vm10, %v2516_v63 }
 0x989   : > { %v2594_v1 = vpop.f32.mrf.mxu1 }
 0x98a   : > { %v2595_v37 = vadd.f32 %v2762_v9, %v2594_v1 }
 0x98b   : > { %v3058_v2 = vpop.f32.mrf.mxu1 }
 0x98c   : > { %v2600_v44 = vadd.f32 %v2595_v37, %v2418_v33 }
 0x98d   : > { %v2597_v3 = vpop.f32.mrf.mxu1 }
 0x98e   : > { %2601 = vst.msk [vmem:[%s593_s21] sm:$0xff] %vm602_vm0, %v2600_v44 }
 0x98f   : > { %v3059_v4 = vpop.f32.mrf.mxu1 }
 0x990   : > { %3177 = shalt.err (!%p3174_p3)
}
 0x991   : > { %s3178_s0 = scalar_lea.hbm %s3885_s20, 128  ;;  %s3182_s28 = scalar_lea.hbm %s3946_s19, 256 }
 0x992   : > { %p3179_p4 = scmp.ne.s32.totalorder %s3885_s20, %s3178_s0  ;;  %p3183_p9 = scmp.lt.s32.totalorder %s3885_s20, %s3946_s19 }
 0x993   : > { %p3184_p10 = scmp.lt.s32.totalorder %s3182_s28, %s3178_s0 }
 0x994   : > { %p3180_p7 = pnand %p3179_p4, %p3375_p5 }
 0x995   : > { %p3185_p11 = por %p3184_p10, %p3183_p9 }
 0x996   : > { %p3181_p8 = pneg %p3180_p7 }
 0x998   : > { %p3186_p12 = pnand %p3185_p11, %p3181_p8 }
 0x99a   : > { %3189 = shalt.err (!%p3186_p12)
}
 0x99b   : > { %3060 = dma.vmem_to_hbm [thread:$0]  (%p3375_p5), %s3887_s24, 128, %s3885_s20, %s2603_s1  }
 0x99c PF: > { %s3971_s25 = sld [smem:[#allocation7_spill]] }
 0x99d   : > { %s3972_s27 = sld [smem:[#allocation5_spill]] }
 0x9a2   : > { %p3066_p13 = scmp.ge.s32.totalorder %s3971_s25, 2 }
 0x9a3   : > { %s2628_s26 = sand.u32 1, %s3972_s27  }
 0x9a4   : > { %p3063_p0 = pnand %p3066_p13, %p3379_p6  ;;  %s2629_s21 = scalar_lea.sflag [#allocation3], %s2628_s26 }
 0x9a6   : > { %p3064_p1 = pneg %p3063_p0 }
 0x9a8   : > { %3207 = dma.done.wait (%p3064_p1), %s2629_s21, 128  }
 0x9a9   : > { %3209 = vsyncadd (%p3064_p1), %s2629_s21, 4294967168  ;;  %s3974_s21 = sld [smem:[#allocation8_spill]]  ;;  %s3977_s0 = smov %s3216_s30 }
 0x9aa   : > { %s3975_s28 = sld [smem:[#allocation6_spill]] }
 0x9ab   : > { %s3976_s20 = sld [smem:[#allocation9_spill]] }
 0x9af   : > { %p29_p2 = scmp.ge.s32.totalorder %s3974_s21, 4  }
 0x9b0   : > { %s3978_s30 = smov %s3975_s28 }
 0x9b1   :  { %31 = sbr.rel (!%p29_p2) target bundleno = 8 (0x8), region = 131 }
 0x9b6   :  { %2634 = vsyncpa [#allocation3], 1 }
 0x9b7   :  { %2636 = vsyncpa [#allocation3 + $0x1], 1 }

</bundles_post_ra>
